<compile_context>
chip_gen: v7x
topology: tpu7x:2x2x1
jax: 0.10.0
libtpu: 0.0.40
codegen_flags: <defaults>
</compile_context>

<pallas_src>
import jax
import jax.numpy as jnp
import numpy as np
from jax.experimental import pallas as pl
from jax.experimental.pallas import tpu as pltpu


# ------------------------------ fused kernel --------------------------------

def _netconv_kernel(p1_ref, w1_ref, b1_ref, w2_ref, b2_ref,
                    wf1_ref, bf1_ref, wf2_ref, bf2_ref,
                    out_ref, s1h, s1p, s2c, s2p):
    f32 = jnp.float32
    w1 = w1_ref[...]            # (32, 128)  conv1 im2col weight (K pad, C pad)
    b1 = b1_ref[...]            # (1, 128)

    # ---- conv1 (k=5, 28x28 -> 24x24) + bias, fused maxpool2 + relu.
    # Processed in chunks of 48 conv rows = 2 output rows x 24 cols, i.e. one
    # pooled output row (12 positions) per chunk.
    for p in range(12):
        p1c = p1_ref[0, pl.ds(p * 48, 48), :]                      # (48, 32)
        y1c = jnp.dot(p1c, w1, preferred_element_type=f32) + b1    # (48, 128)
        mh = jnp.maximum(y1c[0:24, :], y1c[24:48, :])              # pool over H
        s1h[...] = mh
        pe = s1h[pl.ds(0, 12, 2), :]                               # even W cols
        po = s1h[pl.ds(1, 12, 2), :]                               # odd  W cols
        s1p[p, :, :] = jnp.maximum(jnp.maximum(pe, po), 0.0)       # relu(pool)

    # ---- conv2 (k=5, 12x12 -> 8x8) + bias: 25 accumulated MXU matmuls over
    # 8x8 windows of the pooled feature map held in VMEM scratch (channels on
    # lanes, zero-padded to 128 so every matmul is lane-dense).
    acc = jnp.zeros((64, 128), f32)
    for kh in range(5):
        for kw in range(5):
            rows = [s1p[kh + r, pl.ds(kw, 8), :] for r in range(8)]  # 8x(8,128)
            win = jnp.concatenate(rows, axis=0)                      # (64, 128)
            acc = acc + jnp.dot(win, w2_ref[kh * 5 + kw],
                                preferred_element_type=f32)
    y2 = acc + b2_ref[...]                                           # (64, 128)

    # ---- maxpool2 + relu on the 8x8x128 conv2 output.
    for k in range(4):
        s2c[pl.ds(k * 8, 8), :] = jnp.maximum(y2[16 * k:16 * k + 8, :],
                                              y2[16 * k + 8:16 * k + 16, :])
    pe2 = s2c[pl.ds(0, 16, 2), :]                                    # even W
    po2 = s2c[pl.ds(1, 16, 2), :]                                    # odd  W
    s2p[...] = jnp.maximum(jnp.maximum(pe2, po2), 0.0)               # (16, 128)

    # ---- fc1 + relu: flatten 16 spatial positions x 128 padded channels into
    # a lane-dense (1, 2048) row and do a single MXU matmul.
    pieces = [s2p[pl.ds(hw, 1), :] for hw in range(16)]
    flat = jnp.concatenate(pieces, axis=1)                           # (1, 2048)
    h1 = jnp.dot(flat, wf1_ref[...], preferred_element_type=f32) + bf1_ref[...]
    h1 = jnp.maximum(h1, 0.0)                                        # (1, 256)

    # ---- fc2 + log_softmax (padded class lanes carry a -1e30 bias -> exp==0,
    # so they do not perturb max / sum over the 10 real classes).
    logits = jnp.dot(h1, wf2_ref[...], preferred_element_type=f32) + bf2_ref[...]
    m = jnp.max(logits, axis=-1, keepdims=True)
    s = logits - m
    lse = jnp.log(jnp.sum(jnp.exp(s), axis=-1, keepdims=True))
    out_ref[0, :, :] = s - lse                                       # (1, 128)


# ------------------------------ JAX wrapper ----------------------------------

def netconv_forward(x_nchw, params):
    N = x_nchw.shape[0]
    x2 = x_nchw[:, 0]                                          # (N, 28, 28)

    # conv1 im2col in XLA (tiny: 576x25 f32 per sample), row = oh*24 + ow,
    # column = kh*5 + kw, padded K 25 -> 32.
    cols = [x2[:, kh:kh + 24, kw:kw + 24]
            for kh in range(5) for kw in range(5)]
    p1 = jnp.stack(cols, axis=-1).reshape(N, 576, 25)
    p1 = jnp.pad(p1, ((0, 0), (0, 0), (0, 7)))                 # (N, 576, 32)

    # conv1 weight/bias, channels padded to 128 lanes.
    w1p = jnp.zeros((32, 128), jnp.float32).at[:25, :10].set(
        params["conv1_w"].reshape(10, 25).T)
    b1p = jnp.zeros((1, 128), jnp.float32).at[0, :10].set(params["conv1_b"])

    # conv2 weight as 25 taps of (Cin_pad=128, Cout_pad=128).
    w2t = params["conv2_w"].transpose(2, 3, 1, 0).reshape(25, 10, 50)
    w2p = jnp.zeros((25, 128, 128), jnp.float32).at[:, :10, :50].set(w2t)
    b2p = jnp.zeros((1, 128), jnp.float32).at[0, :50].set(params["conv2_b"])

    # fc1 weight re-laid-out for the kernel's flatten order (hw*128 + c) vs
    # torch's NCHW flatten order (c*16 + hw).
    wf = params["fc1_w"].T.reshape(50, 16, 256).transpose(1, 0, 2)  # (16,50,256)
    wf1p = jnp.zeros((16, 128, 256), jnp.float32).at[:, :50, :].set(wf)
    wf1p = wf1p.reshape(2048, 256)
    bf1p = params["fc1_b"].reshape(1, 256)

    # fc2 weight/bias; padded class lanes get -1e30 bias for the log_softmax.
    wf2p = jnp.zeros((256, 128), jnp.float32).at[:, :10].set(params["fc2_w"].T)
    bf2p = jnp.full((1, 128), -1e30, jnp.float32).at[0, :10].set(params["fc2_b"])

    out = pl.pallas_call(
        _netconv_kernel,
        out_shape=jax.ShapeDtypeStruct((N, 1, 128), jnp.float32),
        grid=(N,),
        in_specs=[
            pl.BlockSpec((1, 576, 32), lambda i: (i, 0, 0)),     # conv1 patches
            pl.BlockSpec((32, 128), lambda i: (0, 0)),           # w1 (resident)
            pl.BlockSpec((1, 128), lambda i: (0, 0)),            # b1
            pl.BlockSpec((25, 128, 128), lambda i: (0, 0, 0)),   # w2
            pl.BlockSpec((1, 128), lambda i: (0, 0)),            # b2
            pl.BlockSpec((2048, 256), lambda i: (0, 0)),         # fc1 w
            pl.BlockSpec((1, 256), lambda i: (0, 0)),            # fc1 b
            pl.BlockSpec((256, 128), lambda i: (0, 0)),          # fc2 w
            pl.BlockSpec((1, 128), lambda i: (0, 0)),            # fc2 b
        ],
        out_specs=pl.BlockSpec((1, 1, 128), lambda i: (i, 0, 0)),
        scratch_shapes=[
            pltpu.VMEM((24, 128), jnp.float32),    # s1h: H-pooled conv1 row
            pltpu.VMEM((12, 12, 128), jnp.float32),# s1p: pooled1 feature map
            pltpu.VMEM((32, 128), jnp.float32),    # s2c: H-pooled conv2 rows
            pltpu.VMEM((16, 128), jnp.float32),    # s2p: pooled2 feature map
        ],
        compiler_params=pltpu.CompilerParams(
            dimension_semantics=("parallel",)),
    )(p1, w1p, b1p, w2p, b2p, wf1p, bf1p, wf2p, bf2p)

    return out[:, 0, :10]


# ------------------------ deterministic parameter init -----------------------

def init_params(key):
    ks = jax.random.split(key, 8)

    def u(k, shape, fan_in):
        bound = 1.0 / float(np.sqrt(fan_in))
        return jax.random.uniform(k, shape, jnp.float32, -bound, bound)

    return dict(
        conv1_w=u(ks[0], (10, 1, 5, 5), 1 * 5 * 5),
        conv1_b=u(ks[1], (10,), 1 * 5 * 5),
        conv2_w=u(ks[2], (50, 10, 5, 5), 10 * 5 * 5),
        conv2_b=u(ks[3], (50,), 10 * 5 * 5),
        fc1_w=u(ks[4], (256, 800), 800),
        fc1_b=u(ks[5], (256,), 800),
        fc2_w=u(ks[6], (10, 256), 256),
        fc2_b=u(ks[7], (10,), 256),
    )


# ----------------------------- pure-JAX reference ----------------------------

def ref_forward(x, params):
    dn = ("NCHW", "OIHW", "NCHW")

    def conv(x, w, b):
        y = jax.lax.conv_general_dilated(x, w, (1, 1), "VALID",
                                         dimension_numbers=dn)
        return y + b[None, :, None, None]

    def mp(x):
        return jax.lax.reduce_window(x, -jnp.inf, jax.lax.max,
                                     (1, 1, 2, 2), (1, 1, 2, 2), "VALID")

    y = jax.nn.relu(mp(conv(x, params["conv1_w"], params["conv1_b"])))
    y = jax.nn.relu(mp(conv(y, params["conv2_w"], params["conv2_b"])))
    y = y.reshape(y.shape[0], -1)
    y = jax.nn.relu(y @ params["fc1_w"].T + params["fc1_b"])
    y = y @ params["fc2_w"].T + params["fc2_b"]
    return jax.nn.log_softmax(y, axis=1)


# ----------------------------------- main ------------------------------------

if __name__ == "__main__":
    key = jax.random.PRNGKey(0)
    k_x, k_p = jax.random.split(key)

    # fc1 in-features 800 = 50*4*4 implies a 28x28 single-channel input.
    x = jax.random.normal(k_x, (2, 1, 28, 28), dtype=jnp.float32)
    params = init_params(k_p)

    out = jax.jit(netconv_forward)(x, params)
    out = jax.block_until_ready(out)

    ref = jax.block_until_ready(ref_forward(x, params))
    np.testing.assert_allclose(np.asarray(out), np.asarray(ref),
                               rtol=1e-4, atol=1e-4)
    assert out.shape == (2, 10)
    print("KERNEL_OK")
</pallas_src>

<mosaic_0001>
module attributes {stable_mosaic.version = 11 : i64} {
  func.func @_netconv_kernel(%arg0: i32, %arg1: memref<1x576x32xf32, #tpu.memory_space<vmem>>, %arg2: memref<32x128xf32, #tpu.memory_space<vmem>>, %arg3: memref<1x128xf32, #tpu.memory_space<vmem>>, %arg4: memref<25x128x128xf32, #tpu.memory_space<vmem>>, %arg5: memref<1x128xf32, #tpu.memory_space<vmem>>, %arg6: memref<2048x256xf32, #tpu.memory_space<vmem>>, %arg7: memref<1x256xf32, #tpu.memory_space<vmem>>, %arg8: memref<256x128xf32, #tpu.memory_space<vmem>>, %arg9: memref<1x128xf32, #tpu.memory_space<vmem>>, %arg10: memref<1x1x128xf32, #tpu.memory_space<vmem>>, %arg11: memref<24x128xf32, #tpu.memory_space<vmem>>, %arg12: memref<12x12x128xf32, #tpu.memory_space<vmem>>, %arg13: memref<32x128xf32, #tpu.memory_space<vmem>>, %arg14: memref<16x128xf32, #tpu.memory_space<vmem>>) attributes {dimension_semantics = [#tpu.dimension_semantics<parallel>], iteration_bounds = array<i64: 2>, scalar_prefetch = 0 : i64, scratch_operands = 4 : i64, tpu.core_type = #tpu.core_type<tc>, window_params = [{transform_indices = @transform_0, window_bounds = array<i64: 1, 576, 32>}, {pipeline_mode = #tpu.pipeline_mode<synchronous>, transform_indices = @transform_1, window_bounds = array<i64: 32, 128>}, {pipeline_mode = #tpu.pipeline_mode<synchronous>, transform_indices = @transform_2, window_bounds = array<i64: 1, 128>}, {pipeline_mode = #tpu.pipeline_mode<synchronous>, transform_indices = @transform_3, window_bounds = array<i64: 25, 128, 128>}, {pipeline_mode = #tpu.pipeline_mode<synchronous>, transform_indices = @transform_4, window_bounds = array<i64: 1, 128>}, {pipeline_mode = #tpu.pipeline_mode<synchronous>, transform_indices = @transform_5, window_bounds = array<i64: 2048, 256>}, {pipeline_mode = #tpu.pipeline_mode<synchronous>, transform_indices = @transform_6, window_bounds = array<i64: 1, 256>}, {pipeline_mode = #tpu.pipeline_mode<synchronous>, transform_indices = @transform_7, window_bounds = array<i64: 256, 128>}, {pipeline_mode = #tpu.pipeline_mode<synchronous>, transform_indices = @transform_8, window_bounds = array<i64: 1, 128>}, {transform_indices = @transform_9, window_bounds = array<i64: 1, 1, 128>}]} {
    %c0 = arith.constant 0 : index
    %c0_0 = arith.constant 0 : index
    %0 = vector.load %arg2[%c0, %c0_0] : memref<32x128xf32, #tpu.memory_space<vmem>>, vector<32x128xf32>
    %c0_1 = arith.constant 0 : index
    %c0_2 = arith.constant 0 : index
    %1 = vector.load %arg3[%c0_1, %c0_2] : memref<1x128xf32, #tpu.memory_space<vmem>>, vector<1x128xf32>
    %c0_3 = arith.constant 0 : index
    %c0_4 = arith.constant 0 : index
    %c0_5 = arith.constant 0 : index
    %2 = vector.load %arg1[%c0_3, %c0_4, %c0_5] : memref<1x576x32xf32, #tpu.memory_space<vmem>>, vector<1x48x32xf32>
    %3 = vector.shape_cast %2 : vector<1x48x32xf32> to vector<48x32xf32>
    %cst = arith.constant dense<0.000000e+00> : vector<48x128xf32>
    %4 = tpu.matmul %3, %0, %cst {dimension_numbers = #tpu.dot_dimension_numbers<[1], [0], [0], [1], [0, 0, 1, 1], [], []>} : vector<48x32xf32>, vector<32x128xf32>, vector<48x128xf32> -> vector<48x128xf32>
    %5 = vector.broadcast %1 : vector<1x128xf32> to vector<48x128xf32>
    %6 = arith.addf %4, %5 : vector<48x128xf32>
    %7 = vector.extract_strided_slice %6 {offsets = [0, 0], sizes = [24, 128], strides = [1, 1]} : vector<48x128xf32> to vector<24x128xf32>
    %8 = vector.extract_strided_slice %6 {offsets = [24, 0], sizes = [24, 128], strides = [1, 1]} : vector<48x128xf32> to vector<24x128xf32>
    %9 = arith.maximumf %7, %8 : vector<24x128xf32>
    %c0_6 = arith.constant 0 : index
    %c0_7 = arith.constant 0 : index
    %10 = vector.load %arg11[%c0_6, %c0_7] : memref<24x128xf32, #tpu.memory_space<vmem>>, vector<24x128xf32>
    tpu.vector_store %arg11[%c0_6, %c0_7], %9 {strides = array<i32>} : memref<24x128xf32, #tpu.memory_space<vmem>>, vector<24x128xf32>,
    %c0_8 = arith.constant 0 : index
    %c0_9 = arith.constant 0 : index
    %11 = tpu.strided_load %arg11[%c0_8, %c0_9] {strides = array<i32: 2, 1>} : memref<24x128xf32, #tpu.memory_space<vmem>>, vector<12x128xf32>
    %c1 = arith.constant 1 : index
    %c0_10 = arith.constant 0 : index
    %12 = tpu.strided_load %arg11[%c1, %c0_10] {strides = array<i32: 2, 1>} : memref<24x128xf32, #tpu.memory_space<vmem>>, vector<12x128xf32>
    %13 = arith.maximumf %11, %12 : vector<12x128xf32>
    %cst_11 = arith.constant 0.000000e+00 : f32
    %14 = vector.broadcast %cst_11 : f32 to vector<12x128xf32>
    %15 = arith.maximumf %13, %14 : vector<12x128xf32>
    %c0_12 = arith.constant 0 : index
    %c0_13 = arith.constant 0 : index
    %c0_14 = arith.constant 0 : index
    %16 = vector.load %arg12[%c0_12, %c0_13, %c0_14] : memref<12x12x128xf32, #tpu.memory_space<vmem>>, vector<1x12x128xf32>
    %17 = vector.shape_cast %16 : vector<1x12x128xf32> to vector<12x128xf32>
    %18 = vector.shape_cast %15 : vector<12x128xf32> to vector<1x12x128xf32>
    tpu.vector_store %arg12[%c0_12, %c0_13, %c0_14], %18 {strides = array<i32>} : memref<12x12x128xf32, #tpu.memory_space<vmem>>, vector<1x12x128xf32>,
    %c0_15 = arith.constant 0 : index
    %c48 = arith.constant 48 : index
    %c0_16 = arith.constant 0 : index
    %19 = vector.load %arg1[%c0_15, %c48, %c0_16] : memref<1x576x32xf32, #tpu.memory_space<vmem>>, vector<1x48x32xf32>
    %20 = vector.shape_cast %19 : vector<1x48x32xf32> to vector<48x32xf32>
    %cst_17 = arith.constant dense<0.000000e+00> : vector<48x128xf32>
    %21 = tpu.matmul %20, %0, %cst_17 {dimension_numbers = #tpu.dot_dimension_numbers<[1], [0], [0], [1], [0, 0, 1, 1], [], []>} : vector<48x32xf32>, vector<32x128xf32>, vector<48x128xf32> -> vector<48x128xf32>
    %22 = vector.broadcast %1 : vector<1x128xf32> to vector<48x128xf32>
    %23 = arith.addf %21, %22 : vector<48x128xf32>
    %24 = vector.extract_strided_slice %23 {offsets = [0, 0], sizes = [24, 128], strides = [1, 1]} : vector<48x128xf32> to vector<24x128xf32>
    %25 = vector.extract_strided_slice %23 {offsets = [24, 0], sizes = [24, 128], strides = [1, 1]} : vector<48x128xf32> to vector<24x128xf32>
    %26 = arith.maximumf %24, %25 : vector<24x128xf32>
    %c0_18 = arith.constant 0 : index
    %c0_19 = arith.constant 0 : index
    %27 = vector.load %arg11[%c0_18, %c0_19] : memref<24x128xf32, #tpu.memory_space<vmem>>, vector<24x128xf32>
    tpu.vector_store %arg11[%c0_18, %c0_19], %26 {strides = array<i32>} : memref<24x128xf32, #tpu.memory_space<vmem>>, vector<24x128xf32>,
    %c0_20 = arith.constant 0 : index
    %c0_21 = arith.constant 0 : index
    %28 = tpu.strided_load %arg11[%c0_20, %c0_21] {strides = array<i32: 2, 1>} : memref<24x128xf32, #tpu.memory_space<vmem>>, vector<12x128xf32>
    %c1_22 = arith.constant 1 : index
    %c0_23 = arith.constant 0 : index
    %29 = tpu.strided_load %arg11[%c1_22, %c0_23] {strides = array<i32: 2, 1>} : memref<24x128xf32, #tpu.memory_space<vmem>>, vector<12x128xf32>
    %30 = arith.maximumf %28, %29 : vector<12x128xf32>
    %cst_24 = arith.constant 0.000000e+00 : f32
    %31 = vector.broadcast %cst_24 : f32 to vector<12x128xf32>
    %32 = arith.maximumf %30, %31 : vector<12x128xf32>
    %c1_25 = arith.constant 1 : index
    %c0_26 = arith.constant 0 : index
    %c0_27 = arith.constant 0 : index
    %33 = vector.load %arg12[%c1_25, %c0_26, %c0_27] : memref<12x12x128xf32, #tpu.memory_space<vmem>>, vector<1x12x128xf32>
    %34 = vector.shape_cast %33 : vector<1x12x128xf32> to vector<12x128xf32>
    %35 = vector.shape_cast %32 : vector<12x128xf32> to vector<1x12x128xf32>
    tpu.vector_store %arg12[%c1_25, %c0_26, %c0_27], %35 {strides = array<i32>} : memref<12x12x128xf32, #tpu.memory_space<vmem>>, vector<1x12x128xf32>,
    %c0_28 = arith.constant 0 : index
    %c96 = arith.constant 96 : index
    %c0_29 = arith.constant 0 : index
    %36 = vector.load %arg1[%c0_28, %c96, %c0_29] : memref<1x576x32xf32, #tpu.memory_space<vmem>>, vector<1x48x32xf32>
    %37 = vector.shape_cast %36 : vector<1x48x32xf32> to vector<48x32xf32>
    %cst_30 = arith.constant dense<0.000000e+00> : vector<48x128xf32>
    %38 = tpu.matmul %37, %0, %cst_30 {dimension_numbers = #tpu.dot_dimension_numbers<[1], [0], [0], [1], [0, 0, 1, 1], [], []>} : vector<48x32xf32>, vector<32x128xf32>, vector<48x128xf32> -> vector<48x128xf32>
    %39 = vector.broadcast %1 : vector<1x128xf32> to vector<48x128xf32>
    %40 = arith.addf %38, %39 : vector<48x128xf32>
    %41 = vector.extract_strided_slice %40 {offsets = [0, 0], sizes = [24, 128], strides = [1, 1]} : vector<48x128xf32> to vector<24x128xf32>
    %42 = vector.extract_strided_slice %40 {offsets = [24, 0], sizes = [24, 128], strides = [1, 1]} : vector<48x128xf32> to vector<24x128xf32>
    %43 = arith.maximumf %41, %42 : vector<24x128xf32>
    %c0_31 = arith.constant 0 : index
    %c0_32 = arith.constant 0 : index
    %44 = vector.load %arg11[%c0_31, %c0_32] : memref<24x128xf32, #tpu.memory_space<vmem>>, vector<24x128xf32>
    tpu.vector_store %arg11[%c0_31, %c0_32], %43 {strides = array<i32>} : memref<24x128xf32, #tpu.memory_space<vmem>>, vector<24x128xf32>,
    %c0_33 = arith.constant 0 : index
    %c0_34 = arith.constant 0 : index
    %45 = tpu.strided_load %arg11[%c0_33, %c0_34] {strides = array<i32: 2, 1>} : memref<24x128xf32, #tpu.memory_space<vmem>>, vector<12x128xf32>
    %c1_35 = arith.constant 1 : index
    %c0_36 = arith.constant 0 : index
    %46 = tpu.strided_load %arg11[%c1_35, %c0_36] {strides = array<i32: 2, 1>} : memref<24x128xf32, #tpu.memory_space<vmem>>, vector<12x128xf32>
    %47 = arith.maximumf %45, %46 : vector<12x128xf32>
    %cst_37 = arith.constant 0.000000e+00 : f32
    %48 = vector.broadcast %cst_37 : f32 to vector<12x128xf32>
    %49 = arith.maximumf %47, %48 : vector<12x128xf32>
    %c2 = arith.constant 2 : index
    %c0_38 = arith.constant 0 : index
    %c0_39 = arith.constant 0 : index
    %50 = vector.load %arg12[%c2, %c0_38, %c0_39] : memref<12x12x128xf32, #tpu.memory_space<vmem>>, vector<1x12x128xf32>
    %51 = vector.shape_cast %50 : vector<1x12x128xf32> to vector<12x128xf32>
    %52 = vector.shape_cast %49 : vector<12x128xf32> to vector<1x12x128xf32>
    tpu.vector_store %arg12[%c2, %c0_38, %c0_39], %52 {strides = array<i32>} : memref<12x12x128xf32, #tpu.memory_space<vmem>>, vector<1x12x128xf32>,
    %c0_40 = arith.constant 0 : index
    %c144 = arith.constant 144 : index
    %c0_41 = arith.constant 0 : index
    %53 = vector.load %arg1[%c0_40, %c144, %c0_41] : memref<1x576x32xf32, #tpu.memory_space<vmem>>, vector<1x48x32xf32>
    %54 = vector.shape_cast %53 : vector<1x48x32xf32> to vector<48x32xf32>
    %cst_42 = arith.constant dense<0.000000e+00> : vector<48x128xf32>
    %55 = tpu.matmul %54, %0, %cst_42 {dimension_numbers = #tpu.dot_dimension_numbers<[1], [0], [0], [1], [0, 0, 1, 1], [], []>} : vector<48x32xf32>, vector<32x128xf32>, vector<48x128xf32> -> vector<48x128xf32>
    %56 = vector.broadcast %1 : vector<1x128xf32> to vector<48x128xf32>
    %57 = arith.addf %55, %56 : vector<48x128xf32>
    %58 = vector.extract_strided_slice %57 {offsets = [0, 0], sizes = [24, 128], strides = [1, 1]} : vector<48x128xf32> to vector<24x128xf32>
    %59 = vector.extract_strided_slice %57 {offsets = [24, 0], sizes = [24, 128], strides = [1, 1]} : vector<48x128xf32> to vector<24x128xf32>
    %60 = arith.maximumf %58, %59 : vector<24x128xf32>
    %c0_43 = arith.constant 0 : index
    %c0_44 = arith.constant 0 : index
    %61 = vector.load %arg11[%c0_43, %c0_44] : memref<24x128xf32, #tpu.memory_space<vmem>>, vector<24x128xf32>
    tpu.vector_store %arg11[%c0_43, %c0_44], %60 {strides = array<i32>} : memref<24x128xf32, #tpu.memory_space<vmem>>, vector<24x128xf32>,
    %c0_45 = arith.constant 0 : index
    %c0_46 = arith.constant 0 : index
    %62 = tpu.strided_load %arg11[%c0_45, %c0_46] {strides = array<i32: 2, 1>} : memref<24x128xf32, #tpu.memory_space<vmem>>, vector<12x128xf32>
    %c1_47 = arith.constant 1 : index
    %c0_48 = arith.constant 0 : index
    %63 = tpu.strided_load %arg11[%c1_47, %c0_48] {strides = array<i32: 2, 1>} : memref<24x128xf32, #tpu.memory_space<vmem>>, vector<12x128xf32>
    %64 = arith.maximumf %62, %63 : vector<12x128xf32>
    %cst_49 = arith.constant 0.000000e+00 : f32
    %65 = vector.broadcast %cst_49 : f32 to vector<12x128xf32>
    %66 = arith.maximumf %64, %65 : vector<12x128xf32>
    %c3 = arith.constant 3 : index
    %c0_50 = arith.constant 0 : index
    %c0_51 = arith.constant 0 : index
    %67 = vector.load %arg12[%c3, %c0_50, %c0_51] : memref<12x12x128xf32, #tpu.memory_space<vmem>>, vector<1x12x128xf32>
    %68 = vector.shape_cast %67 : vector<1x12x128xf32> to vector<12x128xf32>
    %69 = vector.shape_cast %66 : vector<12x128xf32> to vector<1x12x128xf32>
    tpu.vector_store %arg12[%c3, %c0_50, %c0_51], %69 {strides = array<i32>} : memref<12x12x128xf32, #tpu.memory_space<vmem>>, vector<1x12x128xf32>,
    %c0_52 = arith.constant 0 : index
    %c192 = arith.constant 192 : index
    %c0_53 = arith.constant 0 : index
    %70 = vector.load %arg1[%c0_52, %c192, %c0_53] : memref<1x576x32xf32, #tpu.memory_space<vmem>>, vector<1x48x32xf32>
    %71 = vector.shape_cast %70 : vector<1x48x32xf32> to vector<48x32xf32>
    %cst_54 = arith.constant dense<0.000000e+00> : vector<48x128xf32>
    %72 = tpu.matmul %71, %0, %cst_54 {dimension_numbers = #tpu.dot_dimension_numbers<[1], [0], [0], [1], [0, 0, 1, 1], [], []>} : vector<48x32xf32>, vector<32x128xf32>, vector<48x128xf32> -> vector<48x128xf32>
    %73 = vector.broadcast %1 : vector<1x128xf32> to vector<48x128xf32>
    %74 = arith.addf %72, %73 : vector<48x128xf32>
    %75 = vector.extract_strided_slice %74 {offsets = [0, 0], sizes = [24, 128], strides = [1, 1]} : vector<48x128xf32> to vector<24x128xf32>
    %76 = vector.extract_strided_slice %74 {offsets = [24, 0], sizes = [24, 128], strides = [1, 1]} : vector<48x128xf32> to vector<24x128xf32>
    %77 = arith.maximumf %75, %76 : vector<24x128xf32>
    %c0_55 = arith.constant 0 : index
    %c0_56 = arith.constant 0 : index
    %78 = vector.load %arg11[%c0_55, %c0_56] : memref<24x128xf32, #tpu.memory_space<vmem>>, vector<24x128xf32>
    tpu.vector_store %arg11[%c0_55, %c0_56], %77 {strides = array<i32>} : memref<24x128xf32, #tpu.memory_space<vmem>>, vector<24x128xf32>,
    %c0_57 = arith.constant 0 : index
    %c0_58 = arith.constant 0 : index
    %79 = tpu.strided_load %arg11[%c0_57, %c0_58] {strides = array<i32: 2, 1>} : memref<24x128xf32, #tpu.memory_space<vmem>>, vector<12x128xf32>
    %c1_59 = arith.constant 1 : index
    %c0_60 = arith.constant 0 : index
    %80 = tpu.strided_load %arg11[%c1_59, %c0_60] {strides = array<i32: 2, 1>} : memref<24x128xf32, #tpu.memory_space<vmem>>, vector<12x128xf32>
    %81 = arith.maximumf %79, %80 : vector<12x128xf32>
    %cst_61 = arith.constant 0.000000e+00 : f32
    %82 = vector.broadcast %cst_61 : f32 to vector<12x128xf32>
    %83 = arith.maximumf %81, %82 : vector<12x128xf32>
    %c4 = arith.constant 4 : index
    %c0_62 = arith.constant 0 : index
    %c0_63 = arith.constant 0 : index
    %84 = vector.load %arg12[%c4, %c0_62, %c0_63] : memref<12x12x128xf32, #tpu.memory_space<vmem>>, vector<1x12x128xf32>
    %85 = vector.shape_cast %84 : vector<1x12x128xf32> to vector<12x128xf32>
    %86 = vector.shape_cast %83 : vector<12x128xf32> to vector<1x12x128xf32>
    tpu.vector_store %arg12[%c4, %c0_62, %c0_63], %86 {strides = array<i32>} : memref<12x12x128xf32, #tpu.memory_space<vmem>>, vector<1x12x128xf32>,
    %c0_64 = arith.constant 0 : index
    %c240 = arith.constant 240 : index
    %c0_65 = arith.constant 0 : index
    %87 = vector.load %arg1[%c0_64, %c240, %c0_65] : memref<1x576x32xf32, #tpu.memory_space<vmem>>, vector<1x48x32xf32>
    %88 = vector.shape_cast %87 : vector<1x48x32xf32> to vector<48x32xf32>
    %cst_66 = arith.constant dense<0.000000e+00> : vector<48x128xf32>
    %89 = tpu.matmul %88, %0, %cst_66 {dimension_numbers = #tpu.dot_dimension_numbers<[1], [0], [0], [1], [0, 0, 1, 1], [], []>} : vector<48x32xf32>, vector<32x128xf32>, vector<48x128xf32> -> vector<48x128xf32>
    %90 = vector.broadcast %1 : vector<1x128xf32> to vector<48x128xf32>
    %91 = arith.addf %89, %90 : vector<48x128xf32>
    %92 = vector.extract_strided_slice %91 {offsets = [0, 0], sizes = [24, 128], strides = [1, 1]} : vector<48x128xf32> to vector<24x128xf32>
    %93 = vector.extract_strided_slice %91 {offsets = [24, 0], sizes = [24, 128], strides = [1, 1]} : vector<48x128xf32> to vector<24x128xf32>
    %94 = arith.maximumf %92, %93 : vector<24x128xf32>
    %c0_67 = arith.constant 0 : index
    %c0_68 = arith.constant 0 : index
    %95 = vector.load %arg11[%c0_67, %c0_68] : memref<24x128xf32, #tpu.memory_space<vmem>>, vector<24x128xf32>
    tpu.vector_store %arg11[%c0_67, %c0_68], %94 {strides = array<i32>} : memref<24x128xf32, #tpu.memory_space<vmem>>, vector<24x128xf32>,
    %c0_69 = arith.constant 0 : index
    %c0_70 = arith.constant 0 : index
    %96 = tpu.strided_load %arg11[%c0_69, %c0_70] {strides = array<i32: 2, 1>} : memref<24x128xf32, #tpu.memory_space<vmem>>, vector<12x128xf32>
    %c1_71 = arith.constant 1 : index
    %c0_72 = arith.constant 0 : index
    %97 = tpu.strided_load %arg11[%c1_71, %c0_72] {strides = array<i32: 2, 1>} : memref<24x128xf32, #tpu.memory_space<vmem>>, vector<12x128xf32>
    %98 = arith.maximumf %96, %97 : vector<12x128xf32>
    %cst_73 = arith.constant 0.000000e+00 : f32
    %99 = vector.broadcast %cst_73 : f32 to vector<12x128xf32>
    %100 = arith.maximumf %98, %99 : vector<12x128xf32>
    %c5 = arith.constant 5 : index
    %c0_74 = arith.constant 0 : index
    %c0_75 = arith.constant 0 : index
    %101 = vector.load %arg12[%c5, %c0_74, %c0_75] : memref<12x12x128xf32, #tpu.memory_space<vmem>>, vector<1x12x128xf32>
    %102 = vector.shape_cast %101 : vector<1x12x128xf32> to vector<12x128xf32>
    %103 = vector.shape_cast %100 : vector<12x128xf32> to vector<1x12x128xf32>
    tpu.vector_store %arg12[%c5, %c0_74, %c0_75], %103 {strides = array<i32>} : memref<12x12x128xf32, #tpu.memory_space<vmem>>, vector<1x12x128xf32>,
    %c0_76 = arith.constant 0 : index
    %c288 = arith.constant 288 : index
    %c0_77 = arith.constant 0 : index
    %104 = vector.load %arg1[%c0_76, %c288, %c0_77] : memref<1x576x32xf32, #tpu.memory_space<vmem>>, vector<1x48x32xf32>
    %105 = vector.shape_cast %104 : vector<1x48x32xf32> to vector<48x32xf32>
    %cst_78 = arith.constant dense<0.000000e+00> : vector<48x128xf32>
    %106 = tpu.matmul %105, %0, %cst_78 {dimension_numbers = #tpu.dot_dimension_numbers<[1], [0], [0], [1], [0, 0, 1, 1], [], []>} : vector<48x32xf32>, vector<32x128xf32>, vector<48x128xf32> -> vector<48x128xf32>
    %107 = vector.broadcast %1 : vector<1x128xf32> to vector<48x128xf32>
    %108 = arith.addf %106, %107 : vector<48x128xf32>
    %109 = vector.extract_strided_slice %108 {offsets = [0, 0], sizes = [24, 128], strides = [1, 1]} : vector<48x128xf32> to vector<24x128xf32>
    %110 = vector.extract_strided_slice %108 {offsets = [24, 0], sizes = [24, 128], strides = [1, 1]} : vector<48x128xf32> to vector<24x128xf32>
    %111 = arith.maximumf %109, %110 : vector<24x128xf32>
    %c0_79 = arith.constant 0 : index
    %c0_80 = arith.constant 0 : index
    %112 = vector.load %arg11[%c0_79, %c0_80] : memref<24x128xf32, #tpu.memory_space<vmem>>, vector<24x128xf32>
    tpu.vector_store %arg11[%c0_79, %c0_80], %111 {strides = array<i32>} : memref<24x128xf32, #tpu.memory_space<vmem>>, vector<24x128xf32>,
    %c0_81 = arith.constant 0 : index
    %c0_82 = arith.constant 0 : index
    %113 = tpu.strided_load %arg11[%c0_81, %c0_82] {strides = array<i32: 2, 1>} : memref<24x128xf32, #tpu.memory_space<vmem>>, vector<12x128xf32>
    %c1_83 = arith.constant 1 : index
    %c0_84 = arith.constant 0 : index
    %114 = tpu.strided_load %arg11[%c1_83, %c0_84] {strides = array<i32: 2, 1>} : memref<24x128xf32, #tpu.memory_space<vmem>>, vector<12x128xf32>
    %115 = arith.maximumf %113, %114 : vector<12x128xf32>
    %cst_85 = arith.constant 0.000000e+00 : f32
    %116 = vector.broadcast %cst_85 : f32 to vector<12x128xf32>
    %117 = arith.maximumf %115, %116 : vector<12x128xf32>
    %c6 = arith.constant 6 : index
    %c0_86 = arith.constant 0 : index
    %c0_87 = arith.constant 0 : index
    %118 = vector.load %arg12[%c6, %c0_86, %c0_87] : memref<12x12x128xf32, #tpu.memory_space<vmem>>, vector<1x12x128xf32>
    %119 = vector.shape_cast %118 : vector<1x12x128xf32> to vector<12x128xf32>
    %120 = vector.shape_cast %117 : vector<12x128xf32> to vector<1x12x128xf32>
    tpu.vector_store %arg12[%c6, %c0_86, %c0_87], %120 {strides = array<i32>} : memref<12x12x128xf32, #tpu.memory_space<vmem>>, vector<1x12x128xf32>,
    %c0_88 = arith.constant 0 : index
    %c336 = arith.constant 336 : index
    %c0_89 = arith.constant 0 : index
    %121 = vector.load %arg1[%c0_88, %c336, %c0_89] : memref<1x576x32xf32, #tpu.memory_space<vmem>>, vector<1x48x32xf32>
    %122 = vector.shape_cast %121 : vector<1x48x32xf32> to vector<48x32xf32>
    %cst_90 = arith.constant dense<0.000000e+00> : vector<48x128xf32>
    %123 = tpu.matmul %122, %0, %cst_90 {dimension_numbers = #tpu.dot_dimension_numbers<[1], [0], [0], [1], [0, 0, 1, 1], [], []>} : vector<48x32xf32>, vector<32x128xf32>, vector<48x128xf32> -> vector<48x128xf32>
    %124 = vector.broadcast %1 : vector<1x128xf32> to vector<48x128xf32>
    %125 = arith.addf %123, %124 : vector<48x128xf32>
    %126 = vector.extract_strided_slice %125 {offsets = [0, 0], sizes = [24, 128], strides = [1, 1]} : vector<48x128xf32> to vector<24x128xf32>
    %127 = vector.extract_strided_slice %125 {offsets = [24, 0], sizes = [24, 128], strides = [1, 1]} : vector<48x128xf32> to vector<24x128xf32>
    %128 = arith.maximumf %126, %127 : vector<24x128xf32>
    %c0_91 = arith.constant 0 : index
    %c0_92 = arith.constant 0 : index
    %129 = vector.load %arg11[%c0_91, %c0_92] : memref<24x128xf32, #tpu.memory_space<vmem>>, vector<24x128xf32>
    tpu.vector_store %arg11[%c0_91, %c0_92], %128 {strides = array<i32>} : memref<24x128xf32, #tpu.memory_space<vmem>>, vector<24x128xf32>,
    %c0_93 = arith.constant 0 : index
    %c0_94 = arith.constant 0 : index
    %130 = tpu.strided_load %arg11[%c0_93, %c0_94] {strides = array<i32: 2, 1>} : memref<24x128xf32, #tpu.memory_space<vmem>>, vector<12x128xf32>
    %c1_95 = arith.constant 1 : index
    %c0_96 = arith.constant 0 : index
    %131 = tpu.strided_load %arg11[%c1_95, %c0_96] {strides = array<i32: 2, 1>} : memref<24x128xf32, #tpu.memory_space<vmem>>, vector<12x128xf32>
    %132 = arith.maximumf %130, %131 : vector<12x128xf32>
    %cst_97 = arith.constant 0.000000e+00 : f32
    %133 = vector.broadcast %cst_97 : f32 to vector<12x128xf32>
    %134 = arith.maximumf %132, %133 : vector<12x128xf32>
    %c7 = arith.constant 7 : index
    %c0_98 = arith.constant 0 : index
    %c0_99 = arith.constant 0 : index
    %135 = vector.load %arg12[%c7, %c0_98, %c0_99] : memref<12x12x128xf32, #tpu.memory_space<vmem>>, vector<1x12x128xf32>
    %136 = vector.shape_cast %135 : vector<1x12x128xf32> to vector<12x128xf32>
    %137 = vector.shape_cast %134 : vector<12x128xf32> to vector<1x12x128xf32>
    tpu.vector_store %arg12[%c7, %c0_98, %c0_99], %137 {strides = array<i32>} : memref<12x12x128xf32, #tpu.memory_space<vmem>>, vector<1x12x128xf32>,
    %c0_100 = arith.constant 0 : index
    %c384 = arith.constant 384 : index
    %c0_101 = arith.constant 0 : index
    %138 = vector.load %arg1[%c0_100, %c384, %c0_101] : memref<1x576x32xf32, #tpu.memory_space<vmem>>, vector<1x48x32xf32>
    %139 = vector.shape_cast %138 : vector<1x48x32xf32> to vector<48x32xf32>
    %cst_102 = arith.constant dense<0.000000e+00> : vector<48x128xf32>
    %140 = tpu.matmul %139, %0, %cst_102 {dimension_numbers = #tpu.dot_dimension_numbers<[1], [0], [0], [1], [0, 0, 1, 1], [], []>} : vector<48x32xf32>, vector<32x128xf32>, vector<48x128xf32> -> vector<48x128xf32>
    %141 = vector.broadcast %1 : vector<1x128xf32> to vector<48x128xf32>
    %142 = arith.addf %140, %141 : vector<48x128xf32>
    %143 = vector.extract_strided_slice %142 {offsets = [0, 0], sizes = [24, 128], strides = [1, 1]} : vector<48x128xf32> to vector<24x128xf32>
    %144 = vector.extract_strided_slice %142 {offsets = [24, 0], sizes = [24, 128], strides = [1, 1]} : vector<48x128xf32> to vector<24x128xf32>
    %145 = arith.maximumf %143, %144 : vector<24x128xf32>
    %c0_103 = arith.constant 0 : index
    %c0_104 = arith.constant 0 : index
    %146 = vector.load %arg11[%c0_103, %c0_104] : memref<24x128xf32, #tpu.memory_space<vmem>>, vector<24x128xf32>
    tpu.vector_store %arg11[%c0_103, %c0_104], %145 {strides = array<i32>} : memref<24x128xf32, #tpu.memory_space<vmem>>, vector<24x128xf32>,
    %c0_105 = arith.constant 0 : index
    %c0_106 = arith.constant 0 : index
    %147 = tpu.strided_load %arg11[%c0_105, %c0_106] {strides = array<i32: 2, 1>} : memref<24x128xf32, #tpu.memory_space<vmem>>, vector<12x128xf32>
    %c1_107 = arith.constant 1 : index
    %c0_108 = arith.constant 0 : index
    %148 = tpu.strided_load %arg11[%c1_107, %c0_108] {strides = array<i32: 2, 1>} : memref<24x128xf32, #tpu.memory_space<vmem>>, vector<12x128xf32>
    %149 = arith.maximumf %147, %148 : vector<12x128xf32>
    %cst_109 = arith.constant 0.000000e+00 : f32
    %150 = vector.broadcast %cst_109 : f32 to vector<12x128xf32>
    %151 = arith.maximumf %149, %150 : vector<12x128xf32>
    %c8 = arith.constant 8 : index
    %c0_110 = arith.constant 0 : index
    %c0_111 = arith.constant 0 : index
    %152 = vector.load %arg12[%c8, %c0_110, %c0_111] : memref<12x12x128xf32, #tpu.memory_space<vmem>>, vector<1x12x128xf32>
    %153 = vector.shape_cast %152 : vector<1x12x128xf32> to vector<12x128xf32>
    %154 = vector.shape_cast %151 : vector<12x128xf32> to vector<1x12x128xf32>
    tpu.vector_store %arg12[%c8, %c0_110, %c0_111], %154 {strides = array<i32>} : memref<12x12x128xf32, #tpu.memory_space<vmem>>, vector<1x12x128xf32>,
    %c0_112 = arith.constant 0 : index
    %c432 = arith.constant 432 : index
    %c0_113 = arith.constant 0 : index
    %155 = vector.load %arg1[%c0_112, %c432, %c0_113] : memref<1x576x32xf32, #tpu.memory_space<vmem>>, vector<1x48x32xf32>
    %156 = vector.shape_cast %155 : vector<1x48x32xf32> to vector<48x32xf32>
    %cst_114 = arith.constant dense<0.000000e+00> : vector<48x128xf32>
    %157 = tpu.matmul %156, %0, %cst_114 {dimension_numbers = #tpu.dot_dimension_numbers<[1], [0], [0], [1], [0, 0, 1, 1], [], []>} : vector<48x32xf32>, vector<32x128xf32>, vector<48x128xf32> -> vector<48x128xf32>
    %158 = vector.broadcast %1 : vector<1x128xf32> to vector<48x128xf32>
    %159 = arith.addf %157, %158 : vector<48x128xf32>
    %160 = vector.extract_strided_slice %159 {offsets = [0, 0], sizes = [24, 128], strides = [1, 1]} : vector<48x128xf32> to vector<24x128xf32>
    %161 = vector.extract_strided_slice %159 {offsets = [24, 0], sizes = [24, 128], strides = [1, 1]} : vector<48x128xf32> to vector<24x128xf32>
    %162 = arith.maximumf %160, %161 : vector<24x128xf32>
    %c0_115 = arith.constant 0 : index
    %c0_116 = arith.constant 0 : index
    %163 = vector.load %arg11[%c0_115, %c0_116] : memref<24x128xf32, #tpu.memory_space<vmem>>, vector<24x128xf32>
    tpu.vector_store %arg11[%c0_115, %c0_116], %162 {strides = array<i32>} : memref<24x128xf32, #tpu.memory_space<vmem>>, vector<24x128xf32>,
    %c0_117 = arith.constant 0 : index
    %c0_118 = arith.constant 0 : index
    %164 = tpu.strided_load %arg11[%c0_117, %c0_118] {strides = array<i32: 2, 1>} : memref<24x128xf32, #tpu.memory_space<vmem>>, vector<12x128xf32>
    %c1_119 = arith.constant 1 : index
    %c0_120 = arith.constant 0 : index
    %165 = tpu.strided_load %arg11[%c1_119, %c0_120] {strides = array<i32: 2, 1>} : memref<24x128xf32, #tpu.memory_space<vmem>>, vector<12x128xf32>
    %166 = arith.maximumf %164, %165 : vector<12x128xf32>
    %cst_121 = arith.constant 0.000000e+00 : f32
    %167 = vector.broadcast %cst_121 : f32 to vector<12x128xf32>
    %168 = arith.maximumf %166, %167 : vector<12x128xf32>
    %c9 = arith.constant 9 : index
    %c0_122 = arith.constant 0 : index
    %c0_123 = arith.constant 0 : index
    %169 = vector.load %arg12[%c9, %c0_122, %c0_123] : memref<12x12x128xf32, #tpu.memory_space<vmem>>, vector<1x12x128xf32>
    %170 = vector.shape_cast %169 : vector<1x12x128xf32> to vector<12x128xf32>
    %171 = vector.shape_cast %168 : vector<12x128xf32> to vector<1x12x128xf32>
    tpu.vector_store %arg12[%c9, %c0_122, %c0_123], %171 {strides = array<i32>} : memref<12x12x128xf32, #tpu.memory_space<vmem>>, vector<1x12x128xf32>,
    %c0_124 = arith.constant 0 : index
    %c480 = arith.constant 480 : index
    %c0_125 = arith.constant 0 : index
    %172 = vector.load %arg1[%c0_124, %c480, %c0_125] : memref<1x576x32xf32, #tpu.memory_space<vmem>>, vector<1x48x32xf32>
    %173 = vector.shape_cast %172 : vector<1x48x32xf32> to vector<48x32xf32>
    %cst_126 = arith.constant dense<0.000000e+00> : vector<48x128xf32>
    %174 = tpu.matmul %173, %0, %cst_126 {dimension_numbers = #tpu.dot_dimension_numbers<[1], [0], [0], [1], [0, 0, 1, 1], [], []>} : vector<48x32xf32>, vector<32x128xf32>, vector<48x128xf32> -> vector<48x128xf32>
    %175 = vector.broadcast %1 : vector<1x128xf32> to vector<48x128xf32>
    %176 = arith.addf %174, %175 : vector<48x128xf32>
    %177 = vector.extract_strided_slice %176 {offsets = [0, 0], sizes = [24, 128], strides = [1, 1]} : vector<48x128xf32> to vector<24x128xf32>
    %178 = vector.extract_strided_slice %176 {offsets = [24, 0], sizes = [24, 128], strides = [1, 1]} : vector<48x128xf32> to vector<24x128xf32>
    %179 = arith.maximumf %177, %178 : vector<24x128xf32>
    %c0_127 = arith.constant 0 : index
    %c0_128 = arith.constant 0 : index
    %180 = vector.load %arg11[%c0_127, %c0_128] : memref<24x128xf32, #tpu.memory_space<vmem>>, vector<24x128xf32>
    tpu.vector_store %arg11[%c0_127, %c0_128], %179 {strides = array<i32>} : memref<24x128xf32, #tpu.memory_space<vmem>>, vector<24x128xf32>,
    %c0_129 = arith.constant 0 : index
    %c0_130 = arith.constant 0 : index
    %181 = tpu.strided_load %arg11[%c0_129, %c0_130] {strides = array<i32: 2, 1>} : memref<24x128xf32, #tpu.memory_space<vmem>>, vector<12x128xf32>
    %c1_131 = arith.constant 1 : index
    %c0_132 = arith.constant 0 : index
    %182 = tpu.strided_load %arg11[%c1_131, %c0_132] {strides = array<i32: 2, 1>} : memref<24x128xf32, #tpu.memory_space<vmem>>, vector<12x128xf32>
    %183 = arith.maximumf %181, %182 : vector<12x128xf32>
    %cst_133 = arith.constant 0.000000e+00 : f32
    %184 = vector.broadcast %cst_133 : f32 to vector<12x128xf32>
    %185 = arith.maximumf %183, %184 : vector<12x128xf32>
    %c10 = arith.constant 10 : index
    %c0_134 = arith.constant 0 : index
    %c0_135 = arith.constant 0 : index
    %186 = vector.load %arg12[%c10, %c0_134, %c0_135] : memref<12x12x128xf32, #tpu.memory_space<vmem>>, vector<1x12x128xf32>
    %187 = vector.shape_cast %186 : vector<1x12x128xf32> to vector<12x128xf32>
    %188 = vector.shape_cast %185 : vector<12x128xf32> to vector<1x12x128xf32>
    tpu.vector_store %arg12[%c10, %c0_134, %c0_135], %188 {strides = array<i32>} : memref<12x12x128xf32, #tpu.memory_space<vmem>>, vector<1x12x128xf32>,
    %c0_136 = arith.constant 0 : index
    %c528 = arith.constant 528 : index
    %c0_137 = arith.constant 0 : index
    %189 = vector.load %arg1[%c0_136, %c528, %c0_137] : memref<1x576x32xf32, #tpu.memory_space<vmem>>, vector<1x48x32xf32>
    %190 = vector.shape_cast %189 : vector<1x48x32xf32> to vector<48x32xf32>
    %cst_138 = arith.constant dense<0.000000e+00> : vector<48x128xf32>
    %191 = tpu.matmul %190, %0, %cst_138 {dimension_numbers = #tpu.dot_dimension_numbers<[1], [0], [0], [1], [0, 0, 1, 1], [], []>} : vector<48x32xf32>, vector<32x128xf32>, vector<48x128xf32> -> vector<48x128xf32>
    %192 = vector.broadcast %1 : vector<1x128xf32> to vector<48x128xf32>
    %193 = arith.addf %191, %192 : vector<48x128xf32>
    %194 = vector.extract_strided_slice %193 {offsets = [0, 0], sizes = [24, 128], strides = [1, 1]} : vector<48x128xf32> to vector<24x128xf32>
    %195 = vector.extract_strided_slice %193 {offsets = [24, 0], sizes = [24, 128], strides = [1, 1]} : vector<48x128xf32> to vector<24x128xf32>
    %196 = arith.maximumf %194, %195 : vector<24x128xf32>
    %c0_139 = arith.constant 0 : index
    %c0_140 = arith.constant 0 : index
    %197 = vector.load %arg11[%c0_139, %c0_140] : memref<24x128xf32, #tpu.memory_space<vmem>>, vector<24x128xf32>
    tpu.vector_store %arg11[%c0_139, %c0_140], %196 {strides = array<i32>} : memref<24x128xf32, #tpu.memory_space<vmem>>, vector<24x128xf32>,
    %c0_141 = arith.constant 0 : index
    %c0_142 = arith.constant 0 : index
    %198 = tpu.strided_load %arg11[%c0_141, %c0_142] {strides = array<i32: 2, 1>} : memref<24x128xf32, #tpu.memory_space<vmem>>, vector<12x128xf32>
    %c1_143 = arith.constant 1 : index
    %c0_144 = arith.constant 0 : index
    %199 = tpu.strided_load %arg11[%c1_143, %c0_144] {strides = array<i32: 2, 1>} : memref<24x128xf32, #tpu.memory_space<vmem>>, vector<12x128xf32>
    %200 = arith.maximumf %198, %199 : vector<12x128xf32>
    %cst_145 = arith.constant 0.000000e+00 : f32
    %201 = vector.broadcast %cst_145 : f32 to vector<12x128xf32>
    %202 = arith.maximumf %200, %201 : vector<12x128xf32>
    %c11 = arith.constant 11 : index
    %c0_146 = arith.constant 0 : index
    %c0_147 = arith.constant 0 : index
    %203 = vector.load %arg12[%c11, %c0_146, %c0_147] : memref<12x12x128xf32, #tpu.memory_space<vmem>>, vector<1x12x128xf32>
    %204 = vector.shape_cast %203 : vector<1x12x128xf32> to vector<12x128xf32>
    %205 = vector.shape_cast %202 : vector<12x128xf32> to vector<1x12x128xf32>
    tpu.vector_store %arg12[%c11, %c0_146, %c0_147], %205 {strides = array<i32>} : memref<12x12x128xf32, #tpu.memory_space<vmem>>, vector<1x12x128xf32>,
    %cst_148 = arith.constant 0.000000e+00 : f32
    %206 = vector.broadcast %cst_148 : f32 to vector<64x128xf32>
    %c0_149 = arith.constant 0 : index
    %c0_150 = arith.constant 0 : index
    %c0_151 = arith.constant 0 : index
    %207 = vector.load %arg12[%c0_149, %c0_150, %c0_151] : memref<12x12x128xf32, #tpu.memory_space<vmem>>, vector<1x8x128xf32>
    %208 = vector.shape_cast %207 : vector<1x8x128xf32> to vector<8x128xf32>
    %c1_152 = arith.constant 1 : index
    %c0_153 = arith.constant 0 : index
    %c0_154 = arith.constant 0 : index
    %209 = vector.load %arg12[%c1_152, %c0_153, %c0_154] : memref<12x12x128xf32, #tpu.memory_space<vmem>>, vector<1x8x128xf32>
    %210 = vector.shape_cast %209 : vector<1x8x128xf32> to vector<8x128xf32>
    %c2_155 = arith.constant 2 : index
    %c0_156 = arith.constant 0 : index
    %c0_157 = arith.constant 0 : index
    %211 = vector.load %arg12[%c2_155, %c0_156, %c0_157] : memref<12x12x128xf32, #tpu.memory_space<vmem>>, vector<1x8x128xf32>
    %212 = vector.shape_cast %211 : vector<1x8x128xf32> to vector<8x128xf32>
    %c3_158 = arith.constant 3 : index
    %c0_159 = arith.constant 0 : index
    %c0_160 = arith.constant 0 : index
    %213 = vector.load %arg12[%c3_158, %c0_159, %c0_160] : memref<12x12x128xf32, #tpu.memory_space<vmem>>, vector<1x8x128xf32>
    %214 = vector.shape_cast %213 : vector<1x8x128xf32> to vector<8x128xf32>
    %c4_161 = arith.constant 4 : index
    %c0_162 = arith.constant 0 : index
    %c0_163 = arith.constant 0 : index
    %215 = vector.load %arg12[%c4_161, %c0_162, %c0_163] : memref<12x12x128xf32, #tpu.memory_space<vmem>>, vector<1x8x128xf32>
    %216 = vector.shape_cast %215 : vector<1x8x128xf32> to vector<8x128xf32>
    %c5_164 = arith.constant 5 : index
    %c0_165 = arith.constant 0 : index
    %c0_166 = arith.constant 0 : index
    %217 = vector.load %arg12[%c5_164, %c0_165, %c0_166] : memref<12x12x128xf32, #tpu.memory_space<vmem>>, vector<1x8x128xf32>
    %218 = vector.shape_cast %217 : vector<1x8x128xf32> to vector<8x128xf32>
    %c6_167 = arith.constant 6 : index
    %c0_168 = arith.constant 0 : index
    %c0_169 = arith.constant 0 : index
    %219 = vector.load %arg12[%c6_167, %c0_168, %c0_169] : memref<12x12x128xf32, #tpu.memory_space<vmem>>, vector<1x8x128xf32>
    %220 = vector.shape_cast %219 : vector<1x8x128xf32> to vector<8x128xf32>
    %c7_170 = arith.constant 7 : index
    %c0_171 = arith.constant 0 : index
    %c0_172 = arith.constant 0 : index
    %221 = vector.load %arg12[%c7_170, %c0_171, %c0_172] : memref<12x12x128xf32, #tpu.memory_space<vmem>>, vector<1x8x128xf32>
    %222 = vector.shape_cast %221 : vector<1x8x128xf32> to vector<8x128xf32>
    %223 = tpu.concatenate %208, %210, %212, %214, %216, %218, %220, %222 in 0 : vector<8x128xf32>, vector<8x128xf32>, vector<8x128xf32>, vector<8x128xf32>, vector<8x128xf32>, vector<8x128xf32>, vector<8x128xf32>, vector<8x128xf32> -> vector<64x128xf32>
    %c0_173 = arith.constant 0 : index
    %c0_174 = arith.constant 0 : index
    %c0_175 = arith.constant 0 : index
    %224 = vector.load %arg4[%c0_173, %c0_174, %c0_175] : memref<25x128x128xf32, #tpu.memory_space<vmem>>, vector<1x128x128xf32>
    %225 = vector.shape_cast %224 : vector<1x128x128xf32> to vector<128x128xf32>
    %cst_176 = arith.constant dense<0.000000e+00> : vector<64x128xf32>
    %226 = tpu.matmul %223, %225, %cst_176 {dimension_numbers = #tpu.dot_dimension_numbers<[1], [0], [0], [1], [0, 0, 1, 1], [], []>} : vector<64x128xf32>, vector<128x128xf32>, vector<64x128xf32> -> vector<64x128xf32>
    %227 = arith.addf %206, %226 : vector<64x128xf32>
    %c0_177 = arith.constant 0 : index
    %c1_178 = arith.constant 1 : index
    %c0_179 = arith.constant 0 : index
    %228 = vector.load %arg12[%c0_177, %c1_178, %c0_179] : memref<12x12x128xf32, #tpu.memory_space<vmem>>, vector<1x8x128xf32>
    %229 = vector.shape_cast %228 : vector<1x8x128xf32> to vector<8x128xf32>
    %c1_180 = arith.constant 1 : index
    %c1_181 = arith.constant 1 : index
    %c0_182 = arith.constant 0 : index
    %230 = vector.load %arg12[%c1_180, %c1_181, %c0_182] : memref<12x12x128xf32, #tpu.memory_space<vmem>>, vector<1x8x128xf32>
    %231 = vector.shape_cast %230 : vector<1x8x128xf32> to vector<8x128xf32>
    %c2_183 = arith.constant 2 : index
    %c1_184 = arith.constant 1 : index
    %c0_185 = arith.constant 0 : index
    %232 = vector.load %arg12[%c2_183, %c1_184, %c0_185] : memref<12x12x128xf32, #tpu.memory_space<vmem>>, vector<1x8x128xf32>
    %233 = vector.shape_cast %232 : vector<1x8x128xf32> to vector<8x128xf32>
    %c3_186 = arith.constant 3 : index
    %c1_187 = arith.constant 1 : index
    %c0_188 = arith.constant 0 : index
    %234 = vector.load %arg12[%c3_186, %c1_187, %c0_188] : memref<12x12x128xf32, #tpu.memory_space<vmem>>, vector<1x8x128xf32>
    %235 = vector.shape_cast %234 : vector<1x8x128xf32> to vector<8x128xf32>
    %c4_189 = arith.constant 4 : index
    %c1_190 = arith.constant 1 : index
    %c0_191 = arith.constant 0 : index
    %236 = vector.load %arg12[%c4_189, %c1_190, %c0_191] : memref<12x12x128xf32, #tpu.memory_space<vmem>>, vector<1x8x128xf32>
    %237 = vector.shape_cast %236 : vector<1x8x128xf32> to vector<8x128xf32>
    %c5_192 = arith.constant 5 : index
    %c1_193 = arith.constant 1 : index
    %c0_194 = arith.constant 0 : index
    %238 = vector.load %arg12[%c5_192, %c1_193, %c0_194] : memref<12x12x128xf32, #tpu.memory_space<vmem>>, vector<1x8x128xf32>
    %239 = vector.shape_cast %238 : vector<1x8x128xf32> to vector<8x128xf32>
    %c6_195 = arith.constant 6 : index
    %c1_196 = arith.constant 1 : index
    %c0_197 = arith.constant 0 : index
    %240 = vector.load %arg12[%c6_195, %c1_196, %c0_197] : memref<12x12x128xf32, #tpu.memory_space<vmem>>, vector<1x8x128xf32>
    %241 = vector.shape_cast %240 : vector<1x8x128xf32> to vector<8x128xf32>
    %c7_198 = arith.constant 7 : index
    %c1_199 = arith.constant 1 : index
    %c0_200 = arith.constant 0 : index
    %242 = vector.load %arg12[%c7_198, %c1_199, %c0_200] : memref<12x12x128xf32, #tpu.memory_space<vmem>>, vector<1x8x128xf32>
    %243 = vector.shape_cast %242 : vector<1x8x128xf32> to vector<8x128xf32>
    %244 = tpu.concatenate %229, %231, %233, %235, %237, %239, %241, %243 in 0 : vector<8x128xf32>, vector<8x128xf32>, vector<8x128xf32>, vector<8x128xf32>, vector<8x128xf32>, vector<8x128xf32>, vector<8x128xf32>, vector<8x128xf32> -> vector<64x128xf32>
    %c1_201 = arith.constant 1 : index
    %c0_202 = arith.constant 0 : index
    %c0_203 = arith.constant 0 : index
    %245 = vector.load %arg4[%c1_201, %c0_202, %c0_203] : memref<25x128x128xf32, #tpu.memory_space<vmem>>, vector<1x128x128xf32>
    %246 = vector.shape_cast %245 : vector<1x128x128xf32> to vector<128x128xf32>
    %cst_204 = arith.constant dense<0.000000e+00> : vector<64x128xf32>
    %247 = tpu.matmul %244, %246, %cst_204 {dimension_numbers = #tpu.dot_dimension_numbers<[1], [0], [0], [1], [0, 0, 1, 1], [], []>} : vector<64x128xf32>, vector<128x128xf32>, vector<64x128xf32> -> vector<64x128xf32>
    %248 = arith.addf %227, %247 : vector<64x128xf32>
    %c0_205 = arith.constant 0 : index
    %c2_206 = arith.constant 2 : index
    %c0_207 = arith.constant 0 : index
    %249 = vector.load %arg12[%c0_205, %c2_206, %c0_207] : memref<12x12x128xf32, #tpu.memory_space<vmem>>, vector<1x8x128xf32>
    %250 = vector.shape_cast %249 : vector<1x8x128xf32> to vector<8x128xf32>
    %c1_208 = arith.constant 1 : index
    %c2_209 = arith.constant 2 : index
    %c0_210 = arith.constant 0 : index
    %251 = vector.load %arg12[%c1_208, %c2_209, %c0_210] : memref<12x12x128xf32, #tpu.memory_space<vmem>>, vector<1x8x128xf32>
    %252 = vector.shape_cast %251 : vector<1x8x128xf32> to vector<8x128xf32>
    %c2_211 = arith.constant 2 : index
    %c2_212 = arith.constant 2 : index
    %c0_213 = arith.constant 0 : index
    %253 = vector.load %arg12[%c2_211, %c2_212, %c0_213] : memref<12x12x128xf32, #tpu.memory_space<vmem>>, vector<1x8x128xf32>
    %254 = vector.shape_cast %253 : vector<1x8x128xf32> to vector<8x128xf32>
    %c3_214 = arith.constant 3 : index
    %c2_215 = arith.constant 2 : index
    %c0_216 = arith.constant 0 : index
    %255 = vector.load %arg12[%c3_214, %c2_215, %c0_216] : memref<12x12x128xf32, #tpu.memory_space<vmem>>, vector<1x8x128xf32>
    %256 = vector.shape_cast %255 : vector<1x8x128xf32> to vector<8x128xf32>
    %c4_217 = arith.constant 4 : index
    %c2_218 = arith.constant 2 : index
    %c0_219 = arith.constant 0 : index
    %257 = vector.load %arg12[%c4_217, %c2_218, %c0_219] : memref<12x12x128xf32, #tpu.memory_space<vmem>>, vector<1x8x128xf32>
    %258 = vector.shape_cast %257 : vector<1x8x128xf32> to vector<8x128xf32>
    %c5_220 = arith.constant 5 : index
    %c2_221 = arith.constant 2 : index
    %c0_222 = arith.constant 0 : index
    %259 = vector.load %arg12[%c5_220, %c2_221, %c0_222] : memref<12x12x128xf32, #tpu.memory_space<vmem>>, vector<1x8x128xf32>
    %260 = vector.shape_cast %259 : vector<1x8x128xf32> to vector<8x128xf32>
    %c6_223 = arith.constant 6 : index
    %c2_224 = arith.constant 2 : index
    %c0_225 = arith.constant 0 : index
    %261 = vector.load %arg12[%c6_223, %c2_224, %c0_225] : memref<12x12x128xf32, #tpu.memory_space<vmem>>, vector<1x8x128xf32>
    %262 = vector.shape_cast %261 : vector<1x8x128xf32> to vector<8x128xf32>
    %c7_226 = arith.constant 7 : index
    %c2_227 = arith.constant 2 : index
    %c0_228 = arith.constant 0 : index
    %263 = vector.load %arg12[%c7_226, %c2_227, %c0_228] : memref<12x12x128xf32, #tpu.memory_space<vmem>>, vector<1x8x128xf32>
    %264 = vector.shape_cast %263 : vector<1x8x128xf32> to vector<8x128xf32>
    %265 = tpu.concatenate %250, %252, %254, %256, %258, %260, %262, %264 in 0 : vector<8x128xf32>, vector<8x128xf32>, vector<8x128xf32>, vector<8x128xf32>, vector<8x128xf32>, vector<8x128xf32>, vector<8x128xf32>, vector<8x128xf32> -> vector<64x128xf32>
    %c2_229 = arith.constant 2 : index
    %c0_230 = arith.constant 0 : index
    %c0_231 = arith.constant 0 : index
    %266 = vector.load %arg4[%c2_229, %c0_230, %c0_231] : memref<25x128x128xf32, #tpu.memory_space<vmem>>, vector<1x128x128xf32>
    %267 = vector.shape_cast %266 : vector<1x128x128xf32> to vector<128x128xf32>
    %cst_232 = arith.constant dense<0.000000e+00> : vector<64x128xf32>
    %268 = tpu.matmul %265, %267, %cst_232 {dimension_numbers = #tpu.dot_dimension_numbers<[1], [0], [0], [1], [0, 0, 1, 1], [], []>} : vector<64x128xf32>, vector<128x128xf32>, vector<64x128xf32> -> vector<64x128xf32>
    %269 = arith.addf %248, %268 : vector<64x128xf32>
    %c0_233 = arith.constant 0 : index
    %c3_234 = arith.constant 3 : index
    %c0_235 = arith.constant 0 : index
    %270 = vector.load %arg12[%c0_233, %c3_234, %c0_235] : memref<12x12x128xf32, #tpu.memory_space<vmem>>, vector<1x8x128xf32>
    %271 = vector.shape_cast %270 : vector<1x8x128xf32> to vector<8x128xf32>
    %c1_236 = arith.constant 1 : index
    %c3_237 = arith.constant 3 : index
    %c0_238 = arith.constant 0 : index
    %272 = vector.load %arg12[%c1_236, %c3_237, %c0_238] : memref<12x12x128xf32, #tpu.memory_space<vmem>>, vector<1x8x128xf32>
    %273 = vector.shape_cast %272 : vector<1x8x128xf32> to vector<8x128xf32>
    %c2_239 = arith.constant 2 : index
    %c3_240 = arith.constant 3 : index
    %c0_241 = arith.constant 0 : index
    %274 = vector.load %arg12[%c2_239, %c3_240, %c0_241] : memref<12x12x128xf32, #tpu.memory_space<vmem>>, vector<1x8x128xf32>
    %275 = vector.shape_cast %274 : vector<1x8x128xf32> to vector<8x128xf32>
    %c3_242 = arith.constant 3 : index
    %c3_243 = arith.constant 3 : index
    %c0_244 = arith.constant 0 : index
    %276 = vector.load %arg12[%c3_242, %c3_243, %c0_244] : memref<12x12x128xf32, #tpu.memory_space<vmem>>, vector<1x8x128xf32>
    %277 = vector.shape_cast %276 : vector<1x8x128xf32> to vector<8x128xf32>
    %c4_245 = arith.constant 4 : index
    %c3_246 = arith.constant 3 : index
    %c0_247 = arith.constant 0 : index
    %278 = vector.load %arg12[%c4_245, %c3_246, %c0_247] : memref<12x12x128xf32, #tpu.memory_space<vmem>>, vector<1x8x128xf32>
    %279 = vector.shape_cast %278 : vector<1x8x128xf32> to vector<8x128xf32>
    %c5_248 = arith.constant 5 : index
    %c3_249 = arith.constant 3 : index
    %c0_250 = arith.constant 0 : index
    %280 = vector.load %arg12[%c5_248, %c3_249, %c0_250] : memref<12x12x128xf32, #tpu.memory_space<vmem>>, vector<1x8x128xf32>
    %281 = vector.shape_cast %280 : vector<1x8x128xf32> to vector<8x128xf32>
    %c6_251 = arith.constant 6 : index
    %c3_252 = arith.constant 3 : index
    %c0_253 = arith.constant 0 : index
    %282 = vector.load %arg12[%c6_251, %c3_252, %c0_253] : memref<12x12x128xf32, #tpu.memory_space<vmem>>, vector<1x8x128xf32>
    %283 = vector.shape_cast %282 : vector<1x8x128xf32> to vector<8x128xf32>
    %c7_254 = arith.constant 7 : index
    %c3_255 = arith.constant 3 : index
    %c0_256 = arith.constant 0 : index
    %284 = vector.load %arg12[%c7_254, %c3_255, %c0_256] : memref<12x12x128xf32, #tpu.memory_space<vmem>>, vector<1x8x128xf32>
    %285 = vector.shape_cast %284 : vector<1x8x128xf32> to vector<8x128xf32>
    %286 = tpu.concatenate %271, %273, %275, %277, %279, %281, %283, %285 in 0 : vector<8x128xf32>, vector<8x128xf32>, vector<8x128xf32>, vector<8x128xf32>, vector<8x128xf32>, vector<8x128xf32>, vector<8x128xf32>, vector<8x128xf32> -> vector<64x128xf32>
    %c3_257 = arith.constant 3 : index
    %c0_258 = arith.constant 0 : index
    %c0_259 = arith.constant 0 : index
    %287 = vector.load %arg4[%c3_257, %c0_258, %c0_259] : memref<25x128x128xf32, #tpu.memory_space<vmem>>, vector<1x128x128xf32>
    %288 = vector.shape_cast %287 : vector<1x128x128xf32> to vector<128x128xf32>
    %cst_260 = arith.constant dense<0.000000e+00> : vector<64x128xf32>
    %289 = tpu.matmul %286, %288, %cst_260 {dimension_numbers = #tpu.dot_dimension_numbers<[1], [0], [0], [1], [0, 0, 1, 1], [], []>} : vector<64x128xf32>, vector<128x128xf32>, vector<64x128xf32> -> vector<64x128xf32>
    %290 = arith.addf %269, %289 : vector<64x128xf32>
    %c0_261 = arith.constant 0 : index
    %c4_262 = arith.constant 4 : index
    %c0_263 = arith.constant 0 : index
    %291 = vector.load %arg12[%c0_261, %c4_262, %c0_263] : memref<12x12x128xf32, #tpu.memory_space<vmem>>, vector<1x8x128xf32>
    %292 = vector.shape_cast %291 : vector<1x8x128xf32> to vector<8x128xf32>
    %c1_264 = arith.constant 1 : index
    %c4_265 = arith.constant 4 : index
    %c0_266 = arith.constant 0 : index
    %293 = vector.load %arg12[%c1_264, %c4_265, %c0_266] : memref<12x12x128xf32, #tpu.memory_space<vmem>>, vector<1x8x128xf32>
    %294 = vector.shape_cast %293 : vector<1x8x128xf32> to vector<8x128xf32>
    %c2_267 = arith.constant 2 : index
    %c4_268 = arith.constant 4 : index
    %c0_269 = arith.constant 0 : index
    %295 = vector.load %arg12[%c2_267, %c4_268, %c0_269] : memref<12x12x128xf32, #tpu.memory_space<vmem>>, vector<1x8x128xf32>
    %296 = vector.shape_cast %295 : vector<1x8x128xf32> to vector<8x128xf32>
    %c3_270 = arith.constant 3 : index
    %c4_271 = arith.constant 4 : index
    %c0_272 = arith.constant 0 : index
    %297 = vector.load %arg12[%c3_270, %c4_271, %c0_272] : memref<12x12x128xf32, #tpu.memory_space<vmem>>, vector<1x8x128xf32>
    %298 = vector.shape_cast %297 : vector<1x8x128xf32> to vector<8x128xf32>
    %c4_273 = arith.constant 4 : index
    %c4_274 = arith.constant 4 : index
    %c0_275 = arith.constant 0 : index
    %299 = vector.load %arg12[%c4_273, %c4_274, %c0_275] : memref<12x12x128xf32, #tpu.memory_space<vmem>>, vector<1x8x128xf32>
    %300 = vector.shape_cast %299 : vector<1x8x128xf32> to vector<8x128xf32>
    %c5_276 = arith.constant 5 : index
    %c4_277 = arith.constant 4 : index
    %c0_278 = arith.constant 0 : index
    %301 = vector.load %arg12[%c5_276, %c4_277, %c0_278] : memref<12x12x128xf32, #tpu.memory_space<vmem>>, vector<1x8x128xf32>
    %302 = vector.shape_cast %301 : vector<1x8x128xf32> to vector<8x128xf32>
    %c6_279 = arith.constant 6 : index
    %c4_280 = arith.constant 4 : index
    %c0_281 = arith.constant 0 : index
    %303 = vector.load %arg12[%c6_279, %c4_280, %c0_281] : memref<12x12x128xf32, #tpu.memory_space<vmem>>, vector<1x8x128xf32>
    %304 = vector.shape_cast %303 : vector<1x8x128xf32> to vector<8x128xf32>
    %c7_282 = arith.constant 7 : index
    %c4_283 = arith.constant 4 : index
    %c0_284 = arith.constant 0 : index
    %305 = vector.load %arg12[%c7_282, %c4_283, %c0_284] : memref<12x12x128xf32, #tpu.memory_space<vmem>>, vector<1x8x128xf32>
    %306 = vector.shape_cast %305 : vector<1x8x128xf32> to vector<8x128xf32>
    %307 = tpu.concatenate %292, %294, %296, %298, %300, %302, %304, %306 in 0 : vector<8x128xf32>, vector<8x128xf32>, vector<8x128xf32>, vector<8x128xf32>, vector<8x128xf32>, vector<8x128xf32>, vector<8x128xf32>, vector<8x128xf32> -> vector<64x128xf32>
    %c4_285 = arith.constant 4 : index
    %c0_286 = arith.constant 0 : index
    %c0_287 = arith.constant 0 : index
    %308 = vector.load %arg4[%c4_285, %c0_286, %c0_287] : memref<25x128x128xf32, #tpu.memory_space<vmem>>, vector<1x128x128xf32>
    %309 = vector.shape_cast %308 : vector<1x128x128xf32> to vector<128x128xf32>
    %cst_288 = arith.constant dense<0.000000e+00> : vector<64x128xf32>
    %310 = tpu.matmul %307, %309, %cst_288 {dimension_numbers = #tpu.dot_dimension_numbers<[1], [0], [0], [1], [0, 0, 1, 1], [], []>} : vector<64x128xf32>, vector<128x128xf32>, vector<64x128xf32> -> vector<64x128xf32>
    %311 = arith.addf %290, %310 : vector<64x128xf32>
    %c1_289 = arith.constant 1 : index
    %c0_290 = arith.constant 0 : index
    %c0_291 = arith.constant 0 : index
    %312 = vector.load %arg12[%c1_289, %c0_290, %c0_291] : memref<12x12x128xf32, #tpu.memory_space<vmem>>, vector<1x8x128xf32>
    %313 = vector.shape_cast %312 : vector<1x8x128xf32> to vector<8x128xf32>
    %c2_292 = arith.constant 2 : index
    %c0_293 = arith.constant 0 : index
    %c0_294 = arith.constant 0 : index
    %314 = vector.load %arg12[%c2_292, %c0_293, %c0_294] : memref<12x12x128xf32, #tpu.memory_space<vmem>>, vector<1x8x128xf32>
    %315 = vector.shape_cast %314 : vector<1x8x128xf32> to vector<8x128xf32>
    %c3_295 = arith.constant 3 : index
    %c0_296 = arith.constant 0 : index
    %c0_297 = arith.constant 0 : index
    %316 = vector.load %arg12[%c3_295, %c0_296, %c0_297] : memref<12x12x128xf32, #tpu.memory_space<vmem>>, vector<1x8x128xf32>
    %317 = vector.shape_cast %316 : vector<1x8x128xf32> to vector<8x128xf32>
    %c4_298 = arith.constant 4 : index
    %c0_299 = arith.constant 0 : index
    %c0_300 = arith.constant 0 : index
    %318 = vector.load %arg12[%c4_298, %c0_299, %c0_300] : memref<12x12x128xf32, #tpu.memory_space<vmem>>, vector<1x8x128xf32>
    %319 = vector.shape_cast %318 : vector<1x8x128xf32> to vector<8x128xf32>
    %c5_301 = arith.constant 5 : index
    %c0_302 = arith.constant 0 : index
    %c0_303 = arith.constant 0 : index
    %320 = vector.load %arg12[%c5_301, %c0_302, %c0_303] : memref<12x12x128xf32, #tpu.memory_space<vmem>>, vector<1x8x128xf32>
    %321 = vector.shape_cast %320 : vector<1x8x128xf32> to vector<8x128xf32>
    %c6_304 = arith.constant 6 : index
    %c0_305 = arith.constant 0 : index
    %c0_306 = arith.constant 0 : index
    %322 = vector.load %arg12[%c6_304, %c0_305, %c0_306] : memref<12x12x128xf32, #tpu.memory_space<vmem>>, vector<1x8x128xf32>
    %323 = vector.shape_cast %322 : vector<1x8x128xf32> to vector<8x128xf32>
    %c7_307 = arith.constant 7 : index
    %c0_308 = arith.constant 0 : index
    %c0_309 = arith.constant 0 : index
    %324 = vector.load %arg12[%c7_307, %c0_308, %c0_309] : memref<12x12x128xf32, #tpu.memory_space<vmem>>, vector<1x8x128xf32>
    %325 = vector.shape_cast %324 : vector<1x8x128xf32> to vector<8x128xf32>
    %c8_310 = arith.constant 8 : index
    %c0_311 = arith.constant 0 : index
    %c0_312 = arith.constant 0 : index
    %326 = vector.load %arg12[%c8_310, %c0_311, %c0_312] : memref<12x12x128xf32, #tpu.memory_space<vmem>>, vector<1x8x128xf32>
    %327 = vector.shape_cast %326 : vector<1x8x128xf32> to vector<8x128xf32>
    %328 = tpu.concatenate %313, %315, %317, %319, %321, %323, %325, %327 in 0 : vector<8x128xf32>, vector<8x128xf32>, vector<8x128xf32>, vector<8x128xf32>, vector<8x128xf32>, vector<8x128xf32>, vector<8x128xf32>, vector<8x128xf32> -> vector<64x128xf32>
    %c5_313 = arith.constant 5 : index
    %c0_314 = arith.constant 0 : index
    %c0_315 = arith.constant 0 : index
    %329 = vector.load %arg4[%c5_313, %c0_314, %c0_315] : memref<25x128x128xf32, #tpu.memory_space<vmem>>, vector<1x128x128xf32>
    %330 = vector.shape_cast %329 : vector<1x128x128xf32> to vector<128x128xf32>
    %cst_316 = arith.constant dense<0.000000e+00> : vector<64x128xf32>
    %331 = tpu.matmul %328, %330, %cst_316 {dimension_numbers = #tpu.dot_dimension_numbers<[1], [0], [0], [1], [0, 0, 1, 1], [], []>} : vector<64x128xf32>, vector<128x128xf32>, vector<64x128xf32> -> vector<64x128xf32>
    %332 = arith.addf %311, %331 : vector<64x128xf32>
    %c1_317 = arith.constant 1 : index
    %c1_318 = arith.constant 1 : index
    %c0_319 = arith.constant 0 : index
    %333 = vector.load %arg12[%c1_317, %c1_318, %c0_319] : memref<12x12x128xf32, #tpu.memory_space<vmem>>, vector<1x8x128xf32>
    %334 = vector.shape_cast %333 : vector<1x8x128xf32> to vector<8x128xf32>
    %c2_320 = arith.constant 2 : index
    %c1_321 = arith.constant 1 : index
    %c0_322 = arith.constant 0 : index
    %335 = vector.load %arg12[%c2_320, %c1_321, %c0_322] : memref<12x12x128xf32, #tpu.memory_space<vmem>>, vector<1x8x128xf32>
    %336 = vector.shape_cast %335 : vector<1x8x128xf32> to vector<8x128xf32>
    %c3_323 = arith.constant 3 : index
    %c1_324 = arith.constant 1 : index
    %c0_325 = arith.constant 0 : index
    %337 = vector.load %arg12[%c3_323, %c1_324, %c0_325] : memref<12x12x128xf32, #tpu.memory_space<vmem>>, vector<1x8x128xf32>
    %338 = vector.shape_cast %337 : vector<1x8x128xf32> to vector<8x128xf32>
    %c4_326 = arith.constant 4 : index
    %c1_327 = arith.constant 1 : index
    %c0_328 = arith.constant 0 : index
    %339 = vector.load %arg12[%c4_326, %c1_327, %c0_328] : memref<12x12x128xf32, #tpu.memory_space<vmem>>, vector<1x8x128xf32>
    %340 = vector.shape_cast %339 : vector<1x8x128xf32> to vector<8x128xf32>
    %c5_329 = arith.constant 5 : index
    %c1_330 = arith.constant 1 : index
    %c0_331 = arith.constant 0 : index
    %341 = vector.load %arg12[%c5_329, %c1_330, %c0_331] : memref<12x12x128xf32, #tpu.memory_space<vmem>>, vector<1x8x128xf32>
    %342 = vector.shape_cast %341 : vector<1x8x128xf32> to vector<8x128xf32>
    %c6_332 = arith.constant 6 : index
    %c1_333 = arith.constant 1 : index
    %c0_334 = arith.constant 0 : index
    %343 = vector.load %arg12[%c6_332, %c1_333, %c0_334] : memref<12x12x128xf32, #tpu.memory_space<vmem>>, vector<1x8x128xf32>
    %344 = vector.shape_cast %343 : vector<1x8x128xf32> to vector<8x128xf32>
    %c7_335 = arith.constant 7 : index
    %c1_336 = arith.constant 1 : index
    %c0_337 = arith.constant 0 : index
    %345 = vector.load %arg12[%c7_335, %c1_336, %c0_337] : memref<12x12x128xf32, #tpu.memory_space<vmem>>, vector<1x8x128xf32>
    %346 = vector.shape_cast %345 : vector<1x8x128xf32> to vector<8x128xf32>
    %c8_338 = arith.constant 8 : index
    %c1_339 = arith.constant 1 : index
    %c0_340 = arith.constant 0 : index
    %347 = vector.load %arg12[%c8_338, %c1_339, %c0_340] : memref<12x12x128xf32, #tpu.memory_space<vmem>>, vector<1x8x128xf32>
    %348 = vector.shape_cast %347 : vector<1x8x128xf32> to vector<8x128xf32>
    %349 = tpu.concatenate %334, %336, %338, %340, %342, %344, %346, %348 in 0 : vector<8x128xf32>, vector<8x128xf32>, vector<8x128xf32>, vector<8x128xf32>, vector<8x128xf32>, vector<8x128xf32>, vector<8x128xf32>, vector<8x128xf32> -> vector<64x128xf32>
    %c6_341 = arith.constant 6 : index
    %c0_342 = arith.constant 0 : index
    %c0_343 = arith.constant 0 : index
    %350 = vector.load %arg4[%c6_341, %c0_342, %c0_343] : memref<25x128x128xf32, #tpu.memory_space<vmem>>, vector<1x128x128xf32>
    %351 = vector.shape_cast %350 : vector<1x128x128xf32> to vector<128x128xf32>
    %cst_344 = arith.constant dense<0.000000e+00> : vector<64x128xf32>
    %352 = tpu.matmul %349, %351, %cst_344 {dimension_numbers = #tpu.dot_dimension_numbers<[1], [0], [0], [1], [0, 0, 1, 1], [], []>} : vector<64x128xf32>, vector<128x128xf32>, vector<64x128xf32> -> vector<64x128xf32>
    %353 = arith.addf %332, %352 : vector<64x128xf32>
    %c1_345 = arith.constant 1 : index
    %c2_346 = arith.constant 2 : index
    %c0_347 = arith.constant 0 : index
    %354 = vector.load %arg12[%c1_345, %c2_346, %c0_347] : memref<12x12x128xf32, #tpu.memory_space<vmem>>, vector<1x8x128xf32>
    %355 = vector.shape_cast %354 : vector<1x8x128xf32> to vector<8x128xf32>
    %c2_348 = arith.constant 2 : index
    %c2_349 = arith.constant 2 : index
    %c0_350 = arith.constant 0 : index
    %356 = vector.load %arg12[%c2_348, %c2_349, %c0_350] : memref<12x12x128xf32, #tpu.memory_space<vmem>>, vector<1x8x128xf32>
    %357 = vector.shape_cast %356 : vector<1x8x128xf32> to vector<8x128xf32>
    %c3_351 = arith.constant 3 : index
    %c2_352 = arith.constant 2 : index
    %c0_353 = arith.constant 0 : index
    %358 = vector.load %arg12[%c3_351, %c2_352, %c0_353] : memref<12x12x128xf32, #tpu.memory_space<vmem>>, vector<1x8x128xf32>
    %359 = vector.shape_cast %358 : vector<1x8x128xf32> to vector<8x128xf32>
    %c4_354 = arith.constant 4 : index
    %c2_355 = arith.constant 2 : index
    %c0_356 = arith.constant 0 : index
    %360 = vector.load %arg12[%c4_354, %c2_355, %c0_356] : memref<12x12x128xf32, #tpu.memory_space<vmem>>, vector<1x8x128xf32>
    %361 = vector.shape_cast %360 : vector<1x8x128xf32> to vector<8x128xf32>
    %c5_357 = arith.constant 5 : index
    %c2_358 = arith.constant 2 : index
    %c0_359 = arith.constant 0 : index
    %362 = vector.load %arg12[%c5_357, %c2_358, %c0_359] : memref<12x12x128xf32, #tpu.memory_space<vmem>>, vector<1x8x128xf32>
    %363 = vector.shape_cast %362 : vector<1x8x128xf32> to vector<8x128xf32>
    %c6_360 = arith.constant 6 : index
    %c2_361 = arith.constant 2 : index
    %c0_362 = arith.constant 0 : index
    %364 = vector.load %arg12[%c6_360, %c2_361, %c0_362] : memref<12x12x128xf32, #tpu.memory_space<vmem>>, vector<1x8x128xf32>
    %365 = vector.shape_cast %364 : vector<1x8x128xf32> to vector<8x128xf32>
    %c7_363 = arith.constant 7 : index
    %c2_364 = arith.constant 2 : index
    %c0_365 = arith.constant 0 : index
    %366 = vector.load %arg12[%c7_363, %c2_364, %c0_365] : memref<12x12x128xf32, #tpu.memory_space<vmem>>, vector<1x8x128xf32>
    %367 = vector.shape_cast %366 : vector<1x8x128xf32> to vector<8x128xf32>
    %c8_366 = arith.constant 8 : index
    %c2_367 = arith.constant 2 : index
    %c0_368 = arith.constant 0 : index
    %368 = vector.load %arg12[%c8_366, %c2_367, %c0_368] : memref<12x12x128xf32, #tpu.memory_space<vmem>>, vector<1x8x128xf32>
    %369 = vector.shape_cast %368 : vector<1x8x128xf32> to vector<8x128xf32>
    %370 = tpu.concatenate %355, %357, %359, %361, %363, %365, %367, %369 in 0 : vector<8x128xf32>, vector<8x128xf32>, vector<8x128xf32>, vector<8x128xf32>, vector<8x128xf32>, vector<8x128xf32>, vector<8x128xf32>, vector<8x128xf32> -> vector<64x128xf32>
    %c7_369 = arith.constant 7 : index
    %c0_370 = arith.constant 0 : index
    %c0_371 = arith.constant 0 : index
    %371 = vector.load %arg4[%c7_369, %c0_370, %c0_371] : memref<25x128x128xf32, #tpu.memory_space<vmem>>, vector<1x128x128xf32>
    %372 = vector.shape_cast %371 : vector<1x128x128xf32> to vector<128x128xf32>
    %cst_372 = arith.constant dense<0.000000e+00> : vector<64x128xf32>
    %373 = tpu.matmul %370, %372, %cst_372 {dimension_numbers = #tpu.dot_dimension_numbers<[1], [0], [0], [1], [0, 0, 1, 1], [], []>} : vector<64x128xf32>, vector<128x128xf32>, vector<64x128xf32> -> vector<64x128xf32>
    %374 = arith.addf %353, %373 : vector<64x128xf32>
    %c1_373 = arith.constant 1 : index
    %c3_374 = arith.constant 3 : index
    %c0_375 = arith.constant 0 : index
    %375 = vector.load %arg12[%c1_373, %c3_374, %c0_375] : memref<12x12x128xf32, #tpu.memory_space<vmem>>, vector<1x8x128xf32>
    %376 = vector.shape_cast %375 : vector<1x8x128xf32> to vector<8x128xf32>
    %c2_376 = arith.constant 2 : index
    %c3_377 = arith.constant 3 : index
    %c0_378 = arith.constant 0 : index
    %377 = vector.load %arg12[%c2_376, %c3_377, %c0_378] : memref<12x12x128xf32, #tpu.memory_space<vmem>>, vector<1x8x128xf32>
    %378 = vector.shape_cast %377 : vector<1x8x128xf32> to vector<8x128xf32>
    %c3_379 = arith.constant 3 : index
    %c3_380 = arith.constant 3 : index
    %c0_381 = arith.constant 0 : index
    %379 = vector.load %arg12[%c3_379, %c3_380, %c0_381] : memref<12x12x128xf32, #tpu.memory_space<vmem>>, vector<1x8x128xf32>
    %380 = vector.shape_cast %379 : vector<1x8x128xf32> to vector<8x128xf32>
    %c4_382 = arith.constant 4 : index
    %c3_383 = arith.constant 3 : index
    %c0_384 = arith.constant 0 : index
    %381 = vector.load %arg12[%c4_382, %c3_383, %c0_384] : memref<12x12x128xf32, #tpu.memory_space<vmem>>, vector<1x8x128xf32>
    %382 = vector.shape_cast %381 : vector<1x8x128xf32> to vector<8x128xf32>
    %c5_385 = arith.constant 5 : index
    %c3_386 = arith.constant 3 : index
    %c0_387 = arith.constant 0 : index
    %383 = vector.load %arg12[%c5_385, %c3_386, %c0_387] : memref<12x12x128xf32, #tpu.memory_space<vmem>>, vector<1x8x128xf32>
    %384 = vector.shape_cast %383 : vector<1x8x128xf32> to vector<8x128xf32>
    %c6_388 = arith.constant 6 : index
    %c3_389 = arith.constant 3 : index
    %c0_390 = arith.constant 0 : index
    %385 = vector.load %arg12[%c6_388, %c3_389, %c0_390] : memref<12x12x128xf32, #tpu.memory_space<vmem>>, vector<1x8x128xf32>
    %386 = vector.shape_cast %385 : vector<1x8x128xf32> to vector<8x128xf32>
    %c7_391 = arith.constant 7 : index
    %c3_392 = arith.constant 3 : index
    %c0_393 = arith.constant 0 : index
    %387 = vector.load %arg12[%c7_391, %c3_392, %c0_393] : memref<12x12x128xf32, #tpu.memory_space<vmem>>, vector<1x8x128xf32>
    %388 = vector.shape_cast %387 : vector<1x8x128xf32> to vector<8x128xf32>
    %c8_394 = arith.constant 8 : index
    %c3_395 = arith.constant 3 : index
    %c0_396 = arith.constant 0 : index
    %389 = vector.load %arg12[%c8_394, %c3_395, %c0_396] : memref<12x12x128xf32, #tpu.memory_space<vmem>>, vector<1x8x128xf32>
    %390 = vector.shape_cast %389 : vector<1x8x128xf32> to vector<8x128xf32>
    %391 = tpu.concatenate %376, %378, %380, %382, %384, %386, %388, %390 in 0 : vector<8x128xf32>, vector<8x128xf32>, vector<8x128xf32>, vector<8x128xf32>, vector<8x128xf32>, vector<8x128xf32>, vector<8x128xf32>, vector<8x128xf32> -> vector<64x128xf32>
    %c8_397 = arith.constant 8 : index
    %c0_398 = arith.constant 0 : index
    %c0_399 = arith.constant 0 : index
    %392 = vector.load %arg4[%c8_397, %c0_398, %c0_399] : memref<25x128x128xf32, #tpu.memory_space<vmem>>, vector<1x128x128xf32>
    %393 = vector.shape_cast %392 : vector<1x128x128xf32> to vector<128x128xf32>
    %cst_400 = arith.constant dense<0.000000e+00> : vector<64x128xf32>
    %394 = tpu.matmul %391, %393, %cst_400 {dimension_numbers = #tpu.dot_dimension_numbers<[1], [0], [0], [1], [0, 0, 1, 1], [], []>} : vector<64x128xf32>, vector<128x128xf32>, vector<64x128xf32> -> vector<64x128xf32>
    %395 = arith.addf %374, %394 : vector<64x128xf32>
    %c1_401 = arith.constant 1 : index
    %c4_402 = arith.constant 4 : index
    %c0_403 = arith.constant 0 : index
    %396 = vector.load %arg12[%c1_401, %c4_402, %c0_403] : memref<12x12x128xf32, #tpu.memory_space<vmem>>, vector<1x8x128xf32>
    %397 = vector.shape_cast %396 : vector<1x8x128xf32> to vector<8x128xf32>
    %c2_404 = arith.constant 2 : index
    %c4_405 = arith.constant 4 : index
    %c0_406 = arith.constant 0 : index
    %398 = vector.load %arg12[%c2_404, %c4_405, %c0_406] : memref<12x12x128xf32, #tpu.memory_space<vmem>>, vector<1x8x128xf32>
    %399 = vector.shape_cast %398 : vector<1x8x128xf32> to vector<8x128xf32>
    %c3_407 = arith.constant 3 : index
    %c4_408 = arith.constant 4 : index
    %c0_409 = arith.constant 0 : index
    %400 = vector.load %arg12[%c3_407, %c4_408, %c0_409] : memref<12x12x128xf32, #tpu.memory_space<vmem>>, vector<1x8x128xf32>
    %401 = vector.shape_cast %400 : vector<1x8x128xf32> to vector<8x128xf32>
    %c4_410 = arith.constant 4 : index
    %c4_411 = arith.constant 4 : index
    %c0_412 = arith.constant 0 : index
    %402 = vector.load %arg12[%c4_410, %c4_411, %c0_412] : memref<12x12x128xf32, #tpu.memory_space<vmem>>, vector<1x8x128xf32>
    %403 = vector.shape_cast %402 : vector<1x8x128xf32> to vector<8x128xf32>
    %c5_413 = arith.constant 5 : index
    %c4_414 = arith.constant 4 : index
    %c0_415 = arith.constant 0 : index
    %404 = vector.load %arg12[%c5_413, %c4_414, %c0_415] : memref<12x12x128xf32, #tpu.memory_space<vmem>>, vector<1x8x128xf32>
    %405 = vector.shape_cast %404 : vector<1x8x128xf32> to vector<8x128xf32>
    %c6_416 = arith.constant 6 : index
    %c4_417 = arith.constant 4 : index
    %c0_418 = arith.constant 0 : index
    %406 = vector.load %arg12[%c6_416, %c4_417, %c0_418] : memref<12x12x128xf32, #tpu.memory_space<vmem>>, vector<1x8x128xf32>
    %407 = vector.shape_cast %406 : vector<1x8x128xf32> to vector<8x128xf32>
    %c7_419 = arith.constant 7 : index
    %c4_420 = arith.constant 4 : index
    %c0_421 = arith.constant 0 : index
    %408 = vector.load %arg12[%c7_419, %c4_420, %c0_421] : memref<12x12x128xf32, #tpu.memory_space<vmem>>, vector<1x8x128xf32>
    %409 = vector.shape_cast %408 : vector<1x8x128xf32> to vector<8x128xf32>
    %c8_422 = arith.constant 8 : index
    %c4_423 = arith.constant 4 : index
    %c0_424 = arith.constant 0 : index
    %410 = vector.load %arg12[%c8_422, %c4_423, %c0_424] : memref<12x12x128xf32, #tpu.memory_space<vmem>>, vector<1x8x128xf32>
    %411 = vector.shape_cast %410 : vector<1x8x128xf32> to vector<8x128xf32>
    %412 = tpu.concatenate %397, %399, %401, %403, %405, %407, %409, %411 in 0 : vector<8x128xf32>, vector<8x128xf32>, vector<8x128xf32>, vector<8x128xf32>, vector<8x128xf32>, vector<8x128xf32>, vector<8x128xf32>, vector<8x128xf32> -> vector<64x128xf32>
    %c9_425 = arith.constant 9 : index
    %c0_426 = arith.constant 0 : index
    %c0_427 = arith.constant 0 : index
    %413 = vector.load %arg4[%c9_425, %c0_426, %c0_427] : memref<25x128x128xf32, #tpu.memory_space<vmem>>, vector<1x128x128xf32>
    %414 = vector.shape_cast %413 : vector<1x128x128xf32> to vector<128x128xf32>
    %cst_428 = arith.constant dense<0.000000e+00> : vector<64x128xf32>
    %415 = tpu.matmul %412, %414, %cst_428 {dimension_numbers = #tpu.dot_dimension_numbers<[1], [0], [0], [1], [0, 0, 1, 1], [], []>} : vector<64x128xf32>, vector<128x128xf32>, vector<64x128xf32> -> vector<64x128xf32>
    %416 = arith.addf %395, %415 : vector<64x128xf32>
    %c2_429 = arith.constant 2 : index
    %c0_430 = arith.constant 0 : index
    %c0_431 = arith.constant 0 : index
    %417 = vector.load %arg12[%c2_429, %c0_430, %c0_431] : memref<12x12x128xf32, #tpu.memory_space<vmem>>, vector<1x8x128xf32>
    %418 = vector.shape_cast %417 : vector<1x8x128xf32> to vector<8x128xf32>
    %c3_432 = arith.constant 3 : index
    %c0_433 = arith.constant 0 : index
    %c0_434 = arith.constant 0 : index
    %419 = vector.load %arg12[%c3_432, %c0_433, %c0_434] : memref<12x12x128xf32, #tpu.memory_space<vmem>>, vector<1x8x128xf32>
    %420 = vector.shape_cast %419 : vector<1x8x128xf32> to vector<8x128xf32>
    %c4_435 = arith.constant 4 : index
    %c0_436 = arith.constant 0 : index
    %c0_437 = arith.constant 0 : index
    %421 = vector.load %arg12[%c4_435, %c0_436, %c0_437] : memref<12x12x128xf32, #tpu.memory_space<vmem>>, vector<1x8x128xf32>
    %422 = vector.shape_cast %421 : vector<1x8x128xf32> to vector<8x128xf32>
    %c5_438 = arith.constant 5 : index
    %c0_439 = arith.constant 0 : index
    %c0_440 = arith.constant 0 : index
    %423 = vector.load %arg12[%c5_438, %c0_439, %c0_440] : memref<12x12x128xf32, #tpu.memory_space<vmem>>, vector<1x8x128xf32>
    %424 = vector.shape_cast %423 : vector<1x8x128xf32> to vector<8x128xf32>
    %c6_441 = arith.constant 6 : index
    %c0_442 = arith.constant 0 : index
    %c0_443 = arith.constant 0 : index
    %425 = vector.load %arg12[%c6_441, %c0_442, %c0_443] : memref<12x12x128xf32, #tpu.memory_space<vmem>>, vector<1x8x128xf32>
    %426 = vector.shape_cast %425 : vector<1x8x128xf32> to vector<8x128xf32>
    %c7_444 = arith.constant 7 : index
    %c0_445 = arith.constant 0 : index
    %c0_446 = arith.constant 0 : index
    %427 = vector.load %arg12[%c7_444, %c0_445, %c0_446] : memref<12x12x128xf32, #tpu.memory_space<vmem>>, vector<1x8x128xf32>
    %428 = vector.shape_cast %427 : vector<1x8x128xf32> to vector<8x128xf32>
    %c8_447 = arith.constant 8 : index
    %c0_448 = arith.constant 0 : index
    %c0_449 = arith.constant 0 : index
    %429 = vector.load %arg12[%c8_447, %c0_448, %c0_449] : memref<12x12x128xf32, #tpu.memory_space<vmem>>, vector<1x8x128xf32>
    %430 = vector.shape_cast %429 : vector<1x8x128xf32> to vector<8x128xf32>
    %c9_450 = arith.constant 9 : index
    %c0_451 = arith.constant 0 : index
    %c0_452 = arith.constant 0 : index
    %431 = vector.load %arg12[%c9_450, %c0_451, %c0_452] : memref<12x12x128xf32, #tpu.memory_space<vmem>>, vector<1x8x128xf32>
    %432 = vector.shape_cast %431 : vector<1x8x128xf32> to vector<8x128xf32>
    %433 = tpu.concatenate %418, %420, %422, %424, %426, %428, %430, %432 in 0 : vector<8x128xf32>, vector<8x128xf32>, vector<8x128xf32>, vector<8x128xf32>, vector<8x128xf32>, vector<8x128xf32>, vector<8x128xf32>, vector<8x128xf32> -> vector<64x128xf32>
    %c10_453 = arith.constant 10 : index
    %c0_454 = arith.constant 0 : index
    %c0_455 = arith.constant 0 : index
    %434 = vector.load %arg4[%c10_453, %c0_454, %c0_455] : memref<25x128x128xf32, #tpu.memory_space<vmem>>, vector<1x128x128xf32>
    %435 = vector.shape_cast %434 : vector<1x128x128xf32> to vector<128x128xf32>
    %cst_456 = arith.constant dense<0.000000e+00> : vector<64x128xf32>
    %436 = tpu.matmul %433, %435, %cst_456 {dimension_numbers = #tpu.dot_dimension_numbers<[1], [0], [0], [1], [0, 0, 1, 1], [], []>} : vector<64x128xf32>, vector<128x128xf32>, vector<64x128xf32> -> vector<64x128xf32>
    %437 = arith.addf %416, %436 : vector<64x128xf32>
    %c2_457 = arith.constant 2 : index
    %c1_458 = arith.constant 1 : index
    %c0_459 = arith.constant 0 : index
    %438 = vector.load %arg12[%c2_457, %c1_458, %c0_459] : memref<12x12x128xf32, #tpu.memory_space<vmem>>, vector<1x8x128xf32>
    %439 = vector.shape_cast %438 : vector<1x8x128xf32> to vector<8x128xf32>
    %c3_460 = arith.constant 3 : index
    %c1_461 = arith.constant 1 : index
    %c0_462 = arith.constant 0 : index
    %440 = vector.load %arg12[%c3_460, %c1_461, %c0_462] : memref<12x12x128xf32, #tpu.memory_space<vmem>>, vector<1x8x128xf32>
    %441 = vector.shape_cast %440 : vector<1x8x128xf32> to vector<8x128xf32>
    %c4_463 = arith.constant 4 : index
    %c1_464 = arith.constant 1 : index
    %c0_465 = arith.constant 0 : index
    %442 = vector.load %arg12[%c4_463, %c1_464, %c0_465] : memref<12x12x128xf32, #tpu.memory_space<vmem>>, vector<1x8x128xf32>
    %443 = vector.shape_cast %442 : vector<1x8x128xf32> to vector<8x128xf32>
    %c5_466 = arith.constant 5 : index
    %c1_467 = arith.constant 1 : index
    %c0_468 = arith.constant 0 : index
    %444 = vector.load %arg12[%c5_466, %c1_467, %c0_468] : memref<12x12x128xf32, #tpu.memory_space<vmem>>, vector<1x8x128xf32>
    %445 = vector.shape_cast %444 : vector<1x8x128xf32> to vector<8x128xf32>
    %c6_469 = arith.constant 6 : index
    %c1_470 = arith.constant 1 : index
    %c0_471 = arith.constant 0 : index
    %446 = vector.load %arg12[%c6_469, %c1_470, %c0_471] : memref<12x12x128xf32, #tpu.memory_space<vmem>>, vector<1x8x128xf32>
    %447 = vector.shape_cast %446 : vector<1x8x128xf32> to vector<8x128xf32>
    %c7_472 = arith.constant 7 : index
    %c1_473 = arith.constant 1 : index
    %c0_474 = arith.constant 0 : index
    %448 = vector.load %arg12[%c7_472, %c1_473, %c0_474] : memref<12x12x128xf32, #tpu.memory_space<vmem>>, vector<1x8x128xf32>
    %449 = vector.shape_cast %448 : vector<1x8x128xf32> to vector<8x128xf32>
    %c8_475 = arith.constant 8 : index
    %c1_476 = arith.constant 1 : index
    %c0_477 = arith.constant 0 : index
    %450 = vector.load %arg12[%c8_475, %c1_476, %c0_477] : memref<12x12x128xf32, #tpu.memory_space<vmem>>, vector<1x8x128xf32>
    %451 = vector.shape_cast %450 : vector<1x8x128xf32> to vector<8x128xf32>
    %c9_478 = arith.constant 9 : index
    %c1_479 = arith.constant 1 : index
    %c0_480 = arith.constant 0 : index
    %452 = vector.load %arg12[%c9_478, %c1_479, %c0_480] : memref<12x12x128xf32, #tpu.memory_space<vmem>>, vector<1x8x128xf32>
    %453 = vector.shape_cast %452 : vector<1x8x128xf32> to vector<8x128xf32>
    %454 = tpu.concatenate %439, %441, %443, %445, %447, %449, %451, %453 in 0 : vector<8x128xf32>, vector<8x128xf32>, vector<8x128xf32>, vector<8x128xf32>, vector<8x128xf32>, vector<8x128xf32>, vector<8x128xf32>, vector<8x128xf32> -> vector<64x128xf32>
    %c11_481 = arith.constant 11 : index
    %c0_482 = arith.constant 0 : index
    %c0_483 = arith.constant 0 : index
    %455 = vector.load %arg4[%c11_481, %c0_482, %c0_483] : memref<25x128x128xf32, #tpu.memory_space<vmem>>, vector<1x128x128xf32>
    %456 = vector.shape_cast %455 : vector<1x128x128xf32> to vector<128x128xf32>
    %cst_484 = arith.constant dense<0.000000e+00> : vector<64x128xf32>
    %457 = tpu.matmul %454, %456, %cst_484 {dimension_numbers = #tpu.dot_dimension_numbers<[1], [0], [0], [1], [0, 0, 1, 1], [], []>} : vector<64x128xf32>, vector<128x128xf32>, vector<64x128xf32> -> vector<64x128xf32>
    %458 = arith.addf %437, %457 : vector<64x128xf32>
    %c2_485 = arith.constant 2 : index
    %c2_486 = arith.constant 2 : index
    %c0_487 = arith.constant 0 : index
    %459 = vector.load %arg12[%c2_485, %c2_486, %c0_487] : memref<12x12x128xf32, #tpu.memory_space<vmem>>, vector<1x8x128xf32>
    %460 = vector.shape_cast %459 : vector<1x8x128xf32> to vector<8x128xf32>
    %c3_488 = arith.constant 3 : index
    %c2_489 = arith.constant 2 : index
    %c0_490 = arith.constant 0 : index
    %461 = vector.load %arg12[%c3_488, %c2_489, %c0_490] : memref<12x12x128xf32, #tpu.memory_space<vmem>>, vector<1x8x128xf32>
    %462 = vector.shape_cast %461 : vector<1x8x128xf32> to vector<8x128xf32>
    %c4_491 = arith.constant 4 : index
    %c2_492 = arith.constant 2 : index
    %c0_493 = arith.constant 0 : index
    %463 = vector.load %arg12[%c4_491, %c2_492, %c0_493] : memref<12x12x128xf32, #tpu.memory_space<vmem>>, vector<1x8x128xf32>
    %464 = vector.shape_cast %463 : vector<1x8x128xf32> to vector<8x128xf32>
    %c5_494 = arith.constant 5 : index
    %c2_495 = arith.constant 2 : index
    %c0_496 = arith.constant 0 : index
    %465 = vector.load %arg12[%c5_494, %c2_495, %c0_496] : memref<12x12x128xf32, #tpu.memory_space<vmem>>, vector<1x8x128xf32>
    %466 = vector.shape_cast %465 : vector<1x8x128xf32> to vector<8x128xf32>
    %c6_497 = arith.constant 6 : index
    %c2_498 = arith.constant 2 : index
    %c0_499 = arith.constant 0 : index
    %467 = vector.load %arg12[%c6_497, %c2_498, %c0_499] : memref<12x12x128xf32, #tpu.memory_space<vmem>>, vector<1x8x128xf32>
    %468 = vector.shape_cast %467 : vector<1x8x128xf32> to vector<8x128xf32>
    %c7_500 = arith.constant 7 : index
    %c2_501 = arith.constant 2 : index
    %c0_502 = arith.constant 0 : index
    %469 = vector.load %arg12[%c7_500, %c2_501, %c0_502] : memref<12x12x128xf32, #tpu.memory_space<vmem>>, vector<1x8x128xf32>
    %470 = vector.shape_cast %469 : vector<1x8x128xf32> to vector<8x128xf32>
    %c8_503 = arith.constant 8 : index
    %c2_504 = arith.constant 2 : index
    %c0_505 = arith.constant 0 : index
    %471 = vector.load %arg12[%c8_503, %c2_504, %c0_505] : memref<12x12x128xf32, #tpu.memory_space<vmem>>, vector<1x8x128xf32>
    %472 = vector.shape_cast %471 : vector<1x8x128xf32> to vector<8x128xf32>
    %c9_506 = arith.constant 9 : index
    %c2_507 = arith.constant 2 : index
    %c0_508 = arith.constant 0 : index
    %473 = vector.load %arg12[%c9_506, %c2_507, %c0_508] : memref<12x12x128xf32, #tpu.memory_space<vmem>>, vector<1x8x128xf32>
    %474 = vector.shape_cast %473 : vector<1x8x128xf32> to vector<8x128xf32>
    %475 = tpu.concatenate %460, %462, %464, %466, %468, %470, %472, %474 in 0 : vector<8x128xf32>, vector<8x128xf32>, vector<8x128xf32>, vector<8x128xf32>, vector<8x128xf32>, vector<8x128xf32>, vector<8x128xf32>, vector<8x128xf32> -> vector<64x128xf32>
    %c12 = arith.constant 12 : index
    %c0_509 = arith.constant 0 : index
    %c0_510 = arith.constant 0 : index
    %476 = vector.load %arg4[%c12, %c0_509, %c0_510] : memref<25x128x128xf32, #tpu.memory_space<vmem>>, vector<1x128x128xf32>
    %477 = vector.shape_cast %476 : vector<1x128x128xf32> to vector<128x128xf32>
    %cst_511 = arith.constant dense<0.000000e+00> : vector<64x128xf32>
    %478 = tpu.matmul %475, %477, %cst_511 {dimension_numbers = #tpu.dot_dimension_numbers<[1], [0], [0], [1], [0, 0, 1, 1], [], []>} : vector<64x128xf32>, vector<128x128xf32>, vector<64x128xf32> -> vector<64x128xf32>
    %479 = arith.addf %458, %478 : vector<64x128xf32>
    %c2_512 = arith.constant 2 : index
    %c3_513 = arith.constant 3 : index
    %c0_514 = arith.constant 0 : index
    %480 = vector.load %arg12[%c2_512, %c3_513, %c0_514] : memref<12x12x128xf32, #tpu.memory_space<vmem>>, vector<1x8x128xf32>
    %481 = vector.shape_cast %480 : vector<1x8x128xf32> to vector<8x128xf32>
    %c3_515 = arith.constant 3 : index
    %c3_516 = arith.constant 3 : index
    %c0_517 = arith.constant 0 : index
    %482 = vector.load %arg12[%c3_515, %c3_516, %c0_517] : memref<12x12x128xf32, #tpu.memory_space<vmem>>, vector<1x8x128xf32>
    %483 = vector.shape_cast %482 : vector<1x8x128xf32> to vector<8x128xf32>
    %c4_518 = arith.constant 4 : index
    %c3_519 = arith.constant 3 : index
    %c0_520 = arith.constant 0 : index
    %484 = vector.load %arg12[%c4_518, %c3_519, %c0_520] : memref<12x12x128xf32, #tpu.memory_space<vmem>>, vector<1x8x128xf32>
    %485 = vector.shape_cast %484 : vector<1x8x128xf32> to vector<8x128xf32>
    %c5_521 = arith.constant 5 : index
    %c3_522 = arith.constant 3 : index
    %c0_523 = arith.constant 0 : index
    %486 = vector.load %arg12[%c5_521, %c3_522, %c0_523] : memref<12x12x128xf32, #tpu.memory_space<vmem>>, vector<1x8x128xf32>
    %487 = vector.shape_cast %486 : vector<1x8x128xf32> to vector<8x128xf32>
    %c6_524 = arith.constant 6 : index
    %c3_525 = arith.constant 3 : index
    %c0_526 = arith.constant 0 : index
    %488 = vector.load %arg12[%c6_524, %c3_525, %c0_526] : memref<12x12x128xf32, #tpu.memory_space<vmem>>, vector<1x8x128xf32>
    %489 = vector.shape_cast %488 : vector<1x8x128xf32> to vector<8x128xf32>
    %c7_527 = arith.constant 7 : index
    %c3_528 = arith.constant 3 : index
    %c0_529 = arith.constant 0 : index
    %490 = vector.load %arg12[%c7_527, %c3_528, %c0_529] : memref<12x12x128xf32, #tpu.memory_space<vmem>>, vector<1x8x128xf32>
    %491 = vector.shape_cast %490 : vector<1x8x128xf32> to vector<8x128xf32>
    %c8_530 = arith.constant 8 : index
    %c3_531 = arith.constant 3 : index
    %c0_532 = arith.constant 0 : index
    %492 = vector.load %arg12[%c8_530, %c3_531, %c0_532] : memref<12x12x128xf32, #tpu.memory_space<vmem>>, vector<1x8x128xf32>
    %493 = vector.shape_cast %492 : vector<1x8x128xf32> to vector<8x128xf32>
    %c9_533 = arith.constant 9 : index
    %c3_534 = arith.constant 3 : index
    %c0_535 = arith.constant 0 : index
    %494 = vector.load %arg12[%c9_533, %c3_534, %c0_535] : memref<12x12x128xf32, #tpu.memory_space<vmem>>, vector<1x8x128xf32>
    %495 = vector.shape_cast %494 : vector<1x8x128xf32> to vector<8x128xf32>
    %496 = tpu.concatenate %481, %483, %485, %487, %489, %491, %493, %495 in 0 : vector<8x128xf32>, vector<8x128xf32>, vector<8x128xf32>, vector<8x128xf32>, vector<8x128xf32>, vector<8x128xf32>, vector<8x128xf32>, vector<8x128xf32> -> vector<64x128xf32>
    %c13 = arith.constant 13 : index
    %c0_536 = arith.constant 0 : index
    %c0_537 = arith.constant 0 : index
    %497 = vector.load %arg4[%c13, %c0_536, %c0_537] : memref<25x128x128xf32, #tpu.memory_space<vmem>>, vector<1x128x128xf32>
    %498 = vector.shape_cast %497 : vector<1x128x128xf32> to vector<128x128xf32>
    %cst_538 = arith.constant dense<0.000000e+00> : vector<64x128xf32>
    %499 = tpu.matmul %496, %498, %cst_538 {dimension_numbers = #tpu.dot_dimension_numbers<[1], [0], [0], [1], [0, 0, 1, 1], [], []>} : vector<64x128xf32>, vector<128x128xf32>, vector<64x128xf32> -> vector<64x128xf32>
    %500 = arith.addf %479, %499 : vector<64x128xf32>
    %c2_539 = arith.constant 2 : index
    %c4_540 = arith.constant 4 : index
    %c0_541 = arith.constant 0 : index
    %501 = vector.load %arg12[%c2_539, %c4_540, %c0_541] : memref<12x12x128xf32, #tpu.memory_space<vmem>>, vector<1x8x128xf32>
    %502 = vector.shape_cast %501 : vector<1x8x128xf32> to vector<8x128xf32>
    %c3_542 = arith.constant 3 : index
    %c4_543 = arith.constant 4 : index
    %c0_544 = arith.constant 0 : index
    %503 = vector.load %arg12[%c3_542, %c4_543, %c0_544] : memref<12x12x128xf32, #tpu.memory_space<vmem>>, vector<1x8x128xf32>
    %504 = vector.shape_cast %503 : vector<1x8x128xf32> to vector<8x128xf32>
    %c4_545 = arith.constant 4 : index
    %c4_546 = arith.constant 4 : index
    %c0_547 = arith.constant 0 : index
    %505 = vector.load %arg12[%c4_545, %c4_546, %c0_547] : memref<12x12x128xf32, #tpu.memory_space<vmem>>, vector<1x8x128xf32>
    %506 = vector.shape_cast %505 : vector<1x8x128xf32> to vector<8x128xf32>
    %c5_548 = arith.constant 5 : index
    %c4_549 = arith.constant 4 : index
    %c0_550 = arith.constant 0 : index
    %507 = vector.load %arg12[%c5_548, %c4_549, %c0_550] : memref<12x12x128xf32, #tpu.memory_space<vmem>>, vector<1x8x128xf32>
    %508 = vector.shape_cast %507 : vector<1x8x128xf32> to vector<8x128xf32>
    %c6_551 = arith.constant 6 : index
    %c4_552 = arith.constant 4 : index
    %c0_553 = arith.constant 0 : index
    %509 = vector.load %arg12[%c6_551, %c4_552, %c0_553] : memref<12x12x128xf32, #tpu.memory_space<vmem>>, vector<1x8x128xf32>
    %510 = vector.shape_cast %509 : vector<1x8x128xf32> to vector<8x128xf32>
    %c7_554 = arith.constant 7 : index
    %c4_555 = arith.constant 4 : index
    %c0_556 = arith.constant 0 : index
    %511 = vector.load %arg12[%c7_554, %c4_555, %c0_556] : memref<12x12x128xf32, #tpu.memory_space<vmem>>, vector<1x8x128xf32>
    %512 = vector.shape_cast %511 : vector<1x8x128xf32> to vector<8x128xf32>
    %c8_557 = arith.constant 8 : index
    %c4_558 = arith.constant 4 : index
    %c0_559 = arith.constant 0 : index
    %513 = vector.load %arg12[%c8_557, %c4_558, %c0_559] : memref<12x12x128xf32, #tpu.memory_space<vmem>>, vector<1x8x128xf32>
    %514 = vector.shape_cast %513 : vector<1x8x128xf32> to vector<8x128xf32>
    %c9_560 = arith.constant 9 : index
    %c4_561 = arith.constant 4 : index
    %c0_562 = arith.constant 0 : index
    %515 = vector.load %arg12[%c9_560, %c4_561, %c0_562] : memref<12x12x128xf32, #tpu.memory_space<vmem>>, vector<1x8x128xf32>
    %516 = vector.shape_cast %515 : vector<1x8x128xf32> to vector<8x128xf32>
    %517 = tpu.concatenate %502, %504, %506, %508, %510, %512, %514, %516 in 0 : vector<8x128xf32>, vector<8x128xf32>, vector<8x128xf32>, vector<8x128xf32>, vector<8x128xf32>, vector<8x128xf32>, vector<8x128xf32>, vector<8x128xf32> -> vector<64x128xf32>
    %c14 = arith.constant 14 : index
    %c0_563 = arith.constant 0 : index
    %c0_564 = arith.constant 0 : index
    %518 = vector.load %arg4[%c14, %c0_563, %c0_564] : memref<25x128x128xf32, #tpu.memory_space<vmem>>, vector<1x128x128xf32>
    %519 = vector.shape_cast %518 : vector<1x128x128xf32> to vector<128x128xf32>
    %cst_565 = arith.constant dense<0.000000e+00> : vector<64x128xf32>
    %520 = tpu.matmul %517, %519, %cst_565 {dimension_numbers = #tpu.dot_dimension_numbers<[1], [0], [0], [1], [0, 0, 1, 1], [], []>} : vector<64x128xf32>, vector<128x128xf32>, vector<64x128xf32> -> vector<64x128xf32>
    %521 = arith.addf %500, %520 : vector<64x128xf32>
    %c3_566 = arith.constant 3 : index
    %c0_567 = arith.constant 0 : index
    %c0_568 = arith.constant 0 : index
    %522 = vector.load %arg12[%c3_566, %c0_567, %c0_568] : memref<12x12x128xf32, #tpu.memory_space<vmem>>, vector<1x8x128xf32>
    %523 = vector.shape_cast %522 : vector<1x8x128xf32> to vector<8x128xf32>
    %c4_569 = arith.constant 4 : index
    %c0_570 = arith.constant 0 : index
    %c0_571 = arith.constant 0 : index
    %524 = vector.load %arg12[%c4_569, %c0_570, %c0_571] : memref<12x12x128xf32, #tpu.memory_space<vmem>>, vector<1x8x128xf32>
    %525 = vector.shape_cast %524 : vector<1x8x128xf32> to vector<8x128xf32>
    %c5_572 = arith.constant 5 : index
    %c0_573 = arith.constant 0 : index
    %c0_574 = arith.constant 0 : index
    %526 = vector.load %arg12[%c5_572, %c0_573, %c0_574] : memref<12x12x128xf32, #tpu.memory_space<vmem>>, vector<1x8x128xf32>
    %527 = vector.shape_cast %526 : vector<1x8x128xf32> to vector<8x128xf32>
    %c6_575 = arith.constant 6 : index
    %c0_576 = arith.constant 0 : index
    %c0_577 = arith.constant 0 : index
    %528 = vector.load %arg12[%c6_575, %c0_576, %c0_577] : memref<12x12x128xf32, #tpu.memory_space<vmem>>, vector<1x8x128xf32>
    %529 = vector.shape_cast %528 : vector<1x8x128xf32> to vector<8x128xf32>
    %c7_578 = arith.constant 7 : index
    %c0_579 = arith.constant 0 : index
    %c0_580 = arith.constant 0 : index
    %530 = vector.load %arg12[%c7_578, %c0_579, %c0_580] : memref<12x12x128xf32, #tpu.memory_space<vmem>>, vector<1x8x128xf32>
    %531 = vector.shape_cast %530 : vector<1x8x128xf32> to vector<8x128xf32>
    %c8_581 = arith.constant 8 : index
    %c0_582 = arith.constant 0 : index
    %c0_583 = arith.constant 0 : index
    %532 = vector.load %arg12[%c8_581, %c0_582, %c0_583] : memref<12x12x128xf32, #tpu.memory_space<vmem>>, vector<1x8x128xf32>
    %533 = vector.shape_cast %532 : vector<1x8x128xf32> to vector<8x128xf32>
    %c9_584 = arith.constant 9 : index
    %c0_585 = arith.constant 0 : index
    %c0_586 = arith.constant 0 : index
    %534 = vector.load %arg12[%c9_584, %c0_585, %c0_586] : memref<12x12x128xf32, #tpu.memory_space<vmem>>, vector<1x8x128xf32>
    %535 = vector.shape_cast %534 : vector<1x8x128xf32> to vector<8x128xf32>
    %c10_587 = arith.constant 10 : index
    %c0_588 = arith.constant 0 : index
    %c0_589 = arith.constant 0 : index
    %536 = vector.load %arg12[%c10_587, %c0_588, %c0_589] : memref<12x12x128xf32, #tpu.memory_space<vmem>>, vector<1x8x128xf32>
    %537 = vector.shape_cast %536 : vector<1x8x128xf32> to vector<8x128xf32>
    %538 = tpu.concatenate %523, %525, %527, %529, %531, %533, %535, %537 in 0 : vector<8x128xf32>, vector<8x128xf32>, vector<8x128xf32>, vector<8x128xf32>, vector<8x128xf32>, vector<8x128xf32>, vector<8x128xf32>, vector<8x128xf32> -> vector<64x128xf32>
    %c15 = arith.constant 15 : index
    %c0_590 = arith.constant 0 : index
    %c0_591 = arith.constant 0 : index
    %539 = vector.load %arg4[%c15, %c0_590, %c0_591] : memref<25x128x128xf32, #tpu.memory_space<vmem>>, vector<1x128x128xf32>
    %540 = vector.shape_cast %539 : vector<1x128x128xf32> to vector<128x128xf32>
    %cst_592 = arith.constant dense<0.000000e+00> : vector<64x128xf32>
    %541 = tpu.matmul %538, %540, %cst_592 {dimension_numbers = #tpu.dot_dimension_numbers<[1], [0], [0], [1], [0, 0, 1, 1], [], []>} : vector<64x128xf32>, vector<128x128xf32>, vector<64x128xf32> -> vector<64x128xf32>
    %542 = arith.addf %521, %541 : vector<64x128xf32>
    %c3_593 = arith.constant 3 : index
    %c1_594 = arith.constant 1 : index
    %c0_595 = arith.constant 0 : index
    %543 = vector.load %arg12[%c3_593, %c1_594, %c0_595] : memref<12x12x128xf32, #tpu.memory_space<vmem>>, vector<1x8x128xf32>
    %544 = vector.shape_cast %543 : vector<1x8x128xf32> to vector<8x128xf32>
    %c4_596 = arith.constant 4 : index
    %c1_597 = arith.constant 1 : index
    %c0_598 = arith.constant 0 : index
    %545 = vector.load %arg12[%c4_596, %c1_597, %c0_598] : memref<12x12x128xf32, #tpu.memory_space<vmem>>, vector<1x8x128xf32>
    %546 = vector.shape_cast %545 : vector<1x8x128xf32> to vector<8x128xf32>
    %c5_599 = arith.constant 5 : index
    %c1_600 = arith.constant 1 : index
    %c0_601 = arith.constant 0 : index
    %547 = vector.load %arg12[%c5_599, %c1_600, %c0_601] : memref<12x12x128xf32, #tpu.memory_space<vmem>>, vector<1x8x128xf32>
    %548 = vector.shape_cast %547 : vector<1x8x128xf32> to vector<8x128xf32>
    %c6_602 = arith.constant 6 : index
    %c1_603 = arith.constant 1 : index
    %c0_604 = arith.constant 0 : index
    %549 = vector.load %arg12[%c6_602, %c1_603, %c0_604] : memref<12x12x128xf32, #tpu.memory_space<vmem>>, vector<1x8x128xf32>
    %550 = vector.shape_cast %549 : vector<1x8x128xf32> to vector<8x128xf32>
    %c7_605 = arith.constant 7 : index
    %c1_606 = arith.constant 1 : index
    %c0_607 = arith.constant 0 : index
    %551 = vector.load %arg12[%c7_605, %c1_606, %c0_607] : memref<12x12x128xf32, #tpu.memory_space<vmem>>, vector<1x8x128xf32>
    %552 = vector.shape_cast %551 : vector<1x8x128xf32> to vector<8x128xf32>
    %c8_608 = arith.constant 8 : index
    %c1_609 = arith.constant 1 : index
    %c0_610 = arith.constant 0 : index
    %553 = vector.load %arg12[%c8_608, %c1_609, %c0_610] : memref<12x12x128xf32, #tpu.memory_space<vmem>>, vector<1x8x128xf32>
    %554 = vector.shape_cast %553 : vector<1x8x128xf32> to vector<8x128xf32>
    %c9_611 = arith.constant 9 : index
    %c1_612 = arith.constant 1 : index
    %c0_613 = arith.constant 0 : index
    %555 = vector.load %arg12[%c9_611, %c1_612, %c0_613] : memref<12x12x128xf32, #tpu.memory_space<vmem>>, vector<1x8x128xf32>
    %556 = vector.shape_cast %555 : vector<1x8x128xf32> to vector<8x128xf32>
    %c10_614 = arith.constant 10 : index
    %c1_615 = arith.constant 1 : index
    %c0_616 = arith.constant 0 : index
    %557 = vector.load %arg12[%c10_614, %c1_615, %c0_616] : memref<12x12x128xf32, #tpu.memory_space<vmem>>, vector<1x8x128xf32>
    %558 = vector.shape_cast %557 : vector<1x8x128xf32> to vector<8x128xf32>
    %559 = tpu.concatenate %544, %546, %548, %550, %552, %554, %556, %558 in 0 : vector<8x128xf32>, vector<8x128xf32>, vector<8x128xf32>, vector<8x128xf32>, vector<8x128xf32>, vector<8x128xf32>, vector<8x128xf32>, vector<8x128xf32> -> vector<64x128xf32>
    %c16 = arith.constant 16 : index
    %c0_617 = arith.constant 0 : index
    %c0_618 = arith.constant 0 : index
    %560 = vector.load %arg4[%c16, %c0_617, %c0_618] : memref<25x128x128xf32, #tpu.memory_space<vmem>>, vector<1x128x128xf32>
    %561 = vector.shape_cast %560 : vector<1x128x128xf32> to vector<128x128xf32>
    %cst_619 = arith.constant dense<0.000000e+00> : vector<64x128xf32>
    %562 = tpu.matmul %559, %561, %cst_619 {dimension_numbers = #tpu.dot_dimension_numbers<[1], [0], [0], [1], [0, 0, 1, 1], [], []>} : vector<64x128xf32>, vector<128x128xf32>, vector<64x128xf32> -> vector<64x128xf32>
    %563 = arith.addf %542, %562 : vector<64x128xf32>
    %c3_620 = arith.constant 3 : index
    %c2_621 = arith.constant 2 : index
    %c0_622 = arith.constant 0 : index
    %564 = vector.load %arg12[%c3_620, %c2_621, %c0_622] : memref<12x12x128xf32, #tpu.memory_space<vmem>>, vector<1x8x128xf32>
    %565 = vector.shape_cast %564 : vector<1x8x128xf32> to vector<8x128xf32>
    %c4_623 = arith.constant 4 : index
    %c2_624 = arith.constant 2 : index
    %c0_625 = arith.constant 0 : index
    %566 = vector.load %arg12[%c4_623, %c2_624, %c0_625] : memref<12x12x128xf32, #tpu.memory_space<vmem>>, vector<1x8x128xf32>
    %567 = vector.shape_cast %566 : vector<1x8x128xf32> to vector<8x128xf32>
    %c5_626 = arith.constant 5 : index
    %c2_627 = arith.constant 2 : index
    %c0_628 = arith.constant 0 : index
    %568 = vector.load %arg12[%c5_626, %c2_627, %c0_628] : memref<12x12x128xf32, #tpu.memory_space<vmem>>, vector<1x8x128xf32>
    %569 = vector.shape_cast %568 : vector<1x8x128xf32> to vector<8x128xf32>
    %c6_629 = arith.constant 6 : index
    %c2_630 = arith.constant 2 : index
    %c0_631 = arith.constant 0 : index
    %570 = vector.load %arg12[%c6_629, %c2_630, %c0_631] : memref<12x12x128xf32, #tpu.memory_space<vmem>>, vector<1x8x128xf32>
    %571 = vector.shape_cast %570 : vector<1x8x128xf32> to vector<8x128xf32>
    %c7_632 = arith.constant 7 : index
    %c2_633 = arith.constant 2 : index
    %c0_634 = arith.constant 0 : index
    %572 = vector.load %arg12[%c7_632, %c2_633, %c0_634] : memref<12x12x128xf32, #tpu.memory_space<vmem>>, vector<1x8x128xf32>
    %573 = vector.shape_cast %572 : vector<1x8x128xf32> to vector<8x128xf32>
    %c8_635 = arith.constant 8 : index
    %c2_636 = arith.constant 2 : index
    %c0_637 = arith.constant 0 : index
    %574 = vector.load %arg12[%c8_635, %c2_636, %c0_637] : memref<12x12x128xf32, #tpu.memory_space<vmem>>, vector<1x8x128xf32>
    %575 = vector.shape_cast %574 : vector<1x8x128xf32> to vector<8x128xf32>
    %c9_638 = arith.constant 9 : index
    %c2_639 = arith.constant 2 : index
    %c0_640 = arith.constant 0 : index
    %576 = vector.load %arg12[%c9_638, %c2_639, %c0_640] : memref<12x12x128xf32, #tpu.memory_space<vmem>>, vector<1x8x128xf32>
    %577 = vector.shape_cast %576 : vector<1x8x128xf32> to vector<8x128xf32>
    %c10_641 = arith.constant 10 : index
    %c2_642 = arith.constant 2 : index
    %c0_643 = arith.constant 0 : index
    %578 = vector.load %arg12[%c10_641, %c2_642, %c0_643] : memref<12x12x128xf32, #tpu.memory_space<vmem>>, vector<1x8x128xf32>
    %579 = vector.shape_cast %578 : vector<1x8x128xf32> to vector<8x128xf32>
    %580 = tpu.concatenate %565, %567, %569, %571, %573, %575, %577, %579 in 0 : vector<8x128xf32>, vector<8x128xf32>, vector<8x128xf32>, vector<8x128xf32>, vector<8x128xf32>, vector<8x128xf32>, vector<8x128xf32>, vector<8x128xf32> -> vector<64x128xf32>
    %c17 = arith.constant 17 : index
    %c0_644 = arith.constant 0 : index
    %c0_645 = arith.constant 0 : index
    %581 = vector.load %arg4[%c17, %c0_644, %c0_645] : memref<25x128x128xf32, #tpu.memory_space<vmem>>, vector<1x128x128xf32>
    %582 = vector.shape_cast %581 : vector<1x128x128xf32> to vector<128x128xf32>
    %cst_646 = arith.constant dense<0.000000e+00> : vector<64x128xf32>
    %583 = tpu.matmul %580, %582, %cst_646 {dimension_numbers = #tpu.dot_dimension_numbers<[1], [0], [0], [1], [0, 0, 1, 1], [], []>} : vector<64x128xf32>, vector<128x128xf32>, vector<64x128xf32> -> vector<64x128xf32>
    %584 = arith.addf %563, %583 : vector<64x128xf32>
    %c3_647 = arith.constant 3 : index
    %c3_648 = arith.constant 3 : index
    %c0_649 = arith.constant 0 : index
    %585 = vector.load %arg12[%c3_647, %c3_648, %c0_649] : memref<12x12x128xf32, #tpu.memory_space<vmem>>, vector<1x8x128xf32>
    %586 = vector.shape_cast %585 : vector<1x8x128xf32> to vector<8x128xf32>
    %c4_650 = arith.constant 4 : index
    %c3_651 = arith.constant 3 : index
    %c0_652 = arith.constant 0 : index
    %587 = vector.load %arg12[%c4_650, %c3_651, %c0_652] : memref<12x12x128xf32, #tpu.memory_space<vmem>>, vector<1x8x128xf32>
    %588 = vector.shape_cast %587 : vector<1x8x128xf32> to vector<8x128xf32>
    %c5_653 = arith.constant 5 : index
    %c3_654 = arith.constant 3 : index
    %c0_655 = arith.constant 0 : index
    %589 = vector.load %arg12[%c5_653, %c3_654, %c0_655] : memref<12x12x128xf32, #tpu.memory_space<vmem>>, vector<1x8x128xf32>
    %590 = vector.shape_cast %589 : vector<1x8x128xf32> to vector<8x128xf32>
    %c6_656 = arith.constant 6 : index
    %c3_657 = arith.constant 3 : index
    %c0_658 = arith.constant 0 : index
    %591 = vector.load %arg12[%c6_656, %c3_657, %c0_658] : memref<12x12x128xf32, #tpu.memory_space<vmem>>, vector<1x8x128xf32>
    %592 = vector.shape_cast %591 : vector<1x8x128xf32> to vector<8x128xf32>
    %c7_659 = arith.constant 7 : index
    %c3_660 = arith.constant 3 : index
    %c0_661 = arith.constant 0 : index
    %593 = vector.load %arg12[%c7_659, %c3_660, %c0_661] : memref<12x12x128xf32, #tpu.memory_space<vmem>>, vector<1x8x128xf32>
    %594 = vector.shape_cast %593 : vector<1x8x128xf32> to vector<8x128xf32>
    %c8_662 = arith.constant 8 : index
    %c3_663 = arith.constant 3 : index
    %c0_664 = arith.constant 0 : index
    %595 = vector.load %arg12[%c8_662, %c3_663, %c0_664] : memref<12x12x128xf32, #tpu.memory_space<vmem>>, vector<1x8x128xf32>
    %596 = vector.shape_cast %595 : vector<1x8x128xf32> to vector<8x128xf32>
    %c9_665 = arith.constant 9 : index
    %c3_666 = arith.constant 3 : index
    %c0_667 = arith.constant 0 : index
    %597 = vector.load %arg12[%c9_665, %c3_666, %c0_667] : memref<12x12x128xf32, #tpu.memory_space<vmem>>, vector<1x8x128xf32>
    %598 = vector.shape_cast %597 : vector<1x8x128xf32> to vector<8x128xf32>
    %c10_668 = arith.constant 10 : index
    %c3_669 = arith.constant 3 : index
    %c0_670 = arith.constant 0 : index
    %599 = vector.load %arg12[%c10_668, %c3_669, %c0_670] : memref<12x12x128xf32, #tpu.memory_space<vmem>>, vector<1x8x128xf32>
    %600 = vector.shape_cast %599 : vector<1x8x128xf32> to vector<8x128xf32>
    %601 = tpu.concatenate %586, %588, %590, %592, %594, %596, %598, %600 in 0 : vector<8x128xf32>, vector<8x128xf32>, vector<8x128xf32>, vector<8x128xf32>, vector<8x128xf32>, vector<8x128xf32>, vector<8x128xf32>, vector<8x128xf32> -> vector<64x128xf32>
    %c18 = arith.constant 18 : index
    %c0_671 = arith.constant 0 : index
    %c0_672 = arith.constant 0 : index
    %602 = vector.load %arg4[%c18, %c0_671, %c0_672] : memref<25x128x128xf32, #tpu.memory_space<vmem>>, vector<1x128x128xf32>
    %603 = vector.shape_cast %602 : vector<1x128x128xf32> to vector<128x128xf32>
    %cst_673 = arith.constant dense<0.000000e+00> : vector<64x128xf32>
    %604 = tpu.matmul %601, %603, %cst_673 {dimension_numbers = #tpu.dot_dimension_numbers<[1], [0], [0], [1], [0, 0, 1, 1], [], []>} : vector<64x128xf32>, vector<128x128xf32>, vector<64x128xf32> -> vector<64x128xf32>
    %605 = arith.addf %584, %604 : vector<64x128xf32>
    %c3_674 = arith.constant 3 : index
    %c4_675 = arith.constant 4 : index
    %c0_676 = arith.constant 0 : index
    %606 = vector.load %arg12[%c3_674, %c4_675, %c0_676] : memref<12x12x128xf32, #tpu.memory_space<vmem>>, vector<1x8x128xf32>
    %607 = vector.shape_cast %606 : vector<1x8x128xf32> to vector<8x128xf32>
    %c4_677 = arith.constant 4 : index
    %c4_678 = arith.constant 4 : index
    %c0_679 = arith.constant 0 : index
    %608 = vector.load %arg12[%c4_677, %c4_678, %c0_679] : memref<12x12x128xf32, #tpu.memory_space<vmem>>, vector<1x8x128xf32>
    %609 = vector.shape_cast %608 : vector<1x8x128xf32> to vector<8x128xf32>
    %c5_680 = arith.constant 5 : index
    %c4_681 = arith.constant 4 : index
    %c0_682 = arith.constant 0 : index
    %610 = vector.load %arg12[%c5_680, %c4_681, %c0_682] : memref<12x12x128xf32, #tpu.memory_space<vmem>>, vector<1x8x128xf32>
    %611 = vector.shape_cast %610 : vector<1x8x128xf32> to vector<8x128xf32>
    %c6_683 = arith.constant 6 : index
    %c4_684 = arith.constant 4 : index
    %c0_685 = arith.constant 0 : index
    %612 = vector.load %arg12[%c6_683, %c4_684, %c0_685] : memref<12x12x128xf32, #tpu.memory_space<vmem>>, vector<1x8x128xf32>
    %613 = vector.shape_cast %612 : vector<1x8x128xf32> to vector<8x128xf32>
    %c7_686 = arith.constant 7 : index
    %c4_687 = arith.constant 4 : index
    %c0_688 = arith.constant 0 : index
    %614 = vector.load %arg12[%c7_686, %c4_687, %c0_688] : memref<12x12x128xf32, #tpu.memory_space<vmem>>, vector<1x8x128xf32>
    %615 = vector.shape_cast %614 : vector<1x8x128xf32> to vector<8x128xf32>
    %c8_689 = arith.constant 8 : index
    %c4_690 = arith.constant 4 : index
    %c0_691 = arith.constant 0 : index
    %616 = vector.load %arg12[%c8_689, %c4_690, %c0_691] : memref<12x12x128xf32, #tpu.memory_space<vmem>>, vector<1x8x128xf32>
    %617 = vector.shape_cast %616 : vector<1x8x128xf32> to vector<8x128xf32>
    %c9_692 = arith.constant 9 : index
    %c4_693 = arith.constant 4 : index
    %c0_694 = arith.constant 0 : index
    %618 = vector.load %arg12[%c9_692, %c4_693, %c0_694] : memref<12x12x128xf32, #tpu.memory_space<vmem>>, vector<1x8x128xf32>
    %619 = vector.shape_cast %618 : vector<1x8x128xf32> to vector<8x128xf32>
    %c10_695 = arith.constant 10 : index
    %c4_696 = arith.constant 4 : index
    %c0_697 = arith.constant 0 : index
    %620 = vector.load %arg12[%c10_695, %c4_696, %c0_697] : memref<12x12x128xf32, #tpu.memory_space<vmem>>, vector<1x8x128xf32>
    %621 = vector.shape_cast %620 : vector<1x8x128xf32> to vector<8x128xf32>
    %622 = tpu.concatenate %607, %609, %611, %613, %615, %617, %619, %621 in 0 : vector<8x128xf32>, vector<8x128xf32>, vector<8x128xf32>, vector<8x128xf32>, vector<8x128xf32>, vector<8x128xf32>, vector<8x128xf32>, vector<8x128xf32> -> vector<64x128xf32>
    %c19 = arith.constant 19 : index
    %c0_698 = arith.constant 0 : index
    %c0_699 = arith.constant 0 : index
    %623 = vector.load %arg4[%c19, %c0_698, %c0_699] : memref<25x128x128xf32, #tpu.memory_space<vmem>>, vector<1x128x128xf32>
    %624 = vector.shape_cast %623 : vector<1x128x128xf32> to vector<128x128xf32>
    %cst_700 = arith.constant dense<0.000000e+00> : vector<64x128xf32>
    %625 = tpu.matmul %622, %624, %cst_700 {dimension_numbers = #tpu.dot_dimension_numbers<[1], [0], [0], [1], [0, 0, 1, 1], [], []>} : vector<64x128xf32>, vector<128x128xf32>, vector<64x128xf32> -> vector<64x128xf32>
    %626 = arith.addf %605, %625 : vector<64x128xf32>
    %c4_701 = arith.constant 4 : index
    %c0_702 = arith.constant 0 : index
    %c0_703 = arith.constant 0 : index
    %627 = vector.load %arg12[%c4_701, %c0_702, %c0_703] : memref<12x12x128xf32, #tpu.memory_space<vmem>>, vector<1x8x128xf32>
    %628 = vector.shape_cast %627 : vector<1x8x128xf32> to vector<8x128xf32>
    %c5_704 = arith.constant 5 : index
    %c0_705 = arith.constant 0 : index
    %c0_706 = arith.constant 0 : index
    %629 = vector.load %arg12[%c5_704, %c0_705, %c0_706] : memref<12x12x128xf32, #tpu.memory_space<vmem>>, vector<1x8x128xf32>
    %630 = vector.shape_cast %629 : vector<1x8x128xf32> to vector<8x128xf32>
    %c6_707 = arith.constant 6 : index
    %c0_708 = arith.constant 0 : index
    %c0_709 = arith.constant 0 : index
    %631 = vector.load %arg12[%c6_707, %c0_708, %c0_709] : memref<12x12x128xf32, #tpu.memory_space<vmem>>, vector<1x8x128xf32>
    %632 = vector.shape_cast %631 : vector<1x8x128xf32> to vector<8x128xf32>
    %c7_710 = arith.constant 7 : index
    %c0_711 = arith.constant 0 : index
    %c0_712 = arith.constant 0 : index
    %633 = vector.load %arg12[%c7_710, %c0_711, %c0_712] : memref<12x12x128xf32, #tpu.memory_space<vmem>>, vector<1x8x128xf32>
    %634 = vector.shape_cast %633 : vector<1x8x128xf32> to vector<8x128xf32>
    %c8_713 = arith.constant 8 : index
    %c0_714 = arith.constant 0 : index
    %c0_715 = arith.constant 0 : index
    %635 = vector.load %arg12[%c8_713, %c0_714, %c0_715] : memref<12x12x128xf32, #tpu.memory_space<vmem>>, vector<1x8x128xf32>
    %636 = vector.shape_cast %635 : vector<1x8x128xf32> to vector<8x128xf32>
    %c9_716 = arith.constant 9 : index
    %c0_717 = arith.constant 0 : index
    %c0_718 = arith.constant 0 : index
    %637 = vector.load %arg12[%c9_716, %c0_717, %c0_718] : memref<12x12x128xf32, #tpu.memory_space<vmem>>, vector<1x8x128xf32>
    %638 = vector.shape_cast %637 : vector<1x8x128xf32> to vector<8x128xf32>
    %c10_719 = arith.constant 10 : index
    %c0_720 = arith.constant 0 : index
    %c0_721 = arith.constant 0 : index
    %639 = vector.load %arg12[%c10_719, %c0_720, %c0_721] : memref<12x12x128xf32, #tpu.memory_space<vmem>>, vector<1x8x128xf32>
    %640 = vector.shape_cast %639 : vector<1x8x128xf32> to vector<8x128xf32>
    %c11_722 = arith.constant 11 : index
    %c0_723 = arith.constant 0 : index
    %c0_724 = arith.constant 0 : index
    %641 = vector.load %arg12[%c11_722, %c0_723, %c0_724] : memref<12x12x128xf32, #tpu.memory_space<vmem>>, vector<1x8x128xf32>
    %642 = vector.shape_cast %641 : vector<1x8x128xf32> to vector<8x128xf32>
    %643 = tpu.concatenate %628, %630, %632, %634, %636, %638, %640, %642 in 0 : vector<8x128xf32>, vector<8x128xf32>, vector<8x128xf32>, vector<8x128xf32>, vector<8x128xf32>, vector<8x128xf32>, vector<8x128xf32>, vector<8x128xf32> -> vector<64x128xf32>
    %c20 = arith.constant 20 : index
    %c0_725 = arith.constant 0 : index
    %c0_726 = arith.constant 0 : index
    %644 = vector.load %arg4[%c20, %c0_725, %c0_726] : memref<25x128x128xf32, #tpu.memory_space<vmem>>, vector<1x128x128xf32>
    %645 = vector.shape_cast %644 : vector<1x128x128xf32> to vector<128x128xf32>
    %cst_727 = arith.constant dense<0.000000e+00> : vector<64x128xf32>
    %646 = tpu.matmul %643, %645, %cst_727 {dimension_numbers = #tpu.dot_dimension_numbers<[1], [0], [0], [1], [0, 0, 1, 1], [], []>} : vector<64x128xf32>, vector<128x128xf32>, vector<64x128xf32> -> vector<64x128xf32>
    %647 = arith.addf %626, %646 : vector<64x128xf32>
    %c4_728 = arith.constant 4 : index
    %c1_729 = arith.constant 1 : index
    %c0_730 = arith.constant 0 : index
    %648 = vector.load %arg12[%c4_728, %c1_729, %c0_730] : memref<12x12x128xf32, #tpu.memory_space<vmem>>, vector<1x8x128xf32>
    %649 = vector.shape_cast %648 : vector<1x8x128xf32> to vector<8x128xf32>
    %c5_731 = arith.constant 5 : index
    %c1_732 = arith.constant 1 : index
    %c0_733 = arith.constant 0 : index
    %650 = vector.load %arg12[%c5_731, %c1_732, %c0_733] : memref<12x12x128xf32, #tpu.memory_space<vmem>>, vector<1x8x128xf32>
    %651 = vector.shape_cast %650 : vector<1x8x128xf32> to vector<8x128xf32>
    %c6_734 = arith.constant 6 : index
    %c1_735 = arith.constant 1 : index
    %c0_736 = arith.constant 0 : index
    %652 = vector.load %arg12[%c6_734, %c1_735, %c0_736] : memref<12x12x128xf32, #tpu.memory_space<vmem>>, vector<1x8x128xf32>
    %653 = vector.shape_cast %652 : vector<1x8x128xf32> to vector<8x128xf32>
    %c7_737 = arith.constant 7 : index
    %c1_738 = arith.constant 1 : index
    %c0_739 = arith.constant 0 : index
    %654 = vector.load %arg12[%c7_737, %c1_738, %c0_739] : memref<12x12x128xf32, #tpu.memory_space<vmem>>, vector<1x8x128xf32>
    %655 = vector.shape_cast %654 : vector<1x8x128xf32> to vector<8x128xf32>
    %c8_740 = arith.constant 8 : index
    %c1_741 = arith.constant 1 : index
    %c0_742 = arith.constant 0 : index
    %656 = vector.load %arg12[%c8_740, %c1_741, %c0_742] : memref<12x12x128xf32, #tpu.memory_space<vmem>>, vector<1x8x128xf32>
    %657 = vector.shape_cast %656 : vector<1x8x128xf32> to vector<8x128xf32>
    %c9_743 = arith.constant 9 : index
    %c1_744 = arith.constant 1 : index
    %c0_745 = arith.constant 0 : index
    %658 = vector.load %arg12[%c9_743, %c1_744, %c0_745] : memref<12x12x128xf32, #tpu.memory_space<vmem>>, vector<1x8x128xf32>
    %659 = vector.shape_cast %658 : vector<1x8x128xf32> to vector<8x128xf32>
    %c10_746 = arith.constant 10 : index
    %c1_747 = arith.constant 1 : index
    %c0_748 = arith.constant 0 : index
    %660 = vector.load %arg12[%c10_746, %c1_747, %c0_748] : memref<12x12x128xf32, #tpu.memory_space<vmem>>, vector<1x8x128xf32>
    %661 = vector.shape_cast %660 : vector<1x8x128xf32> to vector<8x128xf32>
    %c11_749 = arith.constant 11 : index
    %c1_750 = arith.constant 1 : index
    %c0_751 = arith.constant 0 : index
    %662 = vector.load %arg12[%c11_749, %c1_750, %c0_751] : memref<12x12x128xf32, #tpu.memory_space<vmem>>, vector<1x8x128xf32>
    %663 = vector.shape_cast %662 : vector<1x8x128xf32> to vector<8x128xf32>
    %664 = tpu.concatenate %649, %651, %653, %655, %657, %659, %661, %663 in 0 : vector<8x128xf32>, vector<8x128xf32>, vector<8x128xf32>, vector<8x128xf32>, vector<8x128xf32>, vector<8x128xf32>, vector<8x128xf32>, vector<8x128xf32> -> vector<64x128xf32>
    %c21 = arith.constant 21 : index
    %c0_752 = arith.constant 0 : index
    %c0_753 = arith.constant 0 : index
    %665 = vector.load %arg4[%c21, %c0_752, %c0_753] : memref<25x128x128xf32, #tpu.memory_space<vmem>>, vector<1x128x128xf32>
    %666 = vector.shape_cast %665 : vector<1x128x128xf32> to vector<128x128xf32>
    %cst_754 = arith.constant dense<0.000000e+00> : vector<64x128xf32>
    %667 = tpu.matmul %664, %666, %cst_754 {dimension_numbers = #tpu.dot_dimension_numbers<[1], [0], [0], [1], [0, 0, 1, 1], [], []>} : vector<64x128xf32>, vector<128x128xf32>, vector<64x128xf32> -> vector<64x128xf32>
    %668 = arith.addf %647, %667 : vector<64x128xf32>
    %c4_755 = arith.constant 4 : index
    %c2_756 = arith.constant 2 : index
    %c0_757 = arith.constant 0 : index
    %669 = vector.load %arg12[%c4_755, %c2_756, %c0_757] : memref<12x12x128xf32, #tpu.memory_space<vmem>>, vector<1x8x128xf32>
    %670 = vector.shape_cast %669 : vector<1x8x128xf32> to vector<8x128xf32>
    %c5_758 = arith.constant 5 : index
    %c2_759 = arith.constant 2 : index
    %c0_760 = arith.constant 0 : index
    %671 = vector.load %arg12[%c5_758, %c2_759, %c0_760] : memref<12x12x128xf32, #tpu.memory_space<vmem>>, vector<1x8x128xf32>
    %672 = vector.shape_cast %671 : vector<1x8x128xf32> to vector<8x128xf32>
    %c6_761 = arith.constant 6 : index
    %c2_762 = arith.constant 2 : index
    %c0_763 = arith.constant 0 : index
    %673 = vector.load %arg12[%c6_761, %c2_762, %c0_763] : memref<12x12x128xf32, #tpu.memory_space<vmem>>, vector<1x8x128xf32>
    %674 = vector.shape_cast %673 : vector<1x8x128xf32> to vector<8x128xf32>
    %c7_764 = arith.constant 7 : index
    %c2_765 = arith.constant 2 : index
    %c0_766 = arith.constant 0 : index
    %675 = vector.load %arg12[%c7_764, %c2_765, %c0_766] : memref<12x12x128xf32, #tpu.memory_space<vmem>>, vector<1x8x128xf32>
    %676 = vector.shape_cast %675 : vector<1x8x128xf32> to vector<8x128xf32>
    %c8_767 = arith.constant 8 : index
    %c2_768 = arith.constant 2 : index
    %c0_769 = arith.constant 0 : index
    %677 = vector.load %arg12[%c8_767, %c2_768, %c0_769] : memref<12x12x128xf32, #tpu.memory_space<vmem>>, vector<1x8x128xf32>
    %678 = vector.shape_cast %677 : vector<1x8x128xf32> to vector<8x128xf32>
    %c9_770 = arith.constant 9 : index
    %c2_771 = arith.constant 2 : index
    %c0_772 = arith.constant 0 : index
    %679 = vector.load %arg12[%c9_770, %c2_771, %c0_772] : memref<12x12x128xf32, #tpu.memory_space<vmem>>, vector<1x8x128xf32>
    %680 = vector.shape_cast %679 : vector<1x8x128xf32> to vector<8x128xf32>
    %c10_773 = arith.constant 10 : index
    %c2_774 = arith.constant 2 : index
    %c0_775 = arith.constant 0 : index
    %681 = vector.load %arg12[%c10_773, %c2_774, %c0_775] : memref<12x12x128xf32, #tpu.memory_space<vmem>>, vector<1x8x128xf32>
    %682 = vector.shape_cast %681 : vector<1x8x128xf32> to vector<8x128xf32>
    %c11_776 = arith.constant 11 : index
    %c2_777 = arith.constant 2 : index
    %c0_778 = arith.constant 0 : index
    %683 = vector.load %arg12[%c11_776, %c2_777, %c0_778] : memref<12x12x128xf32, #tpu.memory_space<vmem>>, vector<1x8x128xf32>
    %684 = vector.shape_cast %683 : vector<1x8x128xf32> to vector<8x128xf32>
    %685 = tpu.concatenate %670, %672, %674, %676, %678, %680, %682, %684 in 0 : vector<8x128xf32>, vector<8x128xf32>, vector<8x128xf32>, vector<8x128xf32>, vector<8x128xf32>, vector<8x128xf32>, vector<8x128xf32>, vector<8x128xf32> -> vector<64x128xf32>
    %c22 = arith.constant 22 : index
    %c0_779 = arith.constant 0 : index
    %c0_780 = arith.constant 0 : index
    %686 = vector.load %arg4[%c22, %c0_779, %c0_780] : memref<25x128x128xf32, #tpu.memory_space<vmem>>, vector<1x128x128xf32>
    %687 = vector.shape_cast %686 : vector<1x128x128xf32> to vector<128x128xf32>
    %cst_781 = arith.constant dense<0.000000e+00> : vector<64x128xf32>
    %688 = tpu.matmul %685, %687, %cst_781 {dimension_numbers = #tpu.dot_dimension_numbers<[1], [0], [0], [1], [0, 0, 1, 1], [], []>} : vector<64x128xf32>, vector<128x128xf32>, vector<64x128xf32> -> vector<64x128xf32>
    %689 = arith.addf %668, %688 : vector<64x128xf32>
    %c4_782 = arith.constant 4 : index
    %c3_783 = arith.constant 3 : index
    %c0_784 = arith.constant 0 : index
    %690 = vector.load %arg12[%c4_782, %c3_783, %c0_784] : memref<12x12x128xf32, #tpu.memory_space<vmem>>, vector<1x8x128xf32>
    %691 = vector.shape_cast %690 : vector<1x8x128xf32> to vector<8x128xf32>
    %c5_785 = arith.constant 5 : index
    %c3_786 = arith.constant 3 : index
    %c0_787 = arith.constant 0 : index
    %692 = vector.load %arg12[%c5_785, %c3_786, %c0_787] : memref<12x12x128xf32, #tpu.memory_space<vmem>>, vector<1x8x128xf32>
    %693 = vector.shape_cast %692 : vector<1x8x128xf32> to vector<8x128xf32>
    %c6_788 = arith.constant 6 : index
    %c3_789 = arith.constant 3 : index
    %c0_790 = arith.constant 0 : index
    %694 = vector.load %arg12[%c6_788, %c3_789, %c0_790] : memref<12x12x128xf32, #tpu.memory_space<vmem>>, vector<1x8x128xf32>
    %695 = vector.shape_cast %694 : vector<1x8x128xf32> to vector<8x128xf32>
    %c7_791 = arith.constant 7 : index
    %c3_792 = arith.constant 3 : index
    %c0_793 = arith.constant 0 : index
    %696 = vector.load %arg12[%c7_791, %c3_792, %c0_793] : memref<12x12x128xf32, #tpu.memory_space<vmem>>, vector<1x8x128xf32>
    %697 = vector.shape_cast %696 : vector<1x8x128xf32> to vector<8x128xf32>
    %c8_794 = arith.constant 8 : index
    %c3_795 = arith.constant 3 : index
    %c0_796 = arith.constant 0 : index
    %698 = vector.load %arg12[%c8_794, %c3_795, %c0_796] : memref<12x12x128xf32, #tpu.memory_space<vmem>>, vector<1x8x128xf32>
    %699 = vector.shape_cast %698 : vector<1x8x128xf32> to vector<8x128xf32>
    %c9_797 = arith.constant 9 : index
    %c3_798 = arith.constant 3 : index
    %c0_799 = arith.constant 0 : index
    %700 = vector.load %arg12[%c9_797, %c3_798, %c0_799] : memref<12x12x128xf32, #tpu.memory_space<vmem>>, vector<1x8x128xf32>
    %701 = vector.shape_cast %700 : vector<1x8x128xf32> to vector<8x128xf32>
    %c10_800 = arith.constant 10 : index
    %c3_801 = arith.constant 3 : index
    %c0_802 = arith.constant 0 : index
    %702 = vector.load %arg12[%c10_800, %c3_801, %c0_802] : memref<12x12x128xf32, #tpu.memory_space<vmem>>, vector<1x8x128xf32>
    %703 = vector.shape_cast %702 : vector<1x8x128xf32> to vector<8x128xf32>
    %c11_803 = arith.constant 11 : index
    %c3_804 = arith.constant 3 : index
    %c0_805 = arith.constant 0 : index
    %704 = vector.load %arg12[%c11_803, %c3_804, %c0_805] : memref<12x12x128xf32, #tpu.memory_space<vmem>>, vector<1x8x128xf32>
    %705 = vector.shape_cast %704 : vector<1x8x128xf32> to vector<8x128xf32>
    %706 = tpu.concatenate %691, %693, %695, %697, %699, %701, %703, %705 in 0 : vector<8x128xf32>, vector<8x128xf32>, vector<8x128xf32>, vector<8x128xf32>, vector<8x128xf32>, vector<8x128xf32>, vector<8x128xf32>, vector<8x128xf32> -> vector<64x128xf32>
    %c23 = arith.constant 23 : index
    %c0_806 = arith.constant 0 : index
    %c0_807 = arith.constant 0 : index
    %707 = vector.load %arg4[%c23, %c0_806, %c0_807] : memref<25x128x128xf32, #tpu.memory_space<vmem>>, vector<1x128x128xf32>
    %708 = vector.shape_cast %707 : vector<1x128x128xf32> to vector<128x128xf32>
    %cst_808 = arith.constant dense<0.000000e+00> : vector<64x128xf32>
    %709 = tpu.matmul %706, %708, %cst_808 {dimension_numbers = #tpu.dot_dimension_numbers<[1], [0], [0], [1], [0, 0, 1, 1], [], []>} : vector<64x128xf32>, vector<128x128xf32>, vector<64x128xf32> -> vector<64x128xf32>
    %710 = arith.addf %689, %709 : vector<64x128xf32>
    %c4_809 = arith.constant 4 : index
    %c4_810 = arith.constant 4 : index
    %c0_811 = arith.constant 0 : index
    %711 = vector.load %arg12[%c4_809, %c4_810, %c0_811] : memref<12x12x128xf32, #tpu.memory_space<vmem>>, vector<1x8x128xf32>
    %712 = vector.shape_cast %711 : vector<1x8x128xf32> to vector<8x128xf32>
    %c5_812 = arith.constant 5 : index
    %c4_813 = arith.constant 4 : index
    %c0_814 = arith.constant 0 : index
    %713 = vector.load %arg12[%c5_812, %c4_813, %c0_814] : memref<12x12x128xf32, #tpu.memory_space<vmem>>, vector<1x8x128xf32>
    %714 = vector.shape_cast %713 : vector<1x8x128xf32> to vector<8x128xf32>
    %c6_815 = arith.constant 6 : index
    %c4_816 = arith.constant 4 : index
    %c0_817 = arith.constant 0 : index
    %715 = vector.load %arg12[%c6_815, %c4_816, %c0_817] : memref<12x12x128xf32, #tpu.memory_space<vmem>>, vector<1x8x128xf32>
    %716 = vector.shape_cast %715 : vector<1x8x128xf32> to vector<8x128xf32>
    %c7_818 = arith.constant 7 : index
    %c4_819 = arith.constant 4 : index
    %c0_820 = arith.constant 0 : index
    %717 = vector.load %arg12[%c7_818, %c4_819, %c0_820] : memref<12x12x128xf32, #tpu.memory_space<vmem>>, vector<1x8x128xf32>
    %718 = vector.shape_cast %717 : vector<1x8x128xf32> to vector<8x128xf32>
    %c8_821 = arith.constant 8 : index
    %c4_822 = arith.constant 4 : index
    %c0_823 = arith.constant 0 : index
    %719 = vector.load %arg12[%c8_821, %c4_822, %c0_823] : memref<12x12x128xf32, #tpu.memory_space<vmem>>, vector<1x8x128xf32>
    %720 = vector.shape_cast %719 : vector<1x8x128xf32> to vector<8x128xf32>
    %c9_824 = arith.constant 9 : index
    %c4_825 = arith.constant 4 : index
    %c0_826 = arith.constant 0 : index
    %721 = vector.load %arg12[%c9_824, %c4_825, %c0_826] : memref<12x12x128xf32, #tpu.memory_space<vmem>>, vector<1x8x128xf32>
    %722 = vector.shape_cast %721 : vector<1x8x128xf32> to vector<8x128xf32>
    %c10_827 = arith.constant 10 : index
    %c4_828 = arith.constant 4 : index
    %c0_829 = arith.constant 0 : index
    %723 = vector.load %arg12[%c10_827, %c4_828, %c0_829] : memref<12x12x128xf32, #tpu.memory_space<vmem>>, vector<1x8x128xf32>
    %724 = vector.shape_cast %723 : vector<1x8x128xf32> to vector<8x128xf32>
    %c11_830 = arith.constant 11 : index
    %c4_831 = arith.constant 4 : index
    %c0_832 = arith.constant 0 : index
    %725 = vector.load %arg12[%c11_830, %c4_831, %c0_832] : memref<12x12x128xf32, #tpu.memory_space<vmem>>, vector<1x8x128xf32>
    %726 = vector.shape_cast %725 : vector<1x8x128xf32> to vector<8x128xf32>
    %727 = tpu.concatenate %712, %714, %716, %718, %720, %722, %724, %726 in 0 : vector<8x128xf32>, vector<8x128xf32>, vector<8x128xf32>, vector<8x128xf32>, vector<8x128xf32>, vector<8x128xf32>, vector<8x128xf32>, vector<8x128xf32> -> vector<64x128xf32>
    %c24 = arith.constant 24 : index
    %c0_833 = arith.constant 0 : index
    %c0_834 = arith.constant 0 : index
    %728 = vector.load %arg4[%c24, %c0_833, %c0_834] : memref<25x128x128xf32, #tpu.memory_space<vmem>>, vector<1x128x128xf32>
    %729 = vector.shape_cast %728 : vector<1x128x128xf32> to vector<128x128xf32>
    %cst_835 = arith.constant dense<0.000000e+00> : vector<64x128xf32>
    %730 = tpu.matmul %727, %729, %cst_835 {dimension_numbers = #tpu.dot_dimension_numbers<[1], [0], [0], [1], [0, 0, 1, 1], [], []>} : vector<64x128xf32>, vector<128x128xf32>, vector<64x128xf32> -> vector<64x128xf32>
    %731 = arith.addf %710, %730 : vector<64x128xf32>
    %c0_836 = arith.constant 0 : index
    %c0_837 = arith.constant 0 : index
    %732 = vector.load %arg5[%c0_836, %c0_837] : memref<1x128xf32, #tpu.memory_space<vmem>>, vector<1x128xf32>
    %733 = vector.broadcast %732 : vector<1x128xf32> to vector<64x128xf32>
    %734 = arith.addf %731, %733 : vector<64x128xf32>
    %735 = vector.extract_strided_slice %734 {offsets = [0, 0], sizes = [8, 128], strides = [1, 1]} : vector<64x128xf32> to vector<8x128xf32>
    %736 = vector.extract_strided_slice %734 {offsets = [8, 0], sizes = [8, 128], strides = [1, 1]} : vector<64x128xf32> to vector<8x128xf32>
    %737 = arith.maximumf %735, %736 : vector<8x128xf32>
    %c0_838 = arith.constant 0 : index
    %c0_839 = arith.constant 0 : index
    %738 = vector.load %arg13[%c0_838, %c0_839] : memref<32x128xf32, #tpu.memory_space<vmem>>, vector<8x128xf32>
    tpu.vector_store %arg13[%c0_838, %c0_839], %737 {strides = array<i32>} : memref<32x128xf32, #tpu.memory_space<vmem>>, vector<8x128xf32>,
    %739 = vector.extract_strided_slice %734 {offsets = [16, 0], sizes = [8, 128], strides = [1, 1]} : vector<64x128xf32> to vector<8x128xf32>
    %740 = vector.extract_strided_slice %734 {offsets = [24, 0], sizes = [8, 128], strides = [1, 1]} : vector<64x128xf32> to vector<8x128xf32>
    %741 = arith.maximumf %739, %740 : vector<8x128xf32>
    %c8_840 = arith.constant 8 : index
    %c0_841 = arith.constant 0 : index
    %742 = vector.load %arg13[%c8_840, %c0_841] : memref<32x128xf32, #tpu.memory_space<vmem>>, vector<8x128xf32>
    tpu.vector_store %arg13[%c8_840, %c0_841], %741 {strides = array<i32>} : memref<32x128xf32, #tpu.memory_space<vmem>>, vector<8x128xf32>,
    %743 = vector.extract_strided_slice %734 {offsets = [32, 0], sizes = [8, 128], strides = [1, 1]} : vector<64x128xf32> to vector<8x128xf32>
    %744 = vector.extract_strided_slice %734 {offsets = [40, 0], sizes = [8, 128], strides = [1, 1]} : vector<64x128xf32> to vector<8x128xf32>
    %745 = arith.maximumf %743, %744 : vector<8x128xf32>
    %c16_842 = arith.constant 16 : index
    %c0_843 = arith.constant 0 : index
    %746 = vector.load %arg13[%c16_842, %c0_843] : memref<32x128xf32, #tpu.memory_space<vmem>>, vector<8x128xf32>
    tpu.vector_store %arg13[%c16_842, %c0_843], %745 {strides = array<i32>} : memref<32x128xf32, #tpu.memory_space<vmem>>, vector<8x128xf32>,
    %747 = vector.extract_strided_slice %734 {offsets = [48, 0], sizes = [8, 128], strides = [1, 1]} : vector<64x128xf32> to vector<8x128xf32>
    %748 = vector.extract_strided_slice %734 {offsets = [56, 0], sizes = [8, 128], strides = [1, 1]} : vector<64x128xf32> to vector<8x128xf32>
    %749 = arith.maximumf %747, %748 : vector<8x128xf32>
    %c24_844 = arith.constant 24 : index
    %c0_845 = arith.constant 0 : index
    %750 = vector.load %arg13[%c24_844, %c0_845] : memref<32x128xf32, #tpu.memory_space<vmem>>, vector<8x128xf32>
    tpu.vector_store %arg13[%c24_844, %c0_845], %749 {strides = array<i32>} : memref<32x128xf32, #tpu.memory_space<vmem>>, vector<8x128xf32>,
    %c0_846 = arith.constant 0 : index
    %c0_847 = arith.constant 0 : index
    %751 = tpu.strided_load %arg13[%c0_846, %c0_847] {strides = array<i32: 2, 1>} : memref<32x128xf32, #tpu.memory_space<vmem>>, vector<16x128xf32>
    %c1_848 = arith.constant 1 : index
    %c0_849 = arith.constant 0 : index
    %752 = tpu.strided_load %arg13[%c1_848, %c0_849] {strides = array<i32: 2, 1>} : memref<32x128xf32, #tpu.memory_space<vmem>>, vector<16x128xf32>
    %753 = arith.maximumf %751, %752 : vector<16x128xf32>
    %cst_850 = arith.constant 0.000000e+00 : f32
    %754 = vector.broadcast %cst_850 : f32 to vector<16x128xf32>
    %755 = arith.maximumf %753, %754 : vector<16x128xf32>
    %c0_851 = arith.constant 0 : index
    %c0_852 = arith.constant 0 : index
    %756 = vector.load %arg14[%c0_851, %c0_852] : memref<16x128xf32, #tpu.memory_space<vmem>>, vector<16x128xf32>
    tpu.vector_store %arg14[%c0_851, %c0_852], %755 {strides = array<i32>} : memref<16x128xf32, #tpu.memory_space<vmem>>, vector<16x128xf32>,
    %c0_853 = arith.constant 0 : index
    %c0_854 = arith.constant 0 : index
    %757 = vector.load %arg14[%c0_853, %c0_854] : memref<16x128xf32, #tpu.memory_space<vmem>>, vector<1x128xf32>
    %c1_855 = arith.constant 1 : index
    %c0_856 = arith.constant 0 : index
    %758 = vector.load %arg14[%c1_855, %c0_856] : memref<16x128xf32, #tpu.memory_space<vmem>>, vector<1x128xf32>
    %c2_857 = arith.constant 2 : index
    %c0_858 = arith.constant 0 : index
    %759 = vector.load %arg14[%c2_857, %c0_858] : memref<16x128xf32, #tpu.memory_space<vmem>>, vector<1x128xf32>
    %c3_859 = arith.constant 3 : index
    %c0_860 = arith.constant 0 : index
    %760 = vector.load %arg14[%c3_859, %c0_860] : memref<16x128xf32, #tpu.memory_space<vmem>>, vector<1x128xf32>
    %c4_861 = arith.constant 4 : index
    %c0_862 = arith.constant 0 : index
    %761 = vector.load %arg14[%c4_861, %c0_862] : memref<16x128xf32, #tpu.memory_space<vmem>>, vector<1x128xf32>
    %c5_863 = arith.constant 5 : index
    %c0_864 = arith.constant 0 : index
    %762 = vector.load %arg14[%c5_863, %c0_864] : memref<16x128xf32, #tpu.memory_space<vmem>>, vector<1x128xf32>
    %c6_865 = arith.constant 6 : index
    %c0_866 = arith.constant 0 : index
    %763 = vector.load %arg14[%c6_865, %c0_866] : memref<16x128xf32, #tpu.memory_space<vmem>>, vector<1x128xf32>
    %c7_867 = arith.constant 7 : index
    %c0_868 = arith.constant 0 : index
    %764 = vector.load %arg14[%c7_867, %c0_868] : memref<16x128xf32, #tpu.memory_space<vmem>>, vector<1x128xf32>
    %c8_869 = arith.constant 8 : index
    %c0_870 = arith.constant 0 : index
    %765 = vector.load %arg14[%c8_869, %c0_870] : memref<16x128xf32, #tpu.memory_space<vmem>>, vector<1x128xf32>
    %c9_871 = arith.constant 9 : index
    %c0_872 = arith.constant 0 : index
    %766 = vector.load %arg14[%c9_871, %c0_872] : memref<16x128xf32, #tpu.memory_space<vmem>>, vector<1x128xf32>
    %c10_873 = arith.constant 10 : index
    %c0_874 = arith.constant 0 : index
    %767 = vector.load %arg14[%c10_873, %c0_874] : memref<16x128xf32, #tpu.memory_space<vmem>>, vector<1x128xf32>
    %c11_875 = arith.constant 11 : index
    %c0_876 = arith.constant 0 : index
    %768 = vector.load %arg14[%c11_875, %c0_876] : memref<16x128xf32, #tpu.memory_space<vmem>>, vector<1x128xf32>
    %c12_877 = arith.constant 12 : index
    %c0_878 = arith.constant 0 : index
    %769 = vector.load %arg14[%c12_877, %c0_878] : memref<16x128xf32, #tpu.memory_space<vmem>>, vector<1x128xf32>
    %c13_879 = arith.constant 13 : index
    %c0_880 = arith.constant 0 : index
    %770 = vector.load %arg14[%c13_879, %c0_880] : memref<16x128xf32, #tpu.memory_space<vmem>>, vector<1x128xf32>
    %c14_881 = arith.constant 14 : index
    %c0_882 = arith.constant 0 : index
    %771 = vector.load %arg14[%c14_881, %c0_882] : memref<16x128xf32, #tpu.memory_space<vmem>>, vector<1x128xf32>
    %c15_883 = arith.constant 15 : index
    %c0_884 = arith.constant 0 : index
    %772 = vector.load %arg14[%c15_883, %c0_884] : memref<16x128xf32, #tpu.memory_space<vmem>>, vector<1x128xf32>
    %773 = tpu.concatenate %757, %758, %759, %760, %761, %762, %763, %764, %765, %766, %767, %768, %769, %770, %771, %772 in 1 : vector<1x128xf32>, vector<1x128xf32>, vector<1x128xf32>, vector<1x128xf32>, vector<1x128xf32>, vector<1x128xf32>, vector<1x128xf32>, vector<1x128xf32>, vector<1x128xf32>, vector<1x128xf32>, vector<1x128xf32>, vector<1x128xf32>, vector<1x128xf32>, vector<1x128xf32>, vector<1x128xf32>, vector<1x128xf32> -> vector<1x2048xf32>
    %c0_885 = arith.constant 0 : index
    %c0_886 = arith.constant 0 : index
    %774 = vector.load %arg6[%c0_885, %c0_886] : memref<2048x256xf32, #tpu.memory_space<vmem>>, vector<2048x256xf32>
    %cst_887 = arith.constant dense<0.000000e+00> : vector<1x256xf32>
    %775 = tpu.matmul %773, %774, %cst_887 {dimension_numbers = #tpu.dot_dimension_numbers<[1], [0], [0], [1], [0, 0, 1, 1], [], []>} : vector<1x2048xf32>, vector<2048x256xf32>, vector<1x256xf32> -> vector<1x256xf32>
    %c0_888 = arith.constant 0 : index
    %c0_889 = arith.constant 0 : index
    %776 = vector.load %arg7[%c0_888, %c0_889] : memref<1x256xf32, #tpu.memory_space<vmem>>, vector<1x256xf32>
    %777 = arith.addf %775, %776 : vector<1x256xf32>
    %cst_890 = arith.constant 0.000000e+00 : f32
    %778 = vector.broadcast %cst_890 : f32 to vector<1x256xf32>
    %779 = arith.maximumf %777, %778 : vector<1x256xf32>
    %c0_891 = arith.constant 0 : index
    %c0_892 = arith.constant 0 : index
    %780 = vector.load %arg8[%c0_891, %c0_892] : memref<256x128xf32, #tpu.memory_space<vmem>>, vector<256x128xf32>
    %cst_893 = arith.constant dense<0.000000e+00> : vector<1x128xf32>
    %781 = tpu.matmul %779, %780, %cst_893 {dimension_numbers = #tpu.dot_dimension_numbers<[1], [0], [0], [1], [0, 0, 1, 1], [], []>} : vector<1x256xf32>, vector<256x128xf32>, vector<1x128xf32> -> vector<1x128xf32>
    %c0_894 = arith.constant 0 : index
    %c0_895 = arith.constant 0 : index
    %782 = vector.load %arg9[%c0_894, %c0_895] : memref<1x128xf32, #tpu.memory_space<vmem>>, vector<1x128xf32>
    %783 = arith.addf %781, %782 : vector<1x128xf32>
    %cst_896 = arith.constant dense<0xFF800000> : vector<1xf32>
    %784 = vector.multi_reduction <maximumf>, %783, %cst_896 [1] : vector<1x128xf32> to vector<1xf32>
    %785 = vector.shape_cast %784 : vector<1xf32> to vector<1x1xf32>
    %786 = vector.broadcast %785 : vector<1x1xf32> to vector<1x128xf32>
    %787 = arith.subf %783, %786 : vector<1x128xf32>
    %788 = math.exp %787 : vector<1x128xf32>
    %cst_897 = arith.constant dense<0.000000e+00> : vector<1xf32>
    %789 = vector.multi_reduction <add>, %788, %cst_897 [1] : vector<1x128xf32> to vector<1xf32>
    %790 = vector.shape_cast %789 : vector<1xf32> to vector<1x1xf32>
    %791 = math.log %790 : vector<1x1xf32>
    %792 = vector.broadcast %791 : vector<1x1xf32> to vector<1x128xf32>
    %793 = arith.subf %787, %792 : vector<1x128xf32>
    %c0_898 = arith.constant 0 : index
    %c0_899 = arith.constant 0 : index
    %c0_900 = arith.constant 0 : index
    %794 = vector.load %arg10[%c0_898, %c0_899, %c0_900] : memref<1x1x128xf32, #tpu.memory_space<vmem>>, vector<1x1x128xf32>
    %795 = vector.shape_cast %794 : vector<1x1x128xf32> to vector<1x128xf32>
    %796 = vector.shape_cast %793 : vector<1x128xf32> to vector<1x1x128xf32>
    tpu.vector_store %arg10[%c0_898, %c0_899, %c0_900], %796 {strides = array<i32>} : memref<1x1x128xf32, #tpu.memory_space<vmem>>, vector<1x1x128xf32>,
    return
  }
  func.func @transform_0(%arg0: i32) -> (i32, i32, i32) {
    %c0_i32 = arith.constant 0 : i32
    %c0_i32_0 = arith.constant 0 : i32
    %c0_i32_1 = arith.constant 0 : i32
    return %arg0, %c0_i32, %c0_i32_0 : i32, i32, i32
  }
  func.func @transform_1(%arg0: i32) -> (i32, i32) {
    %c0_i32 = arith.constant 0 : i32
    %c0_i32_0 = arith.constant 0 : i32
    %c0_i32_1 = arith.constant 0 : i32
    return %c0_i32, %c0_i32_0 : i32, i32
  }
  func.func @transform_2(%arg0: i32) -> (i32, i32) {
    %c0_i32 = arith.constant 0 : i32
    %c0_i32_0 = arith.constant 0 : i32
    %c0_i32_1 = arith.constant 0 : i32
    return %c0_i32, %c0_i32_0 : i32, i32
  }
  func.func @transform_3(%arg0: i32) -> (i32, i32, i32) {
    %c0_i32 = arith.constant 0 : i32
    %c0_i32_0 = arith.constant 0 : i32
    %c0_i32_1 = arith.constant 0 : i32
    %c0_i32_2 = arith.constant 0 : i32
    return %c0_i32, %c0_i32_0, %c0_i32_1 : i32, i32, i32
  }
  func.func @transform_4(%arg0: i32) -> (i32, i32) {
    %c0_i32 = arith.constant 0 : i32
    %c0_i32_0 = arith.constant 0 : i32
    %c0_i32_1 = arith.constant 0 : i32
    return %c0_i32, %c0_i32_0 : i32, i32
  }
  func.func @transform_5(%arg0: i32) -> (i32, i32) {
    %c0_i32 = arith.constant 0 : i32
    %c0_i32_0 = arith.constant 0 : i32
    %c0_i32_1 = arith.constant 0 : i32
    return %c0_i32, %c0_i32_0 : i32, i32
  }
  func.func @transform_6(%arg0: i32) -> (i32, i32) {
    %c0_i32 = arith.constant 0 : i32
    %c0_i32_0 = arith.constant 0 : i32
    %c0_i32_1 = arith.constant 0 : i32
    return %c0_i32, %c0_i32_0 : i32, i32
  }
  func.func @transform_7(%arg0: i32) -> (i32, i32) {
    %c0_i32 = arith.constant 0 : i32
    %c0_i32_0 = arith.constant 0 : i32
    %c0_i32_1 = arith.constant 0 : i32
    return %c0_i32, %c0_i32_0 : i32, i32
  }
  func.func @transform_8(%arg0: i32) -> (i32, i32) {
    %c0_i32 = arith.constant 0 : i32
    %c0_i32_0 = arith.constant 0 : i32
    %c0_i32_1 = arith.constant 0 : i32
    return %c0_i32, %c0_i32_0 : i32, i32
  }
  func.func @transform_9(%arg0: i32) -> (i32, i32, i32) {
    %c0_i32 = arith.constant 0 : i32
    %c0_i32_0 = arith.constant 0 : i32
    %c0_i32_1 = arith.constant 0 : i32
    return %arg0, %c0_i32, %c0_i32_0 : i32, i32, i32
  }
}

</mosaic_0001>

<bundles_post_ra>
// kernel: netconv_forward.1
= control target key start
LH: loop header
LB: loop body
LE: loop exit
PB: predicated region body
PF: predicated region fallthrough
CT: control target
= control target key end

     0   :  { %14 = vsyncpa [#allocation7], 0  ;;  %s14750_s0 = inlined_call_operand.vmem [shape: f32[2,576,32], index: 0, kind: input, shape index: {}]   ;;  %s14751_s1 = inlined_call_operand.vmem [shape: f32[32,128], index: 1, kind: input, shape index: {}]   ;;  %s14752_s2 = inlined_call_operand.vmem [shape: f32[1,128], index: 2, kind: input, shape index: {}]   ;;  %s14753_s3 = inlined_call_operand.vmem [shape: f32[25,128,128], index: 3, kind: input, shape index: {}]   ;;  %s14754_s4 = inlined_call_operand.vmem [shape: f32[1,128], index: 4, kind: input, shape index: {}]   ;;  %s14755_s5 = inlined_call_operand.vmem [shape: f32[2048,256], index: 5, kind: input, shape index: {}]   ;;  %s14756_s6 = inlined_call_operand.vmem [shape: f32[1,256], index: 6, kind: input, shape index: {}]   ;;  %s14757_s7 = inlined_call_operand.vmem [shape: f32[256,128], index: 7, kind: input, shape index: {}]   ;;  %s14758_s8 = inlined_call_operand.vmem [shape: f32[1,128], index: 8, kind: input, shape index: {}]   ;;  %s14759_s9 = inlined_call_operand.hbm [shape: f32[2,1,128], index: 9, kind: output, shape index: {}]  }
   0x1   :  { %16 = vsyncpa [#allocation7 + $0x1], 0  ;;  %s10983_s30 = smov 0   ;;  %s10985_s10 = smov 0  }
   0x2   :  { %s10987_s11 = smov 0   ;;  %s10989_s12 = smov 0  }
   0x3 LB: > { %s11004_s13 = sadd.s32 4294967295, %s10930_s12   ;;  %s6600_s14 = sadd.s32 4294967294, %s10930_s12   ;;  %s10930_s12 = sphi %s10989_s12, %s14765_s12   ;;  %s10926_s11 = sphi %s10987_s11, %s14764_s11   ;;  %s10922_s10 = sphi %s10985_s10, %s14763_s10   ;;  %s10918_s30 = sphi %s10983_s30, %s14762_s30  }
   0x4   : > { %s11008_s15 = sadd.s32 1, %s10930_s12   ;;  %s223_s16 = sadd.s32 1, %s10926_s11 }
   0x5   : > { %s220_s17 = ssub.s32 %s10930_s12, %s11008_s15  ;;  %p233_p0 = scmp.ne.s32.totalorder %s10926_s11, %s10922_s10 }
   0x6   : > { %p221_p1 = scmp.eq.s32.totalorder %s220_s17, 0  ;;  %p234_p2 = scmp.eq.s32.totalorder %s11004_s13, 1 }
   0x7   : > { %p239_p3 = scmp.ne.s32.totalorder %s10922_s10, %s10918_s30  ;;  %p240_p4 = scmp.eq.s32.totalorder %s6600_s14, 1 }
   0x8   : > { %s11019_s18 = scalar_select %p221_p1, %s10926_s11, %s223_s16  }
   0x9   : > { %p11021_p5 = por %p234_p2, %p233_p0  ;;  %p11025_p6 = por %p240_p4, %p239_p3 }
   0xa   : > { %p6603_p7 = scmp.ge.s32.totalorder %s10930_s12, 1  ;;  %p290_p8 = scmp.lt.s32.totalorder %s10930_s12, 3 }
   0xc   : > { %p291_p9 = pnand %p6603_p7, %p290_p8 }
   0xd   : > { %v330_v0 = vld [vmem:[%s14751_s1] sm:$0xff] (!%p291_p9)  ;;  %v331_v1 = vld [vmem:[%s14751_s1 + $0x8] sm:$0xff] (!%p291_p9)  ;;  %v332_v2 = vld [vmem:[%s14751_s1 + $0x10] sm:$0xff] (!%p291_p9)  ;;  %p325_p10 = scmp.lt.s32.totalorder (!%p291_p9), %s11004_s13, 1  ;;  %vm347_vm0 = vcmask (!%p291_p9), 261120   ;;  %vm6518_vm1 = vcmask (!%p291_p9), 1040384  }
   0xe   : > { %294 = sbr.rel (%p291_p9) target bundleno = 2403 (0x963), region = 56  ;;  %v11041_v3 = vpack.c.bf16 (!%p291_p9), %v331_v1, %v330_v0  ;;  %v333_v4 = vld [vmem:[%s14751_s1 + $0x18] sm:$0xff] (!%p291_p9)  ;;  %s323_s27 = sand.u32 (!%p291_p9), 1, %s10922_s10  }
   0xf   : > { %v11046_v5 = vpack.c.bf16 (!%p291_p9), %v333_v4, %v332_v2  ;;  %v6678_v2 = vld [vmem:[%s14753_s3 + $0x80] sm:$0xff] (!%p291_p9)  ;;  %s7063_s28 = sshll.u32 (!%p291_p9), %s11004_s13, 4  ;;  %s6533_s23 = scalar_lea.sflag (!%p291_p9), [#allocation7], %s323_s27 }
  0x10   : > { %9126 = vmatprep.subr.bf16.mxu0 (!%p291_p9), %v11041_v3  ;;  %10565 = vmatprep.subr.bf16.mxu1 (!%p291_p9), %v11041_v3  ;;  %v6726_v4 = vld [vmem:[%s14753_s3 + $0x200] sm:$0xff] (!%p291_p9)  ;;  %s14708_s22 = scalar_lea.hbm (!%p291_p9), %s14759_s9, %s7063_s28 }
  0x11   : > { %9128 = vmatpush3.bf16.msra.mxu0 (!%p291_p9), %v11041_v3  ;;  %10567 = vmatpush3.bf16.msra.mxu1 (!%p291_p9), %v11041_v3 }
  0x12   : > { %9130 = vmatprep.subr.bf16.mxu0 (!%p291_p9), %v11046_v5  ;;  %10566 = vmatprep.subr.bf16.mxu1 (!%p291_p9), %v11046_v5 }
  0x15   : > { %s326_s29 = scalar_select %p325_p10, %s11004_s13, 1  ;;  %9132 = vmatpush3.bf16.msra.mxu0 %v11046_v5  ;;  %10568 = vmatpush3.bf16.msra.mxu1 %v11046_v5 }
  0x16   : > { %9134 = vmatprep.subr.bf16.mxu1 %v11041_v3  ;;  %9142 = vmatprep.subr.bf16.mxu0 %v11041_v3  ;;  %s10932_s13 = smov [#allocation6]  }
  0x17   : > { %s10777_s14 = smul.u32 576, %s326_s29  ;;  %s324_s29 = scalar_lea.vmem [#allocation6], %s323_s27 }
  0x18   : > { %s10872_s25 = sshll.u32 %s10932_s13, 4  ;;  %s10873_s25 = int_to_ptr.vmem [resolvable:$false] %s10872_s25 }
  0x19   : > { %s11058_s21 = scalar_lea.vmem %s14750_s0, %s10777_s14  ;;  %s6545_s14 = sshll.u32 %s324_s29, 4  ;;  %s14710_s14 = int_to_ptr.vmem [resolvable:$true] %s6545_s14 }
  0x1a   : > { %v335_v6 = vld [vmem:[%s11058_s21] sm:$0xff]  ;;  %v336_v8 = vld [vmem:[%s11058_s21 + $0x8] sm:$0xff]  ;;  %v337_v10 = vld [vmem:[%s11058_s21 + $0x10] sm:$0xff]  ;;  %s10868_s24 = scalar_lea.vmem %s14710_s14, 16  ;;  %p10875_p0 = scmp.lt.s32.totalorder %s14710_s14, %s10873_s25 }
  0x1b   : > { %v339_v7 = vld [vmem:[%s11058_s21 + $0x20] sm:$0xff]  ;;  %v340_v9 = vld [vmem:[%s11058_s21 + $0x28] sm:$0xff]  ;;  %7829 = vmatprep.mubr.msk.f32.mxu0 %vm347_vm0, %v335_v6  ;;  %v480_v11 = vld [vmem:[%s11058_s21 + $0x30] sm:$0xff]  ;;  %p10869_p11 = scmp.ne.s32.totalorder %s14710_s14, %s10868_s24 }
  0x1c   : > { %7835 = vmatprep.mubr.msk.f32.mxu1 %vm347_vm0, %v339_v7  ;;  %7830 = vmatmul.mubr.msk.f32.vlgmr.msra.gmra.mrb[0].mxu0 %vm347_vm0, %v336_v8  ;;  %v338_v12 = vld [vmem:[%s11058_s21 + $0x18] sm:$0xff]  ;;  %v616_v13 = vld [vmem:[%s11058_s21 + $0x60] sm:$0xff]  ;;  %v617_v15 = vld [vmem:[%s11058_s21 + $0x68] sm:$0xff] }
  0x1d   : > { %7836 = vmatmul.mubr.msk.f32.vlgmr.msra.gmra.mrb[0].mxu1 %vm347_vm0, %v340_v9  ;;  %9144 = vmatpush3.bf16.msra.mxu0 %v11041_v3  ;;  %v481_v14 = vld [vmem:[%s11058_s21 + $0x38] sm:$0xff]  ;;  %v482_v16 = vld [vmem:[%s11058_s21 + $0x40] sm:$0xff]  ;;  %v618_v17 = vld [vmem:[%s11058_s21 + $0x70] sm:$0xff]  ;;  %p10870_p12 = pnand %p10869_p11, %p11021_p5 }
  0x1e   : > { %9136 = vmatpush3.bf16.msra.mxu1 %v11041_v3  ;;  %7832 = vmatprep.mubr.msk.f32.mxu0 %vm347_vm0, %v337_v10  ;;  %v483_v18 = vld [vmem:[%s11058_s21 + $0x48] sm:$0xff]  ;;  %v619_v19 = vld [vmem:[%s11058_s21 + $0x78] sm:$0xff]  ;;  %v484_v20 = vld [vmem:[%s11058_s21 + $0x50] sm:$0xff] }
  0x1f   : > { %9138 = vmatprep.subr.bf16.mxu1 %v11046_v5  ;;  %9146 = vmatprep.subr.bf16.mxu0 %v11046_v5  ;;  %v620_v21 = vld [vmem:[%s11058_s21 + $0x80] sm:$0xff]  ;;  %v485_v22 = vld [vmem:[%s11058_s21 + $0x58] sm:$0xff]  ;;  %v621_v23 = vld [vmem:[%s11058_s21 + $0x88] sm:$0xff]  ;;  %p10871_p13 = pneg %p10870_p12 }
  0x20   : > { %7846 = vmatprep.mubr.msk.f32.mxu1 %vm347_vm0, %v480_v11  ;;  %7833 = vmatmul.mubr.msk.f32.gmra.mrb[2].mxu0 %vm347_vm0, %v338_v12  ;;  %v752_v24 = vld [vmem:[%s11058_s21 + $0x90] sm:$0xff]  ;;  %v888_v25 = vld [vmem:[%s11058_s21 + $0xc0] sm:$0xff]  ;;  %v753_v26 = vld [vmem:[%s11058_s21 + $0x98] sm:$0xff] }
  0x21   : > { %9148 = vmatpush3.bf16.msra.mxu0 %v11046_v5  ;;  %7863 = vmatprep.mubr.msk.f32.mxu0 %vm347_vm0, %v616_v13  ;;  %v889_v27 = vld [vmem:[%s11058_s21 + $0xc8] sm:$0xff]  ;;  %v754_v28 = vld [vmem:[%s11058_s21 + $0xa0] sm:$0xff]  ;;  %v890_v29 = vld [vmem:[%s11058_s21 + $0xd0] sm:$0xff] }
  0x22   : > { %9140 = vmatpush3.bf16.msra.mxu1 %v11046_v5  ;;  %9158 = vmatprep.subr.bf16.mxu0 %v11041_v3  ;;  %v755_v30 = vld [vmem:[%s11058_s21 + $0xa8] sm:$0xff]  ;;  %v891_v31 = vld [vmem:[%s11058_s21 + $0xd8] sm:$0xff]  ;;  %v756_v32 = vld [vmem:[%s11058_s21 + $0xb0] sm:$0xff] }
  0x23   : > { %9150 = vmatprep.subr.bf16.mxu1 %v11041_v3  ;;  %v892_v33 = vld [vmem:[%s11058_s21 + $0xe0] sm:$0xff]  ;;  %v757_v34 = vld [vmem:[%s11058_s21 + $0xb8] sm:$0xff]  ;;  %v893_v35 = vld [vmem:[%s11058_s21 + $0xe8] sm:$0xff] }
  0x24   : > { %7864 = vmatmul.mubr.msk.f32.vlgmr.msra.gmra.mrb[4].mxu0 %vm347_vm0, %v617_v15  ;;  %v1024_v36 = vld [vmem:[%s11058_s21 + $0xf0] sm:$0xff]  ;;  %v1160_v37 = vld [vmem:[%s11058_s21 + $0x120] sm:$0xff]  ;;  %v1025_v38 = vld [vmem:[%s11058_s21 + $0xf8] sm:$0xff] }
  0x25   : > { %7847 = vmatmul.mubr.msk.f32.vlgmr.msra.gmra.mrb[2].mxu1 %vm347_vm0, %v481_v14  ;;  %7866 = vmatprep.mubr.msk.f32.mxu0 %vm347_vm0, %v618_v17  ;;  %v1161_v39 = vld [vmem:[%s11058_s21 + $0x128] sm:$0xff]  ;;  %v1026_v40 = vld [vmem:[%s11058_s21 + $0x100] sm:$0xff]  ;;  %v1162_v41 = vld [vmem:[%s11058_s21 + $0x130] sm:$0xff] }
  0x26   : > { %7849 = vmatprep.mubr.msk.f32.mxu1 %vm347_vm0, %v482_v16  ;;  %9152 = vmatpush3.bf16.msra.mxu1 %v11041_v3  ;;  %v1027_v42 = vld [vmem:[%s11058_s21 + $0x108] sm:$0xff]  ;;  %v1163_v43 = vld [vmem:[%s11058_s21 + $0x138] sm:$0xff]  ;;  %v1028_v44 = vld [vmem:[%s11058_s21 + $0x110] sm:$0xff] }
  0x27   : > { %9160 = vmatpush3.bf16.msra.mxu0 %v11041_v3  ;;  %9154 = vmatprep.subr.bf16.mxu1 %v11046_v5  ;;  %v1164_v45 = vld [vmem:[%s11058_s21 + $0x140] sm:$0xff]  ;;  %v1029_v46 = vld [vmem:[%s11058_s21 + $0x118] sm:$0xff]  ;;  %v1165_v47 = vld [vmem:[%s11058_s21 + $0x148] sm:$0xff] }
  0x28   : > { %9162 = vmatprep.subr.bf16.mxu0 %v11046_v5  ;;  %7867 = vmatmul.mubr.msk.f32.gmra.mrb[6].mxu0 %vm347_vm0, %v619_v19  ;;  %v1296_v48 = vld [vmem:[%s11058_s21 + $0x150] sm:$0xff]  ;;  %v1432_v49 = vld [vmem:[%s11058_s21 + $0x180] sm:$0xff]  ;;  %v1297_v50 = vld [vmem:[%s11058_s21 + $0x158] sm:$0xff] }
  0x29   : > { %7850 = vmatmul.mubr.msk.f32.gmra.mrb[4].mxu1 %vm347_vm0, %v483_v18  ;;  %7869 = vmatprep.mubr.msk.f32.mxu0 %vm347_vm0, %v620_v21  ;;  %v1433_v51 = vld [vmem:[%s11058_s21 + $0x188] sm:$0xff]  ;;  %v1298_v52 = vld [vmem:[%s11058_s21 + $0x160] sm:$0xff]  ;;  %v1434_v53 = vld [vmem:[%s11058_s21 + $0x190] sm:$0xff] }
  0x2a   : > { %7852 = vmatprep.mubr.msk.f32.mxu1 %vm347_vm0, %v484_v20  ;;  %9156 = vmatpush3.bf16.msra.mxu1 %v11046_v5  ;;  %v1299_v54 = vld [vmem:[%s11058_s21 + $0x168] sm:$0xff]  ;;  %v1435_v55 = vld [vmem:[%s11058_s21 + $0x198] sm:$0xff]  ;;  %v1300_v56 = vld [vmem:[%s11058_s21 + $0x170] sm:$0xff] }
  0x2b   : > { %9164 = vmatpush3.bf16.msra.mxu0 %v11046_v5  ;;  %9166 = vmatprep.subr.bf16.mxu1 %v11041_v3  ;;  %v1436_v57 = vld [vmem:[%s11058_s21 + $0x1a0] sm:$0xff]  ;;  %v1301_v58 = vld [vmem:[%s11058_s21 + $0x178] sm:$0xff]  ;;  %v1437_v59 = vld [vmem:[%s11058_s21 + $0x1a8] sm:$0xff] }
  0x2c   : > { %9174 = vmatprep.subr.bf16.mxu0 %v11041_v3  ;;  %7870 = vmatmul.mubr.msk.f32.gmra.mrb[8].mxu0 %vm347_vm0, %v621_v23  ;;  %v1568_v60 = vld [vmem:[%s11058_s21 + $0x1b0] sm:$0xff]  ;;  %v1569_v61 = vld [vmem:[%s11058_s21 + $0x1b8] sm:$0xff]  ;;  %v1570_v62 = vld [vmem:[%s11058_s21 + $0x1c0] sm:$0xff] }
  0x2d   : > { %7853 = vmatmul.mubr.msk.f32.gmra.mrb[6].mxu1 %vm347_vm0, %v485_v22  ;;  %7897 = vmatprep.mubr.msk.f32.mxu0 %vm347_vm0, %v888_v25  ;;  %v1571_v63 = vld [vmem:[%s11058_s21 + $0x1c8] sm:$0xff]  ;;  %v1572_v0 = vld [vmem:[%s11058_s21 + $0x1d0] sm:$0xff]  ;;  %v1573_v1 = vld [vmem:[%s11058_s21 + $0x1d8] sm:$0xff] }
  0x2e   : > { %7880 = vmatprep.mubr.msk.f32.mxu1 %vm347_vm0, %v752_v24  ;;  %v6727_v6 = vld [vmem:[%s14753_s3 + $0x208] sm:$0xff]  ;;  %v1704_v7 = vld [vmem:[%s11058_s21 + $0x1e0] sm:$0xff]  ;;  %v1840_v8 = vld [vmem:[%s11058_s21 + $0x210] sm:$0xff] }
  0x2f   : > { %v9349_v9 = vpack.c.bf16 %v6727_v6, %v6726_v4  ;;  %v1705_v10 = vld [vmem:[%s11058_s21 + $0x1e8] sm:$0xff]  ;;  %v1841_v11 = vld [vmem:[%s11058_s21 + $0x218] sm:$0xff]  ;;  %v6680_v12 = vld [vmem:[%s14753_s3 + $0x90] sm:$0xff] }
  0x30   : > { %7898 = vmatmul.mubr.msk.f32.vlgmr.msra.gmra.mrb[10].mxu0 %vm347_vm0, %v889_v27  ;;  %v6681_v13 = vld [vmem:[%s14753_s3 + $0x98] sm:$0xff]  ;;  %v6728_v14 = vld [vmem:[%s14753_s3 + $0x210] sm:$0xff]  ;;  %v6682_v18 = vld [vmem:[%s14753_s3 + $0xa0] sm:$0xff] }
  0x31   : > { %7881 = vmatmul.mubr.msk.f32.vlgmr.msra.gmra.mrb[8].mxu1 %vm347_vm0, %v753_v26  ;;  %7900 = vmatprep.mubr.msk.f32.mxu0 %vm347_vm0, %v890_v29  ;;  %v9225_v15 = vpack.c.bf16 %v6681_v13, %v6680_v12  ;;  %v6729_v16 = vld [vmem:[%s14753_s3 + $0x218] sm:$0xff]  ;;  %v6683_v19 = vld [vmem:[%s14753_s3 + $0xa8] sm:$0xff]  ;;  %v6730_v20 = vld [vmem:[%s14753_s3 + $0x220] sm:$0xff] }
  0x32   : > { %7883 = vmatprep.mubr.msk.f32.mxu1 %vm347_vm0, %v754_v28  ;;  %9168 = vmatpush3.bf16.msra.mxu1 %v11041_v3  ;;  %v9353_v17 = vpack.c.bf16 %v6729_v16, %v6728_v14  ;;  %v9229_v21 = vpack.c.bf16 %v6683_v19, %v6682_v18  ;;  %v6731_v22 = vld [vmem:[%s14753_s3 + $0x228] sm:$0xff]  ;;  %v6684_v24 = vld [vmem:[%s14753_s3 + $0xb0] sm:$0xff]  ;;  %v6685_v25 = vld [vmem:[%s14753_s3 + $0xb8] sm:$0xff] }
  0x33   : > { %9170 = vmatprep.subr.bf16.mxu1 %v11046_v5  ;;  %9176 = vmatpush3.bf16.msra.mxu0 %v11041_v3  ;;  %v9357_v23 = vpack.c.bf16 %v6731_v22, %v6730_v20  ;;  %v6732_v26 = vld [vmem:[%s14753_s3 + $0x230] sm:$0xff]  ;;  %v9233_v27 = vpack.c.bf16 %v6685_v25, %v6684_v24  ;;  %v6733_v28 = vld [vmem:[%s14753_s3 + $0x238] sm:$0xff]  ;;  %v11367_v4 = vld [vmem:[%s14752_s2] ss:$0 sm:$0xff] }
  0x34   : > { %7901 = vmatmul.mubr.msk.f32.gmra.mrb[12].mxu0 %vm347_vm0, %v891_v31  ;;  %9178 = vmatprep.subr.bf16.mxu0 %v11046_v5  ;;  %v9361_v29 = vpack.c.bf16 %v6733_v28, %v6732_v26  ;;  %v1842_v31 = vld [vmem:[%s11058_s21 + $0x220] sm:$0xff] }
  0x35   : > { %7884 = vmatmul.mubr.msk.f32.gmra.mrb[10].mxu1 %vm347_vm0, %v755_v30  ;;  %7903 = vmatprep.mubr.msk.f32.mxu0 %vm347_vm0, %v892_v33  ;;  %v1706_v30 = vld [vmem:[%s11058_s21 + $0x1f0] sm:$0xff]  ;;  %v1707_v33 = vld [vmem:[%s11058_s21 + $0x1f8] sm:$0xff] }
  0x36   : > { %7886 = vmatprep.mubr.msk.f32.mxu1 %vm347_vm0, %v756_v32  ;;  %9172 = vmatpush3.bf16.msra.mxu1 %v11046_v5  ;;  %v6686_v32 = vld [vmem:[%s14753_s3 + $0xc0] sm:$0xff] }
  0x37   : > { %9180 = vmatpush3.bf16.msra.mxu0 %v11046_v5  ;;  %9182 = vmatprep.subr.bf16.mxu1 %v11041_v3 }
  0x38   : > { %7904 = vmatmul.mubr.msk.f32.gmra.mrb[14].mxu0 %vm347_vm0, %v893_v35  ;;  %9190 = vmatprep.subr.bf16.mxu0 %v11041_v3  ;;  %v6687_v35 = vld [vmem:[%s14753_s3 + $0xc8] sm:$0xff] }
  0x39   : > { %7887 = vmatmul.mubr.msk.f32.gmra.mrb[12].mxu1 %vm347_vm0, %v757_v34  ;;  %7931 = vmatprep.mubr.msk.f32.mxu0 %vm347_vm0, %v1160_v37  ;;  %v1843_v34 = vld [vmem:[%s11058_s21 + $0x228] sm:$0xff]  ;;  %v6734_v37 = vld [vmem:[%s14753_s3 + $0x240] sm:$0xff] }
  0x3a   : > { %7914 = vmatprep.mubr.msk.f32.mxu1 %vm347_vm0, %v1024_v36  ;;  %v9237_v36 = vpack.c.bf16 %v6687_v35, %v6686_v32 }
  0x3c   : > { %7932 = vmatmul.mubr.msk.f32.vlgmr.msra.gmra.mrb[16].mxu0 %vm347_vm0, %v1161_v39 }
  0x3d   : > { %7915 = vmatmul.mubr.msk.f32.vlgmr.msra.gmra.mrb[14].mxu1 %vm347_vm0, %v1025_v38  ;;  %7934 = vmatprep.mubr.msk.f32.mxu0 %vm347_vm0, %v1162_v41  ;;  %v6735_v38 = vld [vmem:[%s14753_s3 + $0x248] sm:$0xff]  ;;  %v1844_v41 = vld [vmem:[%s11058_s21 + $0x230] sm:$0xff] }
  0x3e   : > { %7917 = vmatprep.mubr.msk.f32.mxu1 %vm347_vm0, %v1026_v40  ;;  %9184 = vmatpush3.bf16.msra.mxu1 %v11041_v3  ;;  %v9365_v39 = vpack.c.bf16 %v6735_v38, %v6734_v37  ;;  %v1708_v40 = vld [vmem:[%s11058_s21 + $0x200] sm:$0xff] }
  0x3f   : > { %9186 = vmatprep.subr.bf16.mxu1 %v11046_v5  ;;  %9192 = vmatpush3.bf16.msra.mxu0 %v11041_v3 }
  0x40   : > { %7935 = vmatmul.mubr.msk.f32.gmra.mrb[18].mxu0 %vm347_vm0, %v1163_v43  ;;  %9194 = vmatprep.subr.bf16.mxu0 %v11046_v5  ;;  %v1709_v43 = vld [vmem:[%s11058_s21 + $0x208] sm:$0xff] }
  0x41   : > { %7918 = vmatmul.mubr.msk.f32.gmra.mrb[16].mxu1 %vm347_vm0, %v1027_v42  ;;  %7937 = vmatprep.mubr.msk.f32.mxu0 %vm347_vm0, %v1164_v45  ;;  %v6688_v42 = vld [vmem:[%s14753_s3 + $0xd0] sm:$0xff]  ;;  %v6689_v45 = vld [vmem:[%s14753_s3 + $0xd8] sm:$0xff] }
  0x42   : > { %7920 = vmatprep.mubr.msk.f32.mxu1 %vm347_vm0, %v1028_v44  ;;  %9188 = vmatpush3.bf16.msra.mxu1 %v11046_v5  ;;  %v1845_v44 = vld [vmem:[%s11058_s21 + $0x238] sm:$0xff]  ;;  %s10874_s21 = scalar_lea.vmem %s10873_s25, 32 }
  0x43   : > { %9196 = vmatpush3.bf16.msra.mxu0 %v11046_v5  ;;  %9198 = vmatprep.subr.bf16.mxu1 %v11041_v3  ;;  %p10876_p1 = scmp.lt.s32.totalorder %s10874_s21, %s10868_s24 }
  0x44   : > { %7938 = vmatmul.mubr.msk.f32.gmra.mrb[20].mxu0 %vm347_vm0, %v1165_v47  ;;  %9206 = vmatprep.subr.bf16.mxu0 %v11041_v3  ;;  %v6736_v47 = vld [vmem:[%s14753_s3 + $0x250] sm:$0xff] }
  0x45   : > { %7921 = vmatmul.mubr.msk.f32.gmra.mrb[18].mxu1 %vm347_vm0, %v1029_v46  ;;  %7965 = vmatprep.mubr.msk.f32.mxu0 %vm347_vm0, %v1432_v49  ;;  %v9241_v46 = vpack.c.bf16 %v6689_v45, %v6688_v42  ;;  %p10877_p2 = por %p10876_p1, %p10875_p0 }
  0x46   : > { %7948 = vmatprep.mubr.msk.f32.mxu1 %vm347_vm0, %v1296_v48  ;;  %v6737_v48 = vld [vmem:[%s14753_s3 + $0x258] sm:$0xff] }
  0x47   : > { %v9369_v49 = vpack.c.bf16 %v6737_v48, %v6736_v47  ;;  %p10878_p3 = pnand %p10877_p2, %p10871_p13 }
  0x48   : > { %7966 = vmatmul.mubr.msk.f32.vlgmr.msra.gmra.mrb[22].mxu0 %vm347_vm0, %v1433_v51  ;;  %v6691_v51 = vld [vmem:[%s14753_s3 + $0xe8] sm:$0xff] }
  0x49   : > { %7949 = vmatmul.mubr.msk.f32.vlgmr.msra.gmra.mrb[20].mxu1 %vm347_vm0, %v1297_v50  ;;  %7968 = vmatprep.mubr.msk.f32.mxu0 %vm347_vm0, %v1434_v53  ;;  %v6690_v50 = vld [vmem:[%s14753_s3 + $0xe0] sm:$0xff] }
  0x4a   : > { %7951 = vmatprep.mubr.msk.f32.mxu1 %vm347_vm0, %v1298_v52  ;;  %9200 = vmatpush3.bf16.msra.mxu1 %v11041_v3  ;;  %v6738_v52 = vld [vmem:[%s14753_s3 + $0x260] sm:$0xff]  ;;  %v9245_v53 = vpack.c.bf16 %v6691_v51, %v6690_v50 }
  0x4b   : > { %9208 = vmatpush3.bf16.msra.mxu0 %v11041_v3  ;;  %9202 = vmatprep.subr.bf16.mxu1 %v11046_v5 }
  0x4c   : > { %9210 = vmatprep.subr.bf16.mxu0 %v11046_v5  ;;  %7969 = vmatmul.mubr.msk.f32.gmra.mrb[24].mxu0 %vm347_vm0, %v1435_v55 }
  0x4d   : > { %7952 = vmatmul.mubr.msk.f32.gmra.mrb[22].mxu1 %vm347_vm0, %v1299_v54  ;;  %7971 = vmatprep.mubr.msk.f32.mxu0 %vm347_vm0, %v1436_v57  ;;  %v6739_v54 = vld [vmem:[%s14753_s3 + $0x268] sm:$0xff]  ;;  %v6693_v57 = vld [vmem:[%s14753_s3 + $0xf8] sm:$0xff] }
  0x4e   : > { %7954 = vmatprep.mubr.msk.f32.mxu1 %vm347_vm0, %v1300_v56  ;;  %9204 = vmatpush3.bf16.msra.mxu1 %v11046_v5  ;;  %v9373_v55 = vpack.c.bf16 %v6739_v54, %v6738_v52  ;;  %v6692_v56 = vld [vmem:[%s14753_s3 + $0xf0] sm:$0xff] }
  0x4f   : > { %9212 = vmatpush3.bf16.msra.mxu0 %v11046_v5  ;;  %9214 = vmatprep.subr.bf16.mxu1 %v11041_v3 }
  0x50   : > { %7972 = vmatmul.mubr.msk.f32.gmra.mrb[26].mxu0 %vm347_vm0, %v1437_v59  ;;  %9350 = vmatprep.subr.bf16.mxu0 %v9349_v9  ;;  %v9249_v59 = vpack.c.bf16 %v6693_v57, %v6692_v56 }
  0x51   : > { %7955 = vmatmul.mubr.msk.f32.gmra.mrb[24].mxu1 %vm347_vm0, %v1301_v58  ;;  %7999 = vmatprep.mubr.msk.f32.mxu0 %vm347_vm0, %v1704_v7  ;;  %v6740_v58 = vld [vmem:[%s14753_s3 + $0x270] sm:$0xff] }
  0x52   : > { %7982 = vmatprep.mubr.msk.f32.mxu1 %vm347_vm0, %v1568_v60  ;;  %v6741_v60 = vld [vmem:[%s14753_s3 + $0x278] sm:$0xff] }
  0x54   : > { %8000 = vmatmul.mubr.msk.f32.vlgmr.msra.gmra.mrb[28].mxu0 %vm347_vm0, %v1705_v10 }
  0x55   : > { %7983 = vmatmul.mubr.msk.f32.vlgmr.msra.gmra.mrb[26].mxu1 %vm347_vm0, %v1569_v61  ;;  %9352 = vmatpush3.bf16.msra.mxu0 %v9349_v9  ;;  %v9377_v61 = vpack.c.bf16 %v6741_v60, %v6740_v58 }
  0x56   : > { %9216 = vmatpush3.bf16.msra.mxu1 %v11041_v3  ;;  %7985 = vmatprep.mubr.msk.f32.mxu1 %vm347_vm0, %v1570_v62  ;;  %v6679_v3 = vld [vmem:[%s14753_s3 + $0x88] sm:$0xff]  ;;  %v1984_v62 = vld [vmem:[%s14753_s3] sm:$0xff] }
  0x57   : > { %9218 = vmatprep.subr.bf16.mxu1 %v11046_v5  ;;  %9354 = vmatprep.subr.bf16.mxu0 %v9353_v17 }
  0x58   : > { %8002 = vmatprep.mubr.msk.f32.mxu0 %vm347_vm0, %v1706_v30 }
  0x59   : > { %7986 = vmatmul.mubr.msk.f32.gmra.mrb[28].mxu1 %vm347_vm0, %v1571_v63  ;;  %9356 = vmatpush3.bf16.msra.mxu0 %v9353_v17  ;;  %v1985_v63 = vld [vmem:[%s14753_s3 + $0x8] sm:$0xff] }
  0x5a   : > { %9220 = vmatpush3.bf16.msra.mxu1 %v11046_v5  ;;  %7988 = vmatprep.mubr.msk.f32.mxu1 %vm347_vm0, %v1572_v0  ;;  %v9221_v5 = vpack.c.bf16 %v6679_v3, %v6678_v2  ;;  %v6742_v0 = vld [vmem:[%s14753_s3 + $0x280] sm:$0xff]  ;;  %v6743_v2 = vld [vmem:[%s14753_s3 + $0x288] sm:$0xff] }
  0x5b   : > { %9358 = vmatprep.subr.bf16.mxu0 %v9357_v23  ;;  %8003 = vmatmul.mubr.msk.f32.gmra.mrb[30].mxu0 %vm347_vm0, %v1707_v33  ;;  %v11360_v3 = vpack.c.bf16 %v6743_v2, %v6742_v0 }
  0x5c   : > { %9222 = vmatprep.subr.bf16.mxu1 %v9221_v5  ;;  %8005 = vmatprep.mubr.msk.f32.mxu0 %vm347_vm0, %v1708_v40 }
  0x5d   : > { %7989 = vmatmul.mubr.msk.f32.gmra.mrb[30].mxu1 %vm347_vm0, %v1573_v1  ;;  %9360 = vmatpush3.bf16.msra.mxu0 %v9357_v23  ;;  %v11355_v1 = vpack.c.bf16 %v1985_v63, %v1984_v62 }
  0x5e   : > { %8016 = vmatprep.mubr.msk.f32.mxu1 %vm347_vm0, %v1840_v8  ;;  %9362 = vmatprep.subr.bf16.mxu0 %v9361_v29 }
  0x5f   : > { %8006 = vmatmul.mubr.msk.f32.gmra.mrb[32].mxu0 %vm347_vm0, %v1709_v43 }
  0x61   : > { %8017 = vmatmul.mubr.msk.f32.vlgmr.msra.gmra.mrb[32].mxu1 %vm347_vm0, %v1841_v11  ;;  %9364 = vmatpush3.bf16.msra.mxu0 %v9361_v29 }
  0x62   : > { %9224 = vmatpush3.bf16.msra.mxu1 %v9221_v5  ;;  %8019 = vmatprep.mubr.msk.f32.mxu1 %vm347_vm0, %v1842_v31 }
  0x63   : > { %9226 = vmatprep.subr.bf16.mxu1 %v9225_v15  ;;  %9366 = vmatprep.subr.bf16.mxu0 %v9365_v39 }
  0x65   : > { %8020 = vmatmul.mubr.msk.f32.gmra.mrb[34].mxu1 %vm347_vm0, %v1843_v34  ;;  %9368 = vmatpush3.bf16.msra.mxu0 %v9365_v39 }
  0x66   : > { %9228 = vmatpush3.bf16.msra.mxu1 %v9225_v15  ;;  %8022 = vmatprep.mubr.msk.f32.mxu1 %vm347_vm0, %v1844_v41 }
  0x67   : > { %9230 = vmatprep.subr.bf16.mxu1 %v9229_v21  ;;  %9370 = vmatprep.subr.bf16.mxu0 %v9369_v49 }
  0x69   : > { %8023 = vmatmul.mubr.msk.f32.gmra.mrb[36].mxu1 %vm347_vm0, %v1845_v44  ;;  %9372 = vmatpush3.bf16.msra.mxu0 %v9369_v49 }
  0x6a   : > { %9232 = vmatpush3.bf16.msra.mxu1 %v9229_v21  ;;  %9374 = vmatprep.subr.bf16.mxu0 %v9373_v55 }
  0x6b   : > { %9234 = vmatprep.subr.bf16.mxu1 %v9233_v27 }
  0x6d   : > { %9376 = vmatpush3.bf16.msra.mxu0 %v9373_v55 }
  0x6e   : > { %9236 = vmatpush3.bf16.msra.mxu1 %v9233_v27  ;;  %9378 = vmatprep.subr.bf16.mxu0 %v9377_v61 }
  0x6f   : > { %9238 = vmatprep.subr.bf16.mxu1 %v9237_v36 }
  0x71   : > { %9380 = vmatpush3.bf16.msra.mxu0 %v9377_v61 }
  0x72   : > { %9240 = vmatpush3.bf16.msra.mxu1 %v9237_v36  ;;  %9382 = vmatprep.subr.bf16.mxu0 %v11360_v3 }
  0x73   : > { %9242 = vmatprep.subr.bf16.mxu1 %v9241_v46 }
  0x76   : > { %9244 = vmatpush3.bf16.msra.mxu1 %v9241_v46 }
  0x77   : > { %9246 = vmatprep.subr.bf16.mxu1 %v9245_v53 }
  0x7a   : > { %9248 = vmatpush3.bf16.msra.mxu1 %v9245_v53 }
  0x7b   : > { %9250 = vmatprep.subr.bf16.mxu1 %v9249_v59 }
  0x7e   : > { %9252 = vmatpush3.bf16.msra.mxu1 %v9249_v59 }
  0x7f   : > { %9254 = vmatprep.subr.bf16.mxu1 %v11355_v1 }
  0xef   : > { %v7831_v6 = vpop.f32.mrb[0].mxu0 }
  0xf0   : > { %v7837_v5 = vpop.f32.mrb[0].mxu1  ;;  %v438_v7 = vadd.f32 %v7831_v6, %v11367_v4  ;;  %v432_v9 = vpop.f32.mrb[1].mxu0 }
  0xf1   : > { %v452_v8 = vpop.f32.mrb[1].mxu1  ;;  %v433_v11 = vadd.f32 %v11367_v4, %v432_v9  ;;  %v458_v16 = vadd.f32 %v7837_v5, %v11367_v4 }
  0xf2   : > { %v453_v10 = vadd.f32 %v11367_v4, %v452_v8 }
  0xf3   : > { %v7834_v13 = vpop.f32.mrb[2].mxu0 }
  0xf4   : > { %v462_v12 = vmax.f32 %v438_v7, %v453_v10  ;;  %v448_v14 = vadd.f32 %v7834_v13, %v11367_v4  ;;  %v442_v15 = vpop.f32.mrb[3].mxu0 }
  0xf5   : > { %v443_v17 = vadd.f32 %v11367_v4, %v442_v15 }
  0xf6   : > { %465 = vst [vmem:[#allocation2 + $0x8] sm:$0xff] %v462_v12  ;;  %v461_v18 = vmax.f32 %v433_v11, %v448_v14 }
  0xf7   : > { %v463_v19 = vmax.f32 %v443_v17, %v458_v16  ;;  %v7865_v21 = vpop.f32.mrb[4].mxu0 }
  0xf8   : > { %v7848_v20 = vpop.f32.mrb[2].mxu1  ;;  %464 = vst [vmem:[#allocation2] sm:$0xff] %v461_v18  ;;  %v706_v23 = vpop.f32.mrb[5].mxu0  ;;  %v712_v37 = vadd.f32 %v7865_v21, %v11367_v4 }
  0xf9   : > { %v570_v22 = vpop.f32.mrb[3].mxu1  ;;  %466 = vst [vmem:[#allocation2 + $0x10] sm:$0xff] %v463_v19  ;;  %v11376_v24 = vadd.f32 %v11367_v4, %v706_v23  ;;  %v576_v46 = vadd.f32 %v7848_v20, %v11367_v4 }
  0xfa   : > { %v571_v27 = vadd.f32 %v11367_v4, %v570_v22 }
  0xfb   : > { %v7868_v26 = vpop.f32.mrb[6].mxu0 }
  0xfc   : > { %v7851_v25 = vpop.f32.mrb[4].mxu1  ;;  %v11381_v30 = vadd.f32 %v7868_v26, %v11367_v4  ;;  %v716_v31 = vpop.f32.mrb[7].mxu0 }
  0xfd   : > { %v586_v28 = vadd.f32 %v7851_v25, %v11367_v4  ;;  %v580_v29 = vpop.f32.mrb[5].mxu1  ;;  %v717_v34 = vadd.f32 %v11367_v4, %v716_v31 }
  0xfe   : > { %v735_v33 = vmax.f32 %v11376_v24, %v11381_v30  ;;  %v581_v42 = vadd.f32 %v11367_v4, %v580_v29 }
  0xff   : > { %v599_v32 = vmax.f32 %v571_v27, %v586_v28  ;;  %v467_v35 = vld [vmem:[#allocation2] ss:$2 sm:$0xff]  ;;  %v471_v36 = vld [vmem:[#allocation2 + $0x1] ss:$2 sm:$0xff]  ;;  %v7871_v39 = vpop.f32.mrb[8].mxu0 }
 0x100   : > { %v7854_v38 = vpop.f32.mrb[6].mxu1  ;;  %v469_v40 = vld [vmem:[#allocation2 + $0x10] ss:$2 sm:$0xf]  ;;  %v732_v44 = vadd.f32 %v7871_v39, %v11367_v4  ;;  %v474_v45 = vmax.f32 %v467_v35, %v471_v36  ;;  %v726_v48 = vpop.f32.mrb[9].mxu0 }
 0x101   : > { %v473_v41 = vld [vmem:[#allocation2 + $0x11] ss:$2 sm:$0xf]  ;;  %602 = vst [vmem:[#allocation2] sm:$0xff] %v599_v32  ;;  %v596_v43 = vadd.f32 %v7854_v38, %v11367_v4  ;;  %v590_v47 = vpop.f32.mrb[7].mxu1  ;;  %v727_v53 = vadd.f32 %v11367_v4, %v726_v48 }
 0x102   : > { %v475_v49 = vmax.f32 %v469_v40, %v473_v41  ;;  %v737_v51 = vmax.f32 %v717_v34, %v732_v44  ;;  %v591_v52 = vadd.f32 %v11367_v4, %v590_v47  ;;  %v11393_v56 = vmax.f32 %v474_v45, 0.0  ;;  %v1986_v41 = vld [vmem:[%s14753_s3 + $0x10] sm:$0xff] }
 0x103   : > { %v601_v50 = vmax.f32 %v581_v42, %v596_v43  ;;  %v7899_v55 = vpop.f32.mrb[10].mxu0  ;;  %v736_v59 = vmax.f32 %v712_v37, %v727_v53  ;;  %v1987_v42 = vld [vmem:[%s14753_s3 + $0x18] sm:$0xff] }
 0x104   : > { %v7882_v54 = vpop.f32.mrb[8].mxu1  ;;  %v477_v57 = vmax.f32 %v475_v49, 0.0  ;;  %v600_v58 = vmax.f32 %v576_v46, %v591_v52  ;;  %v978_v61 = vpop.f32.mrb[11].mxu0  ;;  %478 = vst [vmem:[#allocation3] sm:$0xff] %v11393_v56  ;;  %v11414_v15 = vadd.f32 %v7899_v55, %v11367_v4 }
 0x105   : > { %604 = vst [vmem:[#allocation2 + $0x10] sm:$0xff] %v601_v50  ;;  %v842_v60 = vpop.f32.mrb[9].mxu1  ;;  %v11400_v63 = vadd.f32 %v11367_v4, %v978_v61  ;;  %v848_v23 = vadd.f32 %v7882_v54, %v11367_v4  ;;  %v6744_v50 = vld [vmem:[%s14753_s3 + $0x290] sm:$0xff] }
 0x106   : > { %479 = vst [vmem:[#allocation3 + $0x8] sm:$0xf] %v477_v57  ;;  %603 = vst [vmem:[#allocation2 + $0x8] sm:$0xff] %v600_v58  ;;  %v11397_v62 = vadd.f32 %v11367_v4, %v842_v60 }
 0x107   : > { %v7902_v2 = vpop.f32.mrb[12].mxu0 }
 0x108   : > { %v7885_v0 = vpop.f32.mrb[10].mxu1  ;;  %v11404_v7 = vadd.f32 %v7902_v2, %v11367_v4  ;;  %v988_v8 = vpop.f32.mrb[13].mxu0 }
 0x109   : > { %v858_v5 = vadd.f32 %v7885_v0, %v11367_v4  ;;  %v852_v6 = vpop.f32.mrb[11].mxu1  ;;  %v11411_v14 = vadd.f32 %v11367_v4, %v988_v8 }
 0x10a   : > { %v1007_v10 = vmax.f32 %v11400_v63, %v11404_v7  ;;  %v853_v13 = vadd.f32 %v11367_v4, %v852_v6 }
 0x10b   : > { %v871_v9 = vmax.f32 %v11397_v62, %v858_v5  ;;  %v7905_v19 = vpop.f32.mrb[14].mxu0 }
 0x10c   : > { %v606_v11 = vld [vmem:[#allocation2 + $0x10] ss:$2 sm:$0xf]  ;;  %v608_v12 = vld [vmem:[#allocation2 + $0x11] ss:$2 sm:$0xf]  ;;  %v11419_v27 = vadd.f32 %v7905_v19, %v11367_v4 }
 0x10d   : > { %740 = vst [vmem:[#allocation2 + $0x10] sm:$0xff] %v737_v51  ;;  %v7888_v16 = vpop.f32.mrb[12].mxu1  ;;  %v2000_v17 = vld [vmem:[#allocation3 + $0x1] sm:$0xff]  ;;  %v610_v20 = vmax.f32 %v606_v11, %v608_v12  ;;  %v607_v22 = vld [vmem:[#allocation2 + $0x1] ss:$2 sm:$0xff]  ;;  %v998_v28 = vpop.f32.mrb[15].mxu0 }
 0x10e   : > { %v2511_v18 = vld [vmem:[#allocation3 + $0x4] sm:$0xff]  ;;  %v868_v25 = vadd.f32 %v7888_v16, %v11367_v4  ;;  %v862_v26 = vpop.f32.mrb[13].mxu1  ;;  %8057 = vmatprep.mubr.f32.mxu1 %v2000_v17  ;;  %v11426_v31 = vadd.f32 %v11367_v4, %v998_v28  ;;  %v1009_v36 = vmax.f32 %v11411_v14, %v11419_v27 }
 0x10f   : > { %v605_v21 = vld [vmem:[#allocation2] ss:$2 sm:$0xff]  ;;  %8233 = vmatprep.mubr.f32.mxu0 %v2511_v18  ;;  %v863_v29 = vadd.f32 %v11367_v4, %v862_v26  ;;  %v612_v34 = vmax.f32 %v610_v20, 0.0  ;;  %v7933_v38 = vpop.f32.mrb[16].mxu0  ;;  %v6745_v51 = vld [vmem:[%s14753_s3 + $0x298] sm:$0xff] }
 0x110   : > { %738 = vst [vmem:[#allocation2] sm:$0xff] %v735_v33  ;;  %739 = vst [vmem:[#allocation2 + $0x8] sm:$0xff] %v736_v59  ;;  %v609_v32 = vmax.f32 %v605_v21, %v607_v22  ;;  %v873_v35 = vmax.f32 %v853_v13, %v868_v25  ;;  %v7916_v37 = vpop.f32.mrb[14].mxu1  ;;  %v1008_v40 = vmax.f32 %v11414_v15, %v11426_v31  ;;  %v1250_v33 = vpop.f32.mrb[17].mxu0  ;;  %v1988_v20 = vld [vmem:[%s14753_s3 + $0x20] sm:$0xff]  ;;  %v1989_v21 = vld [vmem:[%s14753_s3 + $0x28] sm:$0xff] }
 0x111   : > { %v872_v39 = vmax.f32 %v848_v23, %v863_v29  ;;  %v1114_v24 = vpop.f32.mrb[15].mxu1  ;;  %615 = vst [vmem:[#allocation3 + $0x18] sm:$0xf] %v612_v34  ;;  %v11445_v46 = vadd.f32 %v11367_v4, %v1250_v33  ;;  %v9257_v59 = vpack.c.bf16 %v1987_v42, %v1986_v41  ;;  %v11466_v2 = vadd.f32 %v7916_v37, %v11367_v4  ;;  %v6746_v22 = vld [vmem:[%s14753_s3 + $0x2a0] sm:$0xff]  ;;  %v6747_v29 = vld [vmem:[%s14753_s3 + $0x2a8] sm:$0xff] }
 0x112   : > { %v11432_v30 = vmax.f32 %v609_v32, 0.0  ;;  %v11442_v45 = vadd.f32 %v11367_v4, %v1114_v24  ;;  %v11471_v8 = vadd.f32 %v7933_v38, %v11367_v4  ;;  %v9385_v19 = vpack.c.bf16 %v6745_v51, %v6744_v50  ;;  %v1992_v31 = vld [vmem:[%s14753_s3 + $0x40] sm:$0xff] }
 0x113   : > { %v7936_v48 = vpop.f32.mrb[18].mxu0  ;;  %v9261_v42 = vpack.c.bf16 %v1989_v21, %v1988_v20 }
 0x114   : > { %614 = vst [vmem:[#allocation3 + $0x10] sm:$0xff] %v11432_v30  ;;  %v742_v43 = vld [vmem:[#allocation2 + $0x10] ss:$2 sm:$0xf]  ;;  %v7919_v47 = vpop.f32.mrb[16].mxu1  ;;  %v11457_v57 = vadd.f32 %v7936_v48, %v11367_v4  ;;  %v1260_v58 = vpop.f32.mrb[19].mxu0 }
 0x115   : > { %v744_v44 = vld [vmem:[#allocation2 + $0x11] ss:$2 sm:$0xf]  ;;  %v11454_v54 = vadd.f32 %v7919_v47, %v11367_v4  ;;  %v1124_v55 = vpop.f32.mrb[17].mxu1  ;;  %v11463_v61 = vadd.f32 %v11367_v4, %v1260_v58 }
 0x116   : > { %876 = vst [vmem:[#allocation2 + $0x10] sm:$0xff] %v873_v35  ;;  %v746_v49 = vmax.f32 %v742_v43, %v744_v44  ;;  %v11460_v60 = vadd.f32 %v11367_v4, %v1124_v55  ;;  %v1990_v35 = vld [vmem:[%s14753_s3 + $0x30] sm:$0xff]  ;;  %v9389_v43 = vpack.c.bf16 %v6747_v29, %v6746_v22  ;;  %v1991_v44 = vld [vmem:[%s14753_s3 + $0x38] sm:$0xff] }
 0x117   : > { %v741_v52 = vld [vmem:[#allocation2] ss:$2 sm:$0xff]  ;;  %v743_v53 = vld [vmem:[#allocation2 + $0x1] ss:$2 sm:$0xff]  ;;  %v1143_v5 = vmax.f32 %v11442_v45, %v11454_v54  ;;  %v7939_v11 = vpop.f32.mrb[20].mxu0  ;;  %v9265_v55 = vpack.c.bf16 %v1991_v44, %v1990_v35  ;;  %v1995_v44 = vld [vmem:[%s14753_s3 + $0x58] sm:$0xff] }
 0x118   : > { %874 = vst [vmem:[#allocation2] sm:$0xff] %v871_v9  ;;  %875 = vst [vmem:[#allocation2 + $0x8] sm:$0xff] %v872_v39  ;;  %v745_v62 = vmax.f32 %v741_v52, %v743_v53  ;;  %v748_v0 = vmax.f32 %v746_v49, 0.0  ;;  %v7922_v6 = vpop.f32.mrb[18].mxu1  ;;  %v1279_v9 = vmax.f32 %v11445_v46, %v11457_v57  ;;  %v11479_v16 = vadd.f32 %v7939_v11, %v11367_v4  ;;  %v1270_v17 = vpop.f32.mrb[21].mxu0  ;;  %v6695_v46 = vld [vmem:[%s14753_s3 + $0x108] sm:$0xff] }
 0x119   : > { %v11476_v12 = vadd.f32 %v7922_v6, %v11367_v4  ;;  %v1134_v13 = vpop.f32.mrb[19].mxu1  ;;  %v11498_v28 = vadd.f32 %v11367_v4, %v1270_v17  ;;  %v6751_v17 = vld [vmem:[%s14753_s3 + $0x2c8] sm:$0xff]  ;;  %v6758_v57 = vld [vmem:[%s14753_s3 + $0x300] sm:$0xff] }
 0x11a   : > { %v11481_v18 = vmax.f32 %v745_v62, 0.0  ;;  %751 = vst [vmem:[#allocation3 + $0x28] sm:$0xf] %v748_v0  ;;  %v11493_v23 = vadd.f32 %v11367_v4, %v1134_v13  ;;  %v1281_v34 = vmax.f32 %v11463_v61, %v11479_v16 }
 0x11b   : > { %v11495_v25 = vld [vmem:[#allocation3 + $0x11] sm:$0xff]  ;;  %v1145_v32 = vmax.f32 %v11460_v60, %v11476_v12  ;;  %v1280_v24 = vmax.f32 %v11471_v8, %v11498_v28  ;;  %v7967_v14 = vpop.f32.mrb[22].mxu0 }
 0x11c   : > { %v2512_v26 = vld [vmem:[#allocation3 + $0x14] sm:$0xff]  ;;  %8058 = vmatmul.mubr.f32.vlgmr.msra.gmra.mrb[38].mxu1 %v11495_v25  ;;  %750 = vst [vmem:[#allocation3 + $0x20] sm:$0xff] %v11481_v18  ;;  %v1144_v39 = vmax.f32 %v11466_v2, %v11493_v23  ;;  %v7950_v33 = vpop.f32.mrb[20].mxu1  ;;  %v1522_v48 = vpop.f32.mrb[23].mxu0  ;;  %v11580_v35 = vadd.f32 %v7967_v14, %v11367_v4  ;;  %v1996_v23 = vld [vmem:[%s14753_s3 + $0x60] sm:$0xff] }
 0x11d   : > { %8234 = vmatmul.mubr.f32.vlgmr.msra.gmra.mrb[34].mxu0 %v2512_v26  ;;  %v878_v37 = vld [vmem:[#allocation2 + $0x10] ss:$2 sm:$0xf]  ;;  %v880_v38 = vld [vmem:[#allocation2 + $0x11] ss:$2 sm:$0xf]  ;;  %9256 = vmatpush3.bf16.msra.mxu1 %v11355_v1  ;;  %v11540_v52 = vadd.f32 %v11367_v4, %v1522_v48  ;;  %v11577_v22 = vadd.f32 %v7950_v33, %v11367_v4 }
 0x11e   : > { %9384 = vmatpush3.bf16.msra.mxu0 %v11360_v3  ;;  %1012 = vst [vmem:[#allocation2 + $0x10] sm:$0xff] %v1009_v36  ;;  %v882_v41 = vmax.f32 %v878_v37, %v880_v38  ;;  %9258 = vmatprep.subr.bf16.mxu1 %v9257_v59  ;;  %v6748_v1 = vld [vmem:[%s14753_s3 + $0x2b0] sm:$0xff]  ;;  %v6749_v3 = vld [vmem:[%s14753_s3 + $0x2b8] sm:$0xff]  ;;  %v1386_v47 = vpop.f32.mrb[21].mxu1  ;;  %v6759_v28 = vld [vmem:[%s14753_s3 + $0x308] sm:$0xff] }
 0x11f   : > { %9386 = vmatprep.subr.bf16.mxu0 %v9385_v19  ;;  %v877_v27 = vld [vmem:[#allocation2] ss:$2 sm:$0xff]  ;;  %v879_v36 = vld [vmem:[#allocation2 + $0x1] ss:$2 sm:$0xff]  ;;  %v11537_v49 = vadd.f32 %v11367_v4, %v1386_v47  ;;  %v7970_v58 = vpop.f32.mrb[24].mxu0  ;;  %v9393_v15 = vpack.c.bf16 %v6749_v3, %v6748_v1 }
 0x120   : > { %1010 = vst [vmem:[#allocation2] sm:$0xff] %v1007_v10  ;;  %1011 = vst [vmem:[#allocation2 + $0x8] sm:$0xff] %v1008_v40  ;;  %v881_v50 = vmax.f32 %v877_v27, %v879_v36  ;;  %v884_v51 = vmax.f32 %v882_v41, 0.0  ;;  %v7953_v53 = vpop.f32.mrb[22].mxu1  ;;  %v1993_v40 = vld [vmem:[%s14753_s3 + $0x48] sm:$0xff]  ;;  %v11557_v62 = vadd.f32 %v7970_v58, %v11367_v4  ;;  %v1532_v0 = vpop.f32.mrb[25].mxu0 }
 0x121   : > { %9260 = vmatpush3.bf16.msra.mxu1 %v9257_v59  ;;  %v11543_v63 = vadd.f32 %v7953_v53, %v11367_v4  ;;  %v1396_v7 = vpop.f32.mrb[23].mxu1  ;;  %v6750_v59 = vld [vmem:[%s14753_s3 + $0x2c0] sm:$0xff]  ;;  %v11574_v21 = vadd.f32 %v11367_v4, %v1532_v0  ;;  %v9269_v37 = vpack.c.bf16 %v1993_v40, %v1992_v31  ;;  %v1994_v41 = vld [vmem:[%s14753_s3 + $0x50] sm:$0xff]  ;;  %v6753_v53 = vld [vmem:[%s14753_s3 + $0x2d8] sm:$0xff] }
 0x122   : > { %9388 = vmatpush3.bf16.msra.mxu0 %v9385_v19  ;;  %v11545_v10 = vmax.f32 %v881_v50, 0.0  ;;  %887 = vst [vmem:[#allocation3 + $0x38] sm:$0xf] %v884_v51  ;;  %9262 = vmatprep.subr.bf16.mxu1 %v9261_v42  ;;  %v11562_v13 = vadd.f32 %v11367_v4, %v1396_v7  ;;  %v1551_v20 = vmax.f32 %v11540_v52, %v11557_v62  ;;  %v6752_v27 = vld [vmem:[%s14753_s3 + $0x2d0] sm:$0xff]  ;;  %v6755_v40 = vld [vmem:[%s14753_s3 + $0x2e8] sm:$0xff]  ;;  %v1999_v0 = vld [vmem:[%s14753_s3 + $0x78] sm:$0xff] }
 0x123   : > { %9390 = vmatprep.subr.bf16.mxu0 %v9389_v43  ;;  %v11559_v6 = vld [vmem:[#allocation3 + $0x21] sm:$0xff]  ;;  %v1415_v19 = vmax.f32 %v11537_v49, %v11543_v63  ;;  %v7973_v38 = vpop.f32.mrb[26].mxu0  ;;  %v9273_v2 = vpack.c.bf16 %v1995_v44, %v1994_v41 }
 0x124   : > { %v2513_v11 = vld [vmem:[#allocation3 + $0x24] sm:$0xff]  ;;  %8060 = vmatprep.mubr.f32.mxu1 %v11559_v6  ;;  %886 = vst [vmem:[#allocation3 + $0x30] sm:$0xff] %v11545_v10  ;;  %v7956_v26 = vpop.f32.mrb[24].mxu1  ;;  %v1542_v14 = vpop.f32.mrb[27].mxu0 }
 0x125   : > { %8236 = vmatprep.mubr.f32.mxu0 %v2513_v11  ;;  %v1014_v29 = vld [vmem:[#allocation2 + $0x10] ss:$2 sm:$0xf]  ;;  %9264 = vmatpush3.bf16.msra.mxu1 %v9261_v42  ;;  %v11589_v33 = vadd.f32 %v7956_v26, %v11367_v4  ;;  %v1406_v1 = vpop.f32.mrb[25].mxu1  ;;  %v9397_v42 = vpack.c.bf16 %v6751_v17, %v6750_v59  ;;  %v11604_v51 = vadd.f32 %v11367_v4, %v1542_v14 }
 0x126   : > { %9392 = vmatpush3.bf16.msra.mxu0 %v9389_v43  ;;  %v1016_v3 = vld [vmem:[#allocation2 + $0x11] ss:$2 sm:$0xf]  ;;  %9266 = vmatprep.subr.bf16.mxu1 %v9265_v55  ;;  %v11592_v43 = vadd.f32 %v7973_v38, %v11367_v4  ;;  %v11598_v48 = vadd.f32 %v11367_v4, %v1406_v1  ;;  %v6757_v1 = vld [vmem:[%s14753_s3 + $0x2f8] sm:$0xff] }
 0x127   : > { %9394 = vmatprep.subr.bf16.mxu0 %v9393_v15  ;;  %v1013_v36 = vld [vmem:[#allocation2] ss:$2 sm:$0xff]  ;;  %v1015_v47 = vld [vmem:[#allocation2 + $0x1] ss:$2 sm:$0xff]  ;;  %v1018_v50 = vmax.f32 %v1014_v29, %v1016_v3  ;;  %1148 = vst [vmem:[#allocation2 + $0x10] sm:$0xff] %v1145_v32  ;;  %v1417_v58 = vmax.f32 %v11562_v13, %v11589_v33  ;;  %v1552_v45 = vmax.f32 %v11580_v35, %v11604_v51  ;;  %v1998_v59 = vld [vmem:[%s14753_s3 + $0x70] sm:$0xff] }
 0x128   : > { %1146 = vst [vmem:[#allocation2] sm:$0xff] %v1143_v5  ;;  %1147 = vst [vmem:[#allocation2 + $0x8] sm:$0xff] %v1144_v39  ;;  %v1017_v60 = vmax.f32 %v1013_v36, %v1015_v47  ;;  %v1553_v12 = vmax.f32 %v11574_v21, %v11592_v43  ;;  %v1416_v32 = vmax.f32 %v11577_v22, %v11598_v48  ;;  %v1997_v39 = vld [vmem:[%s14753_s3 + $0x68] sm:$0xff]  ;;  %v6756_v11 = vld [vmem:[%s14753_s3 + $0x2f0] sm:$0xff] }
 0x129   : > { %v1020_v7 = vmax.f32 %v1018_v50, 0.0  ;;  %9268 = vmatpush3.bf16.msra.mxu1 %v9265_v55  ;;  %v9401_v5 = vpack.c.bf16 %v6753_v53, %v6752_v27  ;;  %v6754_v55 = vld [vmem:[%s14753_s3 + $0x2e0] sm:$0xff]  ;;  %v9277_v29 = vpack.c.bf16 %v1997_v39, %v1996_v23  ;;  %v9281_v61 = vpack.c.bf16 %v1999_v0, %v1998_v59  ;;  %v6696_v59 = vld [vmem:[%s14753_s3 + $0x110] sm:$0xff]  ;;  %v6697_v0 = vld [vmem:[%s14753_s3 + $0x118] sm:$0xff] }
 0x12a   : > { %9396 = vmatpush3.bf16.msra.mxu0 %v9393_v15  ;;  %v11623_v54 = vmax.f32 %v1017_v60, 0.0  ;;  %9270 = vmatprep.subr.bf16.mxu1 %v9269_v37  ;;  %v9405_v38 = vpack.c.bf16 %v6755_v40, %v6754_v55  ;;  %v9409_v16 = vpack.c.bf16 %v6757_v1, %v6756_v11  ;;  %v11688_v47 = vpack.c.bf16 %v6759_v28, %v6758_v57  ;;  %v6760_v11 = vld [vmem:[%s14753_s3 + $0x310] sm:$0xff]  ;;  %v6767_v28 = vld [vmem:[%s14753_s3 + $0x348] sm:$0xff] }
 0x12b   : > { %9398 = vmatprep.subr.bf16.mxu0 %v9397_v42  ;;  %v11634_v15 = vld [vmem:[#allocation3 + $0x31] sm:$0xff]  ;;  %1023 = vst [vmem:[#allocation3 + $0x48] sm:$0xf] %v1020_v7 }
 0x12c   : > { %v11636_v31 = vld [vmem:[#allocation3 + $0x34] sm:$0xff]  ;;  %8061 = vmatmul.mubr.f32.gmra.mrb[40].mxu1 %v11634_v15  ;;  %1022 = vst [vmem:[#allocation3 + $0x40] sm:$0xff] %v11623_v54 }
 0x12d   : > { %8237 = vmatmul.mubr.f32.gmra.mrb[36].mxu0 %v11636_v31  ;;  %9272 = vmatpush3.bf16.msra.mxu1 %v9269_v37  ;;  %v6700_v1 = vld [vmem:[%s14753_s3 + $0x130] sm:$0xff] }
 0x12e   : > { %9400 = vmatpush3.bf16.msra.mxu0 %v9397_v42  ;;  %v1150_v17 = vld [vmem:[#allocation2 + $0x10] ss:$2 sm:$0xf]  ;;  %v1152_v26 = vld [vmem:[#allocation2 + $0x11] ss:$2 sm:$0xf]  ;;  %9274 = vmatprep.subr.bf16.mxu1 %v9273_v2 }
 0x12f   : > { %9402 = vmatprep.subr.bf16.mxu0 %v9401_v5  ;;  %v1149_v37 = vld [vmem:[#allocation2] ss:$2 sm:$0xff]  ;;  %v1151_v41 = vld [vmem:[#allocation2 + $0x1] ss:$2 sm:$0xff]  ;;  %v1154_v44 = vmax.f32 %v1150_v17, %v1152_v26  ;;  %1284 = vst [vmem:[#allocation2 + $0x10] sm:$0xff] %v1281_v34  ;;  %v6761_v17 = vld [vmem:[%s14753_s3 + $0x318] sm:$0xff]  ;;  %v9289_v26 = vpack.c.bf16 %v6697_v0, %v6696_v59 }
 0x130   : > { %v1153_v3 = vmax.f32 %v1149_v37, %v1151_v41  ;;  %1282 = vst [vmem:[#allocation2] sm:$0xff] %v1279_v9  ;;  %1283 = vst [vmem:[#allocation2 + $0x8] sm:$0xff] %v1280_v24  ;;  %v6694_v34 = vld [vmem:[%s14753_s3 + $0x100] sm:$0xff]  ;;  %v6699_v37 = vld [vmem:[%s14753_s3 + $0x128] sm:$0xff] }
 0x131   : > { %v1156_v42 = vmax.f32 %v1154_v44, 0.0  ;;  %9276 = vmatpush3.bf16.msra.mxu1 %v9273_v2  ;;  %v11686_v36 = vpack.c.bf16 %v6695_v46, %v6694_v34  ;;  %v6763_v41 = vld [vmem:[%s14753_s3 + $0x328] sm:$0xff]  ;;  %v6702_v34 = vld [vmem:[%s14753_s3 + $0x140] sm:$0xff] }
 0x132   : > { %9404 = vmatpush3.bf16.msra.mxu0 %v9401_v5  ;;  %v11665_v14 = vmax.f32 %v1153_v3, 0.0  ;;  %9278 = vmatprep.subr.bf16.mxu1 %v9277_v29  ;;  %v6701_v3 = vld [vmem:[%s14753_s3 + $0x138] sm:$0xff]  ;;  %v6703_v46 = vld [vmem:[%s14753_s3 + $0x148] sm:$0xff]  ;;  %v6770_v0 = vld [vmem:[%s14753_s3 + $0x360] sm:$0xff] }
 0x133   : > { %9406 = vmatprep.subr.bf16.mxu0 %v9405_v38  ;;  %v11676_v8 = vld [vmem:[#allocation3 + $0x41] sm:$0xff]  ;;  %1159 = vst [vmem:[#allocation3 + $0x58] sm:$0xf] %v1156_v42  ;;  %v6707_v59 = vld [vmem:[%s14753_s3 + $0x168] sm:$0xff] }
 0x134   : > { %v11678_v9 = vld [vmem:[#allocation3 + $0x44] sm:$0xff]  ;;  %8063 = vmatprep.mubr.f32.mxu1 %v11676_v8  ;;  %1158 = vst [vmem:[#allocation3 + $0x50] sm:$0xff] %v11665_v14 }
 0x135   : > { %8239 = vmatprep.mubr.f32.mxu0 %v11678_v9  ;;  %9280 = vmatpush3.bf16.msra.mxu1 %v9277_v29  ;;  %v9417_v29 = vpack.c.bf16 %v6761_v17, %v6760_v11  ;;  %v6765_v42 = vld [vmem:[%s14753_s3 + $0x338] sm:$0xff] }
 0x136   : > { %9408 = vmatpush3.bf16.msra.mxu0 %v9405_v38  ;;  %v1286_v24 = vld [vmem:[#allocation2 + $0x10] ss:$2 sm:$0xf]  ;;  %v1288_v27 = vld [vmem:[#allocation2 + $0x11] ss:$2 sm:$0xf]  ;;  %9282 = vmatprep.subr.bf16.mxu1 %v9281_v61 }
 0x137   : > { %9410 = vmatprep.subr.bf16.mxu0 %v9409_v16  ;;  %v1285_v50 = vld [vmem:[#allocation2] ss:$2 sm:$0xff]  ;;  %v1287_v53 = vld [vmem:[#allocation2 + $0x1] ss:$2 sm:$0xff]  ;;  %v1290_v60 = vmax.f32 %v1286_v24, %v1288_v27  ;;  %1420 = vst [vmem:[#allocation2 + $0x10] sm:$0xff] %v1417_v58 }
 0x138   : > { %v1289_v7 = vmax.f32 %v1285_v50, %v1287_v53  ;;  %1418 = vst [vmem:[#allocation2] sm:$0xff] %v1415_v19  ;;  %1419 = vst [vmem:[#allocation2 + $0x8] sm:$0xff] %v1416_v32  ;;  %v6698_v38 = vld [vmem:[%s14753_s3 + $0x120] sm:$0xff] }
 0x139   : > { %v1292_v2 = vmax.f32 %v1290_v60, 0.0  ;;  %9284 = vmatpush3.bf16.msra.mxu1 %v9281_v61  ;;  %v9297_v61 = vpack.c.bf16 %v6701_v3, %v6700_v1  ;;  %v6772_v1 = vld [vmem:[%s14753_s3 + $0x370] sm:$0xff]  ;;  %v6773_v3 = vld [vmem:[%s14753_s3 + $0x378] sm:$0xff] }
 0x13a   : > { %9412 = vmatpush3.bf16.msra.mxu0 %v9409_v16  ;;  %v11699_v5 = vmax.f32 %v1289_v7, 0.0  ;;  %9286 = vmatprep.subr.bf16.mxu1 %v11686_v36  ;;  %v6705_v7 = vld [vmem:[%s14753_s3 + $0x158] sm:$0xff] }
 0x13b   : > { %9414 = vmatprep.subr.bf16.mxu0 %v11688_v47  ;;  %v11703_v13 = vld [vmem:[#allocation3 + $0x51] sm:$0xff]  ;;  %1295 = vst [vmem:[#allocation3 + $0x68] sm:$0xf] %v1292_v2 }
 0x13c   : > { %v11705_v33 = vld [vmem:[#allocation3 + $0x54] sm:$0xff]  ;;  %8064 = vmatmul.mubr.f32.gmra.mrb[42].mxu1 %v11703_v13  ;;  %1294 = vst [vmem:[#allocation3 + $0x60] sm:$0xff] %v11699_v5 }
 0x13d   : > { %8240 = vmatmul.mubr.f32.gmra.mrb[38].mxu0 %v11705_v33  ;;  %v6768_v2 = vld [vmem:[%s14753_s3 + $0x350] sm:$0xff] }
 0x13e   : > { %v1422_v49 = vld [vmem:[#allocation2 + $0x10] ss:$2 sm:$0xf]  ;;  %v1424_v63 = vld [vmem:[#allocation2 + $0x11] ss:$2 sm:$0xf] }
 0x13f   : > { %v1421_v19 = vld [vmem:[#allocation2] ss:$2 sm:$0xff]  ;;  %v1423_v22 = vld [vmem:[#allocation2 + $0x1] ss:$2 sm:$0xff]  ;;  %v1426_v48 = vmax.f32 %v1422_v49, %v1424_v63  ;;  %1556 = vst [vmem:[#allocation2 + $0x10] sm:$0xff] %v1553_v12  ;;  %v6769_v49 = vld [vmem:[%s14753_s3 + $0x358] sm:$0xff] }
 0x140   : > { %v1425_v58 = vmax.f32 %v1421_v19, %v1423_v22  ;;  %1554 = vst [vmem:[#allocation2] sm:$0xff] %v1551_v20  ;;  %1555 = vst [vmem:[#allocation2 + $0x8] sm:$0xff] %v1552_v45 }
 0x141   : > { %v1428_v32 = vmax.f32 %v1426_v48, 0.0 }
 0x142   : > { %v11719_v23 = vmax.f32 %v1425_v58, 0.0 }
 0x143   : > { %v11721_v39 = vld [vmem:[#allocation3 + $0x61] sm:$0xff]  ;;  %1431 = vst [vmem:[#allocation3 + $0x78] sm:$0xf] %v1428_v32 }
 0x144   : > { %v11723_v55 = vld [vmem:[#allocation3 + $0x64] sm:$0xff]  ;;  %8066 = vmatprep.mubr.f32.mxu1 %v11721_v39  ;;  %1430 = vst [vmem:[#allocation3 + $0x70] sm:$0xff] %v11719_v23 }
 0x145   : > { %8242 = vmatprep.mubr.f32.mxu0 %v11723_v55 }
 0x146   : > { %v1558_v52 = vld [vmem:[#allocation2 + $0x10] ss:$2 sm:$0xf]  ;;  %v1560_v62 = vld [vmem:[#allocation2 + $0x11] ss:$2 sm:$0xf] }
 0x147   : > { %v1557_v20 = vld [vmem:[#allocation2] ss:$2 sm:$0xff]  ;;  %v1559_v21 = vld [vmem:[#allocation2 + $0x1] ss:$2 sm:$0xff]  ;;  %v1562_v35 = vmax.f32 %v1558_v52, %v1560_v62 }
 0x148   : > { %v1561_v43 = vmax.f32 %v1557_v20, %v1559_v21  ;;  %v2235_v52 = vld [vmem:[#allocation3 + $0x2] sm:$0xff]  ;;  %v9433_v21 = vpack.c.bf16 %v6769_v49, %v6768_v2  ;;  %v6712_v49 = vld [vmem:[%s14753_s3 + $0x190] sm:$0xff] }
 0x149   : > { %v1564_v51 = vmax.f32 %v1562_v35, 0.0  ;;  %v6706_v35 = vld [vmem:[%s14753_s3 + $0x160] sm:$0xff] }
 0x14a   : > { %v11728_v12 = vmax.f32 %v1561_v43, 0.0 }
 0x14b   : > { %v11730_v45 = vld [vmem:[#allocation3 + $0x71] sm:$0xff]  ;;  %1567 = vst [vmem:[#allocation3 + $0x88] sm:$0xf] %v1564_v51  ;;  %v8001_v51 = vpop.f32.mrb[28].mxu0 }
 0x14c   : > { %v11732_v40 = vld [vmem:[#allocation3 + $0x74] sm:$0xff]  ;;  %8067 = vmatmul.mubr.f32.gmra.mrb[44].mxu1 %v11730_v45  ;;  %1566 = vst [vmem:[#allocation3 + $0x80] sm:$0xff] %v11728_v12  ;;  %v1794_v17 = vpop.f32.mrb[29].mxu0 }
 0x14d   : > { %8243 = vmatmul.mubr.f32.gmra.mrb[40].mxu0 %v11732_v40  ;;  %8101 = vmatprep.mubr.f32.mxu1 %v11393_v56  ;;  %v6762_v56 = vld [vmem:[%s14753_s3 + $0x320] sm:$0xff] }
 0x14e   : > { %8277 = vmatprep.mubr.f32.mxu0 %v11432_v30  ;;  %v9421_v44 = vpack.c.bf16 %v6763_v41, %v6762_v56  ;;  %v6708_v41 = vld [vmem:[%s14753_s3 + $0x170] sm:$0xff] }
 0x150   : > { %8102 = vmatmul.mubr.f32.vlgmr.msra.gmra.mrb[38].mxu1 %v11432_v30  ;;  %v9293_v30 = vpack.c.bf16 %v6699_v37, %v6698_v38  ;;  %v9309_v37 = vpack.c.bf16 %v6707_v59, %v6706_v35  ;;  %v6778_v35 = vld [vmem:[%s14753_s3 + $0x3a0] sm:$0xff] }
 0x151   : > { %8278 = vmatmul.mubr.f32.vlgmr.msra.gmra.mrb[34].mxu0 %v11481_v18  ;;  %9288 = vmatpush3.bf16.msra.mxu1 %v11686_v36  ;;  %v9301_v36 = vpack.c.bf16 %v6703_v46, %v6702_v34 }
 0x152   : > { %9416 = vmatpush3.bf16.msra.mxu0 %v11688_v47  ;;  %8104 = vmatprep.mubr.f32.mxu1 %v11481_v18  ;;  %v6764_v18 = vld [vmem:[%s14753_s3 + $0x330] sm:$0xff] }
 0x153   : > { %8280 = vmatprep.mubr.f32.mxu0 %v11545_v10  ;;  %9290 = vmatprep.subr.bf16.mxu1 %v9289_v26  ;;  %v9425_v16 = vpack.c.bf16 %v6765_v42, %v6764_v18  ;;  %v6704_v47 = vld [vmem:[%s14753_s3 + $0x150] sm:$0xff]  ;;  %v1800_v18 = vadd.f32 %v8001_v51, %v11367_v4 }
 0x154   : > { %9418 = vmatprep.subr.bf16.mxu0 %v9417_v29  ;;  %8105 = vmatmul.mubr.f32.gmra.mrb[40].mxu1 %v11545_v10  ;;  %v7984_v10 = vpop.f32.mrb[26].mxu1  ;;  %v9305_v20 = vpack.c.bf16 %v6705_v7, %v6704_v47 }
 0x155   : > { %8281 = vmatmul.mubr.f32.gmra.mrb[36].mxu0 %v11623_v54  ;;  %9292 = vmatpush3.bf16.msra.mxu1 %v9289_v26  ;;  %v1658_v57 = vpop.f32.mrb[27].mxu1  ;;  %v1664_v63 = vadd.f32 %v7984_v10, %v11367_v4  ;;  %v1795_v26 = vadd.f32 %v11367_v4, %v1794_v17 }
 0x156   : > { %9420 = vmatpush3.bf16.msra.mxu0 %v9417_v29  ;;  %8107 = vmatprep.mubr.f32.mxu1 %v11623_v54  ;;  %v6766_v54 = vld [vmem:[%s14753_s3 + $0x340] sm:$0xff]  ;;  %v1659_v24 = vadd.f32 %v11367_v4, %v1658_v57  ;;  %v7987_v27 = vpop.f32.mrb[28].mxu1  ;;  %v8004_v29 = vpop.f32.mrb[30].mxu0 }
 0x157   : > { %8283 = vmatprep.mubr.f32.mxu0 %v11665_v14  ;;  %9294 = vmatprep.subr.bf16.mxu1 %v9293_v30  ;;  %v1674_v50 = vadd.f32 %v7987_v27, %v11367_v4  ;;  %v1668_v53 = vpop.f32.mrb[29].mxu1  ;;  %v9429_v60 = vpack.c.bf16 %v6767_v28, %v6766_v54  ;;  %v1810_v38 = vadd.f32 %v8004_v29, %v11367_v4  ;;  %v6710_v28 = vld [vmem:[%s14753_s3 + $0x180] sm:$0xff]  ;;  %v6711_v27 = vld [vmem:[%s14753_s3 + $0x188] sm:$0xff] }
 0x158   : > { %9422 = vmatprep.subr.bf16.mxu0 %v9421_v44  ;;  %8108 = vmatmul.mubr.f32.gmra.mrb[42].mxu1 %v11665_v14  ;;  %v1669_v19 = vadd.f32 %v11367_v4, %v1668_v53  ;;  %v7990_v22 = vpop.f32.mrb[30].mxu1  ;;  %v9441_v54 = vpack.c.bf16 %v6773_v3, %v6772_v1 }
 0x159   : > { %8284 = vmatmul.mubr.f32.gmra.mrb[38].mxu0 %v11699_v5  ;;  %9296 = vmatpush3.bf16.msra.mxu1 %v9293_v30  ;;  %v1687_v48 = vmax.f32 %v1659_v24, %v1674_v50  ;;  %v1684_v58 = vadd.f32 %v7990_v22, %v11367_v4  ;;  %v1678_v32 = vpop.f32.mrb[31].mxu1  ;;  %v1804_v30 = vpop.f32.mrb[31].mxu0  ;;  %v1823_v42 = vmax.f32 %v1795_v26, %v1810_v38  ;;  %v6776_v22 = vld [vmem:[%s14753_s3 + $0x390] sm:$0xff] }
 0x15a   : > { %9424 = vmatpush3.bf16.msra.mxu0 %v9421_v44  ;;  %8110 = vmatprep.mubr.f32.mxu1 %v11699_v5  ;;  %v1679_v62 = vadd.f32 %v11367_v4, %v1678_v32  ;;  %v6709_v44 = vld [vmem:[%s14753_s3 + $0x178] sm:$0xff]  ;;  %v1805_v10 = vadd.f32 %v11367_v4, %v1804_v30 }
 0x15b   : > { %8286 = vmatprep.mubr.f32.mxu0 %v11719_v23  ;;  %9298 = vmatprep.subr.bf16.mxu1 %v9297_v61  ;;  %1690 = vst [vmem:[#allocation2] sm:$0xff] %v1687_v48  ;;  %v1689_v43 = vmax.f32 %v1669_v19, %v1684_v58  ;;  %v9313_v57 = vpack.c.bf16 %v6709_v44, %v6708_v41  ;;  %v6713_v19 = vld [vmem:[%s14753_s3 + $0x198] sm:$0xff]  ;;  %v11884_v58 = vld [vmem:[#allocation3 + $0x12] sm:$0xff] }
 0x15c   : > { %9426 = vmatprep.subr.bf16.mxu0 %v9425_v16  ;;  %8111 = vmatmul.mubr.f32.gmra.mrb[44].mxu1 %v11719_v23  ;;  %v1688_v11 = vmax.f32 %v1664_v63, %v1679_v62  ;;  %v6777_v48 = vld [vmem:[%s14753_s3 + $0x398] sm:$0xff]  ;;  %v9321_v32 = vpack.c.bf16 %v6713_v19, %v6712_v49  ;;  %v6714_v62 = vld [vmem:[%s14753_s3 + $0x1a0] sm:$0xff]  ;;  %v11924_v44 = vld [vmem:[#allocation3 + $0x52] sm:$0xff] }
 0x15d   : > { %8287 = vmatmul.mubr.f32.gmra.mrb[40].mxu0 %v11728_v12  ;;  %9300 = vmatpush3.bf16.msra.mxu1 %v9297_v61  ;;  %1692 = vst [vmem:[#allocation2 + $0x10] sm:$0xff] %v1689_v43  ;;  %v8007_v61 = vpop.f32.mrb[32].mxu0  ;;  %v6779_v43 = vld [vmem:[%s14753_s3 + $0x3a8] sm:$0xff] }
 0x15e   : > { %9428 = vmatpush3.bf16.msra.mxu0 %v9425_v16  ;;  %8145 = vmatprep.mubr.f32.mxu1 %v2235_v52  ;;  %1691 = vst [vmem:[#allocation2 + $0x8] sm:$0xff] %v1688_v11  ;;  %v1820_v16 = vadd.f32 %v8007_v61, %v11367_v4  ;;  %v1814_v34 = vpop.f32.mrb[33].mxu0  ;;  %v9449_v52 = vpack.c.bf16 %v6777_v48, %v6776_v22  ;;  %v6783_v61 = vld [vmem:[%s14753_s3 + $0x3c8] sm:$0xff] }
 0x15f   : > { %8321 = vmatprep.mubr.f32.mxu0 %v11495_v25  ;;  %9302 = vmatprep.subr.bf16.mxu1 %v9301_v36  ;;  %v6771_v25 = vld [vmem:[%s14753_s3 + $0x368] sm:$0xff]  ;;  %v1815_v46 = vadd.f32 %v11367_v4, %v1814_v34  ;;  %v9453_v26 = vpack.c.bf16 %v6779_v43, %v6778_v35  ;;  %v6790_v35 = vld [vmem:[%s14753_s3 + $0x400] sm:$0xff] }
 0x160   : > { %9430 = vmatprep.subr.bf16.mxu0 %v9429_v60  ;;  %v9437_v56 = vpack.c.bf16 %v6771_v25, %v6770_v0  ;;  %v1825_v24 = vmax.f32 %v1805_v10, %v1820_v16  ;;  %v6775_v4 = vld [vmem:[%s14753_s3 + $0x388] sm:$0xff]  ;;  %v6717_v25 = vld [vmem:[%s14753_s3 + $0x1b8] sm:$0xff]  ;;  %v6782_v10 = vld [vmem:[%s14753_s3 + $0x3c0] sm:$0xff] }
 0x161   : > { %9304 = vmatpush3.bf16.msra.mxu1 %v9301_v36  ;;  %v6774_v36 = vld [vmem:[%s14753_s3 + $0x380] sm:$0xff]  ;;  %v1824_v47 = vmax.f32 %v1800_v18, %v1815_v46  ;;  %v11904_v0 = vld [vmem:[#allocation3 + $0x32] sm:$0xff] }
 0x162   : > { %9432 = vmatpush3.bf16.msra.mxu0 %v9429_v60  ;;  %9306 = vmatprep.subr.bf16.mxu1 %v9305_v20  ;;  %v9317_v60 = vpack.c.bf16 %v6711_v27, %v6710_v28  ;;  %v9445_v7 = vpack.c.bf16 %v6775_v4, %v6774_v36  ;;  %v6718_v18 = vld [vmem:[%s14753_s3 + $0x1c0] sm:$0xff]  ;;  %v11949_v34 = vld [vmem:[#allocation3 + $0x72] sm:$0xff]  ;;  %v6721_v28 = vld [vmem:[%s14753_s3 + $0x1d8] sm:$0xff] }
 0x163   : > { %9434 = vmatprep.subr.bf16.mxu0 %v9433_v21  ;;  %v11951_v46 = vld [vmem:[#allocation3 + $0x81] sm:$0xff]  ;;  %v6784_v36 = vld [vmem:[%s14753_s3 + $0x3d0] sm:$0xff]  ;;  %v6787_v49 = vld [vmem:[%s14753_s3 + $0x3e8] sm:$0xff] }
 0x164   : > { %v11868_v2 = vld [vmem:[#allocation2 + $0x10] ss:$2 sm:$0xf]  ;;  %v11873_v63 = vld [vmem:[#allocation2 + $0x11] ss:$2 sm:$0xf] }
 0x165   : > { %9308 = vmatpush3.bf16.msra.mxu1 %v9305_v20  ;;  %v11864_v50 = vld [vmem:[#allocation2] ss:$2 sm:$0xff]  ;;  %v11866_v53 = vld [vmem:[#allocation2 + $0x1] ss:$2 sm:$0xff]  ;;  %1828 = vst [vmem:[#allocation2 + $0x10] sm:$0xff] %v1825_v24  ;;  %v6785_v4 = vld [vmem:[%s14753_s3 + $0x3d8] sm:$0xff]  ;;  %v1698_v19 = vmax.f32 %v11868_v2, %v11873_v63 }
 0x166   : > { %9436 = vmatpush3.bf16.msra.mxu0 %v9433_v21  ;;  %9310 = vmatprep.subr.bf16.mxu1 %v9309_v37  ;;  %1826 = vst [vmem:[#allocation2] sm:$0xff] %v1823_v42  ;;  %1827 = vst [vmem:[#allocation2 + $0x8] sm:$0xff] %v1824_v47  ;;  %v6715_v20 = vld [vmem:[%s14753_s3 + $0x1a8] sm:$0xff]  ;;  %v11894_v21 = vld [vmem:[#allocation3 + $0x22] sm:$0xff]  ;;  %v1697_v16 = vmax.f32 %v11864_v50, %v11866_v53  ;;  %v9465_v50 = vpack.c.bf16 %v6785_v4, %v6784_v36 }
 0x167   : > { %9438 = vmatprep.subr.bf16.mxu0 %v9437_v56  ;;  %v9325_v17 = vpack.c.bf16 %v6715_v20, %v6714_v62  ;;  %v6719_v42 = vld [vmem:[%s14753_s3 + $0x1c8] sm:$0xff]  ;;  %v2373_v27 = vld [vmem:[#allocation3 + $0x3] sm:$0xff]  ;;  %v6788_v62 = vld [vmem:[%s14753_s3 + $0x3f0] sm:$0xff] }
 0x168   : > { %v11956_v24 = vmax.f32 %v1697_v16, 0.0  ;;  %v6722_v53 = vld [vmem:[%s14753_s3 + $0x1e0] sm:$0xff]  ;;  %v6789_v2 = vld [vmem:[%s14753_s3 + $0x3f8] sm:$0xff]  ;;  %v6791_v43 = vld [vmem:[%s14753_s3 + $0x408] sm:$0xff] }
 0x169   : > { %9312 = vmatpush3.bf16.msra.mxu1 %v9309_v37  ;;  %v6780_v37 = vld [vmem:[%s14753_s3 + $0x3b0] sm:$0xff]  ;;  %v9473_v20 = vpack.c.bf16 %v6789_v2, %v6788_v62  ;;  %v12048_v16 = vld [vmem:[#allocation3 + $0x82] sm:$0xff] }
 0x16a   : > { %9440 = vmatpush3.bf16.msra.mxu0 %v9437_v56  ;;  %9314 = vmatprep.subr.bf16.mxu1 %v9313_v57  ;;  %v6781_v56 = vld [vmem:[%s14753_s3 + $0x3b8] sm:$0xff]  ;;  %1702 = vst [vmem:[#allocation3 + $0x90] sm:$0xff] %v11956_v24  ;;  %v6804_v4 = vld [vmem:[%s14753_s3 + $0x470] sm:$0xff] }
 0x16b   : > { %9442 = vmatprep.subr.bf16.mxu0 %v9441_v54  ;;  %v9457_v3 = vpack.c.bf16 %v6781_v56, %v6780_v37  ;;  %v12020_v56 = vld [vmem:[#allocation3 + $0x43] sm:$0xff] }
 0x16c   : > { %v1830_v29 = vld [vmem:[#allocation2 + $0x10] ss:$2 sm:$0xf]  ;;  %v1832_v38 = vld [vmem:[#allocation2 + $0x11] ss:$2 sm:$0xf] }
 0x16d   : > { %9316 = vmatpush3.bf16.msra.mxu1 %v9313_v57  ;;  %v1829_v51 = vld [vmem:[#allocation2] ss:$2 sm:$0xff]  ;;  %v1831_v59 = vld [vmem:[#allocation2 + $0x1] ss:$2 sm:$0xff]  ;;  %v1834_v30 = vmax.f32 %v1830_v29, %v1832_v38  ;;  %v9333_v57 = vpack.c.bf16 %v6719_v42, %v6718_v18  ;;  %v6813_v62 = vld [vmem:[%s14753_s3 + $0x4b8] sm:$0xff] }
 0x16e   : > { %9444 = vmatpush3.bf16.msra.mxu0 %v9441_v54  ;;  %9318 = vmatprep.subr.bf16.mxu1 %v9317_v60  ;;  %v1833_v11 = vmax.f32 %v1829_v51, %v1831_v59  ;;  %v9461_v54 = vpack.c.bf16 %v6783_v61, %v6782_v10  ;;  %v9477_v51 = vpack.c.bf16 %v6791_v43, %v6790_v35  ;;  %v6792_v59 = vld [vmem:[%s14753_s3 + $0x410] sm:$0xff]  ;;  %v6795_v29 = vld [vmem:[%s14753_s3 + $0x428] sm:$0xff]  ;;  %v6798_v18 = vld [vmem:[%s14753_s3 + $0x440] sm:$0xff] }
 0x16f   : > { %9446 = vmatprep.subr.bf16.mxu0 %v9445_v7  ;;  %v12017_v38 = vld [vmem:[#allocation3 + $0x33] sm:$0xff]  ;;  %v12105_v43 = vld [vmem:[#allocation3 + $0x83] sm:$0xff] }
 0x170   : > { %8146 = vmatmul.mubr.f32.vlgmr.msra.gmra.mrb[38].mxu1 %v11884_v58  ;;  %v1835_v41 = vmax.f32 %v1833_v11, 0.0  ;;  %v6799_v42 = vld [vmem:[%s14753_s3 + $0x448] sm:$0xff] }
 0x171   : > { %8322 = vmatmul.mubr.f32.vlgmr.msra.gmra.mrb[34].mxu0 %v11559_v6  ;;  %8148 = vmatprep.mubr.f32.mxu1 %v11894_v21  ;;  %v6716_v6 = vld [vmem:[%s14753_s3 + $0x1b0] sm:$0xff]  ;;  %v9493_v61 = vpack.c.bf16 %v6799_v42, %v6798_v18  ;;  %v6823_v18 = vld [vmem:[%s14753_s3 + $0x508] sm:$0xff] }
 0x172   : > { %9320 = vmatpush3.bf16.msra.mxu1 %v9317_v60  ;;  %8324 = vmatprep.mubr.f32.mxu0 %v11634_v15  ;;  %v11914_v15 = vld [vmem:[#allocation3 + $0x42] sm:$0xff]  ;;  %1838 = vst [vmem:[#allocation3 + $0xa0] sm:$0xff] %v1835_v41  ;;  %v9329_v1 = vpack.c.bf16 %v6717_v25, %v6716_v6  ;;  %v6723_v60 = vld [vmem:[%s14753_s3 + $0x1e8] sm:$0xff]  ;;  %v6796_v41 = vld [vmem:[%s14753_s3 + $0x430] sm:$0xff] }
 0x173   : > { %9448 = vmatpush3.bf16.msra.mxu0 %v9445_v7  ;;  %9322 = vmatprep.subr.bf16.mxu1 %v9321_v32  ;;  %v6786_v7 = vld [vmem:[%s14753_s3 + $0x3e0] sm:$0xff]  ;;  %v9341_v22 = vpack.c.bf16 %v6723_v60, %v6722_v53  ;;  %v6793_v6 = vld [vmem:[%s14753_s3 + $0x418] sm:$0xff]  ;;  %v2374_v25 = vld [vmem:[#allocation3 + $0x13] sm:$0xff] }
 0x174   : > { %9450 = vmatprep.subr.bf16.mxu0 %v9449_v52  ;;  %8149 = vmatmul.mubr.f32.gmra.mrb[40].mxu1 %v11904_v0  ;;  %v9469_v48 = vpack.c.bf16 %v6787_v49, %v6786_v7  ;;  %v9481_v11 = vpack.c.bf16 %v6793_v6, %v6792_v59  ;;  %v12045_v10 = vld [vmem:[#allocation3 + $0x73] sm:$0xff]  ;;  %v6806_v53 = vld [vmem:[%s14753_s3 + $0x480] sm:$0xff]  ;;  %v6817_v59 = vld [vmem:[%s14753_s3 + $0x4d8] sm:$0xff] }
 0x175   : > { %8325 = vmatmul.mubr.f32.gmra.mrb[36].mxu0 %v11676_v8  ;;  %8151 = vmatprep.mubr.f32.mxu1 %v11914_v15  ;;  %v1836_v8 = vmax.f32 %v1834_v30, 0.0  ;;  %v6797_v30 = vld [vmem:[%s14753_s3 + $0x438] sm:$0xff]  ;;  %v6807_v60 = vld [vmem:[%s14753_s3 + $0x488] sm:$0xff]  ;;  %v6808_v49 = vld [vmem:[%s14753_s3 + $0x490] sm:$0xff] }
 0x176   : > { %9324 = vmatpush3.bf16.msra.mxu1 %v9321_v32  ;;  %8327 = vmatprep.mubr.f32.mxu0 %v11703_v13  ;;  %v11934_v13 = vld [vmem:[#allocation3 + $0x62] sm:$0xff]  ;;  %v9509_v7 = vpack.c.bf16 %v6807_v60, %v6806_v53  ;;  %v10821_v6 = vld [vmem:[#allocation3 + $0x14] sm:$0xff] }
 0x177   : > { %9452 = vmatpush3.bf16.msra.mxu0 %v9449_v52  ;;  %9326 = vmatprep.subr.bf16.mxu1 %v9325_v17  ;;  %1839 = vst [vmem:[#allocation3 + $0xa8] sm:$0xf] %v1836_v8  ;;  %v6725_v32 = vld [vmem:[%s14753_s3 + $0x1f8] sm:$0xff]  ;;  %v1700_v52 = vmax.f32 %v1698_v19, 0.0  ;;  %v12031_v8 = vld [vmem:[#allocation3 + $0x53] sm:$0xff] }
 0x178   : > { %9454 = vmatprep.subr.bf16.mxu0 %v9453_v26  ;;  %8152 = vmatmul.mubr.f32.gmra.mrb[42].mxu1 %v11924_v44  ;;  %v6809_v19 = vld [vmem:[%s14753_s3 + $0x498] sm:$0xff]  ;;  %v6831_v53 = vld [vmem:[%s14753_s3 + $0x548] sm:$0xff] }
 0x179   : > { %8328 = vmatmul.mubr.f32.gmra.mrb[38].mxu0 %v11721_v39  ;;  %8154 = vmatprep.mubr.f32.mxu1 %v11934_v13  ;;  %v6720_v39 = vld [vmem:[%s14753_s3 + $0x1d0] sm:$0xff]  ;;  %1703 = vst [vmem:[#allocation3 + $0x98] sm:$0xf] %v1700_v52  ;;  %v12164_v60 = vld [vmem:[#allocation3 + $0x84] sm:$0xff] }
 0x17a   : > { %9328 = vmatpush3.bf16.msra.mxu1 %v9325_v17  ;;  %8330 = vmatprep.mubr.f32.mxu0 %v11730_v45  ;;  %v9337_v47 = vpack.c.bf16 %v6721_v28, %v6720_v39  ;;  %v12006_v17 = vld [vmem:[#allocation3 + $0x23] sm:$0xff]  ;;  %v6800_v39 = vld [vmem:[%s14753_s3 + $0x450] sm:$0xff] }
 0x17b   : > { %9456 = vmatpush3.bf16.msra.mxu0 %v9453_v26  ;;  %9330 = vmatprep.subr.bf16.mxu1 %v9329_v1  ;;  %v6794_v26 = vld [vmem:[%s14753_s3 + $0x420] sm:$0xff]  ;;  %v6812_v52 = vld [vmem:[%s14753_s3 + $0x4b0] sm:$0xff] }
 0x17c   : > { %9458 = vmatprep.subr.bf16.mxu0 %v9457_v3  ;;  %8155 = vmatmul.mubr.f32.gmra.mrb[44].mxu1 %v11949_v34  ;;  %v9485_v37 = vpack.c.bf16 %v6795_v29, %v6794_v26  ;;  %v6802_v28 = vld [vmem:[%s14753_s3 + $0x460] sm:$0xff]  ;;  %v9521_v2 = vpack.c.bf16 %v6813_v62, %v6812_v52  ;;  %v6819_v26 = vld [vmem:[%s14753_s3 + $0x4e8] sm:$0xff] }
 0x17d   : > { %8331 = vmatmul.mubr.f32.gmra.mrb[40].mxu0 %v11951_v46  ;;  %8189 = vmatprep.mubr.f32.mxu1 %v2373_v27  ;;  %v6803_v27 = vld [vmem:[%s14753_s3 + $0x468] sm:$0xff] }
 0x17e   : > { %9332 = vmatpush3.bf16.msra.mxu1 %v9329_v1  ;;  %8365 = vmatprep.mubr.f32.mxu0 %v11884_v58  ;;  %v6724_v58 = vld [vmem:[%s14753_s3 + $0x1f0] sm:$0xff]  ;;  %v9489_v1 = vpack.c.bf16 %v6797_v30, %v6796_v41  ;;  %v9501_v36 = vpack.c.bf16 %v6803_v27, %v6802_v28  ;;  %v6821_v41 = vld [vmem:[%s14753_s3 + $0x4f8] sm:$0xff]  ;;  %v6827_v28 = vld [vmem:[%s14753_s3 + $0x528] sm:$0xff] }
 0x17f   : > { %9460 = vmatpush3.bf16.msra.mxu0 %v9457_v3  ;;  %9334 = vmatprep.subr.bf16.mxu1 %v9333_v57  ;;  %v9345_v63 = vpack.c.bf16 %v6725_v32, %v6724_v58  ;;  %v12034_v3 = vld [vmem:[#allocation3 + $0x63] sm:$0xff]  ;;  %v6811_v58 = vld [vmem:[%s14753_s3 + $0x4a8] sm:$0xff] }
 0x180   : > { %9462 = vmatprep.subr.bf16.mxu0 %v9461_v54  ;;  %v12144_v27 = vld [vmem:[#allocation3 + $0x24] sm:$0xff]  ;;  %v6835_v52 = vld [vmem:[%s14753_s3 + $0x568] sm:$0xff] }
 0x182   : > { %9336 = vmatpush3.bf16.msra.mxu1 %v9333_v57  ;;  %v6801_v57 = vld [vmem:[%s14753_s3 + $0x458] sm:$0xff] }
 0x183   : > { %9464 = vmatpush3.bf16.msra.mxu0 %v9461_v54  ;;  %9338 = vmatprep.subr.bf16.mxu1 %v9337_v47  ;;  %v9497_v54 = vpack.c.bf16 %v6801_v57, %v6800_v39  ;;  %v6825_v39 = vld [vmem:[%s14753_s3 + $0x518] sm:$0xff] }
 0x184   : > { %9466 = vmatprep.subr.bf16.mxu0 %v9465_v50 }
 0x186   : > { %9340 = vmatpush3.bf16.msra.mxu1 %v9337_v47  ;;  %v6805_v47 = vld [vmem:[%s14753_s3 + $0x478] sm:$0xff] }
 0x187   : > { %9468 = vmatpush3.bf16.msra.mxu0 %v9465_v50  ;;  %9342 = vmatprep.subr.bf16.mxu1 %v9341_v22  ;;  %v9505_v50 = vpack.c.bf16 %v6805_v47, %v6804_v4  ;;  %v6828_v4 = vld [vmem:[%s14753_s3 + $0x530] sm:$0xff]  ;;  %v6829_v47 = vld [vmem:[%s14753_s3 + $0x538] sm:$0xff] }
 0x188   : > { %9470 = vmatprep.subr.bf16.mxu0 %v9469_v48 }
 0x18a   : > { %9344 = vmatpush3.bf16.msra.mxu1 %v9341_v22  ;;  %v9513_v22 = vpack.c.bf16 %v6809_v19, %v6808_v49  ;;  %v8018_v49 = vpop.f32.mrb[32].mxu1 }
 0x18b   : > { %9472 = vmatpush3.bf16.msra.mxu0 %v9469_v48  ;;  %9346 = vmatprep.subr.bf16.mxu1 %v9345_v63  ;;  %v6810_v48 = vld [vmem:[%s14753_s3 + $0x4a0] sm:$0xff] }
 0x18c   : > { %9474 = vmatprep.subr.bf16.mxu0 %v9473_v20  ;;  %v9517_v32 = vpack.c.bf16 %v6811_v58, %v6810_v48 }
 0x18e   : > { %9348 = vmatpush3.bf16.msra.mxu1 %v9345_v63  ;;  %v6814_v63 = vld [vmem:[%s14753_s3 + $0x4c0] sm:$0xff] }
 0x18f   : > { %9476 = vmatpush3.bf16.msra.mxu0 %v9473_v20  ;;  %v6815_v20 = vld [vmem:[%s14753_s3 + $0x4c8] sm:$0xff] }
 0x190   : > { %9478 = vmatprep.subr.bf16.mxu0 %v9477_v51  ;;  %v9525_v35 = vpack.c.bf16 %v6815_v20, %v6814_v63 }
 0x191   : > { %8190 = vmatmul.mubr.f32.vlgmr.msra.gmra.mrb[38].mxu1 %v2374_v25 }
 0x192   : > { %8366 = vmatmul.mubr.f32.vlgmr.msra.gmra.mrb[34].mxu0 %v11894_v21  ;;  %8192 = vmatprep.mubr.f32.mxu1 %v12006_v17 }
 0x193   : > { %8368 = vmatprep.mubr.f32.mxu0 %v11904_v0  ;;  %9480 = vmatpush3.bf16.msra.mxu0 %v9477_v51  ;;  %v6816_v51 = vld [vmem:[%s14753_s3 + $0x4d0] sm:$0xff] }
 0x194   : > { %9482 = vmatprep.subr.bf16.mxu0 %v9481_v11 }
 0x195   : > { %8193 = vmatmul.mubr.f32.gmra.mrb[40].mxu1 %v12017_v38 }
 0x196   : > { %8369 = vmatmul.mubr.f32.gmra.mrb[36].mxu0 %v11914_v15  ;;  %8195 = vmatprep.mubr.f32.mxu1 %v12020_v56 }
 0x197   : > { %8371 = vmatprep.mubr.f32.mxu0 %v11924_v44  ;;  %9484 = vmatpush3.bf16.msra.mxu0 %v9481_v11  ;;  %v6818_v11 = vld [vmem:[%s14753_s3 + $0x4e0] sm:$0xff] }
 0x198   : > { %9486 = vmatprep.subr.bf16.mxu0 %v9485_v37  ;;  %v9533_v29 = vpack.c.bf16 %v6819_v26, %v6818_v11  ;;  %v6836_v26 = vld [vmem:[%s14753_s3 + $0x570] sm:$0xff] }
 0x199   : > { %8196 = vmatmul.mubr.f32.gmra.mrb[42].mxu1 %v12031_v8 }
 0x19a   : > { %8372 = vmatmul.mubr.f32.gmra.mrb[38].mxu0 %v11934_v13  ;;  %8198 = vmatprep.mubr.f32.mxu1 %v12034_v3 }
 0x19b   : > { %8374 = vmatprep.mubr.f32.mxu0 %v11949_v34  ;;  %9488 = vmatpush3.bf16.msra.mxu0 %v9485_v37  ;;  %v6820_v37 = vld [vmem:[%s14753_s3 + $0x4f0] sm:$0xff] }
 0x19c   : > { %9490 = vmatprep.subr.bf16.mxu0 %v9489_v1  ;;  %v9537_v30 = vpack.c.bf16 %v6821_v41, %v6820_v37 }
 0x19d   : > { %8199 = vmatmul.mubr.f32.gmra.mrb[44].mxu1 %v12045_v10 }
 0x19e   : > { %8375 = vmatmul.mubr.f32.gmra.mrb[40].mxu0 %v12048_v16 }
 0x19f   : > { %9492 = vmatpush3.bf16.msra.mxu0 %v9489_v1  ;;  %8409 = vmatprep.mubr.f32.mxu0 %v2374_v25  ;;  %v9529_v25 = vpack.c.bf16 %v6817_v59, %v6816_v51  ;;  %v6822_v1 = vld [vmem:[%s14753_s3 + $0x500] sm:$0xff] }
 0x1a0   : > { %9494 = vmatprep.subr.bf16.mxu0 %v9493_v61  ;;  %v9541_v42 = vpack.c.bf16 %v6823_v18, %v6822_v1  ;;  %v6838_v1 = vld [vmem:[%s14753_s3 + $0x580] sm:$0xff]  ;;  %v6839_v18 = vld [vmem:[%s14753_s3 + $0x588] sm:$0xff] }
 0x1a3   : > { %9496 = vmatpush3.bf16.msra.mxu0 %v9493_v61  ;;  %v6824_v61 = vld [vmem:[%s14753_s3 + $0x510] sm:$0xff] }
 0x1a4   : > { %9498 = vmatprep.subr.bf16.mxu0 %v9497_v54  ;;  %v9545_v57 = vpack.c.bf16 %v6825_v39, %v6824_v61  ;;  %v6840_v61 = vld [vmem:[%s14753_s3 + $0x590] sm:$0xff]  ;;  %v6841_v39 = vld [vmem:[%s14753_s3 + $0x598] sm:$0xff] }
 0x1a7   : > { %9500 = vmatpush3.bf16.msra.mxu0 %v9497_v54  ;;  %v6826_v54 = vld [vmem:[%s14753_s3 + $0x520] sm:$0xff] }
 0x1a8   : > { %9502 = vmatprep.subr.bf16.mxu0 %v9501_v36 }
 0x1ab   : > { %9504 = vmatpush3.bf16.msra.mxu0 %v9501_v36  ;;  %v9549_v36 = vpack.c.bf16 %v6827_v28, %v6826_v54  ;;  %v6842_v54 = vld [vmem:[%s14753_s3 + $0x5a0] sm:$0xff]  ;;  %v6843_v28 = vld [vmem:[%s14753_s3 + $0x5a8] sm:$0xff] }
 0x1ac   : > { %9506 = vmatprep.subr.bf16.mxu0 %v9505_v50 }
 0x1af   : > { %9508 = vmatpush3.bf16.msra.mxu0 %v9505_v50  ;;  %v9553_v50 = vpack.c.bf16 %v6829_v47, %v6828_v4  ;;  %v12209_v4 = vld [vmem:[#allocation3 + $0x40] sm:$0xff]  ;;  %v9581_v47 = vpack.c.bf16 %v6843_v28, %v6842_v54  ;;  %v6868_v54 = vld [vmem:[%s14753_s3 + $0x670] sm:$0xff] }
 0x1b0   : > { %9510 = vmatprep.subr.bf16.mxu0 %v9509_v7 }
 0x1b2   : > { %8410 = vmatmul.mubr.f32.vlgmr.msra.gmra.mrb[34].mxu0 %v12006_v17 }
 0x1b3   : > { %8412 = vmatprep.mubr.f32.mxu0 %v12017_v38  ;;  %9512 = vmatpush3.bf16.msra.mxu0 %v9509_v7  ;;  %v6833_v7 = vld [vmem:[%s14753_s3 + $0x558] sm:$0xff] }
 0x1b4   : > { %9514 = vmatprep.subr.bf16.mxu0 %v9513_v22 }
 0x1b6   : > { %8413 = vmatmul.mubr.f32.gmra.mrb[36].mxu0 %v12020_v56 }
 0x1b7   : > { %8415 = vmatprep.mubr.f32.mxu0 %v12031_v8  ;;  %9516 = vmatpush3.bf16.msra.mxu0 %v9513_v22  ;;  %v10824_v22 = vld [vmem:[%s14752_s2] ss:$0 sm:$0xff] }
 0x1b8   : > { %9518 = vmatprep.subr.bf16.mxu0 %v9517_v32  ;;  %v1936_v63 = vadd.f32 %v10824_v22, %v8018_v49  ;;  %v10827_v49 = vld [vmem:[#allocation3 + $0x21] sm:$0xff] }
 0x1ba   : > { %8416 = vmatmul.mubr.f32.gmra.mrb[38].mxu0 %v12034_v3 }
 0x1bb   : > { %8418 = vmatprep.mubr.f32.mxu0 %v12045_v10  ;;  %9520 = vmatpush3.bf16.msra.mxu0 %v9517_v32  ;;  %v6834_v32 = vld [vmem:[%s14753_s3 + $0x560] sm:$0xff] }
 0x1bc   : > { %9522 = vmatprep.subr.bf16.mxu0 %v9521_v2 }
 0x1be   : > { %8419 = vmatmul.mubr.f32.gmra.mrb[40].mxu0 %v12105_v43 }
 0x1bf   : > { %9524 = vmatpush3.bf16.msra.mxu0 %v9521_v2  ;;  %8453 = vmatprep.mubr.f32.mxu0 %v10821_v6 }
 0x1c0   : > { %9526 = vmatprep.subr.bf16.mxu0 %v9525_v35 }
 0x1c3   : > { %9528 = vmatpush3.bf16.msra.mxu0 %v9525_v35 }
 0x1c4   : > { %9530 = vmatprep.subr.bf16.mxu0 %v9529_v25 }
 0x1c7   : > { %9532 = vmatpush3.bf16.msra.mxu0 %v9529_v25  ;;  %v9565_v25 = vpack.c.bf16 %v6835_v52, %v6834_v32  ;;  %v6855_v32 = vld [vmem:[%s14753_s3 + $0x608] sm:$0xff] }
 0x1c8   : > { %9534 = vmatprep.subr.bf16.mxu0 %v9533_v29 }
 0x1cb   : > { %9536 = vmatpush3.bf16.msra.mxu0 %v9533_v29  ;;  %v6837_v29 = vld [vmem:[%s14753_s3 + $0x578] sm:$0xff] }
 0x1cc   : > { %9538 = vmatprep.subr.bf16.mxu0 %v9537_v30 }
 0x1cf   : > { %9540 = vmatpush3.bf16.msra.mxu0 %v9537_v30  ;;  %v9569_v30 = vpack.c.bf16 %v6837_v29, %v6836_v26  ;;  %v12277_v26 = vld [vmem:[#allocation3 + $0x51] sm:$0xff]  ;;  %v12280_v29 = vld [vmem:[#allocation3 + $0x61] sm:$0xff] }
 0x1d0   : > { %9542 = vmatprep.subr.bf16.mxu0 %v9541_v42 }
 0x1d2   : > { %8454 = vmatmul.mubr.f32.vlgmr.msra.gmra.mrb[34].mxu0 %v12144_v27 }
 0x1d3   : > { %8456 = vmatprep.mubr.f32.mxu0 %v11636_v31  ;;  %9544 = vmatpush3.bf16.msra.mxu0 %v9541_v42  ;;  %v6830_v31 = vld [vmem:[%s14753_s3 + $0x540] sm:$0xff]  ;;  %v9573_v42 = vpack.c.bf16 %v6839_v18, %v6838_v1  ;;  %v12291_v18 = vld [vmem:[#allocation3 + $0x91] sm:$0xff] }
 0x1d4   : > { %9546 = vmatprep.subr.bf16.mxu0 %v9545_v57 }
 0x1d6   : > { %8457 = vmatmul.mubr.f32.gmra.mrb[36].mxu0 %v11678_v9  ;;  %v9557_v9 = vpack.c.bf16 %v6831_v53, %v6830_v31  ;;  %v6845_v31 = vld [vmem:[%s14753_s3 + $0x5b8] sm:$0xff] }
 0x1d7   : > { %8459 = vmatprep.mubr.f32.mxu0 %v11705_v33  ;;  %9548 = vmatpush3.bf16.msra.mxu0 %v9545_v57  ;;  %v6832_v33 = vld [vmem:[%s14753_s3 + $0x550] sm:$0xff]  ;;  %v9577_v57 = vpack.c.bf16 %v6841_v39, %v6840_v61  ;;  %v6865_v61 = vld [vmem:[%s14753_s3 + $0x658] sm:$0xff]  ;;  %v6867_v39 = vld [vmem:[%s14753_s3 + $0x668] sm:$0xff] }
 0x1d8   : > { %9550 = vmatprep.subr.bf16.mxu0 %v9549_v36  ;;  %v9561_v19 = vpack.c.bf16 %v6833_v7, %v6832_v33  ;;  %v6847_v33 = vld [vmem:[%s14753_s3 + $0x5c8] sm:$0xff]  ;;  %v6849_v7 = vld [vmem:[%s14753_s3 + $0x5d8] sm:$0xff] }
 0x1da   : > { %8460 = vmatmul.mubr.f32.gmra.mrb[38].mxu0 %v11723_v55  ;;  %v10823_v55 = vld [vmem:[#allocation3 + $0x20] sm:$0xff] }
 0x1db   : > { %8462 = vmatprep.mubr.f32.mxu0 %v11732_v40  ;;  %9552 = vmatpush3.bf16.msra.mxu0 %v9549_v36  ;;  %v1930_v40 = vpop.f32.mrb[33].mxu1  ;;  %v12206_v36 = vld [vmem:[#allocation3 + $0x30] sm:$0xff] }
 0x1dc   : > { %9554 = vmatprep.subr.bf16.mxu0 %v9553_v50  ;;  %v1931_v48 = vadd.f32 %v10824_v22, %v1930_v40  ;;  %v8021_v58 = vpop.f32.mrb[34].mxu1 }
 0x1dd   : > { %v1946_v62 = vadd.f32 %v10824_v22, %v8021_v58  ;;  %v1940_v2 = vpop.f32.mrb[35].mxu1  ;;  %v6854_v58 = vld [vmem:[%s14753_s3 + $0x600] sm:$0xff] }
 0x1de   : > { %8463 = vmatmul.mubr.f32.gmra.mrb[40].mxu0 %v12164_v60  ;;  %v1941_v20 = vadd.f32 %v10824_v22, %v1940_v2  ;;  %v8024_v35 = vpop.f32.mrb[36].mxu1  ;;  %v9605_v52 = vpack.c.bf16 %v6855_v32, %v6854_v58  ;;  %v6857_v2 = vld [vmem:[%s14753_s3 + $0x618] sm:$0xff]  ;;  %v6886_v32 = vld [vmem:[%s14753_s3 + $0x700] sm:$0xff] }
 0x1df   : > { %9556 = vmatpush3.bf16.msra.mxu0 %v9553_v50  ;;  %8497 = vmatprep.mubr.f32.mxu0 %v10823_v55  ;;  %v1959_v51 = vmax.f32 %v1931_v48, %v1946_v62  ;;  %v1956_v59 = vadd.f32 %v10824_v22, %v8024_v35  ;;  %v1950_v6 = vpop.f32.mrb[37].mxu1  ;;  %v6844_v50 = vld [vmem:[%s14753_s3 + $0x5b0] sm:$0xff]  ;;  %v6851_v55 = vld [vmem:[%s14753_s3 + $0x5e8] sm:$0xff] }
 0x1e0   : > { %9558 = vmatprep.subr.bf16.mxu0 %v9557_v9  ;;  %v1951_v11 = vadd.f32 %v10824_v22, %v1950_v6  ;;  %v9585_v53 = vpack.c.bf16 %v6845_v31, %v6844_v50  ;;  %v6853_v22 = vld [vmem:[%s14753_s3 + $0x5f8] sm:$0xff]  ;;  %v6856_v62 = vld [vmem:[%s14753_s3 + $0x610] sm:$0xff]  ;;  %v6859_v35 = vld [vmem:[%s14753_s3 + $0x628] sm:$0xff] }
 0x1e1   : > { %v1961_v37 = vmax.f32 %v1941_v20, %v1956_v59  ;;  %1962 = vst [vmem:[#allocation2] sm:$0xff] %v1959_v51  ;;  %v6858_v20 = vld [vmem:[%s14753_s3 + $0x620] sm:$0xff]  ;;  %v12265_v51 = vld [vmem:[#allocation3 + $0x31] sm:$0xff] }
 0x1e2   : > { %v1960_v41 = vmax.f32 %v1936_v63, %v1951_v11  ;;  %v9609_v63 = vpack.c.bf16 %v6857_v2, %v6856_v62  ;;  %v12268_v59 = vld [vmem:[#allocation3 + $0x41] sm:$0xff]  ;;  %v9613_v6 = vpack.c.bf16 %v6859_v35, %v6858_v20  ;;  %v6871_v50 = vld [vmem:[%s14753_s3 + $0x688] sm:$0xff]  ;;  %v6888_v2 = vld [vmem:[%s14753_s3 + $0x710] sm:$0xff] }
 0x1e3   : > { %9560 = vmatpush3.bf16.msra.mxu0 %v9557_v9  ;;  %1964 = vst [vmem:[#allocation2 + $0x10] sm:$0xff] %v1961_v37  ;;  %v6846_v9 = vld [vmem:[%s14753_s3 + $0x5c0] sm:$0xff]  ;;  %v6861_v11 = vld [vmem:[%s14753_s3 + $0x638] sm:$0xff] }
 0x1e4   : > { %9562 = vmatprep.subr.bf16.mxu0 %v9561_v19  ;;  %1963 = vst [vmem:[#allocation2 + $0x8] sm:$0xff] %v1960_v41  ;;  %v6862_v41 = vld [vmem:[%s14753_s3 + $0x640] sm:$0xff] }
 0x1e5   : > { %v6890_v35 = vld [vmem:[%s14753_s3 + $0x720] sm:$0xff] }
 0x1e7   : > { %9564 = vmatpush3.bf16.msra.mxu0 %v9561_v19  ;;  %v6852_v19 = vld [vmem:[%s14753_s3 + $0x5f0] sm:$0xff] }
 0x1e8   : > { %9566 = vmatprep.subr.bf16.mxu0 %v9565_v25  ;;  %v9601_v48 = vpack.c.bf16 %v6853_v22, %v6852_v19  ;;  %v6883_v19 = vld [vmem:[%s14753_s3 + $0x6e8] sm:$0xff] }
 0x1eb   : > { %9568 = vmatpush3.bf16.msra.mxu0 %v9565_v25  ;;  %v6860_v25 = vld [vmem:[%s14753_s3 + $0x630] sm:$0xff] }
 0x1ec   : > { %9570 = vmatprep.subr.bf16.mxu0 %v9569_v30  ;;  %v9617_v37 = vpack.c.bf16 %v6861_v11, %v6860_v25  ;;  %v6892_v11 = vld [vmem:[%s14753_s3 + $0x730] sm:$0xff] }
 0x1ef   : > { %9572 = vmatpush3.bf16.msra.mxu0 %v9569_v30  ;;  %v6863_v30 = vld [vmem:[%s14753_s3 + $0x648] sm:$0xff] }
 0x1f0   : > { %9574 = vmatprep.subr.bf16.mxu0 %v9573_v42  ;;  %v9621_v1 = vpack.c.bf16 %v6863_v30, %v6862_v41  ;;  %v6895_v41 = vld [vmem:[%s14753_s3 + $0x748] sm:$0xff] }
 0x1f1   : > { %v12407_v30 = vld [vmem:[#allocation3 + $0x93] sm:$0xff] }
 0x1f2   : > { %8498 = vmatmul.mubr.f32.vlgmr.msra.gmra.mrb[34].mxu0 %v12206_v36 }
 0x1f3   : > { %8500 = vmatprep.mubr.f32.mxu0 %v12209_v4  ;;  %9576 = vmatpush3.bf16.msra.mxu0 %v9573_v42  ;;  %v6864_v42 = vld [vmem:[%s14753_s3 + $0x650] sm:$0xff] }
 0x1f4   : > { %9578 = vmatprep.subr.bf16.mxu0 %v9577_v57 }
 0x1f6   : > { %8501 = vmatmul.mubr.f32.gmra.mrb[36].mxu0 %v11665_v14  ;;  %v9589_v14 = vpack.c.bf16 %v6847_v33, %v6846_v9  ;;  %v6873_v9 = vld [vmem:[%s14753_s3 + $0x698] sm:$0xff] }
 0x1f7   : > { %8503 = vmatprep.mubr.f32.mxu0 %v11699_v5  ;;  %9580 = vmatpush3.bf16.msra.mxu0 %v9577_v57  ;;  %v6848_v5 = vld [vmem:[%s14753_s3 + $0x5d0] sm:$0xff] }
 0x1f8   : > { %9582 = vmatprep.subr.bf16.mxu0 %v9581_v47 }
 0x1fa   : > { %8504 = vmatmul.mubr.f32.gmra.mrb[38].mxu0 %v11719_v23  ;;  %v9593_v23 = vpack.c.bf16 %v6849_v7, %v6848_v5  ;;  %v6875_v5 = vld [vmem:[%s14753_s3 + $0x6a8] sm:$0xff] }
 0x1fb   : > { %8506 = vmatprep.mubr.f32.mxu0 %v11728_v12  ;;  %9584 = vmatpush3.bf16.msra.mxu0 %v9581_v47  ;;  %v6850_v12 = vld [vmem:[%s14753_s3 + $0x5e0] sm:$0xff] }
 0x1fc   : > { %9586 = vmatprep.subr.bf16.mxu0 %v9585_v53  ;;  %v9597_v40 = vpack.c.bf16 %v6851_v55, %v6850_v12  ;;  %v6870_v47 = vld [vmem:[%s14753_s3 + $0x680] sm:$0xff]  ;;  %v6879_v12 = vld [vmem:[%s14753_s3 + $0x6c8] sm:$0xff] }
 0x1fd   : > { %v9637_v31 = vpack.c.bf16 %v6871_v50, %v6870_v47  ;;  %v12349_v55 = vld [vmem:[#allocation3 + $0x92] sm:$0xff] }
 0x1fe   : > { %8507 = vmatmul.mubr.f32.gmra.mrb[40].mxu0 %v11956_v24  ;;  %v6903_v47 = vld [vmem:[%s14753_s3 + $0x788] sm:$0xff] }
 0x1ff   : > { %9588 = vmatpush3.bf16.msra.mxu0 %v9585_v53  ;;  %8541 = vmatprep.mubr.f32.mxu0 %v10827_v49  ;;  %v6872_v53 = vld [vmem:[%s14753_s3 + $0x690] sm:$0xff] }
 0x200   : > { %9590 = vmatprep.subr.bf16.mxu0 %v9589_v14  ;;  %v9641_v33 = vpack.c.bf16 %v6873_v9, %v6872_v53  ;;  %v6876_v49 = vld [vmem:[%s14753_s3 + $0x6b0] sm:$0xff] }
 0x201   : > { %v6904_v9 = vld [vmem:[%s14753_s3 + $0x790] sm:$0xff] }
 0x203   : > { %9592 = vmatpush3.bf16.msra.mxu0 %v9589_v14  ;;  %v6874_v14 = vld [vmem:[%s14753_s3 + $0x6a0] sm:$0xff] }
 0x204   : > { %9594 = vmatprep.subr.bf16.mxu0 %v9593_v23  ;;  %v9645_v7 = vpack.c.bf16 %v6875_v5, %v6874_v14 }
 0x207   : > { %9596 = vmatpush3.bf16.msra.mxu0 %v9593_v23  ;;  %v6877_v23 = vld [vmem:[%s14753_s3 + $0x6b8] sm:$0xff] }
 0x208   : > { %9598 = vmatprep.subr.bf16.mxu0 %v9597_v40 }
 0x20b   : > { %9600 = vmatpush3.bf16.msra.mxu0 %v9597_v40  ;;  %v6881_v40 = vld [vmem:[%s14753_s3 + $0x6d8] sm:$0xff] }
 0x20c   : > { %9602 = vmatprep.subr.bf16.mxu0 %v9601_v48 }
 0x20f   : > { %9604 = vmatpush3.bf16.msra.mxu0 %v9601_v48  ;;  %v6884_v48 = vld [vmem:[%s14753_s3 + $0x6f0] sm:$0xff] }
 0x210   : > { %9606 = vmatprep.subr.bf16.mxu0 %v9605_v52 }
 0x212   : > { %8542 = vmatmul.mubr.f32.vlgmr.msra.gmra.mrb[34].mxu0 %v12265_v51 }
 0x213   : > { %8544 = vmatprep.mubr.f32.mxu0 %v12268_v59  ;;  %9608 = vmatpush3.bf16.msra.mxu0 %v9605_v52  ;;  %v6887_v52 = vld [vmem:[%s14753_s3 + $0x708] sm:$0xff] }
 0x214   : > { %9610 = vmatprep.subr.bf16.mxu0 %v9609_v63  ;;  %v9669_v62 = vpack.c.bf16 %v6887_v52, %v6886_v32  ;;  %v6912_v32 = vld [vmem:[%s14753_s3 + $0x7d0] sm:$0xff]  ;;  %v6913_v52 = vld [vmem:[%s14753_s3 + $0x7d8] sm:$0xff] }
 0x216   : > { %8545 = vmatmul.mubr.f32.gmra.mrb[36].mxu0 %v12277_v26 }
 0x217   : > { %8547 = vmatprep.mubr.f32.mxu0 %v12280_v29  ;;  %9612 = vmatpush3.bf16.msra.mxu0 %v9609_v63  ;;  %v6889_v63 = vld [vmem:[%s14753_s3 + $0x718] sm:$0xff] }
 0x218   : > { %9614 = vmatprep.subr.bf16.mxu0 %v9613_v6  ;;  %v9673_v20 = vpack.c.bf16 %v6889_v63, %v6888_v2  ;;  %v6915_v2 = vld [vmem:[%s14753_s3 + $0x7e8] sm:$0xff] }
 0x21a   : > { %8548 = vmatmul.mubr.f32.gmra.mrb[38].mxu0 %v11730_v45  ;;  %v9625_v45 = vpack.c.bf16 %v6865_v61, %v6864_v42  ;;  %v6899_v42 = vld [vmem:[%s14753_s3 + $0x768] sm:$0xff] }
 0x21b   : > { %8550 = vmatprep.mubr.f32.mxu0 %v11951_v46  ;;  %9616 = vmatpush3.bf16.msra.mxu0 %v9613_v6  ;;  %v6866_v46 = vld [vmem:[%s14753_s3 + $0x660] sm:$0xff]  ;;  %v6891_v6 = vld [vmem:[%s14753_s3 + $0x728] sm:$0xff] }
 0x21c   : > { %9618 = vmatprep.subr.bf16.mxu0 %v9617_v37  ;;  %v9629_v57 = vpack.c.bf16 %v6867_v39, %v6866_v46  ;;  %v9677_v25 = vpack.c.bf16 %v6891_v6, %v6890_v35  ;;  %v6901_v39 = vld [vmem:[%s14753_s3 + $0x778] sm:$0xff]  ;;  %v6918_v6 = vld [vmem:[%s14753_s3 + $0x800] sm:$0xff] }
 0x21e   : > { %8551 = vmatmul.mubr.f32.gmra.mrb[40].mxu0 %v12291_v18 }
 0x21f   : > { %9620 = vmatpush3.bf16.msra.mxu0 %v9617_v37  ;;  %8585 = vmatprep.mubr.f32.mxu0 %v11894_v21  ;;  %v6869_v21 = vld [vmem:[%s14753_s3 + $0x678] sm:$0xff] }
 0x220   : > { %9622 = vmatprep.subr.bf16.mxu0 %v9621_v1  ;;  %v9633_v28 = vpack.c.bf16 %v6869_v21, %v6868_v54  ;;  %v6893_v37 = vld [vmem:[%s14753_s3 + $0x738] sm:$0xff] }
 0x223   : > { %9624 = vmatpush3.bf16.msra.mxu0 %v9621_v1  ;;  %v6897_v1 = vld [vmem:[%s14753_s3 + $0x758] sm:$0xff] }
 0x224   : > { %9626 = vmatprep.subr.bf16.mxu0 %v9625_v45 }
 0x227   : > { %9628 = vmatpush3.bf16.msra.mxu0 %v9625_v45 }
 0x228   : > { %9630 = vmatprep.subr.bf16.mxu0 %v9629_v57 }
 0x22b   : > { %9632 = vmatpush3.bf16.msra.mxu0 %v9629_v57 }
 0x22c   : > { %9634 = vmatprep.subr.bf16.mxu0 %v9633_v28 }
 0x22f   : > { %9636 = vmatpush3.bf16.msra.mxu0 %v9633_v28  ;;  %v6902_v28 = vld [vmem:[%s14753_s3 + $0x780] sm:$0xff] }
 0x230   : > { %9638 = vmatprep.subr.bf16.mxu0 %v9637_v31 }
 0x232   : > { %8586 = vmatmul.mubr.f32.vlgmr.msra.gmra.mrb[34].mxu0 %v11904_v0  ;;  %v9649_v0 = vpack.c.bf16 %v6877_v23, %v6876_v49  ;;  %v6906_v49 = vld [vmem:[%s14753_s3 + $0x7a0] sm:$0xff]  ;;  %v6907_v23 = vld [vmem:[%s14753_s3 + $0x7a8] sm:$0xff] }
 0x233   : > { %8588 = vmatprep.mubr.f32.mxu0 %v11914_v15  ;;  %9640 = vmatpush3.bf16.msra.mxu0 %v9637_v31  ;;  %v6878_v15 = vld [vmem:[%s14753_s3 + $0x6c0] sm:$0xff]  ;;  %v9701_v31 = vpack.c.bf16 %v6903_v47, %v6902_v28  ;;  %v12553_v28 = vld [vmem:[#allocation3 + $0x80] sm:$0xff] }
 0x234   : > { %9642 = vmatprep.subr.bf16.mxu0 %v9641_v33 }
 0x236   : > { %8589 = vmatmul.mubr.f32.gmra.mrb[36].mxu0 %v11924_v44  ;;  %v9653_v44 = vpack.c.bf16 %v6879_v12, %v6878_v15  ;;  %v12466_v15 = vld [vmem:[#allocation3 + $0x44] sm:$0xff]  ;;  %v9709_v12 = vpack.c.bf16 %v6907_v23, %v6906_v49  ;;  %v6931_v49 = vld [vmem:[%s14753_s3 + $0x868] sm:$0xff] }
 0x237   : > { %8591 = vmatprep.mubr.f32.mxu0 %v11934_v13  ;;  %9644 = vmatpush3.bf16.msra.mxu0 %v9641_v33  ;;  %v6880_v13 = vld [vmem:[%s14753_s3 + $0x6d0] sm:$0xff]  ;;  %v6905_v33 = vld [vmem:[%s14753_s3 + $0x798] sm:$0xff] }
 0x238   : > { %9646 = vmatprep.subr.bf16.mxu0 %v9645_v7  ;;  %v9705_v5 = vpack.c.bf16 %v6905_v33, %v6904_v9  ;;  %v6929_v9 = vld [vmem:[%s14753_s3 + $0x858] sm:$0xff] }
 0x239   : > { %v12563_v33 = vld [vmem:[#allocation3 + $0xa0] sm:$0xff] }
 0x23a   : > { %8592 = vmatmul.mubr.f32.gmra.mrb[38].mxu0 %v11949_v34  ;;  %v9657_v34 = vpack.c.bf16 %v6881_v40, %v6880_v13  ;;  %v6909_v13 = vld [vmem:[%s14753_s3 + $0x7b8] sm:$0xff]  ;;  %v12475_v40 = vld [vmem:[#allocation3 + $0x54] sm:$0xff] }
 0x23b   : > { %8594 = vmatprep.mubr.f32.mxu0 %v12048_v16  ;;  %9648 = vmatpush3.bf16.msra.mxu0 %v9645_v7  ;;  %v6882_v16 = vld [vmem:[%s14753_s3 + $0x6e0] sm:$0xff] }
 0x23c   : > { %9650 = vmatprep.subr.bf16.mxu0 %v9649_v0  ;;  %v9661_v22 = vpack.c.bf16 %v6883_v19, %v6882_v16  ;;  %v6910_v19 = vld [vmem:[%s14753_s3 + $0x7c0] sm:$0xff] }
 0x23e   : > { %8595 = vmatmul.mubr.f32.gmra.mrb[40].mxu0 %v12349_v55 }
 0x23f   : > { %9652 = vmatpush3.bf16.msra.mxu0 %v9649_v0  ;;  %8629 = vmatprep.mubr.f32.mxu0 %v12006_v17  ;;  %v6885_v17 = vld [vmem:[%s14753_s3 + $0x6f8] sm:$0xff]  ;;  %v12463_v0 = vld [vmem:[#allocation3 + $0x34] sm:$0xff] }
 0x240   : > { %9654 = vmatprep.subr.bf16.mxu0 %v9653_v44  ;;  %v9665_v58 = vpack.c.bf16 %v6885_v17, %v6884_v48  ;;  %v12487_v48 = vld [vmem:[#allocation3 + $0x74] sm:$0xff] }
 0x243   : > { %9656 = vmatpush3.bf16.msra.mxu0 %v9653_v44  ;;  %v6908_v44 = vld [vmem:[%s14753_s3 + $0x7b0] sm:$0xff] }
 0x244   : > { %9658 = vmatprep.subr.bf16.mxu0 %v9657_v34  ;;  %v9713_v16 = vpack.c.bf16 %v6909_v13, %v6908_v44  ;;  %v6934_v13 = vld [vmem:[%s14753_s3 + $0x880] sm:$0xff] }
 0x247   : > { %9660 = vmatpush3.bf16.msra.mxu0 %v9657_v34  ;;  %v12478_v34 = vld [vmem:[#allocation3 + $0x64] sm:$0xff] }
 0x248   : > { %9662 = vmatprep.subr.bf16.mxu0 %v9661_v22 }
 0x24b   : > { %9664 = vmatpush3.bf16.msra.mxu0 %v9661_v22  ;;  %v6911_v22 = vld [vmem:[%s14753_s3 + $0x7c8] sm:$0xff] }
 0x24c   : > { %9666 = vmatprep.subr.bf16.mxu0 %v9665_v58  ;;  %v9717_v17 = vpack.c.bf16 %v6911_v22, %v6910_v19  ;;  %v6936_v22 = vld [vmem:[%s14753_s3 + $0x890] sm:$0xff] }
 0x24f   : > { %9668 = vmatpush3.bf16.msra.mxu0 %v9665_v58  ;;  %v12491_v58 = vld [vmem:[#allocation3 + $0x94] sm:$0xff] }
 0x250   : > { %9670 = vmatprep.subr.bf16.mxu0 %v9669_v62 }
 0x252   : > { %8630 = vmatmul.mubr.f32.vlgmr.msra.gmra.mrb[34].mxu0 %v12017_v38  ;;  %v9681_v38 = vpack.c.bf16 %v6893_v37, %v6892_v11  ;;  %v6920_v37 = vld [vmem:[%s14753_s3 + $0x810] sm:$0xff] }
 0x253   : > { %8632 = vmatprep.mubr.f32.mxu0 %v12020_v56  ;;  %9672 = vmatpush3.bf16.msra.mxu0 %v9669_v62  ;;  %v6894_v56 = vld [vmem:[%s14753_s3 + $0x740] sm:$0xff] }
 0x254   : > { %9674 = vmatprep.subr.bf16.mxu0 %v9673_v20  ;;  %v6914_v62 = vld [vmem:[%s14753_s3 + $0x7e0] sm:$0xff] }
 0x255   : > { %v9725_v63 = vpack.c.bf16 %v6915_v2, %v6914_v62  ;;  %v6940_v2 = vld [vmem:[%s14753_s3 + $0x8b0] sm:$0xff] }
 0x256   : > { %8633 = vmatmul.mubr.f32.gmra.mrb[36].mxu0 %v12031_v8  ;;  %v9685_v8 = vpack.c.bf16 %v6895_v41, %v6894_v56  ;;  %v6922_v41 = vld [vmem:[%s14753_s3 + $0x820] sm:$0xff] }
 0x257   : > { %8635 = vmatprep.mubr.f32.mxu0 %v12034_v3  ;;  %9676 = vmatpush3.bf16.msra.mxu0 %v9673_v20  ;;  %v6896_v3 = vld [vmem:[%s14753_s3 + $0x750] sm:$0xff] }
 0x258   : > { %9678 = vmatprep.subr.bf16.mxu0 %v9677_v25  ;;  %v6916_v20 = vld [vmem:[%s14753_s3 + $0x7f0] sm:$0xff] }
 0x25a   : > { %8636 = vmatmul.mubr.f32.gmra.mrb[38].mxu0 %v12045_v10  ;;  %v9689_v10 = vpack.c.bf16 %v6897_v1, %v6896_v3  ;;  %v12532_v3 = vld [vmem:[#allocation3 + $0x50] sm:$0xff] }
 0x25b   : > { %8638 = vmatprep.mubr.f32.mxu0 %v12105_v43  ;;  %9680 = vmatpush3.bf16.msra.mxu0 %v9677_v25  ;;  %v6898_v43 = vld [vmem:[%s14753_s3 + $0x760] sm:$0xff]  ;;  %v6919_v25 = vld [vmem:[%s14753_s3 + $0x808] sm:$0xff] }
 0x25c   : > { %9682 = vmatprep.subr.bf16.mxu0 %v9681_v38  ;;  %v9693_v45 = vpack.c.bf16 %v6899_v42, %v6898_v43  ;;  %v9733_v11 = vpack.c.bf16 %v6919_v25, %v6918_v6  ;;  %v6925_v43 = vld [vmem:[%s14753_s3 + $0x838] sm:$0xff]  ;;  %v1965_v6 = vld [vmem:[#allocation2] ss:$2 sm:$0xff]  ;;  %v1967_v25 = vld [vmem:[#allocation2 + $0x1] ss:$2 sm:$0xff] }
 0x25d   : > { %v12541_v42 = vld [vmem:[#allocation3 + $0x60] sm:$0xff] }
 0x25e   : > { %8639 = vmatmul.mubr.f32.gmra.mrb[40].mxu0 %v12407_v30 }
 0x25f   : > { %9684 = vmatpush3.bf16.msra.mxu0 %v9681_v38  ;;  %8673 = vmatprep.mubr.f32.mxu0 %v12144_v27  ;;  %v6900_v27 = vld [vmem:[%s14753_s3 + $0x770] sm:$0xff]  ;;  %v6921_v38 = vld [vmem:[%s14753_s3 + $0x818] sm:$0xff] }
 0x260   : > { %9686 = vmatprep.subr.bf16.mxu0 %v9685_v8  ;;  %v9697_v54 = vpack.c.bf16 %v6901_v39, %v6900_v27  ;;  %v9737_v56 = vpack.c.bf16 %v6921_v38, %v6920_v37  ;;  %v6926_v39 = vld [vmem:[%s14753_s3 + $0x840] sm:$0xff] }
 0x263   : > { %9688 = vmatpush3.bf16.msra.mxu0 %v9685_v8  ;;  %v6923_v8 = vld [vmem:[%s14753_s3 + $0x828] sm:$0xff] }
 0x264   : > { %v12423_v61 = vpop.f32.mrb[38].mxu1  ;;  %9690 = vmatprep.subr.bf16.mxu0 %v9689_v10  ;;  %v9741_v1 = vpack.c.bf16 %v6923_v8, %v6922_v41  ;;  %v6944_v41 = vld [vmem:[%s14753_s3 + $0x8d0] sm:$0xff]  ;;  %v6945_v8 = vld [vmem:[%s14753_s3 + $0x8d8] sm:$0xff] }
 0x265   : > { %v12425_v46 = vpop.f32.mrb[39].mxu1 }
 0x267   : > { %9692 = vmatpush3.bf16.msra.mxu0 %v9689_v10  ;;  %v6924_v10 = vld [vmem:[%s14753_s3 + $0x830] sm:$0xff] }
 0x268   : > { %v12433_v57 = vpop.f32.mrb[40].mxu1  ;;  %9694 = vmatprep.subr.bf16.mxu0 %v9693_v45  ;;  %v9745_v27 = vpack.c.bf16 %v6925_v43, %v6924_v10  ;;  %v6946_v10 = vld [vmem:[%s14753_s3 + $0x8e0] sm:$0xff]  ;;  %v6947_v43 = vld [vmem:[%s14753_s3 + $0x8e8] sm:$0xff] }
 0x269   : > { %v12435_v21 = vpop.f32.mrb[41].mxu1 }
 0x26b   : > { %9696 = vmatpush3.bf16.msra.mxu0 %v9693_v45  ;;  %v12544_v45 = vld [vmem:[#allocation3 + $0x70] sm:$0xff] }
 0x26c   : > { %v12443_v50 = vpop.f32.mrb[42].mxu1  ;;  %9698 = vmatprep.subr.bf16.mxu0 %v9697_v54 }
 0x26d   : > { %v12445_v53 = vpop.f32.mrb[43].mxu1 }
 0x26f   : > { %9700 = vmatpush3.bf16.msra.mxu0 %v9697_v54  ;;  %v6927_v54 = vld [vmem:[%s14753_s3 + $0x848] sm:$0xff] }
 0x270   : > { %v12453_v14 = vpop.f32.mrb[44].mxu1  ;;  %9702 = vmatprep.subr.bf16.mxu0 %v9701_v31  ;;  %v9749_v47 = vpack.c.bf16 %v6927_v54, %v6926_v39  ;;  %v1968_v39 = vld [vmem:[#allocation2 + $0x11] ss:$2 sm:$0xf] }
 0x271   : > { %v12455_v7 = vpop.f32.mrb[45].mxu1 }
 0x272   : > { %8674 = vmatmul.mubr.f32.vlgmr.msra.gmra.mrb[34].mxu0 %v12463_v0 }
 0x273   : > { %8676 = vmatprep.mubr.f32.mxu0 %v12466_v15  ;;  %9704 = vmatpush3.bf16.msra.mxu0 %v9701_v31  ;;  %v6928_v31 = vld [vmem:[%s14753_s3 + $0x850] sm:$0xff] }
 0x274   : > { %9706 = vmatprep.subr.bf16.mxu0 %v9705_v5 }
 0x276   : > { %8677 = vmatmul.mubr.f32.gmra.mrb[36].mxu0 %v12475_v40 }
 0x277   : > { %8679 = vmatprep.mubr.f32.mxu0 %v12478_v34  ;;  %9708 = vmatpush3.bf16.msra.mxu0 %v9705_v5  ;;  %v6930_v5 = vld [vmem:[%s14753_s3 + $0x860] sm:$0xff] }
 0x278   : > { %9710 = vmatprep.subr.bf16.mxu0 %v9709_v12  ;;  %v9757_v23 = vpack.c.bf16 %v6931_v49, %v6930_v5  ;;  %v6950_v49 = vld [vmem:[%s14753_s3 + $0x900] sm:$0xff] }
 0x27a   : > { %8680 = vmatmul.mubr.f32.gmra.mrb[38].mxu0 %v12487_v48 }
 0x27b   : > { %8682 = vmatprep.mubr.f32.mxu0 %v12164_v60  ;;  %9712 = vmatpush3.bf16.msra.mxu0 %v9709_v12  ;;  %v9721_v60 = vpack.c.bf16 %v6913_v52, %v6912_v32  ;;  %v6932_v12 = vld [vmem:[%s14753_s3 + $0x870] sm:$0xff]  ;;  %v6938_v52 = vld [vmem:[%s14753_s3 + $0x8a0] sm:$0xff] }
 0x27c   : > { %9714 = vmatprep.subr.bf16.mxu0 %v9713_v16 }
 0x27e   : > { %8683 = vmatmul.mubr.f32.gmra.mrb[40].mxu0 %v12491_v58 }
 0x27f   : > { %9716 = vmatpush3.bf16.msra.mxu0 %v9713_v16  ;;  %8717 = vmatprep.mubr.f32.mxu0 %v12206_v36  ;;  %v6917_v36 = vld [vmem:[%s14753_s3 + $0x7f8] sm:$0xff]  ;;  %v6935_v16 = vld [vmem:[%s14753_s3 + $0x888] sm:$0xff] }
 0x280   : > { %9718 = vmatprep.subr.bf16.mxu0 %v9717_v17  ;;  %v9729_v35 = vpack.c.bf16 %v6917_v36, %v6916_v20  ;;  %v9765_v19 = vpack.c.bf16 %v6935_v16, %v6934_v13  ;;  %v12606_v20 = vld [vmem:[#allocation3 + $0x71] sm:$0xff]  ;;  %v6942_v36 = vld [vmem:[%s14753_s3 + $0x8c0] sm:$0xff] }
 0x281   : > { %v6954_v16 = vld [vmem:[%s14753_s3 + $0x920] sm:$0xff] }
 0x283   : > { %9720 = vmatpush3.bf16.msra.mxu0 %v9717_v17  ;;  %v6937_v17 = vld [vmem:[%s14753_s3 + $0x898] sm:$0xff] }
 0x284   : > { %9722 = vmatprep.subr.bf16.mxu0 %v9721_v60  ;;  %v9769_v32 = vpack.c.bf16 %v6937_v17, %v6936_v22  ;;  %v12661_v22 = vld [vmem:[#allocation3 + $0x42] sm:$0xff]  ;;  %v12664_v17 = vld [vmem:[#allocation3 + $0x52] sm:$0xff] }
 0x287   : > { %9724 = vmatpush3.bf16.msra.mxu0 %v9721_v60  ;;  %v6939_v60 = vld [vmem:[%s14753_s3 + $0x8a8] sm:$0xff] }
 0x288   : > { %9726 = vmatprep.subr.bf16.mxu0 %v9725_v63  ;;  %v9773_v62 = vpack.c.bf16 %v6939_v60, %v6938_v52  ;;  %v6956_v52 = vld [vmem:[%s14753_s3 + $0x930] sm:$0xff]  ;;  %v6957_v60 = vld [vmem:[%s14753_s3 + $0x938] sm:$0xff] }
 0x28b   : > { %9728 = vmatpush3.bf16.msra.mxu0 %v9725_v63  ;;  %v6941_v63 = vld [vmem:[%s14753_s3 + $0x8b8] sm:$0xff] }
 0x28c   : > { %9730 = vmatprep.subr.bf16.mxu0 %v9729_v35 }
 0x28f   : > { %9732 = vmatpush3.bf16.msra.mxu0 %v9729_v35  ;;  %v6943_v35 = vld [vmem:[%s14753_s3 + $0x8c8] sm:$0xff] }
 0x290   : > { %9734 = vmatprep.subr.bf16.mxu0 %v9733_v11  ;;  %v9781_v37 = vpack.c.bf16 %v6943_v35, %v6942_v36  ;;  %v6959_v36 = vld [vmem:[%s14753_s3 + $0x948] sm:$0xff]  ;;  %v12685_v35 = vld [vmem:[#allocation3 + $0x82] sm:$0xff] }
 0x292   : > { %8718 = vmatmul.mubr.f32.vlgmr.msra.gmra.mrb[34].mxu0 %v12209_v4 }
 0x293   : > { %8720 = vmatprep.mubr.f32.mxu0 %v12532_v3  ;;  %9736 = vmatpush3.bf16.msra.mxu0 %v9733_v11  ;;  %v12615_v11 = vld [vmem:[#allocation3 + $0x81] sm:$0xff] }
 0x294   : > { %9738 = vmatprep.subr.bf16.mxu0 %v9737_v56 }
 0x296   : > { %8721 = vmatmul.mubr.f32.gmra.mrb[36].mxu0 %v12541_v42 }
 0x297   : > { %8723 = vmatprep.mubr.f32.mxu0 %v12544_v45  ;;  %9740 = vmatpush3.bf16.msra.mxu0 %v9737_v56  ;;  %v12621_v56 = vld [vmem:[#allocation3 + $0xa1] sm:$0xff] }
 0x298   : > { %9742 = vmatprep.subr.bf16.mxu0 %v9741_v1 }
 0x29a   : > { %8724 = vmatmul.mubr.f32.gmra.mrb[38].mxu0 %v12553_v28 }
 0x29b   : > { %8726 = vmatprep.mubr.f32.mxu0 %v11956_v24  ;;  %9744 = vmatpush3.bf16.msra.mxu0 %v9741_v1  ;;  %v9753_v24 = vpack.c.bf16 %v6929_v9, %v6928_v31  ;;  %v9785_v1 = vpack.c.bf16 %v6945_v8, %v6944_v41  ;;  %v6948_v9 = vld [vmem:[%s14753_s3 + $0x8f0] sm:$0xff]  ;;  %v6962_v8 = vld [vmem:[%s14753_s3 + $0x960] sm:$0xff] }
 0x29c   : > { %9746 = vmatprep.subr.bf16.mxu0 %v9745_v27  ;;  %v10850_v41 = vld [vmem:[#allocation3 + $0x33] sm:$0xff] }
 0x29e   : > { %8727 = vmatmul.mubr.f32.gmra.mrb[40].mxu0 %v12563_v33 }
 0x29f   : > { %9748 = vmatpush3.bf16.msra.mxu0 %v9745_v27  ;;  %8761 = vmatprep.mubr.f32.mxu0 %v12265_v51  ;;  %v6933_v51 = vld [vmem:[%s14753_s3 + $0x878] sm:$0xff]  ;;  %v1966_v27 = vld [vmem:[#allocation2 + $0x10] ss:$2 sm:$0xf] }
 0x2a0   : > { %9750 = vmatprep.subr.bf16.mxu0 %v9749_v47  ;;  %v9761_v44 = vpack.c.bf16 %v6933_v51, %v6932_v12  ;;  %v1970_v54 = vmax.f32 %v1966_v27, %v1968_v39  ;;  %v6952_v51 = vld [vmem:[%s14753_s3 + $0x910] sm:$0xff]  ;;  %v6966_v39 = vld [vmem:[%s14753_s3 + $0x980] sm:$0xff] }
 0x2a2   : > { %v1972_v31 = vmax.f32 %v1970_v54, 0.0  ;;  %v6967_v54 = vld [vmem:[%s14753_s3 + $0x988] sm:$0xff] }
 0x2a3   : > { %9752 = vmatpush3.bf16.msra.mxu0 %v9749_v47  ;;  %v9789_v47 = vpack.c.bf16 %v6947_v43, %v6946_v10  ;;  %v6964_v10 = vld [vmem:[%s14753_s3 + $0x970] sm:$0xff]  ;;  %v6965_v43 = vld [vmem:[%s14753_s3 + $0x978] sm:$0xff] }
 0x2a4   : > { %9754 = vmatprep.subr.bf16.mxu0 %v9753_v24  ;;  %1975 = vst [vmem:[#allocation3 + $0xb8] sm:$0xf] %v1972_v31  ;;  %v9825_v27 = vpack.c.bf16 %v6965_v43, %v6964_v10  ;;  %v6968_v31 = vld [vmem:[%s14753_s3 + $0x990] sm:$0xff]  ;;  %v6983_v10 = vld [vmem:[%s14753_s3 + $0xa08] sm:$0xff] }
 0x2a7   : > { %9756 = vmatpush3.bf16.msra.mxu0 %v9753_v24  ;;  %v6949_v24 = vld [vmem:[%s14753_s3 + $0x8f8] sm:$0xff] }
 0x2a8   : > { %9758 = vmatprep.subr.bf16.mxu0 %v9757_v23  ;;  %v9793_v5 = vpack.c.bf16 %v6949_v24, %v6948_v9  ;;  %v6969_v9 = vld [vmem:[%s14753_s3 + $0x998] sm:$0xff] }
 0x2a9   : > { %v9833_v24 = vpack.c.bf16 %v6969_v9, %v6968_v31  ;;  %v6987_v31 = vld [vmem:[%s14753_s3 + $0xa28] sm:$0xff] }
 0x2ab   : > { %9760 = vmatpush3.bf16.msra.mxu0 %v9757_v23  ;;  %v6951_v23 = vld [vmem:[%s14753_s3 + $0x908] sm:$0xff] }
 0x2ac   : > { %9762 = vmatprep.subr.bf16.mxu0 %v9761_v44  ;;  %v9797_v12 = vpack.c.bf16 %v6951_v23, %v6950_v49  ;;  %v6971_v49 = vld [vmem:[%s14753_s3 + $0x9a8] sm:$0xff]  ;;  %v12728_v23 = vld [vmem:[#allocation3 + $0x43] sm:$0xff] }
 0x2af   : > { %9764 = vmatpush3.bf16.msra.mxu0 %v9761_v44  ;;  %v6953_v44 = vld [vmem:[%s14753_s3 + $0x918] sm:$0xff] }
 0x2b0   : > { %9766 = vmatprep.subr.bf16.mxu0 %v9765_v19  ;;  %v9801_v13 = vpack.c.bf16 %v6953_v44, %v6952_v51  ;;  %v6972_v44 = vld [vmem:[%s14753_s3 + $0x9b0] sm:$0xff] }
 0x2b2   : > { %8762 = vmatmul.mubr.f32.vlgmr.msra.gmra.mrb[34].mxu0 %v12268_v59 }
 0x2b3   : > { %8764 = vmatprep.mubr.f32.mxu0 %v12277_v26  ;;  %9768 = vmatpush3.bf16.msra.mxu0 %v9765_v19  ;;  %v9777_v26 = vpack.c.bf16 %v6941_v63, %v6940_v2  ;;  %v6955_v19 = vld [vmem:[%s14753_s3 + $0x928] sm:$0xff]  ;;  %v9809_v63 = vpack.c.bf16 %v6957_v60, %v6956_v52  ;;  %v6974_v52 = vld [vmem:[%s14753_s3 + $0x9c0] sm:$0xff] }
 0x2b4   : > { %9770 = vmatprep.subr.bf16.mxu0 %v9769_v32  ;;  %v12676_v2 = vld [vmem:[#allocation3 + $0x72] sm:$0xff] }
 0x2b5   : > { %v6975_v60 = vld [vmem:[%s14753_s3 + $0x9c8] sm:$0xff] }
 0x2b6   : > { %8765 = vmatmul.mubr.f32.gmra.mrb[36].mxu0 %v12280_v29  ;;  %v1969_v29 = vmax.f32 %v1965_v6, %v1967_v25  ;;  %v12689_v25 = vld [vmem:[#allocation3 + $0xa2] sm:$0xff] }
 0x2b7   : > { %8767 = vmatprep.mubr.f32.mxu0 %v12606_v20  ;;  %9772 = vmatpush3.bf16.msra.mxu0 %v9769_v32  ;;  %v9805_v32 = vpack.c.bf16 %v6955_v19, %v6954_v16  ;;  %v12740_v16 = vld [vmem:[#allocation3 + $0x63] sm:$0xff]  ;;  %v12743_v19 = vld [vmem:[#allocation3 + $0x73] sm:$0xff] }
 0x2b8   : > { %9774 = vmatprep.subr.bf16.mxu0 %v9773_v62  ;;  %v12619_v38 = vmax.f32 %v1969_v29, 0.0  ;;  %v6960_v29 = vld [vmem:[%s14753_s3 + $0x950] sm:$0xff] }
 0x2ba   : > { %8768 = vmatmul.mubr.f32.gmra.mrb[38].mxu0 %v12615_v11  ;;  %1974 = vst [vmem:[#allocation3 + $0xb0] sm:$0xff] %v12619_v38 }
 0x2bb   : > { %8770 = vmatprep.mubr.f32.mxu0 %v12291_v18  ;;  %9776 = vmatpush3.bf16.msra.mxu0 %v9773_v62  ;;  %v10844_v18 = vld [vmem:[#allocation3 + $0x32] sm:$0xff]  ;;  %v12673_v62 = vld [vmem:[#allocation3 + $0x62] sm:$0xff] }
 0x2bc   : > { %9778 = vmatprep.subr.bf16.mxu0 %v9777_v26 }
 0x2be   : > { %8771 = vmatmul.mubr.f32.gmra.mrb[40].mxu0 %v12621_v56 }
 0x2bf   : > { %9780 = vmatpush3.bf16.msra.mxu0 %v9777_v26  ;;  %8805 = vmatprep.mubr.f32.mxu0 %v10844_v18  ;;  %v6958_v26 = vld [vmem:[%s14753_s3 + $0x940] sm:$0xff]  ;;  %v6963_v18 = vld [vmem:[%s14753_s3 + $0x968] sm:$0xff] }
 0x2c0   : > { %9782 = vmatprep.subr.bf16.mxu0 %v9781_v37  ;;  %v9813_v6 = vpack.c.bf16 %v6959_v36, %v6958_v26  ;;  %v9845_v26 = vpack.c.bf16 %v6975_v60, %v6974_v52  ;;  %v12756_v36 = vld [vmem:[#allocation3 + $0xa3] sm:$0xff]  ;;  %v6995_v52 = vld [vmem:[%s14753_s3 + $0xa68] sm:$0xff] }
 0x2c3   : > { %9784 = vmatpush3.bf16.msra.mxu0 %v9781_v37  ;;  %v6961_v37 = vld [vmem:[%s14753_s3 + $0x958] sm:$0xff] }
 0x2c4   : > { %9786 = vmatprep.subr.bf16.mxu0 %v9785_v1 }
 0x2c7   : > { %9788 = vmatpush3.bf16.msra.mxu0 %v9785_v1  ;;  %v9821_v1 = vpack.c.bf16 %v6963_v18, %v6962_v8  ;;  %v6980_v8 = vld [vmem:[%s14753_s3 + $0x9f0] sm:$0xff] }
 0x2c8   : > { %9790 = vmatprep.subr.bf16.mxu0 %v9789_v47 }
 0x2cb   : > { %9792 = vmatpush3.bf16.msra.mxu0 %v9789_v47  ;;  %v9829_v47 = vpack.c.bf16 %v6967_v54, %v6966_v39  ;;  %v6985_v39 = vld [vmem:[%s14753_s3 + $0xa18] sm:$0xff] }
 0x2cc   : > { %9794 = vmatprep.subr.bf16.mxu0 %v9793_v5 }
 0x2cf   : > { %9796 = vmatpush3.bf16.msra.mxu0 %v9793_v5  ;;  %v6970_v5 = vld [vmem:[%s14753_s3 + $0x9a0] sm:$0xff] }
 0x2d0   : > { %9798 = vmatprep.subr.bf16.mxu0 %v9797_v12  ;;  %v9837_v51 = vpack.c.bf16 %v6971_v49, %v6970_v5  ;;  %v6989_v5 = vld [vmem:[%s14753_s3 + $0xa38] sm:$0xff]  ;;  %v6991_v49 = vld [vmem:[%s14753_s3 + $0xa48] sm:$0xff] }
 0x2d2   : > { %8806 = vmatmul.mubr.f32.vlgmr.msra.gmra.mrb[34].mxu0 %v12661_v22 }
 0x2d3   : > { %8808 = vmatprep.mubr.f32.mxu0 %v12664_v17  ;;  %9800 = vmatpush3.bf16.msra.mxu0 %v9797_v12  ;;  %v12731_v12 = vld [vmem:[#allocation3 + $0x53] sm:$0xff] }
 0x2d4   : > { %9802 = vmatprep.subr.bf16.mxu0 %v9801_v13 }
 0x2d6   : > { %8809 = vmatmul.mubr.f32.gmra.mrb[36].mxu0 %v12673_v62 }
 0x2d7   : > { %8811 = vmatprep.mubr.f32.mxu0 %v12676_v2  ;;  %9804 = vmatpush3.bf16.msra.mxu0 %v9801_v13  ;;  %v6973_v13 = vld [vmem:[%s14753_s3 + $0x9b8] sm:$0xff] }
 0x2d8   : > { %9806 = vmatprep.subr.bf16.mxu0 %v9805_v32 }
 0x2da   : > { %8812 = vmatmul.mubr.f32.gmra.mrb[38].mxu0 %v12685_v35 }
 0x2db   : > { %8814 = vmatprep.mubr.f32.mxu0 %v12349_v55  ;;  %9808 = vmatpush3.bf16.msra.mxu0 %v9805_v32  ;;  %v9817_v55 = vpack.c.bf16 %v6961_v37, %v6960_v29  ;;  %v9841_v32 = vpack.c.bf16 %v6973_v13, %v6972_v44  ;;  %v6977_v29 = vld [vmem:[%s14753_s3 + $0x9d8] sm:$0xff]  ;;  %v6978_v37 = vld [vmem:[%s14753_s3 + $0x9e0] sm:$0xff]  ;;  %v6992_v44 = vld [vmem:[%s14753_s3 + $0xa50] sm:$0xff] }
 0x2dc   : > { %9810 = vmatprep.subr.bf16.mxu0 %v9809_v63  ;;  %v6993_v13 = vld [vmem:[%s14753_s3 + $0xa58] sm:$0xff] }
 0x2de   : > { %8815 = vmatmul.mubr.f32.gmra.mrb[40].mxu0 %v12689_v25 }
 0x2df   : > { %9812 = vmatpush3.bf16.msra.mxu0 %v9809_v63  ;;  %8849 = vmatprep.mubr.f32.mxu0 %v10850_v41  ;;  %v12752_v63 = vld [vmem:[#allocation3 + $0x83] sm:$0xff]  ;;  %v6979_v41 = vld [vmem:[%s14753_s3 + $0x9e8] sm:$0xff] }
 0x2e0   : > { %9814 = vmatprep.subr.bf16.mxu0 %v9813_v6 }
 0x2e3   : > { %9816 = vmatpush3.bf16.msra.mxu0 %v9813_v6  ;;  %v6976_v6 = vld [vmem:[%s14753_s3 + $0x9d0] sm:$0xff] }
 0x2e4   : > { %9818 = vmatprep.subr.bf16.mxu0 %v9817_v55 }
 0x2e7   : > { %9820 = vmatpush3.bf16.msra.mxu0 %v9817_v55  ;;  %v9853_v55 = vpack.c.bf16 %v6979_v41, %v6978_v37  ;;  %v7000_v41 = vld [vmem:[%s14753_s3 + $0xa90] sm:$0xff] }
 0x2e8   : > { %9822 = vmatprep.subr.bf16.mxu0 %v9821_v1 }
 0x2eb   : > { %9824 = vmatpush3.bf16.msra.mxu0 %v9821_v1  ;;  %v6982_v1 = vld [vmem:[%s14753_s3 + $0xa00] sm:$0xff] }
 0x2ec   : > { %9826 = vmatprep.subr.bf16.mxu0 %v9825_v27  ;;  %v9861_v43 = vpack.c.bf16 %v6983_v10, %v6982_v1  ;;  %v7004_v10 = vld [vmem:[%s14753_s3 + $0xab0] sm:$0xff] }
 0x2ef   : > { %9828 = vmatpush3.bf16.msra.mxu0 %v9825_v27  ;;  %v6984_v27 = vld [vmem:[%s14753_s3 + $0xa10] sm:$0xff] }
 0x2f0   : > { %9830 = vmatprep.subr.bf16.mxu0 %v9829_v47  ;;  %v9865_v54 = vpack.c.bf16 %v6985_v39, %v6984_v27  ;;  %v7007_v27 = vld [vmem:[%s14753_s3 + $0xac8] sm:$0xff] }
 0x2f1   : > { %v10857_v39 = vld [vmem:[#allocation3 + $0x90] sm:$0xff] }
 0x2f2   : > { %8850 = vmatmul.mubr.f32.vlgmr.msra.gmra.mrb[34].mxu0 %v12728_v23 }
 0x2f3   : > { %8852 = vmatprep.mubr.f32.mxu0 %v12731_v12  ;;  %9832 = vmatpush3.bf16.msra.mxu0 %v9829_v47  ;;  %v6986_v47 = vld [vmem:[%s14753_s3 + $0xa20] sm:$0xff] }
 0x2f4   : > { %9834 = vmatprep.subr.bf16.mxu0 %v9833_v24  ;;  %v9869_v9 = vpack.c.bf16 %v6987_v31, %v6986_v47  ;;  %v5322_v47 = vld [vmem:[%s14755_s5 + $0x8] sm:$0xff]  ;;  %v5321_v31 = vld [vmem:[%s14755_s5] sm:$0xff] }
 0x2f6   : > { %8853 = vmatmul.mubr.f32.gmra.mrb[36].mxu0 %v12740_v16 }
 0x2f7   : > { %8855 = vmatprep.mubr.f32.mxu0 %v12743_v19  ;;  %9836 = vmatpush3.bf16.msra.mxu0 %v9833_v24  ;;  %v6988_v24 = vld [vmem:[%s14753_s3 + $0xa30] sm:$0xff] }
 0x2f8   : > { %9838 = vmatprep.subr.bf16.mxu0 %v9837_v51 }
 0x2fa   : > { %8856 = vmatmul.mubr.f32.gmra.mrb[38].mxu0 %v12752_v63 }
 0x2fb   : > { %8858 = vmatprep.mubr.f32.mxu0 %v12407_v30  ;;  %9840 = vmatpush3.bf16.msra.mxu0 %v9837_v51  ;;  %v9849_v30 = vpack.c.bf16 %v6977_v29, %v6976_v6  ;;  %v12812_v51 = vld [vmem:[#allocation3 + $0x84] sm:$0xff] }
 0x2fc   : > { %9842 = vmatprep.subr.bf16.mxu0 %v9841_v32  ;;  %v6998_v29 = vld [vmem:[%s14753_s3 + $0xa80] sm:$0xff] }
 0x2fe   : > { %8859 = vmatmul.mubr.f32.gmra.mrb[40].mxu0 %v12756_v36 }
 0x2ff   : > { %9844 = vmatpush3.bf16.msra.mxu0 %v9841_v32  ;;  %8893 = vmatprep.mubr.f32.mxu0 %v12463_v0  ;;  %v6981_v0 = vld [vmem:[%s14753_s3 + $0x9f8] sm:$0xff]  ;;  %v6994_v32 = vld [vmem:[%s14753_s3 + $0xa60] sm:$0xff] }
 0x300   : > { %9846 = vmatprep.subr.bf16.mxu0 %v9845_v26  ;;  %v9857_v18 = vpack.c.bf16 %v6981_v0, %v6980_v8  ;;  %v9885_v60 = vpack.c.bf16 %v6995_v52, %v6994_v32  ;;  %v7002_v0 = vld [vmem:[%s14753_s3 + $0xaa0] sm:$0xff]  ;;  %v5332_v32 = vld [vmem:[%s14755_s5 + $0x58] sm:$0xff] }
 0x303   : > { %9848 = vmatpush3.bf16.msra.mxu0 %v9845_v26  ;;  %v6996_v26 = vld [vmem:[%s14753_s3 + $0xa70] sm:$0xff] }
 0x304   : > { %9850 = vmatprep.subr.bf16.mxu0 %v9849_v30 }
 0x307   : > { %9852 = vmatpush3.bf16.msra.mxu0 %v9849_v30  ;;  %v6999_v30 = vld [vmem:[%s14753_s3 + $0xa88] sm:$0xff] }
 0x308   : > { %9854 = vmatprep.subr.bf16.mxu0 %v9853_v55  ;;  %v9893_v37 = vpack.c.bf16 %v6999_v30, %v6998_v29  ;;  %v5334_v29 = vld [vmem:[%s14755_s5 + $0x68] sm:$0xff]  ;;  %v5336_v30 = vld [vmem:[%s14755_s5 + $0x78] sm:$0xff] }
 0x30b   : > { %9856 = vmatpush3.bf16.msra.mxu0 %v9853_v55  ;;  %v7001_v55 = vld [vmem:[%s14753_s3 + $0xa98] sm:$0xff] }
 0x30c   : > { %9858 = vmatprep.subr.bf16.mxu0 %v9857_v18  ;;  %v9897_v8 = vpack.c.bf16 %v7001_v55, %v7000_v41  ;;  %v7013_v41 = vld [vmem:[%s14753_s3 + $0xaf8] sm:$0xff] }
 0x30f   : > { %9860 = vmatpush3.bf16.msra.mxu0 %v9857_v18  ;;  %v7003_v18 = vld [vmem:[%s14753_s3 + $0xaa8] sm:$0xff] }
 0x310   : > { %9862 = vmatprep.subr.bf16.mxu0 %v9861_v43  ;;  %v9901_v1 = vpack.c.bf16 %v7003_v18, %v7002_v0  ;;  %v5333_v0 = vld [vmem:[%s14755_s5 + $0x60] sm:$0xff]  ;;  %v5335_v18 = vld [vmem:[%s14755_s5 + $0x70] sm:$0xff] }
 0x312   : > { %8894 = vmatmul.mubr.f32.vlgmr.msra.gmra.mrb[34].mxu0 %v12466_v15  ;;  %v9873_v15 = vpack.c.bf16 %v6989_v5, %v6988_v24  ;;  %v5326_v24 = vld [vmem:[%s14755_s5 + $0x28] sm:$0xff]  ;;  %v5328_v5 = vld [vmem:[%s14755_s5 + $0x38] sm:$0xff] }
 0x313   : > { %8896 = vmatprep.mubr.f32.mxu0 %v12475_v40  ;;  %9864 = vmatpush3.bf16.msra.mxu0 %v9861_v43  ;;  %v6990_v40 = vld [vmem:[%s14753_s3 + $0xa40] sm:$0xff]  ;;  %v7005_v43 = vld [vmem:[%s14753_s3 + $0xab8] sm:$0xff] }
 0x314   : > { %9866 = vmatprep.subr.bf16.mxu0 %v9865_v54 }
 0x316   : > { %8897 = vmatmul.mubr.f32.gmra.mrb[36].mxu0 %v12478_v34  ;;  %v9877_v34 = vpack.c.bf16 %v6991_v49, %v6990_v40  ;;  %v10025_v49 = vpack.c.bf16 %v5328_v5, %v5326_v24  ;;  %v5341_v24 = vld [vmem:[%s14755_s5 + $0xa0] sm:$0xff]  ;;  %v5343_v5 = vld [vmem:[%s14755_s5 + $0xb0] sm:$0xff] }
 0x317   : > { %8899 = vmatprep.mubr.f32.mxu0 %v12487_v48  ;;  %9868 = vmatpush3.bf16.msra.mxu0 %v9865_v54  ;;  %v12816_v48 = vld [vmem:[#allocation3 + $0xa4] sm:$0xff] }
 0x318   : > { %9870 = vmatprep.subr.bf16.mxu0 %v9869_v9  ;;  %v7009_v54 = vld [vmem:[%s14753_s3 + $0xad8] sm:$0xff] }
 0x31a   : > { %8900 = vmatmul.mubr.f32.gmra.mrb[38].mxu0 %v12812_v51 }
 0x31b   : > { %8902 = vmatprep.mubr.f32.mxu0 %v12491_v58  ;;  %9872 = vmatpush3.bf16.msra.mxu0 %v9869_v9  ;;  %v9881_v58 = vpack.c.bf16 %v6993_v13, %v6992_v44  ;;  %v5330_v44 = vld [vmem:[%s14755_s5 + $0x48] sm:$0xff]  ;;  %v7010_v13 = vld [vmem:[%s14753_s3 + $0xae0] sm:$0xff] }
 0x31c   : > { %9874 = vmatprep.subr.bf16.mxu0 %v9873_v15 }
 0x31e   : > { %8903 = vmatmul.mubr.f32.gmra.mrb[40].mxu0 %v12816_v48 }
 0x31f   : > { %9876 = vmatpush3.bf16.msra.mxu0 %v9873_v15  ;;  %8937 = vmatprep.mubr.f32.mxu0 %v12209_v4  ;;  %v6997_v4 = vld [vmem:[%s14753_s3 + $0xa78] sm:$0xff] }
 0x320   : > { %9878 = vmatprep.subr.bf16.mxu0 %v9877_v34  ;;  %v9889_v6 = vpack.c.bf16 %v6997_v4, %v6996_v26  ;;  %v5329_v26 = vld [vmem:[%s14755_s5 + $0x40] sm:$0xff]  ;;  %v5331_v4 = vld [vmem:[%s14755_s5 + $0x50] sm:$0xff] }
 0x321   : > { %v10031_v55 = vpack.c.bf16 %v5331_v4, %v5329_v26  ;;  %v7020_v4 = vld [vmem:[%s14753_s3 + $0xb30] sm:$0xff] }
 0x323   : > { %9880 = vmatpush3.bf16.msra.mxu0 %v9877_v34  ;;  %v5327_v34 = vld [vmem:[%s14755_s5 + $0x30] sm:$0xff] }
 0x324   : > { %9882 = vmatprep.subr.bf16.mxu0 %v9881_v58 }
 0x327   : > { %9884 = vmatpush3.bf16.msra.mxu0 %v9881_v58  ;;  %v7011_v58 = vld [vmem:[%s14753_s3 + $0xae8] sm:$0xff] }
 0x328   : > { %9886 = vmatprep.subr.bf16.mxu0 %v9885_v60 }
 0x32b   : > { %9888 = vmatpush3.bf16.msra.mxu0 %v9885_v60  ;;  %v10029_v60 = vpack.c.bf16 %v5332_v32, %v5330_v44  ;;  %v5348_v44 = vld [vmem:[%s14755_s5 + $0xd8] sm:$0xff] }
 0x32c   : > { %9890 = vmatprep.subr.bf16.mxu0 %v9889_v6  ;;  %v10859_v32 = vld [vmem:[#allocation3 + $0x61] sm:$0xff] }
 0x32f   : > { %9892 = vmatpush3.bf16.msra.mxu0 %v9889_v6  ;;  %v9917_v6 = vpack.c.bf16 %v7011_v58, %v7010_v13  ;;  %v10858_v13 = vld [vmem:[#allocation3 + $0x51] sm:$0xff]  ;;  %v10043_v58 = vpack.c.bf16 %v5343_v5, %v5341_v24  ;;  %v7033_v24 = vld [vmem:[%s14753_s3 + $0xb98] sm:$0xff] }
 0x330   : > { %9894 = vmatprep.subr.bf16.mxu0 %v9893_v37 }
 0x332   : > { %8938 = vmatmul.mubr.f32.vlgmr.msra.gmra.mrb[34].mxu0 %v12532_v3  ;;  %v9905_v3 = vpack.c.bf16 %v7005_v43, %v7004_v10  ;;  %v5338_v10 = vld [vmem:[%s14755_s5 + $0x88] sm:$0xff]  ;;  %v5340_v43 = vld [vmem:[%s14755_s5 + $0x98] sm:$0xff] }
 0x333   : > { %8940 = vmatprep.mubr.f32.mxu0 %v12541_v42  ;;  %9896 = vmatpush3.bf16.msra.mxu0 %v9893_v37  ;;  %v7006_v42 = vld [vmem:[%s14753_s3 + $0xac0] sm:$0xff]  ;;  %v7012_v37 = vld [vmem:[%s14753_s3 + $0xaf0] sm:$0xff] }
 0x334   : > { %9898 = vmatprep.subr.bf16.mxu0 %v9897_v8 }
 0x336   : > { %8941 = vmatmul.mubr.f32.gmra.mrb[36].mxu0 %v12544_v45  ;;  %v9909_v45 = vpack.c.bf16 %v7007_v27, %v7006_v42  ;;  %v7015_v42 = vld [vmem:[%s14753_s3 + $0xb08] sm:$0xff]  ;;  %v10035_v27 = vpack.c.bf16 %v5335_v18, %v5333_v0 }
 0x337   : > { %8943 = vmatprep.mubr.f32.mxu0 %v12553_v28  ;;  %9900 = vmatpush3.bf16.msra.mxu0 %v9897_v8  ;;  %v7008_v28 = vld [vmem:[%s14753_s3 + $0xad0] sm:$0xff]  ;;  %v10033_v8 = vpack.c.bf16 %v5336_v30, %v5334_v29  ;;  %v7021_v29 = vld [vmem:[%s14753_s3 + $0xb38] sm:$0xff]  ;;  %v5350_v30 = vld [vmem:[%s14755_s5 + $0xe8] sm:$0xff] }
 0x338   : > { %9902 = vmatprep.subr.bf16.mxu0 %v9901_v1  ;;  %v9913_v15 = vpack.c.bf16 %v7009_v54, %v7008_v28  ;;  %v5339_v28 = vld [vmem:[%s14755_s5 + $0x90] sm:$0xff]  ;;  %v9937_v0 = vpack.c.bf16 %v7021_v29, %v7020_v4  ;;  %v7046_v29 = vld [vmem:[%s14753_s3 + $0xc00] sm:$0xff] }
 0x339   : > { %v7044_v4 = vld [vmem:[%s14753_s3 + $0xbf0] sm:$0xff] }
 0x33a   : > { %8944 = vmatmul.mubr.f32.gmra.mrb[38].mxu0 %v10857_v39  ;;  %v10037_v39 = vpack.c.bf16 %v5340_v43, %v5338_v10 }
 0x33b   : > { %8946 = vmatprep.mubr.f32.mxu0 %v12563_v33  ;;  %9904 = vmatpush3.bf16.msra.mxu0 %v9901_v1  ;;  %v5324_v33 = vld [vmem:[%s14755_s5 + $0x18] sm:$0xff]  ;;  %v9921_v1 = vpack.c.bf16 %v7013_v41, %v7012_v37 }
 0x33c   : > { %9906 = vmatprep.subr.bf16.mxu0 %v9905_v3  ;;  %v10021_v9 = vpack.c.bf16 %v5324_v33, %v5322_v47  ;;  %v7016_v47 = vld [vmem:[%s14753_s3 + $0xb10] sm:$0xff]  ;;  %v7017_v33 = vld [vmem:[%s14753_s3 + $0xb18] sm:$0xff] }
 0x33d   : > { %v5352_v37 = vld [vmem:[%s14755_s5 + $0xf8] sm:$0xff] }
 0x33e   : > { %8947 = vmatmul.mubr.f32.gmra.mrb[40].mxu0 %v12619_v38  ;;  %v5323_v38 = vld [vmem:[%s14755_s5 + $0x10] sm:$0xff]  ;;  %10022 = vmatprep.subr.bf16.mxu1 %v10021_v9  ;;  %v5344_v9 = vld [vmem:[%s14755_s5 + $0xb8] sm:$0xff]  ;;  %v10049_v18 = vpack.c.bf16 %v5352_v37, %v5350_v30  ;;  %v7047_v30 = vld [vmem:[%s14753_s3 + $0xc08] sm:$0xff] }
 0x33f   : > { %9908 = vmatpush3.bf16.msra.mxu0 %v9905_v3  ;;  %8981 = vmatprep.mubr.f32.mxu0 %v12268_v59  ;;  %v10023_v40 = vpack.c.bf16 %v5323_v38, %v5321_v31  ;;  %v5325_v59 = vld [vmem:[%s14755_s5 + $0x20] sm:$0xff]  ;;  %v5342_v31 = vld [vmem:[%s14755_s5 + $0xa8] sm:$0xff]  ;;  %v9989_v37 = vpack.c.bf16 %v7047_v30, %v7046_v29  ;;  %v5372_v30 = vld [vmem:[%s14755_s5 + $0x198] sm:$0xff] }
 0x340   : > { %9910 = vmatprep.subr.bf16.mxu0 %v9909_v45  ;;  %v10027_v52 = vpack.c.bf16 %v5327_v34, %v5325_v59  ;;  %v7014_v3 = vld [vmem:[%s14753_s3 + $0xb00] sm:$0xff]  ;;  %v7019_v59 = vld [vmem:[%s14753_s3 + $0xb28] sm:$0xff] }
 0x341   : > { %10024 = vmatpush1.bf16.msra.mxu1 %v10023_v40  ;;  %v9925_v54 = vpack.c.bf16 %v7015_v42, %v7014_v3  ;;  %v7018_v40 = vld [vmem:[%s14753_s3 + $0xb20] sm:$0xff]  ;;  %v5346_v34 = vld [vmem:[%s14755_s5 + $0xc8] sm:$0xff]  ;;  %v7024_v42 = vld [vmem:[%s14753_s3 + $0xb50] sm:$0xff] }
 0x342   : > { %10026 = vmatprep.subr.bf16.mxu1 %v10025_v49  ;;  %v10041_v49 = vpack.c.bf16 %v5344_v9, %v5342_v31  ;;  %v9933_v26 = vpack.c.bf16 %v7019_v59, %v7018_v40  ;;  %v4745_v3 = vld [vmem:[#allocation3 + $0xb1] sm:$0xff] }
 0x343   : > { %9912 = vmatpush3.bf16.msra.mxu0 %v9909_v45  ;;  %v5337_v45 = vld [vmem:[%s14755_s5 + $0x80] sm:$0xff]  ;;  %v7031_v31 = vld [vmem:[%s14753_s3 + $0xb88] sm:$0xff]  ;;  %v7036_v59 = vld [vmem:[%s14753_s3 + $0xbb0] sm:$0xff] }
 0x344   : > { %9914 = vmatprep.subr.bf16.mxu0 %v9913_v15  ;;  %v10039_v38 = vpack.c.bf16 %v5339_v28, %v5337_v45  ;;  %v7027_v45 = vld [vmem:[%s14753_s3 + $0xb68] sm:$0xff] }
 0x345   : > { %10028 = vmatpush1.bf16.msra.mxu1 %v10027_v52  ;;  %v5345_v52 = vld [vmem:[%s14755_s5 + $0xc0] sm:$0xff]  ;;  %v7035_v40 = vld [vmem:[%s14753_s3 + $0xba8] sm:$0xff] }
 0x346   : > { %10030 = vmatprep.subr.bf16.mxu1 %v10029_v60  ;;  %v5347_v60 = vld [vmem:[%s14755_s5 + $0xd0] sm:$0xff]  ;;  %v5370_v29 = vld [vmem:[%s14755_s5 + $0x188] sm:$0xff] }
 0x347   : > { %9916 = vmatpush3.bf16.msra.mxu0 %v9913_v15  ;;  %v9929_v15 = vpack.c.bf16 %v7017_v33, %v7016_v47  ;;  %v10047_v41 = vpack.c.bf16 %v5347_v60, %v5345_v52  ;;  %v7030_v33 = vld [vmem:[%s14753_s3 + $0xb80] sm:$0xff]  ;;  %v7043_v60 = vld [vmem:[%s14753_s3 + $0xbe8] sm:$0xff] }
 0x348   : > { %9918 = vmatprep.subr.bf16.mxu0 %v9917_v6  ;;  %v9957_v9 = vpack.c.bf16 %v7031_v31, %v7030_v33  ;;  %v10865_v33 = vld [vmem:[#allocation3 + $0x64] sm:$0xff]  ;;  %v10866_v31 = vld [vmem:[#allocation3 + $0x74] sm:$0xff] }
 0x349   : > { %10032 = vmatpush1.bf16.msra.mxu1 %v10031_v55  ;;  %v5349_v55 = vld [vmem:[%s14755_s5 + $0xe0] sm:$0xff] }
 0x34a   : > { %10034 = vmatprep.subr.bf16.mxu1 %v10033_v8  ;;  %v5351_v8 = vld [vmem:[%s14755_s5 + $0xf0] sm:$0xff] }
 0x34b   : > { %9920 = vmatpush3.bf16.msra.mxu0 %v9917_v6  ;;  %v10045_v6 = vpack.c.bf16 %v5348_v44, %v5346_v34  ;;  %v10051_v10 = vpack.c.bf16 %v5351_v8, %v5349_v55  ;;  %v7037_v34 = vld [vmem:[%s14753_s3 + $0xbb8] sm:$0xff]  ;;  %v7039_v44 = vld [vmem:[%s14753_s3 + $0xbc8] sm:$0xff] }
 0x34c   : > { %9922 = vmatprep.subr.bf16.mxu0 %v9921_v1  ;;  %v7049_v55 = vld [vmem:[%s14753_s3 + $0xc18] sm:$0xff] }
 0x34d   : > { %10036 = vmatpush1.bf16.msra.mxu1 %v10035_v27  ;;  %v7025_v27 = vld [vmem:[%s14753_s3 + $0xb58] sm:$0xff] }
 0x34e   : > { %10038 = vmatprep.subr.bf16.mxu1 %v10037_v39  ;;  %v7026_v39 = vld [vmem:[%s14753_s3 + $0xb60] sm:$0xff] }
 0x34f   : > { %9924 = vmatpush3.bf16.msra.mxu0 %v9921_v1  ;;  %v10860_v1 = vld [vmem:[#allocation3 + $0x91] sm:$0xff]  ;;  %v9949_v28 = vpack.c.bf16 %v7027_v45, %v7026_v39 }
 0x350   : > { %9926 = vmatprep.subr.bf16.mxu0 %v9925_v54  ;;  %v7059_v39 = vld [vmem:[%s14753_s3 + $0xc68] sm:$0xff] }
 0x351   : > { %10040 = vmatpush1.bf16.msra.mxu1 %v10039_v38  ;;  %v7032_v38 = vld [vmem:[%s14753_s3 + $0xb90] sm:$0xff] }
 0x352   : > { %8982 = vmatmul.mubr.f32.vlgmr.msra.gmra.mrb[34].mxu0 %v10858_v13  ;;  %10042 = vmatprep.subr.bf16.mxu1 %v10041_v49  ;;  %v9961_v5 = vpack.c.bf16 %v7033_v24, %v7032_v38  ;;  %v10861_v13 = vld [vmem:[#allocation3 + $0x92] sm:$0xff] }
 0x353   : > { %8984 = vmatprep.mubr.f32.mxu0 %v10859_v32  ;;  %9928 = vmatpush3.bf16.msra.mxu0 %v9925_v54  ;;  %v7028_v54 = vld [vmem:[%s14753_s3 + $0xb70] sm:$0xff]  ;;  %v7041_v32 = vld [vmem:[%s14753_s3 + $0xbd8] sm:$0xff]  ;;  %v5354_v24 = vld [vmem:[%s14755_s5 + $0x108] sm:$0xff] }
 0x354   : > { %9930 = vmatprep.subr.bf16.mxu0 %v9929_v15  ;;  %v5138_v38 = vld [vmem:[#allocation3 + $0xb4] sm:$0xff] }
 0x355   : > { %10044 = vmatpush1.bf16.msra.mxu1 %v10043_v58  ;;  %v4876_v58 = vld [vmem:[#allocation3 + $0xb2] sm:$0xff] }
 0x356   : > { %8985 = vmatmul.mubr.f32.gmra.mrb[36].mxu0 %v12606_v20  ;;  %10046 = vmatprep.subr.bf16.mxu1 %v10045_v6  ;;  %v7022_v20 = vld [vmem:[%s14753_s3 + $0xb40] sm:$0xff] }
 0x357   : > { %8987 = vmatprep.mubr.f32.mxu0 %v12615_v11  ;;  %9932 = vmatpush3.bf16.msra.mxu0 %v9929_v15  ;;  %v7023_v11 = vld [vmem:[%s14753_s3 + $0xb48] sm:$0xff]  ;;  %v7034_v15 = vld [vmem:[%s14753_s3 + $0xba0] sm:$0xff] }
 0x358   : > { %9934 = vmatprep.subr.bf16.mxu0 %v9933_v26  ;;  %v9941_v43 = vpack.c.bf16 %v7023_v11, %v7022_v20  ;;  %v9965_v49 = vpack.c.bf16 %v7035_v40, %v7034_v15  ;;  %v7052_v11 = vld [vmem:[%s14753_s3 + $0xc30] sm:$0xff]  ;;  %v5353_v40 = vld [vmem:[%s14755_s5 + $0x100] sm:$0xff] }
 0x359   : > { %10048 = vmatpush1.bf16.msra.mxu1 %v10047_v41  ;;  %v7048_v41 = vld [vmem:[%s14753_s3 + $0xc10] sm:$0xff] }
 0x35a   : > { %8988 = vmatmul.mubr.f32.gmra.mrb[38].mxu0 %v10860_v1  ;;  %10050 = vmatprep.subr.bf16.mxu1 %v10049_v18  ;;  %v9993_v8 = vpack.c.bf16 %v7049_v55, %v7048_v41  ;;  %v7051_v18 = vld [vmem:[%s14753_s3 + $0xc28] sm:$0xff]  ;;  %v7053_v1 = vld [vmem:[%s14753_s3 + $0xc38] sm:$0xff]  ;;  %v5369_v41 = vld [vmem:[%s14755_s5 + $0x180] sm:$0xff] }
 0x35b   : > { %8990 = vmatprep.mubr.f32.mxu0 %v12621_v56  ;;  %9936 = vmatpush3.bf16.msra.mxu0 %v9933_v26  ;;  %v9945_v56 = vpack.c.bf16 %v7025_v27, %v7024_v42  ;;  %v7057_v42 = vld [vmem:[%s14753_s3 + $0xc58] sm:$0xff]  ;;  %v5371_v55 = vld [vmem:[%s14755_s5 + $0x190] sm:$0xff] }
 0x35c   : > { %9938 = vmatprep.subr.bf16.mxu0 %v9937_v0  ;;  %v10863_v27 = vld [vmem:[#allocation3 + $0x44] sm:$0xff] }
 0x35d   : > { %10052 = vmatpush1.bf16.msra.mxu1 %v10051_v10  ;;  %v7055_v10 = vld [vmem:[%s14753_s3 + $0xc48] sm:$0xff] }
 0x35e   : > { %8991 = vmatmul.mubr.f32.gmra.mrb[40].mxu0 %v4745_v3  ;;  %v5007_v3 = vld [vmem:[#allocation3 + $0xb3] sm:$0xff] }
 0x35f   : > { %9940 = vmatpush3.bf16.msra.mxu0 %v9937_v0  ;;  %9025 = vmatprep.mubr.f32.mxu0 %v12661_v22  ;;  %v7029_v22 = vld [vmem:[%s14753_s3 + $0xb78] sm:$0xff]  ;;  %v7050_v0 = vld [vmem:[%s14753_s3 + $0xc20] sm:$0xff] }
 0x360   : > { %9942 = vmatprep.subr.bf16.mxu0 %v9941_v43  ;;  %v9953_v47 = vpack.c.bf16 %v7029_v22, %v7028_v54  ;;  %v9997_v20 = vpack.c.bf16 %v7051_v18, %v7050_v0  ;;  %v7061_v54 = vld [vmem:[%s14753_s3 + $0xc78] sm:$0xff]  ;;  %v5374_v0 = vld [vmem:[%s14755_s5 + $0x1a8] sm:$0xff] }
 0x361   : > { %v5376_v18 = vld [vmem:[%s14755_s5 + $0x1b8] sm:$0xff] }
 0x363   : > { %9944 = vmatpush3.bf16.msra.mxu0 %v9941_v43  ;;  %v10862_v43 = vld [vmem:[#allocation3 + $0x93] sm:$0xff] }
 0x364   : > { %9946 = vmatprep.subr.bf16.mxu0 %v9945_v56 }
 0x367   : > { %9948 = vmatpush3.bf16.msra.mxu0 %v9945_v56 }
 0x368   : > { %9950 = vmatprep.subr.bf16.mxu0 %v9949_v28 }
 0x36b   : > { %9952 = vmatpush3.bf16.msra.mxu0 %v9949_v28  ;;  %v7060_v28 = vld [vmem:[%s14753_s3 + $0xc70] sm:$0xff] }
 0x36c   : > { %9954 = vmatprep.subr.bf16.mxu0 %v9953_v47  ;;  %v10017_v22 = vpack.c.bf16 %v7061_v54, %v7060_v28  ;;  %v5386_v28 = vld [vmem:[%s14755_s5 + $0x208] sm:$0xff]  ;;  %v5388_v54 = vld [vmem:[%s14755_s5 + $0x218] sm:$0xff] }
 0x36f   : > { %9956 = vmatpush3.bf16.msra.mxu0 %v9953_v47  ;;  %v10864_v47 = vld [vmem:[#allocation3 + $0x54] sm:$0xff] }
 0x370   : > { %9958 = vmatprep.subr.bf16.mxu0 %v9957_v9 }
 0x372   : > { %9026 = vmatmul.mubr.f32.vlgmr.msra.gmra.mrb[34].mxu0 %v12664_v17  ;;  %v9969_v17 = vpack.c.bf16 %v7037_v34, %v7036_v59  ;;  %v5360_v59 = vld [vmem:[%s14755_s5 + $0x138] sm:$0xff] }
 0x373   : > { %9028 = vmatprep.mubr.f32.mxu0 %v12673_v62  ;;  %9960 = vmatpush3.bf16.msra.mxu0 %v9957_v9  ;;  %v7038_v62 = vld [vmem:[%s14753_s3 + $0xbc0] sm:$0xff]  ;;  %v10867_v9 = vld [vmem:[#allocation3 + $0x94] sm:$0xff] }
 0x374   : > { %9962 = vmatprep.subr.bf16.mxu0 %v9961_v5 }
 0x376   : > { %9029 = vmatmul.mubr.f32.gmra.mrb[36].mxu0 %v12676_v2  ;;  %v9973_v2 = vpack.c.bf16 %v7039_v44, %v7038_v62  ;;  %v5359_v62 = vld [vmem:[%s14755_s5 + $0x130] sm:$0xff] }
 0x377   : > { %9031 = vmatprep.mubr.f32.mxu0 %v12685_v35  ;;  %9964 = vmatpush3.bf16.msra.mxu0 %v9961_v5  ;;  %v7040_v35 = vld [vmem:[%s14753_s3 + $0xbd0] sm:$0xff]  ;;  %v5356_v5 = vld [vmem:[%s14755_s5 + $0x118] sm:$0xff] }
 0x378   : > { %9966 = vmatprep.subr.bf16.mxu0 %v9965_v49  ;;  %v9977_v52 = vpack.c.bf16 %v7041_v32, %v7040_v35  ;;  %v10053_v15 = vpack.c.bf16 %v5356_v5, %v5354_v24  ;;  %v5361_v35 = vld [vmem:[%s14755_s5 + $0x140] sm:$0xff]  ;;  %v5363_v32 = vld [vmem:[%s14755_s5 + $0x150] sm:$0xff] }
 0x37a   : > { %9032 = vmatmul.mubr.f32.gmra.mrb[38].mxu0 %v10861_v13  ;;  %10054 = vmatprep.subr.bf16.mxu1 %v10053_v15  ;;  %v5362_v13 = vld [vmem:[%s14755_s5 + $0x148] sm:$0xff] }
 0x37b   : > { %9034 = vmatprep.mubr.f32.mxu0 %v12689_v25  ;;  %9968 = vmatpush3.bf16.msra.mxu0 %v9965_v49  ;;  %v7042_v25 = vld [vmem:[%s14753_s3 + $0xbe0] sm:$0xff]  ;;  %v5358_v49 = vld [vmem:[%s14755_s5 + $0x128] sm:$0xff] }
 0x37c   : > { %9970 = vmatprep.subr.bf16.mxu0 %v9969_v17  ;;  %v9981_v26 = vpack.c.bf16 %v7043_v60, %v7042_v25  ;;  %v10057_v34 = vpack.c.bf16 %v5360_v59, %v5358_v49  ;;  %v5366_v25 = vld [vmem:[%s14755_s5 + $0x168] sm:$0xff]  ;;  %v5368_v60 = vld [vmem:[%s14755_s5 + $0x178] sm:$0xff] }
 0x37e   : > { %9035 = vmatmul.mubr.f32.gmra.mrb[40].mxu0 %v4876_v58 }
 0x37f   : > { %9972 = vmatpush3.bf16.msra.mxu0 %v9969_v17  ;;  %9069 = vmatprep.mubr.f32.mxu0 %v12728_v23  ;;  %v7045_v23 = vld [vmem:[%s14753_s3 + $0xbf8] sm:$0xff]  ;;  %v5357_v17 = vld [vmem:[%s14755_s5 + $0x120] sm:$0xff] }
 0x380   : > { %9974 = vmatprep.subr.bf16.mxu0 %v9973_v2  ;;  %v9985_v6 = vpack.c.bf16 %v7045_v23, %v7044_v4  ;;  %v10059_v44 = vpack.c.bf16 %v5359_v62, %v5357_v17  ;;  %v5365_v4 = vld [vmem:[%s14755_s5 + $0x160] sm:$0xff]  ;;  %v5367_v23 = vld [vmem:[%s14755_s5 + $0x170] sm:$0xff] }
 0x383   : > { %9976 = vmatpush3.bf16.msra.mxu0 %v9973_v2  ;;  %v5364_v2 = vld [vmem:[%s14755_s5 + $0x158] sm:$0xff] }
 0x384   : > { %9978 = vmatprep.subr.bf16.mxu0 %v9977_v52  ;;  %v10061_v58 = vpack.c.bf16 %v5364_v2, %v5362_v13 }
 0x387   : > { %9980 = vmatpush3.bf16.msra.mxu0 %v9977_v52  ;;  %v10063_v52 = vpack.c.bf16 %v5363_v32, %v5361_v35 }
 0x388   : > { %9982 = vmatprep.subr.bf16.mxu0 %v9981_v26 }
 0x38b   : > { %9984 = vmatpush3.bf16.msra.mxu0 %v9981_v26  ;;  %v10065_v26 = vpack.c.bf16 %v5368_v60, %v5366_v25 }
 0x38c   : > { %9986 = vmatprep.subr.bf16.mxu0 %v9985_v6 }
 0x38f   : > { %9988 = vmatpush3.bf16.msra.mxu0 %v9985_v6  ;;  %v10067_v6 = vpack.c.bf16 %v5367_v23, %v5365_v4 }
 0x390   : > { %9990 = vmatprep.subr.bf16.mxu0 %v9989_v37 }
 0x392   : > { %9070 = vmatmul.mubr.f32.vlgmr.msra.gmra.mrb[34].mxu0 %v12731_v12  ;;  %v10001_v12 = vpack.c.bf16 %v7053_v1, %v7052_v11  ;;  %v5373_v11 = vld [vmem:[%s14755_s5 + $0x1a0] sm:$0xff]  ;;  %v5375_v1 = vld [vmem:[%s14755_s5 + $0x1b0] sm:$0xff] }
 0x393   : > { %9072 = vmatprep.mubr.f32.mxu0 %v12740_v16  ;;  %9992 = vmatpush3.bf16.msra.mxu0 %v9989_v37  ;;  %v7054_v16 = vld [vmem:[%s14753_s3 + $0xc40] sm:$0xff]  ;;  %v10069_v37 = vpack.c.bf16 %v5372_v30, %v5370_v29  ;;  %v5392_v29 = vld [vmem:[%s14755_s5 + $0x238] sm:$0xff] }
 0x394   : > { %9994 = vmatprep.subr.bf16.mxu0 %v9993_v8 }
 0x396   : > { %9073 = vmatmul.mubr.f32.gmra.mrb[36].mxu0 %v12743_v19  ;;  %v10005_v19 = vpack.c.bf16 %v7055_v10, %v7054_v16  ;;  %v5378_v16 = vld [vmem:[%s14755_s5 + $0x1c8] sm:$0xff]  ;;  %v5380_v10 = vld [vmem:[%s14755_s5 + $0x1d8] sm:$0xff] }
 0x397   : > { %9075 = vmatprep.mubr.f32.mxu0 %v12752_v63  ;;  %9996 = vmatpush3.bf16.msra.mxu0 %v9993_v8  ;;  %v7056_v63 = vld [vmem:[%s14753_s3 + $0xc50] sm:$0xff]  ;;  %v10071_v8 = vpack.c.bf16 %v5371_v55, %v5369_v41  ;;  %v5389_v55 = vld [vmem:[%s14755_s5 + $0x220] sm:$0xff] }
 0x398   : > { %9998 = vmatprep.subr.bf16.mxu0 %v9997_v20  ;;  %v10009_v56 = vpack.c.bf16 %v7057_v42, %v7056_v63  ;;  %v5382_v63 = vld [vmem:[%s14755_s5 + $0x1e8] sm:$0xff]  ;;  %v5384_v42 = vld [vmem:[%s14755_s5 + $0x1f8] sm:$0xff] }
 0x39a   : > { %9076 = vmatmul.mubr.f32.gmra.mrb[38].mxu0 %v10862_v43  ;;  %v5377_v43 = vld [vmem:[%s14755_s5 + $0x1c0] sm:$0xff] }
 0x39b   : > { %9078 = vmatprep.mubr.f32.mxu0 %v12756_v36  ;;  %10000 = vmatpush3.bf16.msra.mxu0 %v9997_v20  ;;  %v7058_v36 = vld [vmem:[%s14753_s3 + $0xc60] sm:$0xff]  ;;  %v10073_v20 = vpack.c.bf16 %v5376_v18, %v5374_v0 }
 0x39c   : > { %10002 = vmatprep.subr.bf16.mxu0 %v10001_v12  ;;  %v10013_v45 = vpack.c.bf16 %v7059_v39, %v7058_v36  ;;  %v5381_v36 = vld [vmem:[%s14755_s5 + $0x1e0] sm:$0xff]  ;;  %v5383_v39 = vld [vmem:[%s14755_s5 + $0x1f0] sm:$0xff] }
 0x39e   : > { %9079 = vmatmul.mubr.f32.gmra.mrb[40].mxu0 %v5007_v3  ;;  %v5379_v3 = vld [vmem:[%s14755_s5 + $0x1d0] sm:$0xff] }
 0x39f   : > { %10004 = vmatpush3.bf16.msra.mxu0 %v10001_v12  ;;  %9113 = vmatprep.mubr.f32.mxu0 %v10863_v27  ;;  %v10075_v12 = vpack.c.bf16 %v5375_v1, %v5373_v11  ;;  %v10079_v27 = vpack.c.bf16 %v5379_v3, %v5377_v43  ;;  %v5394_v11 = vld [vmem:[%s14755_s5 + $0x248] sm:$0xff]  ;;  %v5396_v1 = vld [vmem:[%s14755_s5 + $0x258] sm:$0xff]  ;;  %v5395_v3 = vld [vmem:[%s14755_s5 + $0x250] sm:$0xff] }
 0x3a0   : > { %10006 = vmatprep.subr.bf16.mxu0 %v10005_v19  ;;  %v10093_v43 = vpack.c.bf16 %v5396_v1, %v5394_v11 }
 0x3a3   : > { %10008 = vmatpush3.bf16.msra.mxu0 %v10005_v19  ;;  %v10077_v19 = vpack.c.bf16 %v5380_v10, %v5378_v16 }
 0x3a4   : > { %10010 = vmatprep.subr.bf16.mxu0 %v10009_v56 }
 0x3a7   : > { %10012 = vmatpush3.bf16.msra.mxu0 %v10009_v56  ;;  %v10081_v56 = vpack.c.bf16 %v5384_v42, %v5382_v63  ;;  %v5398_v63 = vld [vmem:[%s14755_s5 + $0x268] sm:$0xff]  ;;  %v5400_v42 = vld [vmem:[%s14755_s5 + $0x278] sm:$0xff] }
 0x3a8   : > { %10014 = vmatprep.subr.bf16.mxu0 %v10013_v45 }
 0x3ab   : > { %10016 = vmatpush3.bf16.msra.mxu0 %v10013_v45  ;;  %v10083_v45 = vpack.c.bf16 %v5383_v39, %v5381_v36  ;;  %v5397_v36 = vld [vmem:[%s14755_s5 + $0x260] sm:$0xff]  ;;  %v5399_v39 = vld [vmem:[%s14755_s5 + $0x270] sm:$0xff] }
 0x3ac   : > { %10018 = vmatprep.subr.bf16.mxu0 %v10017_v22 }
 0x3af   : > { %10020 = vmatpush3.bf16.msra.mxu0 %v10017_v22  ;;  %v10085_v22 = vpack.c.bf16 %v5388_v54, %v5386_v28  ;;  %v5404_v28 = vld [vmem:[%s14755_s5 + $0x298] sm:$0xff]  ;;  %v10099_v54 = vpack.c.bf16 %v5399_v39, %v5397_v36 }
 0x3b2   : > { %9114 = vmatmul.mubr.f32.vlgmr.msra.gmra.mrb[34].mxu0 %v10864_v47 }
 0x3b3   : > { %9116 = vmatprep.mubr.f32.mxu0 %v10865_v33  ;;  %v7062_v33 = vld [vmem:[%s14754_s4] ss:$0 sm:$0xff] }
 0x3b6   : > { %9117 = vmatmul.mubr.f32.gmra.mrb[36].mxu0 %v10866_v31 }
 0x3b7   : > { %9119 = vmatprep.mubr.f32.mxu0 %v12812_v51  ;;  %v5355_v51 = vld [vmem:[%s14755_s5 + $0x110] sm:$0xff] }
 0x3ba   : > { %9120 = vmatmul.mubr.f32.gmra.mrb[38].mxu0 %v10867_v9 }
 0x3bb   : > { %9122 = vmatprep.mubr.f32.mxu0 %v12816_v48  ;;  %v10055_v48 = vpack.c.bf16 %v5355_v51, %v5353_v40 }
 0x3bd   : > { %10056 = vmatpush1.bf16.msra.mxu1 %v10055_v48 }
 0x3be   : > { %9123 = vmatmul.mubr.f32.gmra.mrb[40].mxu0 %v5138_v38  ;;  %10058 = vmatprep.subr.bf16.mxu1 %v10057_v34 }
 0x3c1   : > { %10060 = vmatpush1.bf16.msra.mxu1 %v10059_v44 }
 0x3c2   : > { %10062 = vmatprep.subr.bf16.mxu1 %v10061_v58 }
 0x3c5   : > { %10064 = vmatpush1.bf16.msra.mxu1 %v10063_v52 }
 0x3c6   : > { %10066 = vmatprep.subr.bf16.mxu1 %v10065_v26 }
 0x3c9   : > { %10068 = vmatpush1.bf16.msra.mxu1 %v10067_v6 }
 0x3ca   : > { %10070 = vmatprep.subr.bf16.mxu1 %v10069_v37 }
 0x3cd   : > { %10072 = vmatpush1.bf16.msra.mxu1 %v10071_v8 }
 0x3ce   : > { %10074 = vmatprep.subr.bf16.mxu1 %v10073_v20  ;;  %v5391_v20 = vld [vmem:[%s14755_s5 + $0x230] sm:$0xff] }
 0x3cf   : > { %v10091_v10 = vpack.c.bf16 %v5391_v20, %v5389_v55  ;;  %v5436_v20 = vld [vmem:[%s14755_s5 + $0x398] sm:$0xff] }
 0x3d1   : > { %10076 = vmatpush1.bf16.msra.mxu1 %v10075_v12 }
 0x3d2   : > { %10078 = vmatprep.subr.bf16.mxu1 %v10077_v19  ;;  %v5393_v19 = vld [vmem:[%s14755_s5 + $0x240] sm:$0xff] }
 0x3d5   : > { %10080 = vmatpush1.bf16.msra.mxu1 %v10079_v27  ;;  %v10095_v27 = vpack.c.bf16 %v5395_v3, %v5393_v19 }
 0x3d6   : > { %10082 = vmatprep.subr.bf16.mxu1 %v10081_v56  ;;  %v10097_v56 = vpack.c.bf16 %v5400_v42, %v5398_v63  ;;  %v5437_v63 = vld [vmem:[%s14755_s5 + $0x3a0] sm:$0xff]  ;;  %v5439_v42 = vld [vmem:[%s14755_s5 + $0x3b0] sm:$0xff] }
 0x3d7   : > { %v10139_v36 = vpack.c.bf16 %v5439_v42, %v5437_v63  ;;  %v5482_v63 = vld [vmem:[%s14755_s5 + $0x508] sm:$0xff]  ;;  %v5484_v42 = vld [vmem:[%s14755_s5 + $0x518] sm:$0xff] }
 0x3d9   : > { %10084 = vmatpush1.bf16.msra.mxu1 %v10083_v45  ;;  %v5402_v45 = vld [vmem:[%s14755_s5 + $0x288] sm:$0xff] }
 0x3da   : > { %10086 = vmatprep.subr.bf16.mxu1 %v10085_v22  ;;  %v10101_v22 = vpack.c.bf16 %v5404_v28, %v5402_v45  ;;  %v5441_v45 = vld [vmem:[%s14755_s5 + $0x3c0] sm:$0xff]  ;;  %v5443_v28 = vld [vmem:[%s14755_s5 + $0x3d0] sm:$0xff] }
 0x485   : > { %v9115_v47 = vpop.f32.mrb[34].mxu0 }
 0x486   : > { %v10569_v31 = vadd.f32 %v9115_v47, %v12423_v61  ;;  %v5222_v9 = vpop.f32.mrb[35].mxu0  ;;  %v5401_v47 = vld [vmem:[%s14755_s5 + $0x280] sm:$0xff] }
 0x487   : > { %v10570_v38 = vadd.f32 %v5222_v9, %v12425_v46  ;;  %v5408_v9 = vld [vmem:[%s14755_s5 + $0x2b8] sm:$0xff] }
 0x488   : > { %v5277_v24 = vadd.f32 %v10569_v31, %v7062_v33  ;;  %v5406_v31 = vld [vmem:[%s14755_s5 + $0x2a8] sm:$0xff] }
 0x489   : > { %v5276_v5 = vadd.f32 %v10570_v38, %v7062_v33  ;;  %v9118_v15 = vpop.f32.mrb[36].mxu0 }
 0x48a   : > { %v10571_v40 = vadd.f32 %v9118_v15, %v12433_v57  ;;  %v5232_v51 = vpop.f32.mrb[37].mxu0  ;;  %v5407_v15 = vld [vmem:[%s14755_s5 + $0x2b0] sm:$0xff] }
 0x48b   : > { %v5284_v48 = vmax.f32 %v5276_v5, %v5277_v24  ;;  %v10572_v49 = vadd.f32 %v5232_v51, %v12435_v21  ;;  %v10105_v24 = vpack.c.bf16 %v5408_v9, %v5406_v31  ;;  %v5405_v5 = vld [vmem:[%s14755_s5 + $0x2a0] sm:$0xff]  ;;  %v5412_v51 = vld [vmem:[%s14755_s5 + $0x2d8] sm:$0xff]  ;;  %v5447_v9 = vld [vmem:[%s14755_s5 + $0x3f0] sm:$0xff] }
 0x48c   : > { %v5279_v59 = vadd.f32 %v10571_v40, %v7062_v33  ;;  %v5410_v40 = vld [vmem:[%s14755_s5 + $0x2c8] sm:$0xff]  ;;  %v5445_v31 = vld [vmem:[%s14755_s5 + $0x3e0] sm:$0xff] }
 0x48d   : > { %5285 = vst [vmem:[#allocation4] sm:$0xff] %v5284_v48  ;;  %v5278_v34 = vadd.f32 %v10572_v49, %v7062_v33  ;;  %v9121_v17 = vpop.f32.mrb[38].mxu0  ;;  %v10107_v48 = vpack.c.bf16 %v5407_v15, %v5405_v5  ;;  %v10109_v49 = vpack.c.bf16 %v5412_v51, %v5410_v40  ;;  %v10147_v5 = vpack.c.bf16 %v5447_v9, %v5445_v31  ;;  %v5449_v40 = vld [vmem:[%s14755_s5 + $0x400] sm:$0xff]  ;;  %v5451_v51 = vld [vmem:[%s14755_s5 + $0x410] sm:$0xff]  ;;  %v5490_v31 = vld [vmem:[%s14755_s5 + $0x548] sm:$0xff] }
 0x48e   : > { %v10573_v62 = vadd.f32 %v9121_v17, %v12443_v50  ;;  %v5242_v44 = vpop.f32.mrb[39].mxu0  ;;  %v5414_v17 = vld [vmem:[%s14755_s5 + $0x2e8] sm:$0xff]  ;;  %v5492_v9 = vld [vmem:[%s14755_s5 + $0x558] sm:$0xff] }
 0x48f   : > { %v5286_v61 = vmax.f32 %v5278_v34, %v5279_v59  ;;  %v10574_v13 = vadd.f32 %v5242_v44, %v12445_v53  ;;  %v5385_v53 = vld [vmem:[%s14755_s5 + $0x200] sm:$0xff]  ;;  %v5411_v34 = vld [vmem:[%s14755_s5 + $0x2d0] sm:$0xff] }
 0x490   : > { %v5281_v46 = vadd.f32 %v10573_v62, %v7062_v33  ;;  %v5409_v59 = vld [vmem:[%s14755_s5 + $0x2c0] sm:$0xff]  ;;  %v5416_v62 = vld [vmem:[%s14755_s5 + $0x2f8] sm:$0xff] }
 0x491   : > { %5287 = vst [vmem:[#allocation4 + $0x8] sm:$0xff] %v5286_v61  ;;  %v5280_v2 = vadd.f32 %v10574_v13, %v7062_v33  ;;  %v9124_v58 = vpop.f32.mrb[40].mxu0  ;;  %v10111_v44 = vpack.c.bf16 %v5411_v34, %v5409_v59  ;;  %v10113_v61 = vpack.c.bf16 %v5416_v62, %v5414_v17  ;;  %v5413_v13 = vld [vmem:[%s14755_s5 + $0x2e0] sm:$0xff]  ;;  %v10151_v59 = vpack.c.bf16 %v5451_v51, %v5449_v40  ;;  %v5455_v62 = vld [vmem:[%s14755_s5 + $0x430] sm:$0xff]  ;;  %v5494_v40 = vld [vmem:[%s14755_s5 + $0x568] sm:$0xff] }
 0x492   : > { %v10575_v57 = vadd.f32 %v9124_v58, %v12453_v14  ;;  %v5252_v35 = vpop.f32.mrb[41].mxu0  ;;  %v5387_v14 = vld [vmem:[%s14755_s5 + $0x210] sm:$0xff]  ;;  %v5420_v58 = vld [vmem:[%s14755_s5 + $0x318] sm:$0xff]  ;;  %v5453_v17 = vld [vmem:[%s14755_s5 + $0x420] sm:$0xff] }
 0x493   : > { %v5288_v32 = vmax.f32 %v5280_v2, %v5281_v46  ;;  %v10576_v21 = vadd.f32 %v5252_v35, %v12455_v7  ;;  %v5390_v7 = vld [vmem:[%s14755_s5 + $0x228] sm:$0xff]  ;;  %v10087_v41 = vpack.c.bf16 %v5387_v14, %v5385_v53  ;;  %v5415_v46 = vld [vmem:[%s14755_s5 + $0x2f0] sm:$0xff]  ;;  %v5428_v53 = vld [vmem:[%s14755_s5 + $0x358] sm:$0xff] }
 0x494   : > { %v5283_v52 = vadd.f32 %v10575_v57, %v7062_v33  ;;  %v10089_v18 = vpack.c.bf16 %v5392_v29, %v5390_v7  ;;  %v5418_v2 = vld [vmem:[%s14755_s5 + $0x308] sm:$0xff]  ;;  %v10115_v57 = vpack.c.bf16 %v5415_v46, %v5413_v13  ;;  %v5425_v7 = vld [vmem:[%s14755_s5 + $0x340] sm:$0xff]  ;;  %v5427_v29 = vld [vmem:[%s14755_s5 + $0x350] sm:$0xff] }
 0x495   : > { %5289 = vst [vmem:[#allocation4 + $0x10] sm:$0xff] %v5288_v32  ;;  %v5282_v25 = vadd.f32 %v10576_v21, %v7062_v33  ;;  %v5403_v33 = vld [vmem:[%s14755_s5 + $0x290] sm:$0xff]  ;;  %v10117_v35 = vpack.c.bf16 %v5420_v58, %v5418_v2  ;;  %v5417_v32 = vld [vmem:[%s14755_s5 + $0x300] sm:$0xff]  ;;  %v5460_v13 = vld [vmem:[%s14755_s5 + $0x458] sm:$0xff]  ;;  %v10155_v2 = vpack.c.bf16 %v5455_v62, %v5453_v17 }
 0x496   : > { %v10103_v38 = vpack.c.bf16 %v5403_v33, %v5401_v47  ;;  %v5419_v21 = vld [vmem:[%s14755_s5 + $0x310] sm:$0xff]  ;;  %v10143_v47 = vpack.c.bf16 %v5443_v28, %v5441_v45  ;;  %v5486_v45 = vld [vmem:[%s14755_s5 + $0x528] sm:$0xff]  ;;  %v5488_v28 = vld [vmem:[%s14755_s5 + $0x538] sm:$0xff] }
 0x497   : > { %v5290_v60 = vmax.f32 %v5282_v25, %v5283_v52  ;;  %v5422_v52 = vld [vmem:[%s14755_s5 + $0x328] sm:$0xff]  ;;  %v5424_v25 = vld [vmem:[%s14755_s5 + $0x338] sm:$0xff] }
 0x498   : > { %v5292_v26 = vld [vmem:[#allocation4] ss:$2 sm:$0xff]  ;;  %v5296_v50 = vld [vmem:[#allocation4 + $0x1] ss:$2 sm:$0xff]  ;;  %v5498_v17 = vld [vmem:[%s14755_s5 + $0x588] sm:$0xff] }
 0x499   : > { %5291 = vst [vmem:[#allocation4 + $0x18] sm:$0xff] %v5290_v60  ;;  %v5299_v4 = vmax.f32 %v5292_v26, %v5296_v50  ;;  %v10119_v60 = vpack.c.bf16 %v5419_v21, %v5417_v32  ;;  %v10121_v26 = vpack.c.bf16 %v5424_v25, %v5422_v52  ;;  %v5421_v50 = vld [vmem:[%s14755_s5 + $0x320] sm:$0xff]  ;;  %v5462_v32 = vld [vmem:[%s14755_s5 + $0x468] sm:$0xff]  ;;  %v5464_v21 = vld [vmem:[%s14755_s5 + $0x478] sm:$0xff] }
 0x49a   : > { %v10161_v25 = vpack.c.bf16 %v5464_v21, %v5462_v32  ;;  %v5496_v51 = vld [vmem:[%s14755_s5 + $0x578] sm:$0xff]  ;;  %v5501_v32 = vld [vmem:[%s14755_s5 + $0x5a0] sm:$0xff]  ;;  %v5503_v21 = vld [vmem:[%s14755_s5 + $0x5b0] sm:$0xff] }
 0x49b   : > { %v5301_v23 = vmax.f32 %v5299_v4, 0.0  ;;  %v5423_v4 = vld [vmem:[%s14755_s5 + $0x330] sm:$0xff]  ;;  %v5500_v62 = vld [vmem:[%s14755_s5 + $0x598] sm:$0xff] }
 0x49c   : > { %v10123_v14 = vpack.c.bf16 %v5423_v4, %v5421_v50  ;;  %v5466_v50 = vld [vmem:[%s14755_s5 + $0x488] sm:$0xff]  ;;  %v5468_v4 = vld [vmem:[%s14755_s5 + $0x498] sm:$0xff] }
 0x49d   : > { %5303 = vst [vmem:[#allocation5] sm:$0xff] %v5301_v23  ;;  %v5426_v23 = vld [vmem:[%s14755_s5 + $0x348] sm:$0xff] }
 0x4a0   : > { %v5294_v6 = vld [vmem:[#allocation4 + $0x10] ss:$2 sm:$0xff]  ;;  %v5298_v30 = vld [vmem:[#allocation4 + $0x11] ss:$2 sm:$0xff] }
 0x4a1   : > { %v5300_v37 = vmax.f32 %v5294_v6, %v5298_v30  ;;  %v10125_v6 = vpack.c.bf16 %v5428_v53, %v5426_v23  ;;  %v5430_v30 = vld [vmem:[%s14755_s5 + $0x368] sm:$0xff]  ;;  %v10165_v53 = vpack.c.bf16 %v5468_v4, %v5466_v50  ;;  %v5505_v50 = vld [vmem:[%s14755_s5 + $0x5c0] sm:$0xff]  ;;  %v5507_v4 = vld [vmem:[%s14755_s5 + $0x5d0] sm:$0xff] }
 0x4a3   : > { %v5302_v16 = vmax.f32 %v5300_v37, 0.0  ;;  %v5432_v37 = vld [vmem:[%s14755_s5 + $0x378] sm:$0xff] }
 0x4a4   : > { %v5306_v8 = vld [vmem:[#allocation5 + $0x1] sm:$0x1]  ;;  %v5305_v0 = vld [vmem:[#allocation5] sm:$0x1]  ;;  %v5308_v12 = vld [vmem:[#allocation5 + $0x3] sm:$0x1]  ;;  %v10129_v55 = vpack.c.bf16 %v5432_v37, %v5430_v30 }
 0x4a5   : > { %5909 = vmatprep.mubr.f32.mxu1 %v5306_v8  ;;  %5304 = vst [vmem:[#allocation5 + $0x8] sm:$0xff] %v5302_v16  ;;  %v5429_v8 = vld [vmem:[%s14755_s5 + $0x360] sm:$0xff]  ;;  %v5435_v16 = vld [vmem:[%s14755_s5 + $0x390] sm:$0xff]  ;;  %v5310_v46 = vld [vmem:[#allocation5 + $0x5] sm:$0x1] }
 0x4a6   : > { %5910 = vmatmul.mubr.f32.vlgmr.msra.gmra.mrb[46].mxu1 %v5305_v0  ;;  %v5431_v0 = vld [vmem:[%s14755_s5 + $0x370] sm:$0xff] }
 0x4a7   : > { %10088 = vmatpush1.bf16.msra.mxu1 %v10087_v41  ;;  %5980 = vmatprep.mubr.f32.mxu1 %v5308_v12  ;;  %v10127_v41 = vpack.c.bf16 %v5427_v29, %v5425_v7  ;;  %v10131_v11 = vpack.c.bf16 %v5431_v0, %v5429_v8  ;;  %v5433_v12 = vld [vmem:[%s14755_s5 + $0x380] sm:$0xff]  ;;  %v5470_v7 = vld [vmem:[%s14755_s5 + $0x4a8] sm:$0xff]  ;;  %v5472_v29 = vld [vmem:[%s14755_s5 + $0x4b8] sm:$0xff] }
 0x4a8   : > { %10090 = vmatprep.subr.bf16.mxu1 %v10089_v18  ;;  %v5434_v18 = vld [vmem:[%s14755_s5 + $0x388] sm:$0xff]  ;;  %v10135_v19 = vpack.c.bf16 %v5435_v16, %v5433_v12  ;;  %v10169_v37 = vpack.c.bf16 %v5472_v29, %v5470_v7  ;;  %v5476_v0 = vld [vmem:[%s14755_s5 + $0x4d8] sm:$0xff]  ;;  %v5509_v7 = vld [vmem:[%s14755_s5 + $0x5e0] sm:$0xff] }
 0x4a9   : > { %v10133_v1 = vpack.c.bf16 %v5436_v20, %v5434_v18  ;;  %v5474_v8 = vld [vmem:[%s14755_s5 + $0x4c8] sm:$0xff]  ;;  %v5480_v16 = vld [vmem:[%s14755_s5 + $0x4f8] sm:$0xff]  ;;  %v5511_v29 = vld [vmem:[%s14755_s5 + $0x5f0] sm:$0xff] }
 0x4aa   : > { %v10173_v20 = vpack.c.bf16 %v5476_v0, %v5474_v8  ;;  %v5478_v12 = vld [vmem:[%s14755_s5 + $0x4e8] sm:$0xff]  ;;  %v5513_v8 = vld [vmem:[%s14755_s5 + $0x600] sm:$0xff]  ;;  %v5515_v0 = vld [vmem:[%s14755_s5 + $0x610] sm:$0xff] }
 0x4ab   : > { %10092 = vmatpush1.bf16.msra.mxu1 %v10091_v10  ;;  %v5438_v10 = vld [vmem:[%s14755_s5 + $0x3a8] sm:$0xff] }
 0x4ac   : > { %10094 = vmatprep.subr.bf16.mxu1 %v10093_v43  ;;  %v5440_v43 = vld [vmem:[%s14755_s5 + $0x3b8] sm:$0xff] }
 0x4ad   : > { %v10137_v3 = vpack.c.bf16 %v5440_v43, %v5438_v10  ;;  %v10177_v43 = vpack.c.bf16 %v5480_v16, %v5478_v12  ;;  %v5517_v12 = vld [vmem:[%s14755_s5 + $0x620] sm:$0xff]  ;;  %v5519_v16 = vld [vmem:[%s14755_s5 + $0x630] sm:$0xff] }
 0x4af   : > { %10096 = vmatpush1.bf16.msra.mxu1 %v10095_v27  ;;  %v5442_v27 = vld [vmem:[%s14755_s5 + $0x3c8] sm:$0xff] }
 0x4b0   : > { %10098 = vmatprep.subr.bf16.mxu1 %v10097_v56  ;;  %v5444_v56 = vld [vmem:[%s14755_s5 + $0x3d8] sm:$0xff] }
 0x4b1   : > { %v10141_v39 = vpack.c.bf16 %v5444_v56, %v5442_v27  ;;  %v10181_v56 = vpack.c.bf16 %v5484_v42, %v5482_v63  ;;  %v10219_v63 = vpack.c.bf16 %v5519_v16, %v5517_v12  ;;  %v5562_v12 = vld [vmem:[%s14755_s5 + $0x788] sm:$0xff]  ;;  %v5564_v16 = vld [vmem:[%s14755_s5 + $0x798] sm:$0xff] }
 0x4b3   : > { %10100 = vmatpush1.bf16.msra.mxu1 %v10099_v54  ;;  %v5446_v54 = vld [vmem:[%s14755_s5 + $0x3e8] sm:$0xff] }
 0x4b4   : > { %10102 = vmatprep.subr.bf16.mxu1 %v10101_v22  ;;  %v5448_v22 = vld [vmem:[%s14755_s5 + $0x3f8] sm:$0xff] }
 0x4b5   : > { %v10145_v33 = vpack.c.bf16 %v5448_v22, %v5446_v54  ;;  %v10185_v22 = vpack.c.bf16 %v5488_v28, %v5486_v45 }
 0x4b7   : > { %10104 = vmatpush1.bf16.msra.mxu1 %v10103_v38  ;;  %v5450_v38 = vld [vmem:[%s14755_s5 + $0x408] sm:$0xff] }
 0x4b8   : > { %10106 = vmatprep.subr.bf16.mxu1 %v10105_v24  ;;  %v5452_v24 = vld [vmem:[%s14755_s5 + $0x418] sm:$0xff] }
 0x4b9   : > { %v10149_v15 = vpack.c.bf16 %v5452_v24, %v5450_v38  ;;  %v10189_v24 = vpack.c.bf16 %v5492_v9, %v5490_v31 }
 0x4bb   : > { %10108 = vmatpush1.bf16.msra.mxu1 %v10107_v48  ;;  %v5454_v48 = vld [vmem:[%s14755_s5 + $0x428] sm:$0xff] }
 0x4bc   : > { %10110 = vmatprep.subr.bf16.mxu1 %v10109_v49  ;;  %v5456_v49 = vld [vmem:[%s14755_s5 + $0x438] sm:$0xff] }
 0x4bd   : > { %v10153_v34 = vpack.c.bf16 %v5456_v49, %v5454_v48  ;;  %v10193_v49 = vpack.c.bf16 %v5496_v51, %v5494_v40 }
 0x4bf   : > { %10112 = vmatpush1.bf16.msra.mxu1 %v10111_v44  ;;  %v5307_v44 = vld [vmem:[#allocation5 + $0x2] sm:$0x1] }
 0x4c0   : > { %10114 = vmatprep.subr.bf16.mxu1 %v10113_v61  ;;  %v5458_v61 = vld [vmem:[%s14755_s5 + $0x448] sm:$0xff] }
 0x4c1   : > { %v10157_v58 = vpack.c.bf16 %v5460_v13, %v5458_v61  ;;  %v10197_v61 = vpack.c.bf16 %v5500_v62, %v5498_v17  ;;  %v5497_v13 = vld [vmem:[%s14755_s5 + $0x580] sm:$0xff] }
 0x4c3   : > { %10116 = vmatpush1.bf16.msra.mxu1 %v10115_v57  ;;  %v5457_v57 = vld [vmem:[%s14755_s5 + $0x440] sm:$0xff] }
 0x4c4   : > { %10118 = vmatprep.subr.bf16.mxu1 %v10117_v35  ;;  %v5459_v35 = vld [vmem:[%s14755_s5 + $0x450] sm:$0xff] }
 0x4c5   : > { %v10159_v52 = vpack.c.bf16 %v5459_v35, %v5457_v57 }
 0x4c7   : > { %10120 = vmatpush1.bf16.msra.mxu1 %v10119_v60  ;;  %v5461_v60 = vld [vmem:[%s14755_s5 + $0x460] sm:$0xff] }
 0x4c8   : > { %10122 = vmatprep.subr.bf16.mxu1 %v10121_v26  ;;  %v5463_v26 = vld [vmem:[%s14755_s5 + $0x470] sm:$0xff] }
 0x4c9   : > { %v10163_v23 = vpack.c.bf16 %v5463_v26, %v5461_v60  ;;  %v10203_v60 = vpack.c.bf16 %v5503_v21, %v5501_v32  ;;  %v5546_v32 = vld [vmem:[%s14755_s5 + $0x708] sm:$0xff]  ;;  %v5548_v21 = vld [vmem:[%s14755_s5 + $0x718] sm:$0xff] }
 0x4cb   : > { %10124 = vmatpush1.bf16.msra.mxu1 %v10123_v14  ;;  %v5465_v14 = vld [vmem:[%s14755_s5 + $0x480] sm:$0xff] }
 0x4cc   : > { %10126 = vmatprep.subr.bf16.mxu1 %v10125_v6  ;;  %v5467_v6 = vld [vmem:[%s14755_s5 + $0x490] sm:$0xff] }
 0x4cd   : > { %v10167_v30 = vpack.c.bf16 %v5467_v6, %v5465_v14  ;;  %v10207_v14 = vpack.c.bf16 %v5507_v4, %v5505_v50  ;;  %v5550_v50 = vld [vmem:[%s14755_s5 + $0x728] sm:$0xff]  ;;  %v5552_v4 = vld [vmem:[%s14755_s5 + $0x738] sm:$0xff] }
 0x4cf   : > { %10128 = vmatpush1.bf16.msra.mxu1 %v10127_v41  ;;  %v5469_v41 = vld [vmem:[%s14755_s5 + $0x4a0] sm:$0xff] }
 0x4d0   : > { %10130 = vmatprep.subr.bf16.mxu1 %v10129_v55  ;;  %v5471_v55 = vld [vmem:[%s14755_s5 + $0x4b0] sm:$0xff] }
 0x4d1   : > { %v10171_v18 = vpack.c.bf16 %v5471_v55, %v5469_v41  ;;  %v10211_v41 = vpack.c.bf16 %v5511_v29, %v5509_v7  ;;  %v5554_v7 = vld [vmem:[%s14755_s5 + $0x748] sm:$0xff]  ;;  %v5556_v29 = vld [vmem:[%s14755_s5 + $0x758] sm:$0xff] }
 0x4d3   : > { %10132 = vmatpush1.bf16.msra.mxu1 %v10131_v11  ;;  %v5473_v11 = vld [vmem:[%s14755_s5 + $0x4c0] sm:$0xff] }
 0x4d4   : > { %10134 = vmatprep.subr.bf16.mxu1 %v10133_v1  ;;  %v5475_v1 = vld [vmem:[%s14755_s5 + $0x4d0] sm:$0xff] }
 0x4d5   : > { %v10175_v10 = vpack.c.bf16 %v5475_v1, %v5473_v11  ;;  %v10215_v11 = vpack.c.bf16 %v5515_v0, %v5513_v8  ;;  %v5558_v8 = vld [vmem:[%s14755_s5 + $0x768] sm:$0xff]  ;;  %v5560_v0 = vld [vmem:[%s14755_s5 + $0x778] sm:$0xff] }
 0x4d7   : > { %10136 = vmatpush1.bf16.msra.mxu1 %v10135_v19  ;;  %v5477_v19 = vld [vmem:[%s14755_s5 + $0x4e0] sm:$0xff] }
 0x4d8   : > { %10138 = vmatprep.subr.bf16.mxu1 %v10137_v3  ;;  %v5479_v3 = vld [vmem:[%s14755_s5 + $0x4f0] sm:$0xff] }
 0x4d9   : > { %v10179_v27 = vpack.c.bf16 %v5479_v3, %v5477_v19  ;;  %v5524_v19 = vld [vmem:[%s14755_s5 + $0x658] sm:$0xff] }
 0x4da   : > { %v5312_v3 = vld [vmem:[#allocation5 + $0x7] sm:$0x1] }
 0x4db   : > { %10140 = vmatpush1.bf16.msra.mxu1 %v10139_v36  ;;  %v5481_v36 = vld [vmem:[%s14755_s5 + $0x500] sm:$0xff] }
 0x4dc   : > { %10142 = vmatprep.subr.bf16.mxu1 %v10141_v39  ;;  %v5483_v39 = vld [vmem:[%s14755_s5 + $0x510] sm:$0xff] }
 0x4dd   : > { %v10183_v54 = vpack.c.bf16 %v5483_v39, %v5481_v36  ;;  %v5526_v36 = vld [vmem:[%s14755_s5 + $0x668] sm:$0xff]  ;;  %v5528_v39 = vld [vmem:[%s14755_s5 + $0x678] sm:$0xff] }
 0x4de   : > { %v10225_v28 = vpack.c.bf16 %v5528_v39, %v5526_v36  ;;  %v5565_v36 = vld [vmem:[%s14755_s5 + $0x7a0] sm:$0xff]  ;;  %v5567_v39 = vld [vmem:[%s14755_s5 + $0x7b0] sm:$0xff] }
 0x4df   : > { %10144 = vmatpush1.bf16.msra.mxu1 %v10143_v47  ;;  %v5485_v47 = vld [vmem:[%s14755_s5 + $0x520] sm:$0xff] }
 0x4e0   : > { %10146 = vmatprep.subr.bf16.mxu1 %v10145_v33  ;;  %v5487_v33 = vld [vmem:[%s14755_s5 + $0x530] sm:$0xff] }
 0x4e1   : > { %v10187_v38 = vpack.c.bf16 %v5487_v33, %v5485_v47  ;;  %v5530_v47 = vld [vmem:[%s14755_s5 + $0x688] sm:$0xff]  ;;  %v5532_v33 = vld [vmem:[%s14755_s5 + $0x698] sm:$0xff] }
 0x4e2   : > { %v10229_v9 = vpack.c.bf16 %v5532_v33, %v5530_v47  ;;  %v5569_v47 = vld [vmem:[%s14755_s5 + $0x7c0] sm:$0xff]  ;;  %v5571_v33 = vld [vmem:[%s14755_s5 + $0x7d0] sm:$0xff] }
 0x4e3   : > { %10148 = vmatpush1.bf16.msra.mxu1 %v10147_v5  ;;  %v5489_v5 = vld [vmem:[%s14755_s5 + $0x540] sm:$0xff] }
 0x4e4   : > { %10150 = vmatprep.subr.bf16.mxu1 %v10149_v15  ;;  %v5491_v15 = vld [vmem:[%s14755_s5 + $0x550] sm:$0xff] }
 0x4e5   : > { %v10191_v48 = vpack.c.bf16 %v5491_v15, %v5489_v5  ;;  %v5534_v5 = vld [vmem:[%s14755_s5 + $0x6a8] sm:$0xff]  ;;  %v5536_v15 = vld [vmem:[%s14755_s5 + $0x6b8] sm:$0xff] }
 0x4e6   : > { %5981 = vmatmul.mubr.f32.vlgmr.msra.gmra.mrb[46].mxu1 %v5307_v44  ;;  %v10233_v51 = vpack.c.bf16 %v5536_v15, %v5534_v5  ;;  %v5573_v5 = vld [vmem:[%s14755_s5 + $0x7e0] sm:$0xff]  ;;  %v5575_v15 = vld [vmem:[%s14755_s5 + $0x7f0] sm:$0xff] }
 0x4e7   : > { %10152 = vmatpush1.bf16.msra.mxu1 %v10151_v59  ;;  %6051 = vmatprep.mubr.f32.mxu1 %v5310_v46  ;;  %v5493_v59 = vld [vmem:[%s14755_s5 + $0x560] sm:$0xff]  ;;  %v5499_v46 = vld [vmem:[%s14755_s5 + $0x590] sm:$0xff] }
 0x4e8   : > { %10154 = vmatprep.subr.bf16.mxu1 %v10153_v34  ;;  %v5495_v34 = vld [vmem:[%s14755_s5 + $0x570] sm:$0xff]  ;;  %v10199_v57 = vpack.c.bf16 %v5499_v46, %v5497_v13  ;;  %v5542_v13 = vld [vmem:[%s14755_s5 + $0x6e8] sm:$0xff]  ;;  %v5544_v46 = vld [vmem:[%s14755_s5 + $0x6f8] sm:$0xff] }
 0x4e9   : > { %v10195_v44 = vpack.c.bf16 %v5495_v34, %v5493_v59  ;;  %v5538_v59 = vld [vmem:[%s14755_s5 + $0x6c8] sm:$0xff]  ;;  %v5540_v34 = vld [vmem:[%s14755_s5 + $0x6d8] sm:$0xff] }
 0x4ea   : > { %v10237_v62 = vpack.c.bf16 %v5540_v34, %v5538_v59  ;;  %v5577_v59 = vld [vmem:[%s14755_s5 + $0x800] sm:$0xff]  ;;  %v5579_v34 = vld [vmem:[%s14755_s5 + $0x810] sm:$0xff] }
 0x4eb   : > { %10156 = vmatpush1.bf16.msra.mxu1 %v10155_v2  ;;  %v5502_v2 = vld [vmem:[%s14755_s5 + $0x5a8] sm:$0xff] }
 0x4ec   : > { %10158 = vmatprep.subr.bf16.mxu1 %v10157_v58  ;;  %v5504_v58 = vld [vmem:[%s14755_s5 + $0x5b8] sm:$0xff] }
 0x4ed   : > { %v10201_v35 = vpack.c.bf16 %v5504_v58, %v5502_v2  ;;  %v10241_v58 = vpack.c.bf16 %v5544_v46, %v5542_v13  ;;  %v5581_v13 = vld [vmem:[%s14755_s5 + $0x820] sm:$0xff]  ;;  %v5583_v46 = vld [vmem:[%s14755_s5 + $0x830] sm:$0xff] }
 0x4ef   : > { %10160 = vmatpush1.bf16.msra.mxu1 %v10159_v52  ;;  %v5506_v52 = vld [vmem:[%s14755_s5 + $0x5c8] sm:$0xff] }
 0x4f0   : > { %10162 = vmatprep.subr.bf16.mxu1 %v10161_v25  ;;  %v5508_v25 = vld [vmem:[%s14755_s5 + $0x5d8] sm:$0xff] }
 0x4f1   : > { %v10205_v26 = vpack.c.bf16 %v5508_v25, %v5506_v52  ;;  %v10245_v25 = vpack.c.bf16 %v5548_v21, %v5546_v32  ;;  %v10283_v32 = vpack.c.bf16 %v5583_v46, %v5581_v13  ;;  %v5626_v13 = vld [vmem:[%s14755_s5 + $0x988] sm:$0xff]  ;;  %v5628_v46 = vld [vmem:[%s14755_s5 + $0x998] sm:$0xff] }
 0x4f3   : > { %10164 = vmatpush1.bf16.msra.mxu1 %v10163_v23  ;;  %v5510_v23 = vld [vmem:[%s14755_s5 + $0x5e8] sm:$0xff] }
 0x4f4   : > { %10166 = vmatprep.subr.bf16.mxu1 %v10165_v53  ;;  %v5512_v53 = vld [vmem:[%s14755_s5 + $0x5f8] sm:$0xff] }
 0x4f5   : > { %v10209_v6 = vpack.c.bf16 %v5512_v53, %v5510_v23  ;;  %v10249_v53 = vpack.c.bf16 %v5552_v4, %v5550_v50 }
 0x4f7   : > { %10168 = vmatpush1.bf16.msra.mxu1 %v10167_v30  ;;  %v5514_v30 = vld [vmem:[%s14755_s5 + $0x608] sm:$0xff] }
 0x4f8   : > { %10170 = vmatprep.subr.bf16.mxu1 %v10169_v37  ;;  %v5516_v37 = vld [vmem:[%s14755_s5 + $0x618] sm:$0xff] }
 0x4f9   : > { %v10213_v55 = vpack.c.bf16 %v5516_v37, %v5514_v30  ;;  %v10253_v37 = vpack.c.bf16 %v5556_v29, %v5554_v7 }
 0x4fb   : > { %10172 = vmatpush1.bf16.msra.mxu1 %v10171_v18  ;;  %v5518_v18 = vld [vmem:[%s14755_s5 + $0x628] sm:$0xff] }
 0x4fc   : > { %10174 = vmatprep.subr.bf16.mxu1 %v10173_v20  ;;  %v5520_v20 = vld [vmem:[%s14755_s5 + $0x638] sm:$0xff] }
 0x4fd   : > { %v10217_v1 = vpack.c.bf16 %v5520_v20, %v5518_v18  ;;  %v10257_v20 = vpack.c.bf16 %v5560_v0, %v5558_v8 }
 0x4ff   : > { %10176 = vmatpush1.bf16.msra.mxu1 %v10175_v10  ;;  %v5309_v10 = vld [vmem:[#allocation5 + $0x4] sm:$0x1] }
 0x500   : > { %10178 = vmatprep.subr.bf16.mxu1 %v10177_v43  ;;  %v5522_v43 = vld [vmem:[%s14755_s5 + $0x648] sm:$0xff] }
 0x501   : > { %v10221_v42 = vpack.c.bf16 %v5524_v19, %v5522_v43  ;;  %v10261_v43 = vpack.c.bf16 %v5564_v16, %v5562_v12  ;;  %v5561_v19 = vld [vmem:[%s14755_s5 + $0x780] sm:$0xff] }
 0x503   : > { %10180 = vmatpush1.bf16.msra.mxu1 %v10179_v27  ;;  %v5521_v27 = vld [vmem:[%s14755_s5 + $0x640] sm:$0xff] }
 0x504   : > { %10182 = vmatprep.subr.bf16.mxu1 %v10181_v56  ;;  %v5523_v56 = vld [vmem:[%s14755_s5 + $0x650] sm:$0xff] }
 0x505   : > { %v10223_v45 = vpack.c.bf16 %v5523_v56, %v5521_v27 }
 0x507   : > { %10184 = vmatpush1.bf16.msra.mxu1 %v10183_v54  ;;  %v5525_v54 = vld [vmem:[%s14755_s5 + $0x660] sm:$0xff] }
 0x508   : > { %10186 = vmatprep.subr.bf16.mxu1 %v10185_v22  ;;  %v5527_v22 = vld [vmem:[%s14755_s5 + $0x670] sm:$0xff] }
 0x509   : > { %v10227_v31 = vpack.c.bf16 %v5527_v22, %v5525_v54  ;;  %v10267_v54 = vpack.c.bf16 %v5567_v39, %v5565_v36  ;;  %v5610_v36 = vld [vmem:[%s14755_s5 + $0x908] sm:$0xff]  ;;  %v5612_v39 = vld [vmem:[%s14755_s5 + $0x918] sm:$0xff] }
 0x50b   : > { %10188 = vmatpush1.bf16.msra.mxu1 %v10187_v38  ;;  %v5529_v38 = vld [vmem:[%s14755_s5 + $0x680] sm:$0xff] }
 0x50c   : > { %10190 = vmatprep.subr.bf16.mxu1 %v10189_v24  ;;  %v5531_v24 = vld [vmem:[%s14755_s5 + $0x690] sm:$0xff] }
 0x50d   : > { %v10231_v40 = vpack.c.bf16 %v5531_v24, %v5529_v38  ;;  %v10271_v38 = vpack.c.bf16 %v5571_v33, %v5569_v47  ;;  %v5614_v47 = vld [vmem:[%s14755_s5 + $0x928] sm:$0xff]  ;;  %v5616_v33 = vld [vmem:[%s14755_s5 + $0x938] sm:$0xff] }
 0x50f   : > { %10192 = vmatpush1.bf16.msra.mxu1 %v10191_v48  ;;  %v5533_v48 = vld [vmem:[%s14755_s5 + $0x6a0] sm:$0xff] }
 0x510   : > { %10194 = vmatprep.subr.bf16.mxu1 %v10193_v49  ;;  %v5535_v49 = vld [vmem:[%s14755_s5 + $0x6b0] sm:$0xff] }
 0x511   : > { %v10235_v17 = vpack.c.bf16 %v5535_v49, %v5533_v48  ;;  %v10275_v48 = vpack.c.bf16 %v5575_v15, %v5573_v5  ;;  %v5618_v5 = vld [vmem:[%s14755_s5 + $0x948] sm:$0xff]  ;;  %v5620_v15 = vld [vmem:[%s14755_s5 + $0x958] sm:$0xff] }
 0x513   : > { %10196 = vmatpush1.bf16.msra.mxu1 %v10195_v44  ;;  %v5537_v44 = vld [vmem:[%s14755_s5 + $0x6c0] sm:$0xff] }
 0x514   : > { %10198 = vmatprep.subr.bf16.mxu1 %v10197_v61  ;;  %v5539_v61 = vld [vmem:[%s14755_s5 + $0x6d0] sm:$0xff] }
 0x515   : > { %v10239_v2 = vpack.c.bf16 %v5539_v61, %v5537_v44  ;;  %v10279_v44 = vpack.c.bf16 %v5579_v34, %v5577_v59  ;;  %v5622_v59 = vld [vmem:[%s14755_s5 + $0x968] sm:$0xff]  ;;  %v5624_v34 = vld [vmem:[%s14755_s5 + $0x978] sm:$0xff] }
 0x517   : > { %10200 = vmatpush1.bf16.msra.mxu1 %v10199_v57  ;;  %v5541_v57 = vld [vmem:[%s14755_s5 + $0x6e0] sm:$0xff] }
 0x518   : > { %10202 = vmatprep.subr.bf16.mxu1 %v10201_v35  ;;  %v5543_v35 = vld [vmem:[%s14755_s5 + $0x6f0] sm:$0xff] }
 0x519   : > { %v10243_v52 = vpack.c.bf16 %v5543_v35, %v5541_v57  ;;  %v5588_v57 = vld [vmem:[%s14755_s5 + $0x858] sm:$0xff]  ;;  %v5314_v35 = vld [vmem:[#allocation5 + $0x9] sm:$0x1] }
 0x51b   : > { %10204 = vmatpush1.bf16.msra.mxu1 %v10203_v60  ;;  %v5545_v60 = vld [vmem:[%s14755_s5 + $0x700] sm:$0xff] }
 0x51c   : > { %10206 = vmatprep.subr.bf16.mxu1 %v10205_v26  ;;  %v5547_v26 = vld [vmem:[%s14755_s5 + $0x710] sm:$0xff] }
 0x51d   : > { %v10247_v23 = vpack.c.bf16 %v5547_v26, %v5545_v60  ;;  %v5590_v60 = vld [vmem:[%s14755_s5 + $0x868] sm:$0xff]  ;;  %v5592_v26 = vld [vmem:[%s14755_s5 + $0x878] sm:$0xff] }
 0x51e   : > { %v10289_v4 = vpack.c.bf16 %v5592_v26, %v5590_v60  ;;  %v5629_v60 = vld [vmem:[%s14755_s5 + $0x9a0] sm:$0xff]  ;;  %v5631_v26 = vld [vmem:[%s14755_s5 + $0x9b0] sm:$0xff] }
 0x51f   : > { %10208 = vmatpush1.bf16.msra.mxu1 %v10207_v14  ;;  %v5549_v14 = vld [vmem:[%s14755_s5 + $0x720] sm:$0xff] }
 0x520   : > { %10210 = vmatprep.subr.bf16.mxu1 %v10209_v6  ;;  %v5551_v6 = vld [vmem:[%s14755_s5 + $0x730] sm:$0xff] }
 0x521   : > { %v10251_v30 = vpack.c.bf16 %v5551_v6, %v5549_v14  ;;  %v5594_v14 = vld [vmem:[%s14755_s5 + $0x888] sm:$0xff]  ;;  %v5596_v6 = vld [vmem:[%s14755_s5 + $0x898] sm:$0xff] }
 0x522   : > { %v10293_v29 = vpack.c.bf16 %v5596_v6, %v5594_v14  ;;  %v5633_v14 = vld [vmem:[%s14755_s5 + $0x9c0] sm:$0xff]  ;;  %v5635_v6 = vld [vmem:[%s14755_s5 + $0x9d0] sm:$0xff] }
 0x523   : > { %10212 = vmatpush1.bf16.msra.mxu1 %v10211_v41  ;;  %v5553_v41 = vld [vmem:[%s14755_s5 + $0x740] sm:$0xff] }
 0x524   : > { %10214 = vmatprep.subr.bf16.mxu1 %v10213_v55  ;;  %v5555_v55 = vld [vmem:[%s14755_s5 + $0x750] sm:$0xff] }
 0x525   : > { %v10255_v18 = vpack.c.bf16 %v5555_v55, %v5553_v41  ;;  %v5598_v41 = vld [vmem:[%s14755_s5 + $0x8a8] sm:$0xff]  ;;  %v5600_v55 = vld [vmem:[%s14755_s5 + $0x8b8] sm:$0xff] }
 0x526   : > { %6052 = vmatmul.mubr.f32.vlgmr.msra.gmra.mrb[46].mxu1 %v5309_v10  ;;  %v10297_v0 = vpack.c.bf16 %v5600_v55, %v5598_v41  ;;  %v5637_v41 = vld [vmem:[%s14755_s5 + $0x9e0] sm:$0xff]  ;;  %v5639_v55 = vld [vmem:[%s14755_s5 + $0x9f0] sm:$0xff] }
 0x527   : > { %10216 = vmatpush1.bf16.msra.mxu1 %v10215_v11  ;;  %6122 = vmatprep.mubr.f32.mxu1 %v5312_v3  ;;  %v5557_v11 = vld [vmem:[%s14755_s5 + $0x760] sm:$0xff]  ;;  %v5563_v3 = vld [vmem:[%s14755_s5 + $0x790] sm:$0xff] }
 0x528   : > { %10218 = vmatprep.subr.bf16.mxu1 %v10217_v1  ;;  %v5559_v1 = vld [vmem:[%s14755_s5 + $0x770] sm:$0xff]  ;;  %v10263_v27 = vpack.c.bf16 %v5563_v3, %v5561_v19  ;;  %v5606_v19 = vld [vmem:[%s14755_s5 + $0x8e8] sm:$0xff]  ;;  %v5608_v3 = vld [vmem:[%s14755_s5 + $0x8f8] sm:$0xff] }
 0x529   : > { %v10259_v10 = vpack.c.bf16 %v5559_v1, %v5557_v11  ;;  %v5602_v11 = vld [vmem:[%s14755_s5 + $0x8c8] sm:$0xff]  ;;  %v5604_v1 = vld [vmem:[%s14755_s5 + $0x8d8] sm:$0xff] }
 0x52a   : > { %v10301_v16 = vpack.c.bf16 %v5604_v1, %v5602_v11  ;;  %v5641_v11 = vld [vmem:[%s14755_s5 + $0xa00] sm:$0xff]  ;;  %v5643_v1 = vld [vmem:[%s14755_s5 + $0xa10] sm:$0xff] }
 0x52b   : > { %10220 = vmatpush1.bf16.msra.mxu1 %v10219_v63  ;;  %v5566_v63 = vld [vmem:[%s14755_s5 + $0x7a8] sm:$0xff] }
 0x52c   : > { %10222 = vmatprep.subr.bf16.mxu1 %v10221_v42  ;;  %v5568_v42 = vld [vmem:[%s14755_s5 + $0x7b8] sm:$0xff] }
 0x52d   : > { %v10265_v56 = vpack.c.bf16 %v5568_v42, %v5566_v63  ;;  %v10305_v42 = vpack.c.bf16 %v5608_v3, %v5606_v19  ;;  %v5645_v19 = vld [vmem:[%s14755_s5 + $0xa20] sm:$0xff]  ;;  %v5647_v3 = vld [vmem:[%s14755_s5 + $0xa30] sm:$0xff] }
 0x52f   : > { %10224 = vmatpush1.bf16.msra.mxu1 %v10223_v45  ;;  %v5570_v45 = vld [vmem:[%s14755_s5 + $0x7c8] sm:$0xff] }
 0x530   : > { %10226 = vmatprep.subr.bf16.mxu1 %v10225_v28  ;;  %v5572_v28 = vld [vmem:[%s14755_s5 + $0x7d8] sm:$0xff] }
 0x531   : > { %v10269_v22 = vpack.c.bf16 %v5572_v28, %v5570_v45  ;;  %v10309_v28 = vpack.c.bf16 %v5612_v39, %v5610_v36  ;;  %v10347_v36 = vpack.c.bf16 %v5647_v3, %v5645_v19  ;;  %v5690_v19 = vld [vmem:[%s14755_s5 + $0xb88] sm:$0xff]  ;;  %v5692_v3 = vld [vmem:[%s14755_s5 + $0xb98] sm:$0xff] }
 0x533   : > { %10228 = vmatpush1.bf16.msra.mxu1 %v10227_v31  ;;  %v5574_v31 = vld [vmem:[%s14755_s5 + $0x7e8] sm:$0xff] }
 0x534   : > { %10230 = vmatprep.subr.bf16.mxu1 %v10229_v9  ;;  %v5576_v9 = vld [vmem:[%s14755_s5 + $0x7f8] sm:$0xff] }
 0x535   : > { %v10273_v24 = vpack.c.bf16 %v5576_v9, %v5574_v31  ;;  %v10313_v9 = vpack.c.bf16 %v5616_v33, %v5614_v47 }
 0x537   : > { %10232 = vmatpush1.bf16.msra.mxu1 %v10231_v40  ;;  %v5578_v40 = vld [vmem:[%s14755_s5 + $0x808] sm:$0xff] }
 0x538   : > { %10234 = vmatprep.subr.bf16.mxu1 %v10233_v51  ;;  %v5580_v51 = vld [vmem:[%s14755_s5 + $0x818] sm:$0xff] }
 0x539   : > { %v10277_v49 = vpack.c.bf16 %v5580_v51, %v5578_v40  ;;  %v10317_v51 = vpack.c.bf16 %v5620_v15, %v5618_v5 }
 0x53b   : > { %10236 = vmatpush1.bf16.msra.mxu1 %v10235_v17  ;;  %v5582_v17 = vld [vmem:[%s14755_s5 + $0x828] sm:$0xff] }
 0x53c   : > { %10238 = vmatprep.subr.bf16.mxu1 %v10237_v62  ;;  %v5584_v62 = vld [vmem:[%s14755_s5 + $0x838] sm:$0xff] }
 0x53d   : > { %v10281_v61 = vpack.c.bf16 %v5584_v62, %v5582_v17  ;;  %v10321_v62 = vpack.c.bf16 %v5624_v34, %v5622_v59 }
 0x53f   : > { %10240 = vmatpush1.bf16.msra.mxu1 %v10239_v2  ;;  %v5311_v2 = vld [vmem:[#allocation5 + $0x6] sm:$0x1] }
 0x540   : > { %10242 = vmatprep.subr.bf16.mxu1 %v10241_v58  ;;  %v5586_v58 = vld [vmem:[%s14755_s5 + $0x848] sm:$0xff] }
 0x541   : > { %v10285_v21 = vpack.c.bf16 %v5588_v57, %v5586_v58  ;;  %v10325_v58 = vpack.c.bf16 %v5628_v46, %v5626_v13  ;;  %v5625_v57 = vld [vmem:[%s14755_s5 + $0x980] sm:$0xff] }
 0x543   : > { %10244 = vmatpush1.bf16.msra.mxu1 %v10243_v52  ;;  %v5585_v52 = vld [vmem:[%s14755_s5 + $0x840] sm:$0xff] }
 0x544   : > { %10246 = vmatprep.subr.bf16.mxu1 %v10245_v25  ;;  %v5587_v25 = vld [vmem:[%s14755_s5 + $0x850] sm:$0xff] }
 0x545   : > { %v10287_v50 = vpack.c.bf16 %v5587_v25, %v5585_v52 }
 0x547   : > { %10248 = vmatpush1.bf16.msra.mxu1 %v10247_v23  ;;  %v5589_v23 = vld [vmem:[%s14755_s5 + $0x860] sm:$0xff] }
 0x548   : > { %10250 = vmatprep.subr.bf16.mxu1 %v10249_v53  ;;  %v5591_v53 = vld [vmem:[%s14755_s5 + $0x870] sm:$0xff] }
 0x549   : > { %v10291_v7 = vpack.c.bf16 %v5591_v53, %v5589_v23  ;;  %v10331_v23 = vpack.c.bf16 %v5631_v26, %v5629_v60  ;;  %v5674_v60 = vld [vmem:[%s14755_s5 + $0xb08] sm:$0xff]  ;;  %v5676_v26 = vld [vmem:[%s14755_s5 + $0xb18] sm:$0xff] }
 0x54b   : > { %10252 = vmatpush1.bf16.msra.mxu1 %v10251_v30  ;;  %v5593_v30 = vld [vmem:[%s14755_s5 + $0x880] sm:$0xff] }
 0x54c   : > { %10254 = vmatprep.subr.bf16.mxu1 %v10253_v37  ;;  %v5595_v37 = vld [vmem:[%s14755_s5 + $0x890] sm:$0xff] }
 0x54d   : > { %v10295_v8 = vpack.c.bf16 %v5595_v37, %v5593_v30  ;;  %v10335_v30 = vpack.c.bf16 %v5635_v6, %v5633_v14  ;;  %v5678_v14 = vld [vmem:[%s14755_s5 + $0xb28] sm:$0xff]  ;;  %v5680_v6 = vld [vmem:[%s14755_s5 + $0xb38] sm:$0xff] }
 0x54f   : > { %10256 = vmatpush1.bf16.msra.mxu1 %v10255_v18  ;;  %v5597_v18 = vld [vmem:[%s14755_s5 + $0x8a0] sm:$0xff] }
 0x550   : > { %10258 = vmatprep.subr.bf16.mxu1 %v10257_v20  ;;  %v5599_v20 = vld [vmem:[%s14755_s5 + $0x8b0] sm:$0xff] }
 0x551   : > { %v10299_v12 = vpack.c.bf16 %v5599_v20, %v5597_v18  ;;  %v10339_v18 = vpack.c.bf16 %v5639_v55, %v5637_v41  ;;  %v5682_v41 = vld [vmem:[%s14755_s5 + $0xb48] sm:$0xff]  ;;  %v5684_v55 = vld [vmem:[%s14755_s5 + $0xb58] sm:$0xff] }
 0x553   : > { %10260 = vmatpush1.bf16.msra.mxu1 %v10259_v10  ;;  %v5601_v10 = vld [vmem:[%s14755_s5 + $0x8c0] sm:$0xff] }
 0x554   : > { %10262 = vmatprep.subr.bf16.mxu1 %v10261_v43  ;;  %v5603_v43 = vld [vmem:[%s14755_s5 + $0x8d0] sm:$0xff] }
 0x555   : > { %v10303_v63 = vpack.c.bf16 %v5603_v43, %v5601_v10  ;;  %v10343_v10 = vpack.c.bf16 %v5643_v1, %v5641_v11  ;;  %v5686_v11 = vld [vmem:[%s14755_s5 + $0xb68] sm:$0xff]  ;;  %v5688_v1 = vld [vmem:[%s14755_s5 + $0xb78] sm:$0xff] }
 0x557   : > { %10264 = vmatpush1.bf16.msra.mxu1 %v10263_v27  ;;  %v5605_v27 = vld [vmem:[%s14755_s5 + $0x8e0] sm:$0xff] }
 0x558   : > { %10266 = vmatprep.subr.bf16.mxu1 %v10265_v56  ;;  %v5607_v56 = vld [vmem:[%s14755_s5 + $0x8f0] sm:$0xff] }
 0x559   : > { %v10307_v45 = vpack.c.bf16 %v5607_v56, %v5605_v27  ;;  %v5652_v27 = vld [vmem:[%s14755_s5 + $0xa58] sm:$0xff]  ;;  %v5316_v56 = vld [vmem:[#allocation5 + $0xb] sm:$0x1] }
 0x55b   : > { %10268 = vmatpush1.bf16.msra.mxu1 %v10267_v54  ;;  %v5609_v54 = vld [vmem:[%s14755_s5 + $0x900] sm:$0xff] }
 0x55c   : > { %10270 = vmatprep.subr.bf16.mxu1 %v10269_v22  ;;  %v5611_v22 = vld [vmem:[%s14755_s5 + $0x910] sm:$0xff] }
 0x55d   : > { %v10311_v31 = vpack.c.bf16 %v5611_v22, %v5609_v54  ;;  %v5654_v54 = vld [vmem:[%s14755_s5 + $0xa68] sm:$0xff]  ;;  %v5656_v22 = vld [vmem:[%s14755_s5 + $0xa78] sm:$0xff] }
 0x55e   : > { %v10353_v33 = vpack.c.bf16 %v5656_v22, %v5654_v54  ;;  %v5693_v54 = vld [vmem:[%s14755_s5 + $0xba0] sm:$0xff]  ;;  %v5695_v22 = vld [vmem:[%s14755_s5 + $0xbb0] sm:$0xff] }
 0x55f   : > { %10272 = vmatpush1.bf16.msra.mxu1 %v10271_v38  ;;  %v5613_v38 = vld [vmem:[%s14755_s5 + $0x920] sm:$0xff] }
 0x560   : > { %10274 = vmatprep.subr.bf16.mxu1 %v10273_v24  ;;  %v5615_v24 = vld [vmem:[%s14755_s5 + $0x930] sm:$0xff] }
 0x561   : > { %v10315_v40 = vpack.c.bf16 %v5615_v24, %v5613_v38  ;;  %v5658_v38 = vld [vmem:[%s14755_s5 + $0xa88] sm:$0xff]  ;;  %v5660_v24 = vld [vmem:[%s14755_s5 + $0xa98] sm:$0xff] }
 0x562   : > { %v10357_v15 = vpack.c.bf16 %v5660_v24, %v5658_v38  ;;  %v5697_v38 = vld [vmem:[%s14755_s5 + $0xbc0] sm:$0xff]  ;;  %v5699_v24 = vld [vmem:[%s14755_s5 + $0xbd0] sm:$0xff] }
 0x563   : > { %10276 = vmatpush1.bf16.msra.mxu1 %v10275_v48  ;;  %v5617_v48 = vld [vmem:[%s14755_s5 + $0x940] sm:$0xff] }
 0x564   : > { %10278 = vmatprep.subr.bf16.mxu1 %v10277_v49  ;;  %v5619_v49 = vld [vmem:[%s14755_s5 + $0x950] sm:$0xff] }
 0x565   : > { %v10319_v17 = vpack.c.bf16 %v5619_v49, %v5617_v48  ;;  %v5662_v48 = vld [vmem:[%s14755_s5 + $0xaa8] sm:$0xff]  ;;  %v5664_v49 = vld [vmem:[%s14755_s5 + $0xab8] sm:$0xff] }
 0x566   : > { %6123 = vmatmul.mubr.f32.vlgmr.msra.gmra.mrb[46].mxu1 %v5311_v2  ;;  %v10361_v34 = vpack.c.bf16 %v5664_v49, %v5662_v48  ;;  %v5701_v48 = vld [vmem:[%s14755_s5 + $0xbe0] sm:$0xff]  ;;  %v5703_v49 = vld [vmem:[%s14755_s5 + $0xbf0] sm:$0xff] }
 0x567   : > { %10280 = vmatpush1.bf16.msra.mxu1 %v10279_v44  ;;  %6193 = vmatprep.mubr.f32.mxu1 %v5314_v35  ;;  %v5621_v44 = vld [vmem:[%s14755_s5 + $0x960] sm:$0xff]  ;;  %v5627_v35 = vld [vmem:[%s14755_s5 + $0x990] sm:$0xff] }
 0x568   : > { %10282 = vmatprep.subr.bf16.mxu1 %v10281_v61  ;;  %v5623_v61 = vld [vmem:[%s14755_s5 + $0x970] sm:$0xff]  ;;  %v10327_v52 = vpack.c.bf16 %v5627_v35, %v5625_v57  ;;  %v5670_v57 = vld [vmem:[%s14755_s5 + $0xae8] sm:$0xff]  ;;  %v5672_v35 = vld [vmem:[%s14755_s5 + $0xaf8] sm:$0xff] }
 0x569   : > { %v10323_v2 = vpack.c.bf16 %v5623_v61, %v5621_v44  ;;  %v5666_v44 = vld [vmem:[%s14755_s5 + $0xac8] sm:$0xff]  ;;  %v5668_v61 = vld [vmem:[%s14755_s5 + $0xad8] sm:$0xff] }
 0x56a   : > { %v10365_v46 = vpack.c.bf16 %v5668_v61, %v5666_v44  ;;  %v5705_v44 = vld [vmem:[%s14755_s5 + $0xc00] sm:$0xff]  ;;  %v5707_v61 = vld [vmem:[%s14755_s5 + $0xc10] sm:$0xff] }
 0x56b   : > { %10284 = vmatpush1.bf16.msra.mxu1 %v10283_v32  ;;  %v5630_v32 = vld [vmem:[%s14755_s5 + $0x9a8] sm:$0xff] }
 0x56c   : > { %10286 = vmatprep.subr.bf16.mxu1 %v10285_v21  ;;  %v5632_v21 = vld [vmem:[%s14755_s5 + $0x9b8] sm:$0xff] }
 0x56d   : > { %v10329_v25 = vpack.c.bf16 %v5632_v21, %v5630_v32  ;;  %v10369_v21 = vpack.c.bf16 %v5672_v35, %v5670_v57  ;;  %v5709_v57 = vld [vmem:[%s14755_s5 + $0xc20] sm:$0xff]  ;;  %v5711_v35 = vld [vmem:[%s14755_s5 + $0xc30] sm:$0xff] }
 0x56f   : > { %10288 = vmatpush1.bf16.msra.mxu1 %v10287_v50  ;;  %v5634_v50 = vld [vmem:[%s14755_s5 + $0x9c8] sm:$0xff] }
 0x570   : > { %10290 = vmatprep.subr.bf16.mxu1 %v10289_v4  ;;  %v5636_v4 = vld [vmem:[%s14755_s5 + $0x9d8] sm:$0xff] }
 0x571   : > { %v10333_v53 = vpack.c.bf16 %v5636_v4, %v5634_v50  ;;  %v10373_v4 = vpack.c.bf16 %v5676_v26, %v5674_v60  ;;  %v10411_v60 = vpack.c.bf16 %v5711_v35, %v5709_v57  ;;  %v5754_v57 = vld [vmem:[%s14755_s5 + $0xd88] sm:$0xff]  ;;  %v5756_v35 = vld [vmem:[%s14755_s5 + $0xd98] sm:$0xff] }
 0x573   : > { %10292 = vmatpush1.bf16.msra.mxu1 %v10291_v7  ;;  %v5638_v7 = vld [vmem:[%s14755_s5 + $0x9e8] sm:$0xff] }
 0x574   : > { %10294 = vmatprep.subr.bf16.mxu1 %v10293_v29  ;;  %v5640_v29 = vld [vmem:[%s14755_s5 + $0x9f8] sm:$0xff] }
 0x575   : > { %v10337_v37 = vpack.c.bf16 %v5640_v29, %v5638_v7  ;;  %v10377_v29 = vpack.c.bf16 %v5680_v6, %v5678_v14 }
 0x577   : > { %10296 = vmatpush1.bf16.msra.mxu1 %v10295_v8  ;;  %v5642_v8 = vld [vmem:[%s14755_s5 + $0xa08] sm:$0xff] }
 0x578   : > { %10298 = vmatprep.subr.bf16.mxu1 %v10297_v0  ;;  %v5644_v0 = vld [vmem:[%s14755_s5 + $0xa18] sm:$0xff] }
 0x579   : > { %v10341_v20 = vpack.c.bf16 %v5644_v0, %v5642_v8  ;;  %v10381_v0 = vpack.c.bf16 %v5684_v55, %v5682_v41 }
 0x57b   : > { %10300 = vmatpush1.bf16.msra.mxu1 %v10299_v12  ;;  %v5646_v12 = vld [vmem:[%s14755_s5 + $0xa28] sm:$0xff] }
 0x57c   : > { %10302 = vmatprep.subr.bf16.mxu1 %v10301_v16  ;;  %v5648_v16 = vld [vmem:[%s14755_s5 + $0xa38] sm:$0xff] }
 0x57d   : > { %v10345_v43 = vpack.c.bf16 %v5648_v16, %v5646_v12  ;;  %v10385_v16 = vpack.c.bf16 %v5688_v1, %v5686_v11 }
 0x57f   : > { %10304 = vmatpush1.bf16.msra.mxu1 %v10303_v63  ;;  %v5313_v63 = vld [vmem:[#allocation5 + $0x8] sm:$0x1] }
 0x580   : > { %10306 = vmatprep.subr.bf16.mxu1 %v10305_v42  ;;  %v5650_v42 = vld [vmem:[%s14755_s5 + $0xa48] sm:$0xff] }
 0x581   : > { %v10349_v39 = vpack.c.bf16 %v5652_v27, %v5650_v42  ;;  %v10389_v42 = vpack.c.bf16 %v5692_v3, %v5690_v19  ;;  %v5689_v27 = vld [vmem:[%s14755_s5 + $0xb80] sm:$0xff] }
 0x583   : > { %10308 = vmatpush1.bf16.msra.mxu1 %v10307_v45  ;;  %v5649_v45 = vld [vmem:[%s14755_s5 + $0xa40] sm:$0xff] }
 0x584   : > { %10310 = vmatprep.subr.bf16.mxu1 %v10309_v28  ;;  %v5651_v28 = vld [vmem:[%s14755_s5 + $0xa50] sm:$0xff] }
 0x585   : > { %v10351_v47 = vpack.c.bf16 %v5651_v28, %v5649_v45 }
 0x587   : > { %10312 = vmatpush1.bf16.msra.mxu1 %v10311_v31  ;;  %v5653_v31 = vld [vmem:[%s14755_s5 + $0xa60] sm:$0xff] }
 0x588   : > { %10314 = vmatprep.subr.bf16.mxu1 %v10313_v9  ;;  %v5655_v9 = vld [vmem:[%s14755_s5 + $0xa70] sm:$0xff] }
 0x589   : > { %v10355_v5 = vpack.c.bf16 %v5655_v9, %v5653_v31  ;;  %v10395_v31 = vpack.c.bf16 %v5695_v22, %v5693_v54  ;;  %v5738_v54 = vld [vmem:[%s14755_s5 + $0xd08] sm:$0xff]  ;;  %v5740_v22 = vld [vmem:[%s14755_s5 + $0xd18] sm:$0xff] }
 0x58b   : > { %10316 = vmatpush1.bf16.msra.mxu1 %v10315_v40  ;;  %v5657_v40 = vld [vmem:[%s14755_s5 + $0xa80] sm:$0xff] }
 0x58c   : > { %10318 = vmatprep.subr.bf16.mxu1 %v10317_v51  ;;  %v5659_v51 = vld [vmem:[%s14755_s5 + $0xa90] sm:$0xff] }
 0x58d   : > { %v10359_v59 = vpack.c.bf16 %v5659_v51, %v5657_v40  ;;  %v10399_v40 = vpack.c.bf16 %v5699_v24, %v5697_v38  ;;  %v5742_v38 = vld [vmem:[%s14755_s5 + $0xd28] sm:$0xff]  ;;  %v5744_v24 = vld [vmem:[%s14755_s5 + $0xd38] sm:$0xff] }
 0x58f   : > { %10320 = vmatpush1.bf16.msra.mxu1 %v10319_v17  ;;  %v5661_v17 = vld [vmem:[%s14755_s5 + $0xaa0] sm:$0xff] }
 0x590   : > { %10322 = vmatprep.subr.bf16.mxu1 %v10321_v62  ;;  %v5663_v62 = vld [vmem:[%s14755_s5 + $0xab0] sm:$0xff] }
 0x591   : > { %v10363_v13 = vpack.c.bf16 %v5663_v62, %v5661_v17  ;;  %v10403_v17 = vpack.c.bf16 %v5703_v49, %v5701_v48  ;;  %v5746_v48 = vld [vmem:[%s14755_s5 + $0xd48] sm:$0xff]  ;;  %v5748_v49 = vld [vmem:[%s14755_s5 + $0xd58] sm:$0xff] }
 0x593   : > { %10324 = vmatpush1.bf16.msra.mxu1 %v10323_v2  ;;  %v5665_v2 = vld [vmem:[%s14755_s5 + $0xac0] sm:$0xff] }
 0x594   : > { %10326 = vmatprep.subr.bf16.mxu1 %v10325_v58  ;;  %v5667_v58 = vld [vmem:[%s14755_s5 + $0xad0] sm:$0xff] }
 0x595   : > { %v10367_v32 = vpack.c.bf16 %v5667_v58, %v5665_v2  ;;  %v10407_v2 = vpack.c.bf16 %v5707_v61, %v5705_v44  ;;  %v5750_v44 = vld [vmem:[%s14755_s5 + $0xd68] sm:$0xff]  ;;  %v5752_v61 = vld [vmem:[%s14755_s5 + $0xd78] sm:$0xff] }
 0x597   : > { %10328 = vmatpush1.bf16.msra.mxu1 %v10327_v52  ;;  %v5669_v52 = vld [vmem:[%s14755_s5 + $0xae0] sm:$0xff] }
 0x598   : > { %10330 = vmatprep.subr.bf16.mxu1 %v10329_v25  ;;  %v5671_v25 = vld [vmem:[%s14755_s5 + $0xaf0] sm:$0xff] }
 0x599   : > { %v10371_v50 = vpack.c.bf16 %v5671_v25, %v5669_v52  ;;  %v5716_v52 = vld [vmem:[%s14755_s5 + $0xc58] sm:$0xff]  ;;  %v5318_v25 = vld [vmem:[#allocation5 + $0xd] sm:$0x1] }
 0x59b   : > { %10332 = vmatpush1.bf16.msra.mxu1 %v10331_v23  ;;  %v5673_v23 = vld [vmem:[%s14755_s5 + $0xb00] sm:$0xff] }
 0x59c   : > { %10334 = vmatprep.subr.bf16.mxu1 %v10333_v53  ;;  %v5675_v53 = vld [vmem:[%s14755_s5 + $0xb10] sm:$0xff] }
 0x59d   : > { %v10375_v7 = vpack.c.bf16 %v5675_v53, %v5673_v23  ;;  %v5718_v23 = vld [vmem:[%s14755_s5 + $0xc68] sm:$0xff]  ;;  %v5720_v53 = vld [vmem:[%s14755_s5 + $0xc78] sm:$0xff] }
 0x59e   : > { %v10417_v6 = vpack.c.bf16 %v5720_v53, %v5718_v23  ;;  %v5757_v23 = vld [vmem:[%s14755_s5 + $0xda0] sm:$0xff]  ;;  %v5759_v53 = vld [vmem:[%s14755_s5 + $0xdb0] sm:$0xff] }
 0x59f   : > { %10336 = vmatpush1.bf16.msra.mxu1 %v10335_v30  ;;  %v5677_v30 = vld [vmem:[%s14755_s5 + $0xb20] sm:$0xff] }
 0x5a0   : > { %10338 = vmatprep.subr.bf16.mxu1 %v10337_v37  ;;  %v5679_v37 = vld [vmem:[%s14755_s5 + $0xb30] sm:$0xff] }
 0x5a1   : > { %v10379_v8 = vpack.c.bf16 %v5679_v37, %v5677_v30  ;;  %v5722_v30 = vld [vmem:[%s14755_s5 + $0xc88] sm:$0xff]  ;;  %v5724_v37 = vld [vmem:[%s14755_s5 + $0xc98] sm:$0xff] }
 0x5a2   : > { %v10421_v55 = vpack.c.bf16 %v5724_v37, %v5722_v30  ;;  %v5761_v30 = vld [vmem:[%s14755_s5 + $0xdc0] sm:$0xff]  ;;  %v5763_v37 = vld [vmem:[%s14755_s5 + $0xdd0] sm:$0xff] }
 0x5a3   : > { %10340 = vmatpush1.bf16.msra.mxu1 %v10339_v18  ;;  %v5681_v18 = vld [vmem:[%s14755_s5 + $0xb40] sm:$0xff] }
 0x5a4   : > { %10342 = vmatprep.subr.bf16.mxu1 %v10341_v20  ;;  %v5683_v20 = vld [vmem:[%s14755_s5 + $0xb50] sm:$0xff] }
 0x5a5   : > { %v10383_v12 = vpack.c.bf16 %v5683_v20, %v5681_v18  ;;  %v5726_v18 = vld [vmem:[%s14755_s5 + $0xca8] sm:$0xff]  ;;  %v5728_v20 = vld [vmem:[%s14755_s5 + $0xcb8] sm:$0xff] }
 0x5a6   : > { %6194 = vmatmul.mubr.f32.vlgmr.msra.gmra.mrb[46].mxu1 %v5313_v63  ;;  %v10425_v1 = vpack.c.bf16 %v5728_v20, %v5726_v18  ;;  %v5765_v18 = vld [vmem:[%s14755_s5 + $0xde0] sm:$0xff]  ;;  %v5767_v20 = vld [vmem:[%s14755_s5 + $0xdf0] sm:$0xff] }
 0x5a7   : > { %10344 = vmatpush1.bf16.msra.mxu1 %v10343_v10  ;;  %6264 = vmatprep.mubr.f32.mxu1 %v5316_v56  ;;  %v5685_v10 = vld [vmem:[%s14755_s5 + $0xb60] sm:$0xff]  ;;  %v5691_v56 = vld [vmem:[%s14755_s5 + $0xb90] sm:$0xff] }
 0x5a8   : > { %10346 = vmatprep.subr.bf16.mxu1 %v10345_v43  ;;  %v5687_v43 = vld [vmem:[%s14755_s5 + $0xb70] sm:$0xff]  ;;  %v10391_v45 = vpack.c.bf16 %v5691_v56, %v5689_v27  ;;  %v5734_v27 = vld [vmem:[%s14755_s5 + $0xce8] sm:$0xff]  ;;  %v5736_v56 = vld [vmem:[%s14755_s5 + $0xcf8] sm:$0xff] }
 0x5a9   : > { %v10387_v63 = vpack.c.bf16 %v5687_v43, %v5685_v10  ;;  %v5730_v10 = vld [vmem:[%s14755_s5 + $0xcc8] sm:$0xff]  ;;  %v5732_v43 = vld [vmem:[%s14755_s5 + $0xcd8] sm:$0xff] }
 0x5aa   : > { %v10429_v3 = vpack.c.bf16 %v5732_v43, %v5730_v10  ;;  %v5769_v10 = vld [vmem:[%s14755_s5 + $0xe00] sm:$0xff]  ;;  %v5771_v43 = vld [vmem:[%s14755_s5 + $0xe10] sm:$0xff] }
 0x5ab   : > { %10348 = vmatpush1.bf16.msra.mxu1 %v10347_v36  ;;  %v5694_v36 = vld [vmem:[%s14755_s5 + $0xba8] sm:$0xff] }
 0x5ac   : > { %10350 = vmatprep.subr.bf16.mxu1 %v10349_v39  ;;  %v5696_v39 = vld [vmem:[%s14755_s5 + $0xbb8] sm:$0xff] }
 0x5ad   : > { %v10393_v28 = vpack.c.bf16 %v5696_v39, %v5694_v36  ;;  %v10433_v39 = vpack.c.bf16 %v5736_v56, %v5734_v27  ;;  %v5773_v27 = vld [vmem:[%s14755_s5 + $0xe20] sm:$0xff]  ;;  %v5775_v56 = vld [vmem:[%s14755_s5 + $0xe30] sm:$0xff] }
 0x5af   : > { %10352 = vmatpush1.bf16.msra.mxu1 %v10351_v47  ;;  %v5698_v47 = vld [vmem:[%s14755_s5 + $0xbc8] sm:$0xff] }
 0x5b0   : > { %10354 = vmatprep.subr.bf16.mxu1 %v10353_v33  ;;  %v5700_v33 = vld [vmem:[%s14755_s5 + $0xbd8] sm:$0xff] }
 0x5b1   : > { %v10397_v9 = vpack.c.bf16 %v5700_v33, %v5698_v47  ;;  %v10437_v33 = vpack.c.bf16 %v5740_v22, %v5738_v54  ;;  %v10475_v54 = vpack.c.bf16 %v5775_v56, %v5773_v27  ;;  %v5818_v27 = vld [vmem:[%s14755_s5 + $0xf88] sm:$0xff]  ;;  %v5820_v56 = vld [vmem:[%s14755_s5 + $0xf98] sm:$0xff] }
 0x5b3   : > { %10356 = vmatpush1.bf16.msra.mxu1 %v10355_v5  ;;  %v5702_v5 = vld [vmem:[%s14755_s5 + $0xbe8] sm:$0xff] }
 0x5b4   : > { %10358 = vmatprep.subr.bf16.mxu1 %v10357_v15  ;;  %v5704_v15 = vld [vmem:[%s14755_s5 + $0xbf8] sm:$0xff] }
 0x5b5   : > { %v10401_v51 = vpack.c.bf16 %v5704_v15, %v5702_v5  ;;  %v10441_v15 = vpack.c.bf16 %v5744_v24, %v5742_v38 }
 0x5b7   : > { %10360 = vmatpush1.bf16.msra.mxu1 %v10359_v59  ;;  %v5706_v59 = vld [vmem:[%s14755_s5 + $0xc08] sm:$0xff] }
 0x5b8   : > { %10362 = vmatprep.subr.bf16.mxu1 %v10361_v34  ;;  %v5708_v34 = vld [vmem:[%s14755_s5 + $0xc18] sm:$0xff] }
 0x5b9   : > { %v10405_v62 = vpack.c.bf16 %v5708_v34, %v5706_v59  ;;  %v10445_v34 = vpack.c.bf16 %v5748_v49, %v5746_v48 }
 0x5bb   : > { %10364 = vmatpush1.bf16.msra.mxu1 %v10363_v13  ;;  %v5710_v13 = vld [vmem:[%s14755_s5 + $0xc28] sm:$0xff] }
 0x5bc   : > { %10366 = vmatprep.subr.bf16.mxu1 %v10365_v46  ;;  %v5712_v46 = vld [vmem:[%s14755_s5 + $0xc38] sm:$0xff] }
 0x5bd   : > { %v10409_v58 = vpack.c.bf16 %v5712_v46, %v5710_v13  ;;  %v10449_v46 = vpack.c.bf16 %v5752_v61, %v5750_v44 }
 0x5bf   : > { %10368 = vmatpush1.bf16.msra.mxu1 %v10367_v32  ;;  %v5315_v32 = vld [vmem:[#allocation5 + $0xa] sm:$0x1] }
 0x5c0   : > { %10370 = vmatprep.subr.bf16.mxu1 %v10369_v21  ;;  %v5714_v21 = vld [vmem:[%s14755_s5 + $0xc48] sm:$0xff] }
 0x5c1   : > { %v10413_v26 = vpack.c.bf16 %v5716_v52, %v5714_v21  ;;  %v10453_v21 = vpack.c.bf16 %v5756_v35, %v5754_v57  ;;  %v5753_v52 = vld [vmem:[%s14755_s5 + $0xd80] sm:$0xff] }
 0x5c3   : > { %10372 = vmatpush1.bf16.msra.mxu1 %v10371_v50  ;;  %v5713_v50 = vld [vmem:[%s14755_s5 + $0xc40] sm:$0xff] }
 0x5c4   : > { %10374 = vmatprep.subr.bf16.mxu1 %v10373_v4  ;;  %v5715_v4 = vld [vmem:[%s14755_s5 + $0xc50] sm:$0xff] }
 0x5c5   : > { %v10415_v14 = vpack.c.bf16 %v5715_v4, %v5713_v50 }
 0x5c7   : > { %10376 = vmatpush1.bf16.msra.mxu1 %v10375_v7  ;;  %v5717_v7 = vld [vmem:[%s14755_s5 + $0xc60] sm:$0xff] }
 0x5c8   : > { %10378 = vmatprep.subr.bf16.mxu1 %v10377_v29  ;;  %v5719_v29 = vld [vmem:[%s14755_s5 + $0xc70] sm:$0xff] }
 0x5c9   : > { %v10419_v41 = vpack.c.bf16 %v5719_v29, %v5717_v7  ;;  %v10459_v7 = vpack.c.bf16 %v5759_v53, %v5757_v23  ;;  %v5802_v23 = vld [vmem:[%s14755_s5 + $0xf08] sm:$0xff]  ;;  %v5804_v53 = vld [vmem:[%s14755_s5 + $0xf18] sm:$0xff] }
 0x5cb   : > { %10380 = vmatpush1.bf16.msra.mxu1 %v10379_v8  ;;  %v5721_v8 = vld [vmem:[%s14755_s5 + $0xc80] sm:$0xff] }
 0x5cc   : > { %10382 = vmatprep.subr.bf16.mxu1 %v10381_v0  ;;  %v5723_v0 = vld [vmem:[%s14755_s5 + $0xc90] sm:$0xff] }
 0x5cd   : > { %v10423_v11 = vpack.c.bf16 %v5723_v0, %v5721_v8  ;;  %v10463_v8 = vpack.c.bf16 %v5763_v37, %v5761_v30  ;;  %v5806_v30 = vld [vmem:[%s14755_s5 + $0xf28] sm:$0xff]  ;;  %v5808_v37 = vld [vmem:[%s14755_s5 + $0xf38] sm:$0xff] }
 0x5cf   : > { %10384 = vmatpush1.bf16.msra.mxu1 %v10383_v12  ;;  %v5725_v12 = vld [vmem:[%s14755_s5 + $0xca0] sm:$0xff] }
 0x5d0   : > { %10386 = vmatprep.subr.bf16.mxu1 %v10385_v16  ;;  %v5727_v16 = vld [vmem:[%s14755_s5 + $0xcb0] sm:$0xff] }
 0x5d1   : > { %v10427_v19 = vpack.c.bf16 %v5727_v16, %v5725_v12  ;;  %v10467_v12 = vpack.c.bf16 %v5767_v20, %v5765_v18  ;;  %v5810_v18 = vld [vmem:[%s14755_s5 + $0xf48] sm:$0xff]  ;;  %v5812_v20 = vld [vmem:[%s14755_s5 + $0xf58] sm:$0xff] }
 0x5d3   : > { %10388 = vmatpush1.bf16.msra.mxu1 %v10387_v63  ;;  %v5729_v63 = vld [vmem:[%s14755_s5 + $0xcc0] sm:$0xff] }
 0x5d4   : > { %10390 = vmatprep.subr.bf16.mxu1 %v10389_v42  ;;  %v5731_v42 = vld [vmem:[%s14755_s5 + $0xcd0] sm:$0xff] }
 0x5d5   : > { %v10431_v36 = vpack.c.bf16 %v5731_v42, %v5729_v63  ;;  %v10471_v63 = vpack.c.bf16 %v5771_v43, %v5769_v10  ;;  %v5814_v10 = vld [vmem:[%s14755_s5 + $0xf68] sm:$0xff]  ;;  %v5816_v43 = vld [vmem:[%s14755_s5 + $0xf78] sm:$0xff] }
 0x5d7   : > { %10392 = vmatpush1.bf16.msra.mxu1 %v10391_v45  ;;  %v5733_v45 = vld [vmem:[%s14755_s5 + $0xce0] sm:$0xff] }
 0x5d8   : > { %10394 = vmatprep.subr.bf16.mxu1 %v10393_v28  ;;  %v5735_v28 = vld [vmem:[%s14755_s5 + $0xcf0] sm:$0xff] }
 0x5d9   : > { %v10435_v47 = vpack.c.bf16 %v5735_v28, %v5733_v45  ;;  %v5780_v45 = vld [vmem:[%s14755_s5 + $0xe58] sm:$0xff]  ;;  %v5320_v28 = vld [vmem:[#allocation5 + $0xf] sm:$0x1] }
 0x5db   : > { %10396 = vmatpush1.bf16.msra.mxu1 %v10395_v31  ;;  %v5737_v31 = vld [vmem:[%s14755_s5 + $0xd00] sm:$0xff] }
 0x5dc   : > { %10398 = vmatprep.subr.bf16.mxu1 %v10397_v9  ;;  %v5739_v9 = vld [vmem:[%s14755_s5 + $0xd10] sm:$0xff] }
 0x5dd   : > { %v10439_v5 = vpack.c.bf16 %v5739_v9, %v5737_v31  ;;  %v5782_v31 = vld [vmem:[%s14755_s5 + $0xe68] sm:$0xff]  ;;  %v5784_v9 = vld [vmem:[%s14755_s5 + $0xe78] sm:$0xff] }
 0x5de   : > { %v10481_v24 = vpack.c.bf16 %v5784_v9, %v5782_v31  ;;  %v5821_v31 = vld [vmem:[%s14755_s5 + $0xfa0] sm:$0xff]  ;;  %v5823_v9 = vld [vmem:[%s14755_s5 + $0xfb0] sm:$0xff] }
 0x5df   : > { %10400 = vmatpush1.bf16.msra.mxu1 %v10399_v40  ;;  %v5741_v40 = vld [vmem:[%s14755_s5 + $0xd20] sm:$0xff] }
 0x5e0   : > { %10402 = vmatprep.subr.bf16.mxu1 %v10401_v51  ;;  %v5743_v51 = vld [vmem:[%s14755_s5 + $0xd30] sm:$0xff] }
 0x5e1   : > { %v10443_v59 = vpack.c.bf16 %v5743_v51, %v5741_v40  ;;  %v5786_v40 = vld [vmem:[%s14755_s5 + $0xe88] sm:$0xff]  ;;  %v5788_v51 = vld [vmem:[%s14755_s5 + $0xe98] sm:$0xff] }
 0x5e2   : > { %v10485_v49 = vpack.c.bf16 %v5788_v51, %v5786_v40  ;;  %v5825_v40 = vld [vmem:[%s14755_s5 + $0xfc0] sm:$0xff]  ;;  %v5827_v51 = vld [vmem:[%s14755_s5 + $0xfd0] sm:$0xff] }
 0x5e3   : > { %10404 = vmatpush1.bf16.msra.mxu1 %v10403_v17  ;;  %v5745_v17 = vld [vmem:[%s14755_s5 + $0xd40] sm:$0xff] }
 0x5e4   : > { %10406 = vmatprep.subr.bf16.mxu1 %v10405_v62  ;;  %v5747_v62 = vld [vmem:[%s14755_s5 + $0xd50] sm:$0xff] }
 0x5e5   : > { %v10447_v13 = vpack.c.bf16 %v5747_v62, %v5745_v17  ;;  %v5790_v17 = vld [vmem:[%s14755_s5 + $0xea8] sm:$0xff]  ;;  %v5792_v62 = vld [vmem:[%s14755_s5 + $0xeb8] sm:$0xff] }
 0x5e6   : > { %6265 = vmatmul.mubr.f32.vlgmr.msra.gmra.mrb[46].mxu1 %v5315_v32  ;;  %v10489_v61 = vpack.c.bf16 %v5792_v62, %v5790_v17  ;;  %v5829_v17 = vld [vmem:[%s14755_s5 + $0xfe0] sm:$0xff]  ;;  %v5831_v62 = vld [vmem:[%s14755_s5 + $0xff0] sm:$0xff] }
 0x5e7   : > { %10408 = vmatpush1.bf16.msra.mxu1 %v10407_v2  ;;  %6335 = vmatprep.mubr.f32.mxu1 %v5318_v25  ;;  %v5749_v2 = vld [vmem:[%s14755_s5 + $0xd60] sm:$0xff]  ;;  %v5755_v25 = vld [vmem:[%s14755_s5 + $0xd90] sm:$0xff] }
 0x5e8   : > { %10410 = vmatprep.subr.bf16.mxu1 %v10409_v58  ;;  %v5751_v58 = vld [vmem:[%s14755_s5 + $0xd70] sm:$0xff]  ;;  %v10455_v50 = vpack.c.bf16 %v5755_v25, %v5753_v52  ;;  %v5798_v52 = vld [vmem:[%s14755_s5 + $0xee8] sm:$0xff]  ;;  %v5800_v25 = vld [vmem:[%s14755_s5 + $0xef8] sm:$0xff] }
 0x5e9   : > { %v10451_v32 = vpack.c.bf16 %v5751_v58, %v5749_v2  ;;  %v5794_v2 = vld [vmem:[%s14755_s5 + $0xec8] sm:$0xff]  ;;  %v5796_v58 = vld [vmem:[%s14755_s5 + $0xed8] sm:$0xff] }
 0x5ea   : > { %v10493_v35 = vpack.c.bf16 %v5796_v58, %v5794_v2  ;;  %v6415_v2 = vld [vmem:[%s14757_s7] sm:$0xff]  ;;  %v6416_v58 = vld [vmem:[%s14757_s7 + $0x8] sm:$0xff] }
 0x5eb   : > { %10412 = vmatpush1.bf16.msra.mxu1 %v10411_v60  ;;  %v5758_v60 = vld [vmem:[%s14755_s5 + $0xda8] sm:$0xff] }
 0x5ec   : > { %10414 = vmatprep.subr.bf16.mxu1 %v10413_v26  ;;  %v5760_v26 = vld [vmem:[%s14755_s5 + $0xdb8] sm:$0xff] }
 0x5ed   : > { %v10457_v4 = vpack.c.bf16 %v5760_v26, %v5758_v60  ;;  %v10497_v26 = vpack.c.bf16 %v5800_v25, %v5798_v52  ;;  %v6417_v52 = vld [vmem:[%s14757_s7 + $0x10] sm:$0xff]  ;;  %v6418_v25 = vld [vmem:[%s14757_s7 + $0x18] sm:$0xff] }
 0x5ef   : > { %10416 = vmatpush1.bf16.msra.mxu1 %v10415_v14  ;;  %v5762_v14 = vld [vmem:[%s14755_s5 + $0xdc8] sm:$0xff] }
 0x5f0   : > { %10418 = vmatprep.subr.bf16.mxu1 %v10417_v6  ;;  %v5764_v6 = vld [vmem:[%s14755_s5 + $0xdd8] sm:$0xff] }
 0x5f1   : > { %v10461_v29 = vpack.c.bf16 %v5764_v6, %v5762_v14  ;;  %v10501_v6 = vpack.c.bf16 %v5804_v53, %v5802_v23  ;;  %v6419_v53 = vld [vmem:[%s14757_s7 + $0x20] sm:$0xff] }
 0x5f3   : > { %10420 = vmatpush1.bf16.msra.mxu1 %v10419_v41  ;;  %v5766_v41 = vld [vmem:[%s14755_s5 + $0xde8] sm:$0xff] }
 0x5f4   : > { %10422 = vmatprep.subr.bf16.mxu1 %v10421_v55  ;;  %v5768_v55 = vld [vmem:[%s14755_s5 + $0xdf8] sm:$0xff] }
 0x5f5   : > { %v10465_v0 = vpack.c.bf16 %v5768_v55, %v5766_v41  ;;  %v10505_v55 = vpack.c.bf16 %v5808_v37, %v5806_v30  ;;  %v6421_v37 = vld [vmem:[%s14757_s7 + $0x30] sm:$0xff] }
 0x5f7   : > { %10424 = vmatpush1.bf16.msra.mxu1 %v10423_v11  ;;  %v5770_v11 = vld [vmem:[%s14755_s5 + $0xe08] sm:$0xff] }
 0x5f8   : > { %10426 = vmatprep.subr.bf16.mxu1 %v10425_v1  ;;  %v5772_v1 = vld [vmem:[%s14755_s5 + $0xe18] sm:$0xff] }
 0x5f9   : > { %v10469_v16 = vpack.c.bf16 %v5772_v1, %v5770_v11  ;;  %v10509_v1 = vpack.c.bf16 %v5812_v20, %v5810_v18  ;;  %v6423_v20 = vld [vmem:[%s14757_s7 + $0x40] sm:$0xff] }
 0x5fb   : > { %10428 = vmatpush1.bf16.msra.mxu1 %v10427_v19  ;;  %v5774_v19 = vld [vmem:[%s14755_s5 + $0xe28] sm:$0xff] }
 0x5fc   : > { %10430 = vmatprep.subr.bf16.mxu1 %v10429_v3  ;;  %v5776_v3 = vld [vmem:[%s14755_s5 + $0xe38] sm:$0xff] }
 0x5fd   : > { %v10473_v42 = vpack.c.bf16 %v5776_v3, %v5774_v19  ;;  %v10513_v3 = vpack.c.bf16 %v5816_v43, %v5814_v10  ;;  %v6425_v43 = vld [vmem:[%s14757_s7 + $0x50] sm:$0xff] }
 0x5ff   : > { %10432 = vmatpush1.bf16.msra.mxu1 %v10431_v36  ;;  %v5317_v36 = vld [vmem:[#allocation5 + $0xc] sm:$0x1] }
 0x600   : > { %10434 = vmatprep.subr.bf16.mxu1 %v10433_v39  ;;  %v5778_v39 = vld [vmem:[%s14755_s5 + $0xe48] sm:$0xff] }
 0x601   : > { %v10477_v22 = vpack.c.bf16 %v5780_v45, %v5778_v39  ;;  %v10517_v39 = vpack.c.bf16 %v5820_v56, %v5818_v27  ;;  %v5817_v45 = vld [vmem:[%s14755_s5 + $0xf80] sm:$0xff] }
 0x602   : > { %v6427_v56 = vld [vmem:[%s14757_s7 + $0x60] sm:$0xff] }
 0x603   : > { %10436 = vmatpush1.bf16.msra.mxu1 %v10435_v47  ;;  %v5777_v47 = vld [vmem:[%s14755_s5 + $0xe40] sm:$0xff] }
 0x604   : > { %10438 = vmatprep.subr.bf16.mxu1 %v10437_v33  ;;  %v5779_v33 = vld [vmem:[%s14755_s5 + $0xe50] sm:$0xff] }
 0x605   : > { %v10479_v38 = vpack.c.bf16 %v5779_v33, %v5777_v47 }
 0x607   : > { %10440 = vmatpush1.bf16.msra.mxu1 %v10439_v5  ;;  %v5781_v5 = vld [vmem:[%s14755_s5 + $0xe60] sm:$0xff] }
 0x608   : > { %10442 = vmatprep.subr.bf16.mxu1 %v10441_v15  ;;  %v5783_v15 = vld [vmem:[%s14755_s5 + $0xe70] sm:$0xff] }
 0x609   : > { %v10483_v48 = vpack.c.bf16 %v5783_v15, %v5781_v5  ;;  %v10523_v5 = vpack.c.bf16 %v5823_v9, %v5821_v31  ;;  %v5835_v31 = vlaneseq }
 0x60b   : > { %10444 = vmatpush1.bf16.msra.mxu1 %v10443_v59  ;;  %v5785_v59 = vld [vmem:[%s14755_s5 + $0xe80] sm:$0xff]  ;;  %v5836_v9 = vshrl.u32 %v5835_v31, 7 }
 0x60c   : > { %10446 = vmatprep.subr.bf16.mxu1 %v10445_v34  ;;  %v5787_v34 = vld [vmem:[%s14755_s5 + $0xe90] sm:$0xff] }
 0x60d   : > { %v10487_v44 = vpack.c.bf16 %v5787_v34, %v5785_v59  ;;  %v10527_v59 = vpack.c.bf16 %v5827_v51, %v5825_v40 }
 0x60f   : > { %10448 = vmatpush1.bf16.msra.mxu1 %v10447_v13  ;;  %v5789_v13 = vld [vmem:[%s14755_s5 + $0xea0] sm:$0xff] }
 0x610   : > { %10450 = vmatprep.subr.bf16.mxu1 %v10449_v46  ;;  %v5791_v46 = vld [vmem:[%s14755_s5 + $0xeb0] sm:$0xff] }
 0x611   : > { %v10491_v57 = vpack.c.bf16 %v5791_v46, %v5789_v13  ;;  %v10531_v13 = vpack.c.bf16 %v5831_v62, %v5829_v17 }
 0x613   : > { %10452 = vmatpush1.bf16.msra.mxu1 %v10451_v32  ;;  %v5793_v32 = vld [vmem:[%s14755_s5 + $0xec0] sm:$0xff] }
 0x614   : > { %10454 = vmatprep.subr.bf16.mxu1 %v10453_v21  ;;  %v5795_v21 = vld [vmem:[%s14755_s5 + $0xed0] sm:$0xff] }
 0x615   : > { %v10495_v60 = vpack.c.bf16 %v5795_v21, %v5793_v32  ;;  %v10535_v32 = vpack.c.bf16 %v6416_v58, %v6415_v2 }
 0x617   : > { %10456 = vmatpush1.bf16.msra.mxu1 %v10455_v50  ;;  %v5797_v50 = vld [vmem:[%s14755_s5 + $0xee0] sm:$0xff] }
 0x618   : > { %10458 = vmatprep.subr.bf16.mxu1 %v10457_v4  ;;  %v5799_v4 = vld [vmem:[%s14755_s5 + $0xef0] sm:$0xff] }
 0x619   : > { %v10499_v14 = vpack.c.bf16 %v5799_v4, %v5797_v50  ;;  %v6436_v50 = vld [vmem:[%s14757_s7 + $0xa8] sm:$0xff]  ;;  %v10539_v4 = vpack.c.bf16 %v6418_v25, %v6417_v52 }
 0x61b   : > { %10460 = vmatpush1.bf16.msra.mxu1 %v10459_v7  ;;  %v5801_v7 = vld [vmem:[%s14755_s5 + $0xf00] sm:$0xff] }
 0x61c   : > { %10462 = vmatprep.subr.bf16.mxu1 %v10461_v29  ;;  %v5803_v29 = vld [vmem:[%s14755_s5 + $0xf10] sm:$0xff] }
 0x61d   : > { %v10503_v41 = vpack.c.bf16 %v5803_v29, %v5801_v7  ;;  %v6438_v7 = vld [vmem:[%s14757_s7 + $0xb8] sm:$0xff] }
 0x61f   : > { %10464 = vmatpush1.bf16.msra.mxu1 %v10463_v8  ;;  %v5805_v8 = vld [vmem:[%s14755_s5 + $0xf20] sm:$0xff] }
 0x620   : > { %10466 = vmatprep.subr.bf16.mxu1 %v10465_v0  ;;  %v5807_v0 = vld [vmem:[%s14755_s5 + $0xf30] sm:$0xff] }
 0x621   : > { %v10507_v11 = vpack.c.bf16 %v5807_v0, %v5805_v8  ;;  %v6440_v8 = vld [vmem:[%s14757_s7 + $0xc8] sm:$0xff] }
 0x623   : > { %10468 = vmatpush1.bf16.msra.mxu1 %v10467_v12  ;;  %v5809_v12 = vld [vmem:[%s14755_s5 + $0xf40] sm:$0xff] }
 0x624   : > { %10470 = vmatprep.subr.bf16.mxu1 %v10469_v16  ;;  %v5811_v16 = vld [vmem:[%s14755_s5 + $0xf50] sm:$0xff] }
 0x625   : > { %v10511_v19 = vpack.c.bf16 %v5811_v16, %v5809_v12  ;;  %v6442_v12 = vld [vmem:[%s14757_s7 + $0xd8] sm:$0xff] }
 0x626   : > { %6336 = vmatmul.mubr.f32.vlgmr.msra.gmra.mrb[46].mxu1 %v5317_v36 }
 0x627   : > { %10472 = vmatpush1.bf16.msra.mxu1 %v10471_v63  ;;  %6406 = vmatprep.mubr.f32.mxu1 %v5320_v28  ;;  %v5813_v63 = vld [vmem:[%s14755_s5 + $0xf60] sm:$0xff]  ;;  %v5819_v28 = vld [vmem:[%s14755_s5 + $0xf90] sm:$0xff] }
 0x628   : > { %10474 = vmatprep.subr.bf16.mxu1 %v10473_v42  ;;  %v5815_v42 = vld [vmem:[%s14755_s5 + $0xf70] sm:$0xff]  ;;  %v10519_v47 = vpack.c.bf16 %v5819_v28, %v5817_v45  ;;  %v6446_v28 = vld [vmem:[%s14757_s7 + $0xf8] sm:$0xff] }
 0x629   : > { %v10515_v36 = vpack.c.bf16 %v5815_v42, %v5813_v63  ;;  %v6444_v63 = vld [vmem:[%s14757_s7 + $0xe8] sm:$0xff]  ;;  %v6445_v45 = vld [vmem:[%s14757_s7 + $0xf0] sm:$0xff] }
 0x62b   : > { %10476 = vmatpush1.bf16.msra.mxu1 %v10475_v54  ;;  %v5822_v54 = vld [vmem:[%s14755_s5 + $0xfa8] sm:$0xff] }
 0x62c   : > { %10478 = vmatprep.subr.bf16.mxu1 %v10477_v22  ;;  %v5824_v22 = vld [vmem:[%s14755_s5 + $0xfb8] sm:$0xff] }
 0x62d   : > { %v10521_v33 = vpack.c.bf16 %v5824_v22, %v5822_v54  ;;  %v6429_v54 = vld [vmem:[%s14757_s7 + $0x70] sm:$0xff]  ;;  %v10561_v22 = vpack.c.bf16 %v6446_v28, %v6445_v45 }
 0x62f   : > { %10480 = vmatpush1.bf16.msra.mxu1 %v10479_v38  ;;  %v5826_v38 = vld [vmem:[%s14755_s5 + $0xfc8] sm:$0xff] }
 0x630   : > { %10482 = vmatprep.subr.bf16.mxu1 %v10481_v24  ;;  %v5828_v24 = vld [vmem:[%s14755_s5 + $0xfd8] sm:$0xff] }
 0x631   : > { %v10525_v15 = vpack.c.bf16 %v5828_v24, %v5826_v38  ;;  %v5837_v38 = vsub.s32 0, %v5836_v9  ;;  %v5833_v24 = vld [vmem:[%s14756_s6] sm:$0x3] }
 0x633   : > { %10484 = vmatpush1.bf16.msra.mxu1 %v10483_v48  ;;  %v5830_v48 = vld [vmem:[%s14755_s5 + $0xfe8] sm:$0xff] }
 0x634   : > { %10486 = vmatprep.subr.bf16.mxu1 %v10485_v49  ;;  %v5832_v49 = vld [vmem:[%s14755_s5 + $0xff8] sm:$0xff] }
 0x635   : > { %v10529_v34 = vpack.c.bf16 %v5832_v49, %v5830_v48 }
 0x637   : > { %10488 = vmatpush1.bf16.msra.mxu1 %v10487_v44  ;;  %v6431_v44 = vld [vmem:[%s14757_s7 + $0x80] sm:$0xff] }
 0x638   : > { %10490 = vmatprep.subr.bf16.mxu1 %v10489_v61  ;;  %v6432_v61 = vld [vmem:[%s14757_s7 + $0x88] sm:$0xff] }
 0x639   : > { %v10533_v46 = vpack.c.bf16 %v6432_v61, %v6431_v44  ;;  %v6447_v61 = vld [vmem:[%s14758_s8] sm:$0x1] }
 0x63b   : > { %10492 = vmatpush1.bf16.msra.mxu1 %v10491_v57  ;;  %v6433_v57 = vld [vmem:[%s14757_s7 + $0x90] sm:$0xff] }
 0x63c   : > { %10494 = vmatprep.subr.bf16.mxu1 %v10493_v35  ;;  %v6434_v35 = vld [vmem:[%s14757_s7 + $0x98] sm:$0xff] }
 0x63d   : > { %v10537_v21 = vpack.c.bf16 %v6434_v35, %v6433_v57 }
 0x63f   : > { %10496 = vmatpush1.bf16.msra.mxu1 %v10495_v60  ;;  %v5319_v60 = vld [vmem:[#allocation5 + $0xe] sm:$0x1] }
 0x640   : > { %10498 = vmatprep.subr.bf16.mxu1 %v10497_v26  ;;  %v6435_v26 = vld [vmem:[%s14757_s7 + $0xa0] sm:$0xff] }
 0x641   : > { %v10541_v23 = vpack.c.bf16 %v6436_v50, %v6435_v26 }
 0x643   : > { %10500 = vmatpush1.bf16.msra.mxu1 %v10499_v14  ;;  %v6420_v14 = vld [vmem:[%s14757_s7 + $0x28] sm:$0xff] }
 0x644   : > { %10502 = vmatprep.subr.bf16.mxu1 %v10501_v6  ;;  %v6437_v6 = vld [vmem:[%s14757_s7 + $0xb0] sm:$0xff]  ;;  %v10543_v29 = vpack.c.bf16 %v6420_v14, %v6419_v53 }
 0x645   : > { %v10545_v30 = vpack.c.bf16 %v6438_v7, %v6437_v6 }
 0x647   : > { %10504 = vmatpush1.bf16.msra.mxu1 %v10503_v41  ;;  %v6422_v41 = vld [vmem:[%s14757_s7 + $0x38] sm:$0xff] }
 0x648   : > { %10506 = vmatprep.subr.bf16.mxu1 %v10505_v55  ;;  %v6439_v55 = vld [vmem:[%s14757_s7 + $0xc0] sm:$0xff]  ;;  %v10547_v0 = vpack.c.bf16 %v6422_v41, %v6421_v37 }
 0x649   : > { %v10549_v18 = vpack.c.bf16 %v6440_v8, %v6439_v55 }
 0x64b   : > { %10508 = vmatpush1.bf16.msra.mxu1 %v10507_v11  ;;  %v6424_v11 = vld [vmem:[%s14757_s7 + $0x48] sm:$0xff] }
 0x64c   : > { %10510 = vmatprep.subr.bf16.mxu1 %v10509_v1  ;;  %v6441_v1 = vld [vmem:[%s14757_s7 + $0xd0] sm:$0xff]  ;;  %v10551_v16 = vpack.c.bf16 %v6424_v11, %v6423_v20 }
 0x64d   : > { %v10553_v10 = vpack.c.bf16 %v6442_v12, %v6441_v1 }
 0x64f   : > { %10512 = vmatpush1.bf16.msra.mxu1 %v10511_v19  ;;  %v6426_v19 = vld [vmem:[%s14757_s7 + $0x58] sm:$0xff] }
 0x650   : > { %10514 = vmatprep.subr.bf16.mxu1 %v10513_v3  ;;  %v6443_v3 = vld [vmem:[%s14757_s7 + $0xe0] sm:$0xff]  ;;  %v10555_v42 = vpack.c.bf16 %v6426_v19, %v6425_v43 }
 0x651   : > { %v10557_v27 = vpack.c.bf16 %v6444_v63, %v6443_v3 }
 0x653   : > { %10516 = vmatpush1.bf16.msra.mxu1 %v10515_v36  ;;  %v6428_v36 = vld [vmem:[%s14757_s7 + $0x68] sm:$0xff] }
 0x654   : > { %10518 = vmatprep.subr.bf16.mxu1 %v10517_v39  ;;  %v10559_v39 = vpack.c.bf16 %v6428_v36, %v6427_v56 }
 0x657   : > { %10520 = vmatpush1.bf16.msra.mxu1 %v10519_v47  ;;  %v6430_v47 = vld [vmem:[%s14757_s7 + $0x78] sm:$0xff] }
 0x658   : > { %10522 = vmatprep.subr.bf16.mxu1 %v10521_v33  ;;  %v10563_v33 = vpack.c.bf16 %v6430_v47, %v6429_v54 }
 0x65b   : > { %10524 = vmatpush1.bf16.msra.mxu1 %v10523_v5  ;;  %v5841_v5 = vsub.s32 1, %v5836_v9 }
 0x65c   : > { %10526 = vmatprep.subr.bf16.mxu1 %v10525_v15  ;;  %v5838_v15 = vrot.slane %v5833_v24, %v5837_v38 }
 0x65d   : > { %v5842_v40 = vrot.slane %v5833_v24, %v5841_v5 }
 0x65f   : > { %10528 = vmatpush1.bf16.msra.mxu1 %v10527_v59 }
 0x660   : > { %10530 = vmatprep.subr.bf16.mxu1 %v10529_v34 }
 0x663   : > { %10532 = vmatpush1.bf16.msra.mxu1 %v10531_v13 }
 0x664   : > { %10534 = vmatprep.subr.bf16.mxu1 %v10533_v46 }
 0x666   : > { %6407 = vmatmul.mubr.f32.vlgmr.msra.gmra.mrb[46].mxu1 %v5319_v60 }
 0x667   : > { %10536 = vmatpush3.bf16.msra.mxu1 %v10535_v32 }
 0x668   : > { %10538 = vmatprep.subr.bf16.mxu1 %v10537_v21 }
 0x66b   : > { %10540 = vmatpush3.bf16.msra.mxu1 %v10539_v4 }
 0x66c   : > { %10542 = vmatprep.subr.bf16.mxu1 %v10541_v23 }
 0x66f   : > { %10544 = vmatpush3.bf16.msra.mxu1 %v10543_v29 }
 0x670   : > { %10546 = vmatprep.subr.bf16.mxu1 %v10545_v30 }
 0x673   : > { %10548 = vmatpush3.bf16.msra.mxu1 %v10547_v0 }
 0x674   : > { %10550 = vmatprep.subr.bf16.mxu1 %v10549_v18 }
 0x677   : > { %10552 = vmatpush3.bf16.msra.mxu1 %v10551_v16 }
 0x678   : > { %10554 = vmatprep.subr.bf16.mxu1 %v10553_v10 }
 0x67b   : > { %10556 = vmatpush3.bf16.msra.mxu1 %v10555_v42 }
 0x67c   : > { %10558 = vmatprep.subr.bf16.mxu1 %v10557_v27 }
 0x67f   : > { %10560 = vmatpush3.bf16.msra.mxu1 %v10559_v39 }
 0x680   : > { %10562 = vmatprep.subr.bf16.mxu1 %v10561_v22 }
 0x683   : > { %10564 = vmatpush3.bf16.msra.mxu1 %v10563_v33 }
 0x739   : > { %v6408_v51 = vpop.f32.mrb[46].mxu1 }
 0x73a   : > { %v10577_v48 = vadd.f32 %v6408_v51, %v5838_v15  ;;  %v6410_v49 = vpop.f32.mrb[47].mxu1 }
 0x73b   : > { %v10578_v59 = vadd.f32 %v6410_v49, %v5842_v40 }
 0x73c   : > { %v6413_v17 = vmax.f32 %v10577_v48, 0.0 }
 0x73d   : > { %v6414_v34 = vmax.f32 %v10578_v59, 0.0 }
 0x73f   : > { %6512 = vmatprep.mubr.f32.mxu1 %v6414_v34 }
 0x740   : > { %6513 = vmatmul.mubr.f32.vlgmr.msra.gmra.mrb[48].mxu1 %v6413_v17 }
 0x813   : > { %v7818_v62 = vpop.f32.mrb[48].mxu1 }
 0x814   : > { %v7819_v44 = vpop.f32.mrb[49].mxu1 }
 0x815   : > { %v7820_v13 = vadd.f32 %v7819_v44, %v7818_v62 }
 0x817   : > { %v6515_v46 = vadd.f32 %v7820_v13, %v6447_v61 }
 0x819   : > { %v6519_v2 = vsel %vm6518_vm1, %v6515_v46, -inf }
 0x81a   : > { %6520 = vmax.xlane.f32.xlu0 %v6519_v2 }
 0x8a7   : > { %v6521_v58 = vpop.xlane.xlu0 %6520 }
 0x8a8   : > { %v6522_v57 = vsub.f32 %v6515_v46, %v6521_v58 }
 0x8aa   : > { %v6523_v35 = vmul.f32 1.442695, %v6522_v57 }
 0x8ac   : > { %10817 = vpow2.f32 %v6523_v35 }
 0x8b6   : > { %v10818_v32 = vpop.eup %10817 }
 0x8b7   : > { %v6525_v21 = vsel %vm6518_vm1, %v10818_v32, 0.0 }
 0x8b8   : > { %6526 = vadd.xlane.f32.xlu0 %v6525_v21 }
 0x945   : > { %v6527_v52 = vpop.xlane.xlu0 %6526 }
 0x946   : > { %10819 = vlog2.f32 %v6527_v52 }
 0x950   : > { %v10820_v25 = vpop.eup %10819 }
 0x951   : > { %v6529_v60 = vmul.f32 0.6931472, %v10820_v25 }
 0x953   : > { %v6530_v26 = vsub.f32 %v6522_v57, %v6529_v60 }
 0x955   : > { %6531 = vst [vmem:[%s324_s29] sm:$0x1] %v6530_v26 }
 0x956   : > { %10881 = shalt.err (!%p10878_p3)
}
 0x957   : > { %s10882_s26 = scalar_lea.hbm %s14708_s22, 16  ;;  %s10886_s29 = scalar_lea.hbm %s14759_s9, 32 }
 0x958   : > { %p10883_p4 = scmp.ne.s32.totalorder %s14708_s22, %s10882_s26  ;;  %p10887_p9 = scmp.lt.u32.totalorder %s14708_s22, %s14759_s9 }
 0x959   : > { %p10888_p10 = scmp.lt.u32.totalorder %s10886_s29, %s10882_s26  ;;  %p10890_p12 = scmp.lt.u32.totalorder %s10882_s26, %s14708_s22 }
 0x95a   : > { %p10884_p7 = pnand %p10883_p4, %p11021_p5 }
 0x95b   : > { %p10889_p11 = por %p10888_p10, %p10887_p9 }
 0x95c   : > { %p10885_p8 = pneg %p10884_p7 }
 0x95d   : > { %p10891_p13 = por %p10890_p12, %p10889_p11 }
 0x95f   : > { %p10892_p0 = pnand %p10891_p13, %p10885_p8 }
 0x961   : > { %10895 = shalt.err (!%p10892_p0)
}
 0x962   : > { %10778 = dma.vmem_to_hbm [thread:$0]  (%p11021_p5), %s14710_s14, 16, %s14708_s22, %s6533_s23  }
 0x963 PF: > { %p10784_p1 = scmp.ge.s32.totalorder %s10930_s12, 2  ;;  %s6557_s24 = sand.u32 1, %s10918_s30  }
 0x964   : > { %s6558_s13 = scalar_lea.sflag [#allocation7], %s6557_s24 }
 0x965   : > { %p10781_p2 = pnand %p10784_p1, %p11025_p6 }
 0x967   : > { %10913 = dma.done.wait (!%p10781_p2), %s6558_s13, 16  }
 0x968   : > { %10915 = vsyncadd (!%p10781_p2), %s6558_s13, 4294967280  ;;  %p19_p3 = scmp.ge.s32.totalorder %s11008_s15, 4   ;;  %s14762_s30 = smov %s10922_s10 }
 0x969   : > { %s14763_s10 = smov %s10926_s11  ;;  %s14764_s11 = smov %s11019_s18 }
 0x96a   : > { %s14765_s12 = smov %s11008_s15  ;;  %21 = sbr.rel (!%p19_p3) target bundleno = 3 (0x3), region = 132 }
 0x971   :  { %6562 = vsyncpa [#allocation7], 1 }
 0x972   :  { %6564 = vsyncpa [#allocation7 + $0x1], 1 }

</bundles_post_ra>
